<compile_context>
chip_gen: v7x
topology: tpu7x:2x2x1
jax: 0.10.0
libtpu: 0.0.40
codegen_flags: <defaults>
</compile_context>

<pallas_src>
import math
import functools

import jax
import jax.numpy as jnp
from jax.experimental import pallas as pl
from jax.experimental.pallas import tpu as pltpu


def _cross_attn_kernel(x_ref, wq_ref, bq_ref, wk_ref, bk_ref, wv_ref, bv_ref,
                       wd_ref, bd_ref, gamma_ref, beta_ref, o_ref,
                       kh_ref, vh_ref, vcol_ref, *, num_heads, positive, eps, q_tile):
    # x_ref: (1, S, D) bf16 (full sequence, constant across qi -> DMA'd once per batch)
    # o_ref: (1, q_tile, D); kh_ref: (H, dh, S) bf16; vh_ref: (H, S, dh) bf16; vcol_ref: (H, 1, dh) f32
    qi = pl.program_id(1)
    S = x_ref.shape[1]
    D = x_ref.shape[2]
    H = num_heads
    dh = D // H
    scale = 1.0 / math.sqrt(dh)

    # ---- K / V cache: computed once per batch (qi == 0), reused for all query tiles. ----
    @pl.when(qi == 0)
    def _():
        x_full = x_ref[0]                                                   # (S, D) bf16
        k = jnp.dot(x_full, wk_ref[...], preferred_element_type=jnp.float32) + bk_ref[...]  # (S, D) f32
        v = jnp.dot(x_full, wv_ref[...], preferred_element_type=jnp.float32) + bv_ref[...]  # (S, D) f32

        # Per-head column sum of V from the f32 projection (negative-mode identity input).
        vcol_ref[...] = jnp.sum(v, axis=0, keepdims=True).reshape(H, 1, dh)

        # Head split (major-dim shuffle) + one batched minor transpose for K so the cached
        # layout is already MXU-native (K-dim x N-dim) for the scores contraction.
        k_h = jnp.transpose(k.reshape(S, H, dh), (1, 0, 2))                 # (H, S, dh) f32
        kh_ref[...] = jnp.transpose(k_h, (0, 2, 1)).astype(jnp.bfloat16)    # (H, dh, S) bf16
        vh_ref[...] = jnp.transpose(v.reshape(S, H, dh), (1, 0, 2)).astype(jnp.bfloat16)  # (H, S, dh)

    # ---- Query tile: slice from the resident full-sequence block (no duplicate input stream).
    q_start = pl.multiple_of(qi * q_tile, q_tile)
    x_q = x_ref[0, pl.ds(q_start, q_tile), :]                               # (Tq, D) bf16
    q = jnp.dot(x_q, wq_ref[...], preferred_element_type=jnp.float32) + bq_ref[...]       # (Tq, D) f32
    # Fold 1/sqrt(dh) into Q (cheaper than scaling (H, Tq, S) scores).
    q = q * scale
    qh = jnp.transpose(q.astype(jnp.bfloat16).reshape(q_tile, H, dh), (1, 0, 2))          # (H, Tq, dh)

    # ---- Head-batched attention with deferred softmax normalization. ----
    scores = jnp.einsum('hqd,hdk->hqk', qh, kh_ref[...],
                        preferred_element_type=jnp.float32)                 # (H, Tq, S) f32
    m = jnp.max(scores, axis=-1, keepdims=True)
    e = jnp.exp(scores - m)                                                 # un-normalized probs
    denom = jnp.sum(e, axis=-1, keepdims=True)                              # (H, Tq, 1)

    pv_un = jnp.einsum('hqk,hkd->hqd', e.astype(jnp.bfloat16), vh_ref[...],
                       preferred_element_type=jnp.float32)                  # (H, Tq, dh)
    inv = pl.reciprocal(denom, approx=True)                                 # EUP slot
    if positive:
        ctx_h = pv_un * inv                                                 # softmax(S) @ V
    else:
        # MultiheadAttention2: (1 - P) @ V == colsum(V) - P @ V (exact identity).
        ctx_h = vcol_ref[...] - pv_un * inv

    # ---- Merge heads -> (Tq, D), dense1, LayerNorm. ----
    ctx = jnp.transpose(ctx_h, (1, 0, 2)).reshape(q_tile, D)
    out = jnp.dot(ctx.astype(jnp.bfloat16), wd_ref[...],
                  preferred_element_type=jnp.float32) + bd_ref[...]
    mu = jnp.mean(out, axis=-1, keepdims=True)
    var = jnp.mean(jnp.square(out - mu), axis=-1, keepdims=True)
    y = (out - mu) * jax.lax.rsqrt(var + eps)
    y = y * gamma_ref[...] + beta_ref[...]
    o_ref[0] = y.astype(o_ref.dtype)


@functools.lru_cache(maxsize=None)
def _vmem_limit_bytes():
    # Generation-aware budget: ~3/4 of physical VMEM (v5e/v6e 128 MiB -> 96 MiB, v7x 64 MiB -> 48 MiB).
    try:
        cap = int(pltpu.get_tpu_info().vmem_capacity_bytes)
    except Exception:  # hardware query unavailable -> conservative default
        cap = 64 * 1024 * 1024
    return min(cap * 3 // 4, 100 * 1024 * 1024)


@functools.lru_cache(maxsize=None)
def _build_cross_attention_call(B, S, D, num_heads, positive, q_tile, out_dtype_name):
    """Build (and cache) the pallas_call for one configuration."""
    H = num_heads
    dh = D // H
    nq = S // q_tile
    out_dtype = jnp.dtype(out_dtype_name)

    kernel = functools.partial(_cross_attn_kernel, num_heads=H, positive=positive,
                               eps=1e-5, q_tile=q_tile)

    # Grid-invariant parameters (constant index_map -> fetched once; not re-DMA'd per step).
    const_map = lambda b, qi: (0, 0)
    w_spec = pl.BlockSpec((D, D), const_map)
    vec_spec = pl.BlockSpec((1, D), const_map)

    return pl.pallas_call(
        kernel,
        out_shape=jax.ShapeDtypeStruct((B, S, D), out_dtype),
        grid_spec=pltpu.PrefetchScalarGridSpec(
            num_scalar_prefetch=0,
            grid=(B, nq),                                              # batch x query-tile
            in_specs=[
                pl.BlockSpec((1, S, D), lambda b, qi: (b, 0, 0)),       # x (single stream)
                w_spec, vec_spec,   # Wq, bq
                w_spec, vec_spec,   # Wk, bk
                w_spec, vec_spec,   # Wv, bv
                w_spec, vec_spec,   # Wd, bd
                vec_spec, vec_spec,  # gamma, beta
            ],
            out_specs=pl.BlockSpec((1, q_tile, D), lambda b, qi: (b, qi, 0)),
            scratch_shapes=[
                pltpu.VMEM((H, dh, S), jnp.bfloat16),   # cached K^T per head (MXU-native RHS)
                pltpu.VMEM((H, S, dh), jnp.bfloat16),   # cached V per head
                pltpu.VMEM((H, 1, dh), jnp.float32),    # per-head colsum(V) (f32, pre-cast)
            ],
        ),
        compiler_params=pltpu.CompilerParams(
            # b is parallel (megacore sharding on v7x); qi carries the K/V cache -> arbitrary.
            dimension_semantics=("parallel", "arbitrary"),
            vmem_limit_bytes=_vmem_limit_bytes(),
        ),
    )


def cross_attention(x, params, *, num_heads, mode, q_tile=None):
    """x: (B, S, D) float; params: dict of f32 weights/biases (weights stored (in, out))."""
    B, S, D = x.shape
    assert D % num_heads == 0, "fc_dim must be divisible by num_heads"

    if q_tile is None:
        q_tile = S
        for cand in (512, 256, 128, 64, 32, 16, 8):
            if cand <= S and S % cand == 0:
                q_tile = cand
                break
    assert S % q_tile == 0, "S must be divisible by the query tile"
    # Bound the f32 (H, q_tile, S) score/exp temporaries (~<=8 MiB each) -> safe on v7x's 64 MiB.
    while q_tile > 8 and q_tile % 2 == 0 and num_heads * q_tile * S * 4 > (8 << 20):
        q_tile //= 2

    positive = (mode == 'positive')
    out_dtype = jnp.dtype(x.dtype)

    fn = _build_cross_attention_call(B, S, D, num_heads, positive, q_tile, out_dtype.name)

    # bf16 activations + weights into the MXU (f32 accumulation); biases / LN params stay f32.
    x_b = x.astype(jnp.bfloat16)
    args = (x_b,
            params["wq"].astype(jnp.bfloat16), params["bq"],
            params["wk"].astype(jnp.bfloat16), params["bk"],
            params["wv"].astype(jnp.bfloat16), params["bv"],
            params["wd"].astype(jnp.bfloat16), params["bd"],
            params["gamma"], params["beta"])
    return fn(*args)


def _reference(x, params, *, num_heads, mode):
    """Pure-JAX f32 reference (matches the PyTorch forward, eval mode)."""
    B, S, D = x.shape
    dh = D // num_heads

    def proj(w, b):
        return jnp.einsum('bsd,de->bse', x, w) + b[0]

    q = proj(params["wq"], params["bq"]).reshape(B, S, num_heads, dh).transpose(0, 2, 1, 3)
    k = proj(params["wk"], params["bk"]).reshape(B, S, num_heads, dh).transpose(0, 2, 1, 3)
    v = proj(params["wv"], params["bv"]).reshape(B, S, num_heads, dh).transpose(0, 2, 1, 3)

    scores = jnp.einsum('bhqd,bhkd->bhqk', q, k) / math.sqrt(dh)
    probs = jax.nn.softmax(scores, axis=-1)
    if mode != 'positive':
        probs = 1.0 - probs
    ctx = jnp.einsum('bhqk,bhkd->bhqd', probs, v)
    ctx = ctx.transpose(0, 2, 1, 3).reshape(B, S, D)

    out = jnp.einsum('bsd,de->bse', ctx, params["wd"]) + params["bd"][0]
    mu = jnp.mean(out, axis=-1, keepdims=True)
    var = jnp.mean((out - mu) ** 2, axis=-1, keepdims=True)
    y = (out - mu) * jax.lax.rsqrt(var + 1e-5)
    return y * params["gamma"][0] + params["beta"][0]


def init_params(key, D):
    ks = jax.random.split(key, 8)
    scale = 0.02
    return {
        "wq": jax.random.normal(ks[0], (D, D), jnp.float32) * scale,
        "bq": jax.random.normal(ks[1], (1, D), jnp.float32) * scale,
        "wk": jax.random.normal(ks[2], (D, D), jnp.float32) * scale,
        "bk": jax.random.normal(ks[3], (1, D), jnp.float32) * scale,
        "wv": jax.random.normal(ks[4], (D, D), jnp.float32) * scale,
        "bv": jax.random.normal(ks[5], (1, D), jnp.float32) * scale,
        "wd": jax.random.normal(ks[6], (D, D), jnp.float32) * scale,
        "bd": jax.random.normal(ks[7], (1, D), jnp.float32) * scale,
        "gamma": jnp.ones((1, D), jnp.float32),
        "beta": jnp.zeros((1, D), jnp.float32),
    }


if __name__ == "__main__":
    # Lane-dense small config: D multiple of 128, head_dim = D // H = 128.
    B, S, D, H = 2, 256, 256, 2
    key = jax.random.PRNGKey(0)
    kx, kp = jax.random.split(key)
    x = jax.random.normal(kx, (B, S, D), jnp.float32)
    params = init_params(kp, D)

    ok = True
    for mode in ("positive", "negative"):
        ref = _reference(x, params, num_heads=H, mode=mode)
        # q_tile=128 exercises the multi-tile K/V-cache carry (nq=2); default uses one tile.
        for qt in (128, None):
            out = jax.block_until_ready(
                cross_attention(x, params, num_heads=H, mode=mode, q_tile=qt))
            # bf16 MXU operands (f32 accumulation) + approx reciprocal -> bf16-grade tolerance.
            if not jnp.allclose(out, ref, atol=2e-2, rtol=2e-2):
                ok = False

    print("KERNEL_OK" if ok else "KERNEL_MISMATCH")
</pallas_src>

<mosaic_0001>
module attributes {stable_mosaic.version = 11 : i64} {
  func.func @_cross_attn_kernel(%arg0: i32, %arg1: i32, %arg2: memref<1x256x256xbf16, #tpu.memory_space<vmem>>, %arg3: memref<256x256xbf16, #tpu.memory_space<vmem>>, %arg4: memref<1x256xf32, #tpu.memory_space<vmem>>, %arg5: memref<256x256xbf16, #tpu.memory_space<vmem>>, %arg6: memref<1x256xf32, #tpu.memory_space<vmem>>, %arg7: memref<256x256xbf16, #tpu.memory_space<vmem>>, %arg8: memref<1x256xf32, #tpu.memory_space<vmem>>, %arg9: memref<256x256xbf16, #tpu.memory_space<vmem>>, %arg10: memref<1x256xf32, #tpu.memory_space<vmem>>, %arg11: memref<1x256xf32, #tpu.memory_space<vmem>>, %arg12: memref<1x256xf32, #tpu.memory_space<vmem>>, %arg13: memref<1x128x256xf32, #tpu.memory_space<vmem>>, %arg14: memref<2x128x256xbf16, #tpu.memory_space<vmem>>, %arg15: memref<2x256x128xbf16, #tpu.memory_space<vmem>>, %arg16: memref<2x1x128xf32, #tpu.memory_space<vmem>>) attributes {dimension_semantics = [#tpu.dimension_semantics<parallel>, #tpu.dimension_semantics<arbitrary>], iteration_bounds = array<i64: 2, 2>, scalar_prefetch = 0 : i64, scratch_operands = 3 : i64, tpu.core_type = #tpu.core_type<tc>, window_params = [{transform_indices = @transform_0, window_bounds = array<i64: 1, 256, 256>}, {pipeline_mode = #tpu.pipeline_mode<synchronous>, transform_indices = @transform_1, window_bounds = array<i64: 256, 256>}, {pipeline_mode = #tpu.pipeline_mode<synchronous>, transform_indices = @transform_2, window_bounds = array<i64: 1, 256>}, {pipeline_mode = #tpu.pipeline_mode<synchronous>, transform_indices = @transform_3, window_bounds = array<i64: 256, 256>}, {pipeline_mode = #tpu.pipeline_mode<synchronous>, transform_indices = @transform_4, window_bounds = array<i64: 1, 256>}, {pipeline_mode = #tpu.pipeline_mode<synchronous>, transform_indices = @transform_5, window_bounds = array<i64: 256, 256>}, {pipeline_mode = #tpu.pipeline_mode<synchronous>, transform_indices = @transform_6, window_bounds = array<i64: 1, 256>}, {pipeline_mode = #tpu.pipeline_mode<synchronous>, transform_indices = @transform_7, window_bounds = array<i64: 256, 256>}, {pipeline_mode = #tpu.pipeline_mode<synchronous>, transform_indices = @transform_8, window_bounds = array<i64: 1, 256>}, {pipeline_mode = #tpu.pipeline_mode<synchronous>, transform_indices = @transform_9, window_bounds = array<i64: 1, 256>}, {pipeline_mode = #tpu.pipeline_mode<synchronous>, transform_indices = @transform_10, window_bounds = array<i64: 1, 256>}, {transform_indices = @transform_11, window_bounds = array<i64: 1, 128, 256>}]} {
    %c0_i32 = arith.constant 0 : i32
    %0 = arith.cmpi eq, %arg1, %c0_i32 : i32
    %1 = arith.extui %0 : i1 to i32
    %c0_i32_0 = arith.constant 0 : i32
    %2 = arith.cmpi ne, %1, %c0_i32_0 : i32
    scf.if %2 {
      %c0_34 = arith.constant 0 : index
      %c0_35 = arith.constant 0 : index
      %c0_36 = arith.constant 0 : index
      %68 = vector.load %arg2[%c0_34, %c0_35, %c0_36] : memref<1x256x256xbf16, #tpu.memory_space<vmem>>, vector<1x256x256xbf16>
      %69 = vector.shape_cast %68 : vector<1x256x256xbf16> to vector<256x256xbf16>
      %c0_37 = arith.constant 0 : index
      %c0_38 = arith.constant 0 : index
      %70 = vector.load %arg5[%c0_37, %c0_38] : memref<256x256xbf16, #tpu.memory_space<vmem>>, vector<256x256xbf16>
      %cst_39 = arith.constant dense<0.000000e+00> : vector<256x256xf32>
      %71 = tpu.matmul %69, %70, %cst_39 {dimension_numbers = #tpu.dot_dimension_numbers<[1], [0], [0], [1], [0, 0, 1, 1], [], []>} : vector<256x256xbf16>, vector<256x256xbf16>, vector<256x256xf32> -> vector<256x256xf32>
      %c0_40 = arith.constant 0 : index
      %c0_41 = arith.constant 0 : index
      %72 = vector.load %arg6[%c0_40, %c0_41] : memref<1x256xf32, #tpu.memory_space<vmem>>, vector<1x256xf32>
      %73 = vector.broadcast %72 : vector<1x256xf32> to vector<256x256xf32>
      %74 = arith.addf %71, %73 : vector<256x256xf32>
      %c0_42 = arith.constant 0 : index
      %c0_43 = arith.constant 0 : index
      %75 = vector.load %arg7[%c0_42, %c0_43] : memref<256x256xbf16, #tpu.memory_space<vmem>>, vector<256x256xbf16>
      %cst_44 = arith.constant dense<0.000000e+00> : vector<256x256xf32>
      %76 = tpu.matmul %69, %75, %cst_44 {dimension_numbers = #tpu.dot_dimension_numbers<[1], [0], [0], [1], [0, 0, 1, 1], [], []>} : vector<256x256xbf16>, vector<256x256xbf16>, vector<256x256xf32> -> vector<256x256xf32>
      %c0_45 = arith.constant 0 : index
      %c0_46 = arith.constant 0 : index
      %77 = vector.load %arg8[%c0_45, %c0_46] : memref<1x256xf32, #tpu.memory_space<vmem>>, vector<1x256xf32>
      %78 = vector.broadcast %77 : vector<1x256xf32> to vector<256x256xf32>
      %79 = arith.addf %76, %78 : vector<256x256xf32>
      %cst_47 = arith.constant dense<0.000000e+00> : vector<256xf32>
      %80 = vector.multi_reduction <add>, %79, %cst_47 [0] : vector<256x256xf32> to vector<256xf32>
      %81 = vector.shape_cast %80 : vector<256xf32> to vector<1x256xf32>
      %82 = vector.shape_cast %81 : vector<1x256xf32> to vector<2x1x128xf32>
      %c0_48 = arith.constant 0 : index
      %c0_49 = arith.constant 0 : index
      %c0_50 = arith.constant 0 : index
      %83 = vector.load %arg16[%c0_48, %c0_49, %c0_50] : memref<2x1x128xf32, #tpu.memory_space<vmem>>, vector<2x1x128xf32>
      tpu.vector_store %arg16[%c0_48, %c0_49, %c0_50], %82 {strides = array<i32>} : memref<2x1x128xf32, #tpu.memory_space<vmem>>, vector<2x1x128xf32>,
      %84 = vector.shape_cast %74 : vector<256x256xf32> to vector<256x2x128xf32>
      %85 = tpu.transpose %84, [1, 0, 2] : vector<256x2x128xf32> -> vector<2x256x128xf32>
      %86 = tpu.transpose %85, [0, 2, 1] : vector<2x256x128xf32> -> vector<2x128x256xf32>
      %87 = arith.truncf %86 : vector<2x128x256xf32> to vector<2x128x256xbf16>
      %c0_51 = arith.constant 0 : index
      %c0_52 = arith.constant 0 : index
      %c0_53 = arith.constant 0 : index
      %88 = vector.load %arg14[%c0_51, %c0_52, %c0_53] : memref<2x128x256xbf16, #tpu.memory_space<vmem>>, vector<2x128x256xbf16>
      tpu.vector_store %arg14[%c0_51, %c0_52, %c0_53], %87 {strides = array<i32>} : memref<2x128x256xbf16, #tpu.memory_space<vmem>>, vector<2x128x256xbf16>,
      %89 = vector.shape_cast %79 : vector<256x256xf32> to vector<256x2x128xf32>
      %90 = tpu.transpose %89, [1, 0, 2] : vector<256x2x128xf32> -> vector<2x256x128xf32>
      %91 = arith.truncf %90 : vector<2x256x128xf32> to vector<2x256x128xbf16>
      %c0_54 = arith.constant 0 : index
      %c0_55 = arith.constant 0 : index
      %c0_56 = arith.constant 0 : index
      %92 = vector.load %arg15[%c0_54, %c0_55, %c0_56] : memref<2x256x128xbf16, #tpu.memory_space<vmem>>, vector<2x256x128xbf16>
      tpu.vector_store %arg15[%c0_54, %c0_55, %c0_56], %91 {strides = array<i32>} : memref<2x256x128xbf16, #tpu.memory_space<vmem>>, vector<2x256x128xbf16>,
    } else {
    }
    %c128_i32 = arith.constant 128 : i32
    %3 = arith.muli %arg1, %c128_i32 : i32
    %4 = tpu.assume_multiple %3, 128 : i32
    %c0 = arith.constant 0 : index
    %5 = arith.index_cast %4 : i32 to index
    %c0_1 = arith.constant 0 : index
    %6 = vector.load %arg2[%c0, %5, %c0_1] : memref<1x256x256xbf16, #tpu.memory_space<vmem>>, vector<1x128x256xbf16>
    %7 = vector.shape_cast %6 : vector<1x128x256xbf16> to vector<128x256xbf16>
    %c0_2 = arith.constant 0 : index
    %c0_3 = arith.constant 0 : index
    %8 = vector.load %arg3[%c0_2, %c0_3] : memref<256x256xbf16, #tpu.memory_space<vmem>>, vector<256x256xbf16>
    %cst = arith.constant dense<0.000000e+00> : vector<128x256xf32>
    %9 = tpu.matmul %7, %8, %cst {dimension_numbers = #tpu.dot_dimension_numbers<[1], [0], [0], [1], [0, 0, 1, 1], [], []>} : vector<128x256xbf16>, vector<256x256xbf16>, vector<128x256xf32> -> vector<128x256xf32>
    %c0_4 = arith.constant 0 : index
    %c0_5 = arith.constant 0 : index
    %10 = vector.load %arg4[%c0_4, %c0_5] : memref<1x256xf32, #tpu.memory_space<vmem>>, vector<1x256xf32>
    %11 = vector.broadcast %10 : vector<1x256xf32> to vector<128x256xf32>
    %12 = arith.addf %9, %11 : vector<128x256xf32>
    %cst_6 = arith.constant 0.0883883461 : f32
    %13 = vector.broadcast %cst_6 : f32 to vector<128x256xf32>
    %14 = arith.mulf %12, %13 : vector<128x256xf32>
    %15 = arith.truncf %14 : vector<128x256xf32> to vector<128x256xbf16>
    %16 = vector.shape_cast %15 : vector<128x256xbf16> to vector<128x2x128xbf16>
    %17 = tpu.transpose %16, [1, 0, 2] : vector<128x2x128xbf16> -> vector<2x128x128xbf16>
    %c0_7 = arith.constant 0 : index
    %c0_8 = arith.constant 0 : index
    %c0_9 = arith.constant 0 : index
    %18 = vector.load %arg14[%c0_7, %c0_8, %c0_9] : memref<2x128x256xbf16, #tpu.memory_space<vmem>>, vector<2x128x256xbf16>
    "tpu.trace_start"() <{level = 10 : i32, message = "hqd,hdk->hqk"}> : () -> ()
    %cst_10 = arith.constant dense<0.000000e+00> : vector<2x128x256xf32>
    %19 = tpu.matmul %17, %18, %cst_10 {dimension_numbers = #tpu.dot_dimension_numbers<[2], [1], [1], [2], [0, 0, 0, 1, 1, 2], [0], [0]>} : vector<2x128x128xbf16>, vector<2x128x256xbf16>, vector<2x128x256xf32> -> vector<2x128x256xf32>
    "tpu.trace_stop"() : () -> ()
    %cst_11 = arith.constant dense<0xFF800000> : vector<2x128xf32>
    %20 = vector.multi_reduction <maximumf>, %19, %cst_11 [2] : vector<2x128x256xf32> to vector<2x128xf32>
    %21 = vector.shape_cast %20 : vector<2x128xf32> to vector<2x128x1xf32>
    %22 = vector.broadcast %21 : vector<2x128x1xf32> to vector<2x128x256xf32>
    %23 = arith.subf %19, %22 : vector<2x128x256xf32>
    %24 = math.exp %23 : vector<2x128x256xf32>
    %cst_12 = arith.constant dense<0.000000e+00> : vector<2x128xf32>
    %25 = vector.multi_reduction <add>, %24, %cst_12 [2] : vector<2x128x256xf32> to vector<2x128xf32>
    %26 = vector.shape_cast %25 : vector<2x128xf32> to vector<2x128x1xf32>
    %27 = arith.truncf %24 : vector<2x128x256xf32> to vector<2x128x256xbf16>
    %c0_13 = arith.constant 0 : index
    %c0_14 = arith.constant 0 : index
    %c0_15 = arith.constant 0 : index
    %28 = vector.load %arg15[%c0_13, %c0_14, %c0_15] : memref<2x256x128xbf16, #tpu.memory_space<vmem>>, vector<2x256x128xbf16>
    "tpu.trace_start"() <{level = 10 : i32, message = "hqk,hkd->hqd"}> : () -> ()
    %cst_16 = arith.constant dense<0.000000e+00> : vector<2x128x128xf32>
    %29 = tpu.matmul %27, %28, %cst_16 {dimension_numbers = #tpu.dot_dimension_numbers<[2], [1], [1], [2], [0, 0, 0, 1, 1, 2], [0], [0]>} : vector<2x128x256xbf16>, vector<2x256x128xbf16>, vector<2x128x128xf32> -> vector<2x128x128xf32>
    "tpu.trace_stop"() : () -> ()
    %30 = tpu.reciprocal %26 {approx = true} : vector<2x128x1xf32> -> vector<2x128x1xf32>
    %31 = vector.broadcast %30 : vector<2x128x1xf32> to vector<2x128x128xf32>
    %32 = arith.mulf %29, %31 : vector<2x128x128xf32>
    %33 = tpu.transpose %32, [1, 0, 2] : vector<2x128x128xf32> -> vector<128x2x128xf32>
    %34 = vector.shape_cast %33 : vector<128x2x128xf32> to vector<128x256xf32>
    %35 = arith.truncf %34 : vector<128x256xf32> to vector<128x256xbf16>
    %c0_17 = arith.constant 0 : index
    %c0_18 = arith.constant 0 : index
    %36 = vector.load %arg9[%c0_17, %c0_18] : memref<256x256xbf16, #tpu.memory_space<vmem>>, vector<256x256xbf16>
    %cst_19 = arith.constant dense<0.000000e+00> : vector<128x256xf32>
    %37 = tpu.matmul %35, %36, %cst_19 {dimension_numbers = #tpu.dot_dimension_numbers<[1], [0], [0], [1], [0, 0, 1, 1], [], []>} : vector<128x256xbf16>, vector<256x256xbf16>, vector<128x256xf32> -> vector<128x256xf32>
    %c0_20 = arith.constant 0 : index
    %c0_21 = arith.constant 0 : index
    %38 = vector.load %arg10[%c0_20, %c0_21] : memref<1x256xf32, #tpu.memory_space<vmem>>, vector<1x256xf32>
    %39 = vector.broadcast %38 : vector<1x256xf32> to vector<128x256xf32>
    %40 = arith.addf %37, %39 : vector<128x256xf32>
    %cst_22 = arith.constant dense<0.000000e+00> : vector<128xf32>
    %41 = vector.multi_reduction <add>, %40, %cst_22 [1] : vector<128x256xf32> to vector<128xf32>
    %42 = vector.shape_cast %41 : vector<128xf32> to vector<128x1xf32>
    %cst_23 = arith.constant 2.560000e+02 : f32
    %43 = vector.broadcast %cst_23 : f32 to vector<128x1xf32>
    %44 = arith.divf %42, %43 : vector<128x1xf32>
    %45 = vector.broadcast %44 : vector<128x1xf32> to vector<128x256xf32>
    %46 = arith.subf %40, %45 : vector<128x256xf32>
    %47 = arith.mulf %46, %46 : vector<128x256xf32>
    %cst_24 = arith.constant dense<0.000000e+00> : vector<128xf32>
    %48 = vector.multi_reduction <add>, %47, %cst_24 [1] : vector<128x256xf32> to vector<128xf32>
    %49 = vector.shape_cast %48 : vector<128xf32> to vector<128x1xf32>
    %cst_25 = arith.constant 2.560000e+02 : f32
    %50 = vector.broadcast %cst_25 : f32 to vector<128x1xf32>
    %51 = arith.divf %49, %50 : vector<128x1xf32>
    %52 = vector.broadcast %44 : vector<128x1xf32> to vector<128x256xf32>
    %53 = arith.subf %40, %52 : vector<128x256xf32>
    %cst_26 = arith.constant 9.99999974E-6 : f32
    %54 = vector.broadcast %cst_26 : f32 to vector<128x1xf32>
    %55 = arith.addf %51, %54 : vector<128x1xf32>
    %56 = math.rsqrt %55 : vector<128x1xf32>
    %57 = vector.broadcast %56 : vector<128x1xf32> to vector<128x256xf32>
    %58 = arith.mulf %53, %57 : vector<128x256xf32>
    %c0_27 = arith.constant 0 : index
    %c0_28 = arith.constant 0 : index
    %59 = vector.load %arg11[%c0_27, %c0_28] : memref<1x256xf32, #tpu.memory_space<vmem>>, vector<1x256xf32>
    %60 = vector.broadcast %59 : vector<1x256xf32> to vector<128x256xf32>
    %61 = arith.mulf %58, %60 : vector<128x256xf32>
    %c0_29 = arith.constant 0 : index
    %c0_30 = arith.constant 0 : index
    %62 = vector.load %arg12[%c0_29, %c0_30] : memref<1x256xf32, #tpu.memory_space<vmem>>, vector<1x256xf32>
    %63 = vector.broadcast %62 : vector<1x256xf32> to vector<128x256xf32>
    %64 = arith.addf %61, %63 : vector<128x256xf32>
    %c0_31 = arith.constant 0 : index
    %c0_32 = arith.constant 0 : index
    %c0_33 = arith.constant 0 : index
    %65 = vector.load %arg13[%c0_31, %c0_32, %c0_33] : memref<1x128x256xf32, #tpu.memory_space<vmem>>, vector<1x128x256xf32>
    %66 = vector.shape_cast %65 : vector<1x128x256xf32> to vector<128x256xf32>
    %67 = vector.shape_cast %64 : vector<128x256xf32> to vector<1x128x256xf32>
    tpu.vector_store %arg13[%c0_31, %c0_32, %c0_33], %67 {strides = array<i32>} : memref<1x128x256xf32, #tpu.memory_space<vmem>>, vector<1x128x256xf32>,
    return
  }
  func.func @transform_0(%arg0: i32, %arg1: i32) -> (i32, i32, i32) {
    %c0_i32 = arith.constant 0 : i32
    %c0_i32_0 = arith.constant 0 : i32
    %c0_i32_1 = arith.constant 0 : i32
    return %arg0, %c0_i32, %c0_i32_0 : i32, i32, i32
  }
  func.func @transform_1(%arg0: i32, %arg1: i32) -> (i32, i32) {
    %c0_i32 = arith.constant 0 : i32
    %c0_i32_0 = arith.constant 0 : i32
    %c0_i32_1 = arith.constant 0 : i32
    return %c0_i32, %c0_i32_0 : i32, i32
  }
  func.func @transform_2(%arg0: i32, %arg1: i32) -> (i32, i32) {
    %c0_i32 = arith.constant 0 : i32
    %c0_i32_0 = arith.constant 0 : i32
    %c0_i32_1 = arith.constant 0 : i32
    return %c0_i32, %c0_i32_0 : i32, i32
  }
  func.func @transform_3(%arg0: i32, %arg1: i32) -> (i32, i32) {
    %c0_i32 = arith.constant 0 : i32
    %c0_i32_0 = arith.constant 0 : i32
    %c0_i32_1 = arith.constant 0 : i32
    return %c0_i32, %c0_i32_0 : i32, i32
  }
  func.func @transform_4(%arg0: i32, %arg1: i32) -> (i32, i32) {
    %c0_i32 = arith.constant 0 : i32
    %c0_i32_0 = arith.constant 0 : i32
    %c0_i32_1 = arith.constant 0 : i32
    return %c0_i32, %c0_i32_0 : i32, i32
  }
  func.func @transform_5(%arg0: i32, %arg1: i32) -> (i32, i32) {
    %c0_i32 = arith.constant 0 : i32
    %c0_i32_0 = arith.constant 0 : i32
    %c0_i32_1 = arith.constant 0 : i32
    return %c0_i32, %c0_i32_0 : i32, i32
  }
  func.func @transform_6(%arg0: i32, %arg1: i32) -> (i32, i32) {
    %c0_i32 = arith.constant 0 : i32
    %c0_i32_0 = arith.constant 0 : i32
    %c0_i32_1 = arith.constant 0 : i32
    return %c0_i32, %c0_i32_0 : i32, i32
  }
  func.func @transform_7(%arg0: i32, %arg1: i32) -> (i32, i32) {
    %c0_i32 = arith.constant 0 : i32
    %c0_i32_0 = arith.constant 0 : i32
    %c0_i32_1 = arith.constant 0 : i32
    return %c0_i32, %c0_i32_0 : i32, i32
  }
  func.func @transform_8(%arg0: i32, %arg1: i32) -> (i32, i32) {
    %c0_i32 = arith.constant 0 : i32
    %c0_i32_0 = arith.constant 0 : i32
    %c0_i32_1 = arith.constant 0 : i32
    return %c0_i32, %c0_i32_0 : i32, i32
  }
  func.func @transform_9(%arg0: i32, %arg1: i32) -> (i32, i32) {
    %c0_i32 = arith.constant 0 : i32
    %c0_i32_0 = arith.constant 0 : i32
    %c0_i32_1 = arith.constant 0 : i32
    return %c0_i32, %c0_i32_0 : i32, i32
  }
  func.func @transform_10(%arg0: i32, %arg1: i32) -> (i32, i32) {
    %c0_i32 = arith.constant 0 : i32
    %c0_i32_0 = arith.constant 0 : i32
    %c0_i32_1 = arith.constant 0 : i32
    return %c0_i32, %c0_i32_0 : i32, i32
  }
  func.func @transform_11(%arg0: i32, %arg1: i32) -> (i32, i32, i32) {
    %c0_i32 = arith.constant 0 : i32
    %c0_i32_0 = arith.constant 0 : i32
    return %arg0, %arg1, %c0_i32 : i32, i32, i32
  }
}

</mosaic_0001>

<bundles_post_ra>
// kernel: tpu_custom_call.1
= control target key start
LH: loop header
LB: loop body
LE: loop exit
PB: predicated region body
PF: predicated region fallthrough
CT: control target
= control target key end

     0   :  { %s22331_s0 = inlined_call_operand.hbm [shape: bf16[2,256,256], index: 0, kind: input, shape index: {}]   ;;  %s22332_s1 = inlined_call_operand.hbm [shape: bf16[256,256], index: 1, kind: input, shape index: {}]   ;;  %s22333_s2 = inlined_call_operand.vmem [shape: f32[1,256], index: 2, kind: input, shape index: {}]   ;;  %s22334_s3 = inlined_call_operand.hbm [shape: bf16[256,256], index: 3, kind: input, shape index: {}]   ;;  %s22335_s4 = inlined_call_operand.vmem [shape: f32[1,256], index: 4, kind: input, shape index: {}]   ;;  %s22336_s5 = inlined_call_operand.hbm [shape: bf16[256,256], index: 5, kind: input, shape index: {}]   ;;  %s22337_s6 = inlined_call_operand.vmem [shape: f32[1,256], index: 6, kind: input, shape index: {}]   ;;  %s22338_s7 = inlined_call_operand.hbm [shape: bf16[256,256], index: 7, kind: input, shape index: {}]   ;;  %s22339_s8 = inlined_call_operand.vmem [shape: f32[1,256], index: 8, kind: input, shape index: {}]   ;;  %s22340_s9 = inlined_call_operand.vmem [shape: f32[1,256], index: 9, kind: input, shape index: {}]   ;;  %s22341_s10 = inlined_call_operand.vmem [shape: f32[1,256], index: 10, kind: input, shape index: {}]   ;;  %s22342_s11 = inlined_call_operand.hbm [shape: f32[2,256,256], index: 11, kind: output, shape index: {}]  }
   0x1   :  { %22505 = sst [smem:[#allocation111_spill]] %s22332_s1 }
   0x2   :  { %22506 = sst [smem:[#allocation112_spill]] %s22333_s2 }
   0x3   :  { %22507 = sst [smem:[#allocation113_spill]] %s22334_s3 }
   0x4   :  { %22508 = sst [smem:[#allocation114_spill]] %s22335_s4 }
   0x5   :  { %22509 = sst [smem:[#allocation115_spill]] %s22337_s6 }
   0x6   :  { %22510 = sst [smem:[#allocation116_spill]] %s22339_s8 }
   0x7   :  { %22511 = sst [smem:[#allocation117_spill]] %s22340_s9 }
   0x8   :  { %22512 = sst [smem:[#allocation118_spill]] %s22341_s10 }
   0x9   :  { %22513 = sst [smem:[#allocation119_spill]] %s22342_s11 }
   0xa   :  { %16 = vsyncpa [#allocation6], 0 }
   0xb   :  { %18 = vsyncpa [#allocation6 + $0x1], 0 }
   0xc   :  { %19 = vsyncpa [#allocation9], 0 }
   0xd   :  { %20 = vsyncpa [#allocation12], 0 }
   0xe   :  { %21 = vsyncpa [#allocation7], 0 }
   0xf   :  { %23 = vsyncpa [#allocation7 + $0x1], 0  ;;  %s16848_s17 = smov 0   ;;  %s16850_s18 = smov 0  }
  0x10   :  { %s16852_s19 = smov 0   ;;  %s16854_s20 = smov 0  }
  0x11   :  { %s16856_s21 = smov 0   ;;  %s16858_s22 = smov 0  }
  0x12   :  { %s16860_s23 = smov 0   ;;  %s16862_s24 = smov 0  }
  0x13   :  { %s16864_s25 = smov 0   ;;  %s16866_s26 = smov 0  }
  0x14   :  { %s16868_s27 = smov 0  }
  0x15 LB: > { %22514 = sst [smem:[#allocation19_spill]] %s16729_s17  ;;  %s15071_s28 = sadd.s32 4294967295, %s16769_s27   ;;  %s16769_s27 = sphi %s16868_s27, %s29_s27   ;;  %s16765_s26 = sphi %s16866_s26, %s22987_s26   ;;  %s16761_s25 = sphi %s16864_s25, %s22986_s25   ;;  %s16757_s24 = sphi %s16862_s24, %s22985_s24   ;;  %s16753_s23 = sphi %s16860_s23, %s22984_s23   ;;  %s16749_s22 = sphi %s16858_s22, %s22983_s22   ;;  %s16745_s21 = sphi %s16856_s21, %s22982_s21   ;;  %s16741_s20 = sphi %s16854_s20, %s22981_s20   ;;  %s16737_s19 = sphi %s16852_s19, %s22980_s19   ;;  %s16733_s18 = sphi %s16850_s18, %s22979_s18   ;;  %s16729_s17 = sphi %s16848_s17, %s22978_s17  }
  0x16   : > { %22515 = sst [smem:[#allocation20_spill]] %s16753_s23  ;;  %s15072_s29 = sadd.s32 4294967294, %s16769_s27  }
  0x17   : > { %22516 = sst [smem:[#allocation21_spill]] %s16757_s24  ;;  %p61_p0 = scmp.ne.s32.totalorder %s16745_s21, %s16741_s20 }
  0x18   : > { %p16904_p1 = scmp.eq.s32.totalorder %s15071_s28, 0  ;;  %p296_p2 = scmp.ne.s32.totalorder %s16737_s19, %s16733_s18 }
  0x19   : > { %p297_p3 = scmp.eq.s32.totalorder %s15071_s28, 3  ;;  %p302_p5 = scmp.ne.s32.totalorder %s16733_s18, %s16729_s17 }
  0x1a   : > { %s22517_s30 = scalar_select %p16904_p1, 1, 0 }
  0x1b   : > { %p16912_p4 = por %p16904_p1, %p61_p0  ;;  %p16918_p6 = por %p297_p3, %p296_p2 }
  0x1c   : > { %p303_p7 = scmp.eq.s32.totalorder %s15072_s29, 3  ;;  %p15073_p8 = scmp.ge.s32.totalorder %s16769_s27, 1 }
  0x1d   : > { %s22518_s12 = scalar_select %p16912_p4, 1, 0 }
  0x1e   : > { %s22519_s13 = scalar_select %p16918_p6, 1, 0 }
  0x1f   : > { %p310_p9 = scmp.lt.s32.totalorder %s16769_s27, 5  ;;  %p16924_p10 = por %p303_p7, %p302_p5 }
  0x20   : > { %22520 = sst [smem:[#allocation22_spill]] %s22519_s13  ;;  %s16771_s16 = smov [#allocation8]  }
  0x21   : > { %s22521_s14 = scalar_select %p16924_p10, 1, 0 }
  0x22   : > { %p16928_p11 = pnand %p15073_p8, %p310_p9  ;;  %s322_s20 = sshll.u32 %s16771_s16, 4  ;;  %s323_s20 = int_to_ptr.vmem [resolvable:$true] %s322_s20 }
  0x23   : > { %22522 = sst [smem:[#allocation23_spill]] %s22521_s14  ;;  %s16772_s29 = smov [#allocation11]  }
  0x24   : > { %s22523_s15 = scalar_select %p16928_p11, 1, 0 }
  0x25   : > { %p15651_p12 = pneg %p16928_p11  ;;  %s354_s17 = sshll.u32 %s16772_s29, 4  ;;  %s16940_s17 = int_to_ptr.vmem [resolvable:$true] %s354_s17 }
  0x26   : > { %s22525_s1 = sld [smem:[#allocation111_spill]] }
  0x27   : > { %p16936_p13 = pnand %p15651_p12, %p16904_p1 }
  0x29   : > { %p16950_p2 = pneg %p16936_p13 }
  0x2c   : > { %s16497_s13 = scalar_lea.hbm %s22525_s1, 4096 }
  0x2d   : > { %p16498_p0 = scmp.ne.s32.totalorder %s22525_s1, %s16497_s13  ;;  %p16504_p7 = scmp.lt.u32.totalorder %s16497_s13, %s22525_s1 }
  0x2f   : > { %p16500_p3 = pnand %p16950_p2, %p16498_p0 }
  0x31   : > { %p16501_p5 = pneg %p16500_p3 }
  0x33   : > { %p16506_p8 = pnand %p16504_p7, %p16501_p5 }
  0x35   : > { %16509 = shalt.err (!%p16506_p8)
}
  0x36   : > { %s16510_s11 = scalar_lea.vmem %s323_s20, 4096  ;;  %p16518_p6 = scmp.lt.s32.totalorder %s323_s20, %s323_s20 }
  0x37   : > { %p16511_p9 = scmp.ne.s32.totalorder %s323_s20, %s16510_s11  ;;  %p16519_p1 = scmp.lt.s32.totalorder %s16510_s11, %s16510_s11 }
  0x39   : > { %p16513_p12 = pnand %p16511_p9, %p16950_p2  ;;  %p16520_p4 = por %p16519_p1, %p16518_p6 }
  0x3b   : > { %p16514_p10 = pneg %p16513_p12 }
  0x3d   : > { %p16521_p11 = pnand %p16520_p4, %p16514_p10 }
  0x3f   : > { %16524 = shalt.err (!%p16521_p11)
}
  0x40   : > { %s22354_s10 = smov 128   ;;  %s22355_s24 = smov 8  }
  0x41   : > { %15654 = dma.hbm_to_vmem [thread:$0]  (!%p16936_p13), %s22525_s1, 4096, %s323_s20, [#allocation9], %s22354_s10, %s22354_s10, %s22355_s24  }
  0x42   : > { %s16525_s8 = scalar_lea.hbm %s22336_s5, 4096 }
  0x43   : > { %p16526_p1 = scmp.ne.s32.totalorder %s22336_s5, %s16525_s8  ;;  %p16532_p10 = scmp.lt.u32.totalorder %s16525_s8, %s22336_s5 }
  0x45   : > { %p16528_p4 = pnand %p16526_p1, %p16950_p2 }
  0x47   : > { %p16529_p6 = pneg %p16528_p4 }
  0x49   : > { %p16534_p11 = pnand %p16532_p10, %p16529_p6 }
  0x4b   : > { %16537 = shalt.err (!%p16534_p11)
}
  0x4c   : > { %s16538_s20 = scalar_lea.vmem %s16940_s17, 4096  ;;  %p16546_p7 = scmp.lt.s32.totalorder %s16940_s17, %s16940_s17 }
  0x4d   : > { %p16539_p0 = scmp.ne.s32.totalorder %s16940_s17, %s16538_s20  ;;  %p16547_p8 = scmp.lt.s32.totalorder %s16538_s20, %s16538_s20 }
  0x4f   : > { %p16541_p3 = pnand %p16539_p0, %p16950_p2  ;;  %p16548_p9 = por %p16547_p8, %p16546_p7 }
  0x51   : > { %p16542_p5 = pneg %p16541_p3 }
  0x53   : > { %p16549_p12 = pnand %p16548_p9, %p16542_p5 }
  0x55   : > { %16552 = shalt.err (!%p16549_p12)
}
  0x56   : > { %15660 = dma.hbm_to_vmem [thread:$0]  (!%p16936_p13), %s22336_s5, 4096, %s16940_s17, [#allocation12], %s22354_s10, %s22354_s10, %s22355_s24  }
  0x57   : > { %s16775_s6 = smov [#allocation10]   ;;  %s16776_s9 = smov [#allocation13]  }
  0x58   : > { %s338_s8 = sshll.u32 %s16775_s6, 4  ;;  %s370_s13 = sshll.u32 %s16776_s9, 4  ;;  %s339_s8 = int_to_ptr.vmem [resolvable:$true] %s338_s8  ;;  %s371_s13 = int_to_ptr.vmem [resolvable:$true] %s370_s13 }
  0x59   : > { %s22527_s3 = sld [smem:[#allocation113_spill]] }
  0x5f   : > { %s16553_s11 = scalar_lea.hbm %s22527_s3, 4096 }
  0x60   : > { %p16554_p1 = scmp.ne.s32.totalorder %s22527_s3, %s16553_s11  ;;  %p16560_p10 = scmp.lt.u32.totalorder %s16553_s11, %s22527_s3 }
  0x62   : > { %p16556_p4 = pnand %p16554_p1, %p16950_p2 }
  0x64   : > { %p16557_p6 = pneg %p16556_p4 }
  0x66   : > { %p16562_p11 = pnand %p16560_p10, %p16557_p6 }
  0x68   : > { %16565 = shalt.err (!%p16562_p11)
}
  0x69   : > { %s16566_s17 = scalar_lea.vmem %s339_s8, 4096  ;;  %p16574_p7 = scmp.lt.s32.totalorder %s339_s8, %s339_s8 }
  0x6a   : > { %p16567_p0 = scmp.ne.s32.totalorder %s339_s8, %s16566_s17  ;;  %p16575_p8 = scmp.lt.s32.totalorder %s16566_s17, %s16566_s17 }
  0x6c   : > { %p16569_p3 = pnand %p16567_p0, %p16950_p2  ;;  %p16576_p9 = por %p16575_p8, %p16574_p7 }
  0x6e   : > { %p16570_p5 = pneg %p16569_p3 }
  0x70   : > { %p16577_p12 = pnand %p16576_p9, %p16570_p5 }
  0x72   : > { %16580 = shalt.err (!%p16577_p12)
}
  0x73   : > { %15657 = dma.hbm_to_vmem [thread:$0]  (!%p16936_p13), %s22527_s3, 4096, %s339_s8, [#allocation9], %s22354_s10, %s22354_s10, %s22355_s24  }
  0x74   : > { %s16581_s9 = scalar_lea.hbm %s22338_s7, 4096 }
  0x75   : > { %p16582_p1 = scmp.ne.s32.totalorder %s22338_s7, %s16581_s9  ;;  %p16588_p10 = scmp.lt.u32.totalorder %s16581_s9, %s22338_s7 }
  0x77   : > { %p16584_p4 = pnand %p16582_p1, %p16950_p2 }
  0x79   : > { %p16585_p6 = pneg %p16584_p4 }
  0x7b   : > { %p16590_p11 = pnand %p16588_p10, %p16585_p6 }
  0x7d   : > { %16593 = shalt.err (!%p16590_p11)
}
  0x7e   : > { %s16594_s2 = scalar_lea.vmem %s371_s13, 4096  ;;  %p16602_p7 = scmp.lt.s32.totalorder %s371_s13, %s371_s13 }
  0x7f   : > { %p16595_p0 = scmp.ne.s32.totalorder %s371_s13, %s16594_s2  ;;  %p16603_p8 = scmp.lt.s32.totalorder %s16594_s2, %s16594_s2 }
  0x81   : > { %p16597_p3 = pnand %p16595_p0, %p16950_p2  ;;  %p16604_p9 = por %p16603_p8, %p16602_p7 }
  0x83   : > { %p16598_p5 = pneg %p16597_p3 }
  0x85   : > { %p16605_p12 = pnand %p16604_p9, %p16598_p5 }
  0x87   : > { %16608 = shalt.err (!%p16605_p12)
}
  0x88   : > { %15663 = dma.hbm_to_vmem [thread:$0]  (!%p16936_p13), %s22338_s7, 4096, %s371_s13, [#allocation12], %s22354_s10, %s22354_s10, %s22355_s24  }
  0x89   : > { %s38_s28 = sadd.s32 1, %s16761_s25  ;;  %s41_s16 = sadd.s32 1, %s16765_s26 }
  0x8a   : > { %p39_p2 = scmp.ge.s32.totalorder %s38_s28, 2  ;;  %s48_s1 = sadd.s32 1, %s16749_s22 }
  0x8b   : > { %p55_p1 = scmp.ne.s32.totalorder %s16749_s22, %s16745_s21  ;;  %p56_p4 = scmp.eq.s32.totalorder %s16769_s27, 0 }
  0x8c   : > { %s22989_s28 = smov (%p39_p2, %s38_s28), 0  ;;  %s22991_s16 = smov (!%p39_p2, %s41_s16), %s16765_s26 }
  0x8d   : > { %s282_s23 = ssub.s32 %s16761_s25, %s22989_s28  ;;  %p43_p6 = scmp.ge.s32.totalorder %s22991_s16, 2 }
  0x8e   : > { %s286_s4 = sadd.s32 1, %s16737_s19  ;;  %p17049_p10 = por %p56_p4, %p55_p1 }
  0x8f   : > { %p15676_p13 = scmp.lt.s32.totalorder %s16769_s27, 4  ;;  %s22993_s16 = smov (%p43_p6, %s22991_s16), 0 }
  0x90   : > { %s393_s6 = sand.u32 1, %s16749_s22   ;;  %s15468_s9 = sshll.u32 %s16765_s26, 12 }
  0x91   : > { %s45_s14 = ssub.s32 %s16765_s26, %s22993_s16  ;;  %s15079_s11 = sshll.u32 %s393_s6, 8 }
  0x92   : > { %p46_p11 = scmp.eq.s32.totalorder %s45_s14, 0  ;;  %s283_s29 = sor.u32 %s282_s23, %s45_s14 }
  0x93   : > { %p284_p0 = scmp.eq.s32.totalorder %s283_s29, 0  ;;  %s17069_s10 = scalar_lea.hbm %s22331_s0, %s15468_s9 }
  0x94   : > { %s17061_s20 = scalar_select %p46_p11, %s16749_s22, %s48_s1  }
  0x95   : > { %s17064_s2 = scalar_select %p284_p0, %s16737_s19, %s286_s4  }
  0x96   : > { %s397_s24 = scalar_lea.vmem [#allocation5], %s15079_s11  ;;  %p17075_p3 = pnand %p15676_p13, %p17049_p10 }
  0x97   : > { %s404_s3 = sshll.u32 %s397_s24, 4  ;;  %s17081_s1 = scalar_lea.sflag [#allocation6], %s393_s6  ;;  %s17079_s3 = int_to_ptr.vmem [resolvable:$true] %s404_s3 }
  0x98   : > { %s16609_s4 = scalar_lea.hbm %s17069_s10, 4096  ;;  %p16611_p7 = pneg %p17075_p3 }
  0x99   : > { %p16610_p5 = scmp.ne.s32.totalorder %s17069_s10, %s16609_s4  ;;  %s16614_s9 = scalar_lea.hbm %s22331_s0, 8192 }
  0x9a   : > { %p16615_p12 = scmp.lt.u32.totalorder %s17069_s10, %s22331_s0  ;;  %p16616_p2 = scmp.lt.u32.totalorder %s16614_s9, %s16609_s4 }
  0x9b   : > { %p16612_p8 = pnand %p16611_p7, %p16610_p5  ;;  %p16618_p4 = scmp.lt.u32.totalorder %s16609_s4, %s17069_s10 }
  0x9c   : > { %p16617_p1 = por %p16616_p2, %p16615_p12 }
  0x9d   : > { %p16613_p9 = pneg %p16612_p8 }
  0x9e   : > { %p16619_p6 = por %p16618_p4, %p16617_p1 }
  0xa0   : > { %p16620_p10 = pnand %p16619_p6, %p16613_p9 }
  0xa2   : > { %16623 = shalt.err (!%p16620_p10)
}
  0xa3   : > { %s16624_s6 = scalar_lea.vmem %s17079_s3, 4096  ;;  %s16777_s11 = smov [#allocation5]  }
  0xa4   : > { %p16625_p13 = scmp.ne.s32.totalorder %s17079_s3, %s16624_s6  ;;  %s16629_s8 = sshll.u32 %s16777_s11, 4  ;;  %s16630_s8 = int_to_ptr.vmem [resolvable:$false] %s16629_s8 }
  0xa5   : > { %s16631_s17 = scalar_lea.vmem %s16630_s8, 8192  ;;  %p16632_p5 = scmp.lt.s32.totalorder %s17079_s3, %s16630_s8 }
  0xa6   : > { %p16627_p11 = pnand %p16625_p13, %p16611_p7  ;;  %p16633_p8 = scmp.lt.s32.totalorder %s16631_s17, %s16624_s6 }
  0xa8   : > { %p16628_p0 = pneg %p16627_p11  ;;  %p16634_p12 = por %p16633_p8, %p16632_p5 }
  0xaa   : > { %p16635_p2 = pnand %p16634_p12, %p16628_p0 }
  0xac   : > { %16638 = shalt.err (!%p16635_p2)
}
  0xad   : > { %s22530_s4 = smov 8   ;;  %s22531_s24 = smov 128  }
  0xae   : > { %15667 = dma.hbm_to_vmem [thread:$0]  (!%p17075_p3), %s17069_s10, 4096, %s17079_s3, %s17081_s1, %s22531_s24, %s22531_s24, %s22530_s4  }
  0xaf   : > { %p22532_p7 = scmp.ne.s32.totalorder %s22523_s15, 0 }
  0xb1   : > { %416 = sbr.rel (%p22532_p7) target bundleno = 2752 (0xac0), region = 64 }
  0xb8   : > { %s418_s13 = sand.u32 1, %s16745_s21   ;;  %p22533_p9 = scmp.ne.s32.totalorder %s22518_s12, 0 }
  0xb9   : > { %s15083_s9 = sshll.u32 %s418_s13, 8  ;;  %s419_s14 = scalar_lea.sflag [#allocation6], %s418_s13 }
  0xba   : > { %s17115_s29 = scalar_lea.vmem [#allocation5], %s15083_s9 }
  0xbb   : > { %16712 = dma.done.wait (%p22533_p9), %s419_s14, 4096  }
  0xbc   : > { %16714 = vsyncadd (%p22533_p9), %s419_s14, 4294963200  ;;  %p22534_p1 = scmp.ne.s32.totalorder %s22517_s30, 0 }
  0xbe   : > { %16716 = dma.done.wait (%p22534_p1), [#allocation9], 8192  }
  0xbf   : > { %16718 = vsyncadd (%p22534_p1), [#allocation9], 4294959104 }
  0xc0   : > { %16720 = dma.done.wait (%p22534_p1), [#allocation12], 8192  }
  0xc1   : > { %16722 = vsyncadd (%p22534_p1), [#allocation12], 4294959104  ;;  %s474_s3 = sand.u32 1, %s16733_s18   ;;  %s22535_s12 = sld [smem:[#allocation20_spill]] }
  0xc2   : > { %s15088_s15 = sshll.u32 %s474_s3, 8 }
  0xc3   : > { %s17132_s10 = scalar_lea.vmem [#allocation14], %s15088_s15 }
  0xc7   : > { %p15089_p3 = scmp.ne.s32.totalorder %s22535_s12, 0 }
  0xc9   : > { %482 = sbr.rel (%p15089_p3) target bundleno = 1039 (0x40f), region = 88 }
  0xd0   : > { %v16009_v0 = vld [vmem:[#allocation10 + $0x4] ss:$8 sps:$4 sm:$0xff]   ;;  %v16011_v1 = vld [vmem:[#allocation10] ss:$8 sps:$4 sm:$0xff]   ;;  %v16012_v2 = vld [vmem:[#allocation10 + $0x14] ss:$8 sps:$4 sm:$0xff]  }
  0xd1   : > { %879 = vmatprep.subr.bf16.mxu0 %v16009_v0  ;;  %v16014_v3 = vld [vmem:[#allocation10 + $0x10] ss:$8 sps:$4 sm:$0xff]   ;;  %v16015_v4 = vld [vmem:[#allocation10 + $0x24] ss:$8 sps:$4 sm:$0xff]   ;;  %v16017_v5 = vld [vmem:[#allocation10 + $0x20] ss:$8 sps:$4 sm:$0xff]  }
  0xd2   : > { %880 = vmatpush1.bf16.msra.mxu0 %v16011_v1  ;;  %v16018_v6 = vld [vmem:[#allocation10 + $0x34] ss:$8 sps:$4 sm:$0xff]   ;;  %v16020_v7 = vld [vmem:[#allocation10 + $0x30] ss:$8 sps:$4 sm:$0xff]   ;;  %v16021_v8 = vld [vmem:[#allocation10 + $0x44] ss:$8 sps:$4 sm:$0xff]  }
  0xd3   : > { %881 = vmatprep.subr.bf16.mxu0 %v16012_v2  ;;  %v16023_v9 = vld [vmem:[#allocation10 + $0x40] ss:$8 sps:$4 sm:$0xff]   ;;  %v16024_v10 = vld [vmem:[#allocation10 + $0x54] ss:$8 sps:$4 sm:$0xff]   ;;  %v16026_v11 = vld [vmem:[#allocation10 + $0x50] ss:$8 sps:$4 sm:$0xff]  }
  0xd4   : > { %v16027_v12 = vld [vmem:[#allocation10 + $0x64] ss:$8 sps:$4 sm:$0xff]   ;;  %v16029_v13 = vld [vmem:[#allocation10 + $0x60] ss:$8 sps:$4 sm:$0xff]   ;;  %v16030_v14 = vld [vmem:[#allocation10 + $0x74] ss:$8 sps:$4 sm:$0xff]  }
  0xd5   : > { %v16059_v15 = vld [vmem:[%s17115_s29 + $0x4] ss:$8 sps:$4 sm:$0xff]   ;;  %v16062_v17 = vld [vmem:[#allocation11] ss:$8 sps:$4 sm:$0xff]   ;;  %v16063_v18 = vld [vmem:[#allocation11 + $0x14] ss:$8 sps:$4 sm:$0xff]  }
  0xd6   : > { %882 = vmatpush1.bf16.msra.mxu0 %v16014_v3  ;;  %v16060_v16 = vld [vmem:[#allocation11 + $0x4] ss:$8 sps:$4 sm:$0xff]   ;;  %911 = vmatprep.mubr.bf16.mxu0 %v16059_v15  ;;  %v16067_v19 = vld [vmem:[#allocation11 + $0x10] ss:$8 sps:$4 sm:$0xff]   ;;  %v16071_v23 = vld [vmem:[#allocation11 + $0x20] ss:$8 sps:$4 sm:$0xff]  }
  0xd7   : > { %883 = vmatprep.subr.bf16.mxu0 %v16015_v4  ;;  %1276 = vmatprep.subr.bf16.mxu1 %v16060_v16  ;;  %v16032_v20 = vld [vmem:[#allocation10 + $0x70] ss:$8 sps:$4 sm:$0xff]   ;;  %v16069_v21 = vld [vmem:[#allocation11 + $0x24] ss:$8 sps:$4 sm:$0xff]   ;;  %v16035_v24 = vld [vmem:[#allocation10 + $0x80] ss:$8 sps:$4 sm:$0xff]  }
  0xd8   : > { %1308 = vmatprep.mubr.bf16.mxu1 %v16059_v15  ;;  %1277 = vmatpush1.bf16.msra.mxu1 %v16062_v17  ;;  %v16033_v22 = vld [vmem:[#allocation10 + $0x84] ss:$8 sps:$4 sm:$0xff]   ;;  %v16072_v25 = vld [vmem:[#allocation11 + $0x34] ss:$8 sps:$4 sm:$0xff]   ;;  %v16076_v27 = vld [vmem:[#allocation11 + $0x30] ss:$8 sps:$4 sm:$0xff]  }
  0xd9   : > { %1278 = vmatprep.subr.bf16.mxu1 %v16063_v18  ;;  %v16036_v26 = vld [vmem:[#allocation10 + $0x94] ss:$8 sps:$4 sm:$0xff]   ;;  %v16038_v28 = vld [vmem:[#allocation10 + $0x90] ss:$8 sps:$4 sm:$0xff]   ;;  %v16078_v29 = vld [vmem:[#allocation11 + $0x44] ss:$8 sps:$4 sm:$0xff]  }
  0xda   : > { %884 = vmatpush1.bf16.msra.mxu0 %v16017_v5  ;;  %v16039_v30 = vld [vmem:[#allocation10 + $0xa4] ss:$8 sps:$4 sm:$0xff]   ;;  %v16080_v31 = vld [vmem:[#allocation11 + $0x40] ss:$8 sps:$4 sm:$0xff]   ;;  %v16081_v33 = vld [vmem:[#allocation11 + $0x54] ss:$8 sps:$4 sm:$0xff]  }
  0xdb   : > { %885 = vmatprep.subr.bf16.mxu0 %v16018_v6  ;;  %v16041_v32 = vld [vmem:[#allocation10 + $0xa0] ss:$8 sps:$4 sm:$0xff]   ;;  %v16042_v34 = vld [vmem:[#allocation10 + $0xb4] ss:$8 sps:$4 sm:$0xff]   ;;  %v16085_v35 = vld [vmem:[#allocation11 + $0x50] ss:$8 sps:$4 sm:$0xff]  }
  0xdc   : > { %1279 = vmatpush1.bf16.msra.mxu1 %v16067_v19  ;;  %v16044_v36 = vld [vmem:[#allocation10 + $0xb0] ss:$8 sps:$4 sm:$0xff]   ;;  %v16087_v37 = vld [vmem:[#allocation11 + $0x64] ss:$8 sps:$4 sm:$0xff]   ;;  %v16089_v39 = vld [vmem:[#allocation11 + $0x60] ss:$8 sps:$4 sm:$0xff]  }
  0xdd   : > { %1280 = vmatprep.subr.bf16.mxu1 %v16069_v21  ;;  %v16045_v38 = vld [vmem:[#allocation10 + $0xc4] ss:$8 sps:$4 sm:$0xff]   ;;  %v16047_v40 = vld [vmem:[#allocation10 + $0xc0] ss:$8 sps:$4 sm:$0xff]   ;;  %v16090_v41 = vld [vmem:[#allocation11 + $0x74] ss:$8 sps:$4 sm:$0xff]  }
  0xde   : > { %886 = vmatpush1.bf16.msra.mxu0 %v16020_v7  ;;  %v16048_v42 = vld [vmem:[#allocation10 + $0xd4] ss:$8 sps:$4 sm:$0xff]   ;;  %v16094_v43 = vld [vmem:[#allocation11 + $0x70] ss:$8 sps:$4 sm:$0xff]   ;;  %v16096_v45 = vld [vmem:[#allocation11 + $0x84] ss:$8 sps:$4 sm:$0xff]  }
  0xdf   : > { %887 = vmatprep.subr.bf16.mxu0 %v16021_v8  ;;  %v16050_v44 = vld [vmem:[#allocation10 + $0xd0] ss:$8 sps:$4 sm:$0xff]   ;;  %v16051_v46 = vld [vmem:[#allocation10 + $0xe4] ss:$8 sps:$4 sm:$0xff]   ;;  %v16098_v47 = vld [vmem:[#allocation11 + $0x80] ss:$8 sps:$4 sm:$0xff]  }
  0xe0   : > { %1281 = vmatpush1.bf16.msra.mxu1 %v16071_v23  ;;  %v16053_v48 = vld [vmem:[#allocation10 + $0xe0] ss:$8 sps:$4 sm:$0xff]   ;;  %v16099_v49 = vld [vmem:[#allocation11 + $0x94] ss:$8 sps:$4 sm:$0xff]   ;;  %v16103_v51 = vld [vmem:[#allocation11 + $0x90] ss:$8 sps:$4 sm:$0xff]  }
  0xe1   : > { %1282 = vmatprep.subr.bf16.mxu1 %v16072_v25  ;;  %v16054_v50 = vld [vmem:[#allocation10 + $0xf4] ss:$8 sps:$4 sm:$0xff]   ;;  %v16056_v52 = vld [vmem:[#allocation10 + $0xf0] ss:$8 sps:$4 sm:$0xff]   ;;  %v16105_v53 = vld [vmem:[#allocation11 + $0xa4] ss:$8 sps:$4 sm:$0xff]  }
  0xe2   : > { %888 = vmatpush1.bf16.msra.mxu0 %v16023_v9  ;;  %v16057_v54 = vld [vmem:[%s17115_s29] ss:$8 sps:$4 sm:$0xff]   ;;  %v16065_v56 = vld [vmem:[%s17115_s29 + $0x14] ss:$8 sps:$4 sm:$0xff]   ;;  %v16112_v58 = vld [vmem:[#allocation11 + $0xb0] ss:$8 sps:$4 sm:$0xff]  }
  0xe3   : > { %889 = vmatprep.subr.bf16.mxu0 %v16024_v10  ;;  %v16107_v55 = vld [vmem:[#allocation11 + $0xa0] ss:$8 sps:$4 sm:$0xff]   ;;  %v16108_v57 = vld [vmem:[#allocation11 + $0xb4] ss:$8 sps:$4 sm:$0xff]   ;;  %v16114_v59 = vld [vmem:[#allocation11 + $0xc4] ss:$8 sps:$4 sm:$0xff]  }
  0xe4   : > { %1283 = vmatpush1.bf16.msra.mxu1 %v16076_v27  ;;  %v16068_v60 = vld [vmem:[%s17115_s29 + $0x10] ss:$8 sps:$4 sm:$0xff]   ;;  %v16116_v61 = vld [vmem:[#allocation11 + $0xc0] ss:$8 sps:$4 sm:$0xff]   ;;  %v16074_v62 = vld [vmem:[%s17115_s29 + $0x24] ss:$8 sps:$4 sm:$0xff]  }
  0xe5   : > { %1284 = vmatprep.subr.bf16.mxu1 %v16078_v29  ;;  %v16117_v63 = vld [vmem:[#allocation11 + $0xd4] ss:$8 sps:$4 sm:$0xff]   ;;  %v16121_v0 = vld [vmem:[#allocation11 + $0xd0] ss:$8 sps:$4 sm:$0xff]   ;;  %v16123_v1 = vld [vmem:[#allocation11 + $0xe4] ss:$8 sps:$4 sm:$0xff]  }
  0xe6   : > { %890 = vmatpush1.bf16.msra.mxu0 %v16026_v11  ;;  %v16077_v2 = vld [vmem:[%s17115_s29 + $0x20] ss:$8 sps:$4 sm:$0xff]   ;;  %v16083_v4 = vld [vmem:[%s17115_s29 + $0x34] ss:$8 sps:$4 sm:$0xff]   ;;  %v16130_v6 = vld [vmem:[#allocation11 + $0xf0] ss:$8 sps:$4 sm:$0xff]  }
  0xe7   : > { %891 = vmatprep.subr.bf16.mxu0 %v16027_v12  ;;  %v16125_v3 = vld [vmem:[#allocation11 + $0xe0] ss:$8 sps:$4 sm:$0xff]   ;;  %v16126_v5 = vld [vmem:[#allocation11 + $0xf4] ss:$8 sps:$4 sm:$0xff]   ;;  %v16086_v7 = vld [vmem:[%s17115_s29 + $0x30] ss:$8 sps:$4 sm:$0xff]  }
  0xe8   : > { %1285 = vmatpush1.bf16.msra.mxu1 %v16080_v31  ;;  %v16092_v8 = vld [vmem:[%s17115_s29 + $0x44] ss:$8 sps:$4 sm:$0xff]   ;;  %v16095_v9 = vld [vmem:[%s17115_s29 + $0x40] ss:$8 sps:$4 sm:$0xff]   ;;  %v16101_v10 = vld [vmem:[%s17115_s29 + $0x54] ss:$8 sps:$4 sm:$0xff]  }
  0xe9   : > { %1286 = vmatprep.subr.bf16.mxu1 %v16081_v33  ;;  %v16104_v11 = vld [vmem:[%s17115_s29 + $0x50] ss:$8 sps:$4 sm:$0xff]   ;;  %v16110_v12 = vld [vmem:[%s17115_s29 + $0x64] ss:$8 sps:$4 sm:$0xff]   ;;  %v16131_v17 = vld [vmem:[%s17115_s29 + $0x80] ss:$8 sps:$4 sm:$0xff]  }
  0xea   : > { %892 = vmatpush1.bf16.msra.mxu0 %v16029_v13  ;;  %v16113_v13 = vld [vmem:[%s17115_s29 + $0x60] ss:$8 sps:$4 sm:$0xff]   ;;  %v16122_v15 = vld [vmem:[%s17115_s29 + $0x70] ss:$8 sps:$4 sm:$0xff]   ;;  %v16128_v16 = vld [vmem:[%s17115_s29 + $0x84] ss:$8 sps:$4 sm:$0xff]  }
  0xeb   : > { %893 = vmatprep.subr.bf16.mxu0 %v16030_v14  ;;  %v16119_v14 = vld [vmem:[%s17115_s29 + $0x74] ss:$8 sps:$4 sm:$0xff]   ;;  %v16134_v19 = vld [vmem:[%s17115_s29 + $0x90] ss:$8 sps:$4 sm:$0xff]   ;;  %v16137_v21 = vld [vmem:[%s17115_s29 + $0xa0] ss:$8 sps:$4 sm:$0xff]  }
  0xec   : > { %1287 = vmatpush1.bf16.msra.mxu1 %v16085_v35  ;;  %v16132_v18 = vld [vmem:[%s17115_s29 + $0x94] ss:$8 sps:$4 sm:$0xff]   ;;  %v16140_v23 = vld [vmem:[%s17115_s29 + $0xb0] ss:$8 sps:$4 sm:$0xff]   ;;  %v16143_v25 = vld [vmem:[%s17115_s29 + $0xc0] ss:$8 sps:$4 sm:$0xff]  }
  0xed   : > { %1288 = vmatprep.subr.bf16.mxu1 %v16087_v37  ;;  %v16146_v27 = vld [vmem:[%s17115_s29 + $0xd0] ss:$8 sps:$4 sm:$0xff]   ;;  %v16149_v29 = vld [vmem:[%s17115_s29 + $0xe0] ss:$8 sps:$4 sm:$0xff]   ;;  %s22537_s1 = sld [smem:[#allocation114_spill]]  ;;  %s22720_s8 = sld [smem:[#allocation115_spill]] }
  0xee   : > { %894 = vmatpush1.bf16.msra.mxu0 %v16032_v20  ;;  %v16135_v20 = vld [vmem:[%s17115_s29 + $0xa4] ss:$8 sps:$4 sm:$0xff]   ;;  %v16152_v31 = vld [vmem:[%s17115_s29 + $0xf0] ss:$8 sps:$4 sm:$0xff]  }
  0xef   : > { %895 = vmatprep.subr.bf16.mxu0 %v16033_v22  ;;  %v16138_v22 = vld [vmem:[%s17115_s29 + $0xb4] ss:$8 sps:$4 sm:$0xff]  }
  0xf0   : > { %1289 = vmatpush1.bf16.msra.mxu1 %v16089_v39 }
  0xf1   : > { %1290 = vmatprep.subr.bf16.mxu1 %v16090_v41 }
  0xf2   : > { %896 = vmatpush1.bf16.msra.mxu0 %v16035_v24  ;;  %v16141_v24 = vld [vmem:[%s17115_s29 + $0xc4] ss:$8 sps:$4 sm:$0xff]  }
  0xf3   : > { %897 = vmatprep.subr.bf16.mxu0 %v16036_v26  ;;  %v16144_v26 = vld [vmem:[%s17115_s29 + $0xd4] ss:$8 sps:$4 sm:$0xff]   ;;  %v547_v37 = vld [vmem:[%s22537_s1] sm:$0x3] }
  0xf4   : > { %1291 = vmatpush1.bf16.msra.mxu1 %v16094_v43 }
  0xf5   : > { %1292 = vmatprep.subr.bf16.mxu1 %v16096_v45 }
  0xf6   : > { %898 = vmatpush1.bf16.msra.mxu0 %v16038_v28  ;;  %v16147_v28 = vld [vmem:[%s17115_s29 + $0xe4] ss:$8 sps:$4 sm:$0xff]  }
  0xf7   : > { %899 = vmatprep.subr.bf16.mxu0 %v16039_v30  ;;  %v16150_v30 = vld [vmem:[%s17115_s29 + $0xf4] ss:$8 sps:$4 sm:$0xff]  }
  0xf8   : > { %1293 = vmatpush1.bf16.msra.mxu1 %v16098_v47 }
  0xf9   : > { %1294 = vmatprep.subr.bf16.mxu1 %v16099_v49 }
  0xfa   : > { %900 = vmatpush1.bf16.msra.mxu0 %v16041_v32  ;;  %v549_v32 = vlaneseq }
  0xfb   : > { %901 = vmatprep.subr.bf16.mxu0 %v16042_v34  ;;  %v16778_v34 = vmov 1983009808  }
  0xfc   : > { %1295 = vmatpush1.bf16.msra.mxu1 %v16103_v51  ;;  %v17167_v33 = vshrl.u32 %v549_v32, 7  ;;  %v1550_v35 = vunpack.c.l.s4 %v16778_v34  ;;  %v22374_v51 = vmov 0.0  }
  0xfd   : > { %1296 = vmatprep.subr.bf16.mxu1 %v16105_v53 }
  0xfe   : > { %902 = vmatpush1.bf16.msra.mxu0 %v16044_v36  ;;  %22536 = vst [vmem:[#allocation24_spill] sm:$0xff] %v17167_v33  ;;  %v22357_v36 = vsub.s32 0, %v17167_v33  ;;  %v1551_v39 = vunpack.c.0.s8 %v1550_v35 }
  0xff   : > { %903 = vmatprep.subr.bf16.mxu0 %v16045_v38  ;;  %v22356_v38 = vsub.s32 1, %v17167_v33 }
 0x100   : > { %1297 = vmatpush1.bf16.msra.mxu1 %v16107_v55 }
 0x101   : > { %1298 = vmatprep.subr.bf16.mxu1 %v16108_v57  ;;  %v17180_v43 = vrot.slane %v547_v37, %v22356_v38 }
 0x102   : > { %904 = vmatpush1.bf16.msra.mxu0 %v16047_v40  ;;  %v16779_v40 = vmov 1934713408  }
 0x103   : > { %905 = vmatprep.subr.bf16.mxu0 %v16048_v42  ;;  %v1581_v41 = vunpack.c.l.s4 %v16779_v40  ;;  %v17176_v42 = vrot.slane %v547_v37, %v22357_v36 }
 0x104   : > { %1299 = vmatpush1.bf16.msra.mxu1 %v16112_v58 }
 0x105   : > { %1300 = vmatprep.subr.bf16.mxu1 %v16114_v59 }
 0x106   : > { %906 = vmatpush1.bf16.msra.mxu0 %v16050_v44  ;;  %v17183_v44 = vsub.s32 %v1551_v39, %v17167_v33 }
 0x107   : > { %907 = vmatprep.subr.bf16.mxu0 %v16051_v46  ;;  %v1582_v46 = vunpack.c.0.s8 %v1581_v41 }
 0x108   : > { %1301 = vmatpush1.bf16.msra.mxu1 %v16116_v61 }
 0x109   : > { %1302 = vmatprep.subr.bf16.mxu1 %v16117_v63  ;;  %v17193_v58 = vsub.s32 %v1582_v46, %v17167_v33 }
 0x10a   : > { %908 = vmatpush1.bf16.msra.mxu0 %v16053_v48 }
 0x10b   : > { %909 = vmatprep.subr.bf16.mxu0 %v16054_v50 }
 0x10c   : > { %1303 = vmatpush1.bf16.msra.mxu1 %v16121_v0 }
 0x10d   : > { %1304 = vmatprep.subr.bf16.mxu1 %v16123_v1 }
 0x10e   : > { %910 = vmatpush1.bf16.msra.mxu0 %v16056_v52 }
 0x110   : > { %1305 = vmatpush1.bf16.msra.mxu1 %v16125_v3 }
 0x111   : > { %912 = vmatmul.mubr.bf16.vlgmr.msra.gmra.mrb[0].mxu0 %v16057_v54  ;;  %1306 = vmatprep.subr.bf16.mxu1 %v16126_v5 }
 0x112   : > { %921 = vmatprep.mubr.bf16.mxu0 %v16065_v56 }
 0x114   : > { %1307 = vmatpush1.bf16.msra.mxu1 %v16130_v6 }
 0x117   : > { %1309 = vmatmul.mubr.bf16.vlgmr.msra.gmra.mrb[0].mxu1 %v16057_v54 }
 0x118   : > { %1318 = vmatprep.mubr.bf16.mxu1 %v16065_v56 }
 0x119   : > { %922 = vmatmul.mubr.bf16.gmra.mrb[4].mxu0 %v16068_v60 }
 0x11a   : > { %931 = vmatprep.mubr.bf16.mxu0 %v16074_v62 }
 0x11f   : > { %1319 = vmatmul.mubr.bf16.gmra.mrb[4].mxu1 %v16068_v60 }
 0x120   : > { %1328 = vmatprep.mubr.bf16.mxu1 %v16074_v62 }
 0x121   : > { %932 = vmatmul.mubr.bf16.gmra.mrb[8].mxu0 %v16077_v2 }
 0x122   : > { %941 = vmatprep.mubr.bf16.mxu0 %v16083_v4 }
 0x127   : > { %1329 = vmatmul.mubr.bf16.gmra.mrb[8].mxu1 %v16077_v2 }
 0x128   : > { %1338 = vmatprep.mubr.bf16.mxu1 %v16083_v4 }
 0x129   : > { %942 = vmatmul.mubr.bf16.gmra.mrb[12].mxu0 %v16086_v7 }
 0x12a   : > { %951 = vmatprep.mubr.bf16.mxu0 %v16092_v8 }
 0x12f   : > { %1339 = vmatmul.mubr.bf16.gmra.mrb[12].mxu1 %v16086_v7 }
 0x130   : > { %1348 = vmatprep.mubr.bf16.mxu1 %v16092_v8 }
 0x131   : > { %952 = vmatmul.mubr.bf16.gmra.mrb[16].mxu0 %v16095_v9 }
 0x132   : > { %961 = vmatprep.mubr.bf16.mxu0 %v16101_v10 }
 0x137   : > { %1349 = vmatmul.mubr.bf16.gmra.mrb[16].mxu1 %v16095_v9 }
 0x138   : > { %1358 = vmatprep.mubr.bf16.mxu1 %v16101_v10 }
 0x139   : > { %962 = vmatmul.mubr.bf16.gmra.mrb[20].mxu0 %v16104_v11 }
 0x13a   : > { %971 = vmatprep.mubr.bf16.mxu0 %v16110_v12 }
 0x13f   : > { %1359 = vmatmul.mubr.bf16.gmra.mrb[20].mxu1 %v16104_v11 }
 0x140   : > { %1368 = vmatprep.mubr.bf16.mxu1 %v16110_v12 }
 0x141   : > { %972 = vmatmul.mubr.bf16.gmra.mrb[24].mxu0 %v16113_v13 }
 0x142   : > { %981 = vmatprep.mubr.bf16.mxu0 %v16119_v14 }
 0x147   : > { %1369 = vmatmul.mubr.bf16.gmra.mrb[24].mxu1 %v16113_v13 }
 0x148   : > { %1378 = vmatprep.mubr.bf16.mxu1 %v16119_v14 }
 0x149   : > { %982 = vmatmul.mubr.bf16.gmra.mrb[28].mxu0 %v16122_v15 }
 0x14a   : > { %991 = vmatprep.mubr.bf16.mxu0 %v16128_v16 }
 0x14f   : > { %1379 = vmatmul.mubr.bf16.gmra.mrb[28].mxu1 %v16122_v15 }
 0x150   : > { %1388 = vmatprep.mubr.bf16.mxu1 %v16128_v16 }
 0x151   : > { %992 = vmatmul.mubr.bf16.gmra.mrb[32].mxu0 %v16131_v17 }
 0x152   : > { %1001 = vmatprep.mubr.bf16.mxu0 %v16132_v18 }
 0x157   : > { %1389 = vmatmul.mubr.bf16.gmra.mrb[32].mxu1 %v16131_v17 }
 0x158   : > { %1398 = vmatprep.mubr.bf16.mxu1 %v16132_v18 }
 0x159   : > { %1002 = vmatmul.mubr.bf16.gmra.mrb[36].mxu0 %v16134_v19 }
 0x15a   : > { %1011 = vmatprep.mubr.bf16.mxu0 %v16135_v20 }
 0x15f   : > { %1399 = vmatmul.mubr.bf16.gmra.mrb[36].mxu1 %v16134_v19 }
 0x160   : > { %1408 = vmatprep.mubr.bf16.mxu1 %v16135_v20 }
 0x161   : > { %1012 = vmatmul.mubr.bf16.gmra.mrb[40].mxu0 %v16137_v21 }
 0x162   : > { %1021 = vmatprep.mubr.bf16.mxu0 %v16138_v22 }
 0x167   : > { %1409 = vmatmul.mubr.bf16.gmra.mrb[40].mxu1 %v16137_v21 }
 0x168   : > { %1418 = vmatprep.mubr.bf16.mxu1 %v16138_v22 }
 0x169   : > { %1022 = vmatmul.mubr.bf16.gmra.mrb[44].mxu0 %v16140_v23 }
 0x16a   : > { %1031 = vmatprep.mubr.bf16.mxu0 %v16141_v24 }
 0x16f   : > { %1419 = vmatmul.mubr.bf16.gmra.mrb[44].mxu1 %v16140_v23 }
 0x170   : > { %1428 = vmatprep.mubr.bf16.mxu1 %v16141_v24 }
 0x171   : > { %1032 = vmatmul.mubr.bf16.gmra.mrb[48].mxu0 %v16143_v25 }
 0x172   : > { %1041 = vmatprep.mubr.bf16.mxu0 %v16144_v26 }
 0x177   : > { %1429 = vmatmul.mubr.bf16.gmra.mrb[48].mxu1 %v16143_v25 }
 0x178   : > { %1438 = vmatprep.mubr.bf16.mxu1 %v16144_v26 }
 0x179   : > { %1042 = vmatmul.mubr.bf16.gmra.mrb[52].mxu0 %v16146_v27 }
 0x17a   : > { %1051 = vmatprep.mubr.bf16.mxu0 %v16147_v28 }
 0x17f   : > { %1439 = vmatmul.mubr.bf16.gmra.mrb[52].mxu1 %v16146_v27 }
 0x180   : > { %1448 = vmatprep.mubr.bf16.mxu1 %v16147_v28 }
 0x181   : > { %1052 = vmatmul.mubr.bf16.gmra.mrb[56].mxu0 %v16149_v29 }
 0x182   : > { %1061 = vmatprep.mubr.bf16.mxu0 %v16150_v30 }
 0x187   : > { %1449 = vmatmul.mubr.bf16.gmra.mrb[56].mxu1 %v16149_v29 }
 0x188   : > { %1458 = vmatprep.mubr.bf16.mxu1 %v16150_v30 }
 0x189   : > { %1062 = vmatmul.mubr.bf16.gmra.mrb[60].mxu0 %v16152_v31 }
 0x18f   : > { %1459 = vmatmul.mubr.bf16.gmra.mrb[60].mxu1 %v16152_v31 }
 0x1e4   : > { %v913_v45 = vpop.f32.mrb[0].mxu0 }
 0x1e5   : > { %v914_v47 = vadd.f32 %v913_v45, %v17176_v42  ;;  %v915_v48 = vpop.f32.mrb[1].mxu0 }
 0x1e6   : > { %v916_v49 = vadd.f32 %v915_v48, %v17180_v43  ;;  %v917_v50 = vpop.f32.mrb[2].mxu0 }
 0x1e7   : > { %v1548_v52 = vcombine.high %v914_v47, %v22374_v51  ;;  %v1555_v53 = vrot.slane %v914_v47, %v17183_v44  ;;  %v918_v54 = vadd.f32 %v917_v50, %v17176_v42  ;;  %v919_v55 = vpop.f32.mrb[3].mxu0 }
 0x1e8   : > { %v1563_v56 = vcombine.high %v916_v49, %v22374_v51  ;;  %v1570_v57 = vrot.slane %v916_v49, %v17183_v44  ;;  %v920_v59 = vadd.f32 %v919_v55, %v17180_v43 }
 0x1e9   : > { %v1562_v60 = vrot.slane %v1548_v52, %v17183_v44  ;;  %v1614_v61 = vcombine.high %v918_v54, %v22374_v51  ;;  %v1621_v62 = vrot.slane %v918_v54, %v17183_v44 }
 0x1ea   : > { %v1577_v63 = vrot.slane %v1563_v56, %v17183_v44  ;;  %v1578_v0 = vcombine.low %v1555_v53, %v1570_v57  ;;  %v1579_v1 = vcombine.high %v1555_v53, %v1570_v57  ;;  %v1629_v2 = vcombine.high %v920_v59, %v22374_v51 }
 0x1eb   : > { %v1628_v3 = vrot.slane %v1614_v61, %v17183_v44  ;;  %v1636_v4 = vrot.slane %v920_v59, %v17183_v44 }
 0x1ec   : > { %v17204_v5 = vrot.slane %v1578_v0, %v17193_v58  ;;  %v17207_v6 = vrot.slane %v1579_v1, %v17193_v58  ;;  %v1594_v7 = vcombine.low %v1562_v60, %v1577_v63  ;;  %v1595_v8 = vcombine.high %v1562_v60, %v1577_v63  ;;  %v923_v9 = vpop.f32.mrb[4].mxu0 }
 0x1ed   : > { %v1643_v10 = vrot.slane %v1629_v2, %v17183_v44  ;;  %v1644_v11 = vcombine.low %v1621_v62, %v1636_v4  ;;  %v1645_v12 = vcombine.high %v1621_v62, %v1636_v4  ;;  %v924_v13 = vadd.f32 %v923_v9, %v17176_v42  ;;  %v925_v14 = vpop.f32.mrb[5].mxu0 }
 0x1ee   : > { %v17212_v15 = vrot.slane %v1594_v7, %v17193_v58  ;;  %v17215_v16 = vrot.slane %v1595_v8, %v17193_v58  ;;  %v3660_v17 = vcombine.low %v17204_v5, %v17207_v6  ;;  %v15186_v18 = vcombine.high %v17204_v5, %v17207_v6  ;;  %v927_v19 = vpop.f32.mrb[6].mxu0 }
 0x1ef   : > { %v17222_v20 = vrot.slane %v1644_v11, %v17193_v58  ;;  %v17225_v21 = vrot.slane %v1645_v12, %v17193_v58  ;;  %v1660_v22 = vcombine.low %v1628_v3, %v1643_v10  ;;  %v1661_v23 = vcombine.high %v1628_v3, %v1643_v10  ;;  %v929_v24 = vpop.f32.mrb[7].mxu0 }
 0x1f0   : > { %v1680_v25 = vcombine.high %v924_v13, %v22374_v51  ;;  %v1687_v26 = vrot.slane %v924_v13, %v17183_v44  ;;  %v926_v27 = vadd.f32 %v925_v14, %v17180_v43  ;;  %v928_v28 = vadd.f32 %v927_v19, %v17176_v42 }
 0x1f1   : > { %v17232_v29 = vrot.slane %v1660_v22, %v17193_v58  ;;  %v17235_v30 = vrot.slane %v1661_v23, %v17193_v58  ;;  %v930_v46 = vadd.f32 %v929_v24, %v17180_v43  ;;  %v17257_v57 = vrot.slane %v3660_v17, %v17183_v44 }
 0x1f2   : > { %v1694_v34 = vrot.slane %v1680_v25, %v17183_v44  ;;  %v1695_v35 = vcombine.high %v926_v27, %v22374_v51  ;;  %v1702_v37 = vrot.slane %v926_v27, %v17183_v44  ;;  %v1746_v39 = vcombine.high %v928_v28, %v22374_v51 }
 0x1f3   : > { %v1753_v45 = vrot.slane %v928_v28, %v17183_v44  ;;  %v1761_v53 = vcombine.high %v930_v46, %v22374_v51  ;;  %v1768_v54 = vrot.slane %v930_v46, %v17183_v44 }
 0x1f4   : > { %v1709_v47 = vrot.slane %v1695_v35, %v17183_v44  ;;  %v1710_v48 = vcombine.low %v1687_v26, %v1702_v37  ;;  %v1711_v49 = vcombine.high %v1687_v26, %v1702_v37  ;;  %v1760_v50 = vrot.slane %v1746_v39, %v17183_v44  ;;  %v933_v52 = vpop.f32.mrb[8].mxu0 }
 0x1f5   : > { %v934_v55 = vadd.f32 %v933_v52, %v17176_v42  ;;  %v935_v56 = vpop.f32.mrb[9].mxu0  ;;  %v1775_v0 = vrot.slane %v1761_v53, %v17183_v44  ;;  %v1776_v1 = vcombine.low %v1753_v45, %v1768_v54  ;;  %v1777_v2 = vcombine.high %v1753_v45, %v1768_v54 }
 0x1f6   : > { %v17260_v59 = vrot.slane %v1710_v48, %v17193_v58  ;;  %v17263_v60 = vrot.slane %v1711_v49, %v17193_v58  ;;  %v1726_v61 = vcombine.low %v1694_v34, %v1709_v47  ;;  %v1727_v62 = vcombine.high %v1694_v34, %v1709_v47  ;;  %v937_v63 = vpop.f32.mrb[10].mxu0 }
 0x1f7   : > { %v1812_v3 = vcombine.high %v934_v55, %v22374_v51  ;;  %v939_v4 = vpop.f32.mrb[11].mxu0  ;;  %v17278_v11 = vrot.slane %v1776_v1, %v17193_v58  ;;  %v17281_v12 = vrot.slane %v1777_v2, %v17193_v58  ;;  %v1792_v13 = vcombine.low %v1760_v50, %v1775_v0 }
 0x1f8   : > { %v17268_v7 = vrot.slane %v1726_v61, %v17193_v58  ;;  %v17271_v8 = vrot.slane %v1727_v62, %v17193_v58  ;;  %v1793_v14 = vcombine.high %v1760_v50, %v1775_v0  ;;  %v1819_v22 = vrot.slane %v934_v55, %v17183_v44 }
 0x1f9   : > { %v1826_v23 = vrot.slane %v1812_v3, %v17183_v44  ;;  %v17290_v24 = vrot.slane %v1792_v13, %v17193_v58  ;;  %v936_v28 = vadd.f32 %v935_v56, %v17180_v43  ;;  %v938_v34 = vadd.f32 %v937_v63, %v17176_v42 }
 0x1fa   : > { %v17293_v25 = vrot.slane %v1793_v14, %v17193_v58  ;;  %v940_v35 = vadd.f32 %v939_v4, %v17180_v43  ;;  %v17306_v39 = vrot.slane %v15186_v18, %v17183_v44 }
 0x1fb   : > { %v1827_v50 = vcombine.high %v936_v28, %v22374_v51  ;;  %v1834_v52 = vrot.slane %v936_v28, %v17183_v44  ;;  %v1878_v5 = vcombine.high %v938_v34, %v22374_v51  ;;  %v1885_v6 = vrot.slane %v938_v34, %v17183_v44 }
 0x1fc   : > { %v943_v37 = vpop.f32.mrb[12].mxu0  ;;  %v1893_v53 = vcombine.high %v940_v35, %v22374_v51  ;;  %v1900_v54 = vrot.slane %v940_v35, %v17183_v44 }
 0x1fd   : > { %v944_v47 = vadd.f32 %v943_v37, %v17176_v42  ;;  %v945_v48 = vpop.f32.mrb[13].mxu0  ;;  %v1841_v62 = vrot.slane %v1827_v50, %v17183_v44  ;;  %v1842_v63 = vcombine.low %v1819_v22, %v1834_v52  ;;  %v1843_v0 = vcombine.high %v1819_v22, %v1834_v52 }
 0x1fe   : > { %v947_v18 = vpop.f32.mrb[14].mxu0  ;;  %v1892_v1 = vrot.slane %v1878_v5, %v17183_v44  ;;  %v1907_v2 = vrot.slane %v1893_v53, %v17183_v44  ;;  %v1908_v3 = vcombine.low %v1885_v6, %v1900_v54  ;;  %v1909_v4 = vcombine.high %v1885_v6, %v1900_v54 }
 0x1ff   : > { %v1944_v55 = vcombine.high %v944_v47, %v22374_v51  ;;  %v1951_v56 = vrot.slane %v944_v47, %v17183_v44  ;;  %v949_v61 = vpop.f32.mrb[15].mxu0  ;;  %v17328_v14 = vrot.slane %v1842_v63, %v17193_v58  ;;  %v17331_v28 = vrot.slane %v1843_v0, %v17193_v58 }
 0x200   : > { %v1858_v34 = vcombine.low %v1826_v23, %v1841_v62  ;;  %v1859_v35 = vcombine.high %v1826_v23, %v1841_v62  ;;  %v17334_v37 = vrot.slane %v1908_v3, %v17193_v58  ;;  %v17337_v22 = vrot.slane %v1909_v4, %v17193_v58 }
 0x201   : > { %v1958_v13 = vrot.slane %v1944_v55, %v17183_v44  ;;  %22538 = vst [vmem:[#allocation25_spill] sm:$0xff] %v17328_v14  ;;  %22539 = vst [vmem:[#allocation26_spill] sm:$0xff] %v17331_v28  ;;  %v1924_v47 = vcombine.low %v1892_v1, %v1907_v2  ;;  %v1925_v50 = vcombine.high %v1892_v1, %v1907_v2 }
 0x202   : > { %22540 = vst [vmem:[#allocation27_spill] sm:$0xff] %v17334_v37  ;;  %22541 = vst [vmem:[#allocation28_spill] sm:$0xff] %v17337_v22  ;;  %v17340_v52 = vrot.slane %v1858_v34, %v17193_v58  ;;  %v17343_v5 = vrot.slane %v1859_v35, %v17193_v58  ;;  %v946_v3 = vadd.f32 %v945_v48, %v17180_v43  ;;  %v17768_v37 = vpop.f32.mrb[0].mxu1 }
 0x203   : > { %v17350_v54 = vrot.slane %v1924_v47, %v17193_v58  ;;  %v17353_v55 = vrot.slane %v1925_v50, %v17193_v58  ;;  %v948_v4 = vadd.f32 %v947_v18, %v17176_v42  ;;  %v950_v50 = vadd.f32 %v949_v61, %v17180_v43  ;;  %22587 = vst [vmem:[#allocation73_spill] sm:$0xff] %v17768_v37 }
 0x204   : > { %22542 = vst [vmem:[#allocation29_spill] sm:$0xff] %v17340_v52  ;;  %22543 = vst [vmem:[#allocation30_spill] sm:$0xff] %v17343_v5  ;;  %v953_v53 = vpop.f32.mrb[16].mxu0  ;;  %v1959_v63 = vcombine.high %v946_v3, %v22374_v51  ;;  %v1966_v62 = vrot.slane %v946_v3, %v17183_v44 }
 0x205   : > { %22544 = vst [vmem:[#allocation31_spill] sm:$0xff] %v17350_v54  ;;  %22545 = vst [vmem:[#allocation32_spill] sm:$0xff] %v17353_v55  ;;  %v955_v0 = vpop.f32.mrb[17].mxu0  ;;  %v954_v38 = vadd.f32 %v953_v53, %v17176_v42  ;;  %v2010_v48 = vcombine.high %v948_v4, %v22374_v51  ;;  %v2017_v18 = vrot.slane %v948_v4, %v17183_v44 }
 0x206   : > { %v957_v34 = vpop.f32.mrb[18].mxu0  ;;  %v2025_v2 = vcombine.high %v950_v50, %v22374_v51  ;;  %v2032_v35 = vrot.slane %v950_v50, %v17183_v44  ;;  %v1973_v61 = vrot.slane %v1959_v63, %v17183_v44  ;;  %v1974_v53 = vcombine.low %v1951_v56, %v1966_v62 }
 0x207   : > { %v959_v36 = vpop.f32.mrb[19].mxu0  ;;  %v2076_v1 = vcombine.high %v954_v38, %v22374_v51  ;;  %v2083_v47 = vrot.slane %v954_v38, %v17183_v44  ;;  %v1975_v23 = vcombine.high %v1951_v56, %v1966_v62  ;;  %v2024_v6 = vrot.slane %v2010_v48, %v17183_v44 }
 0x208   : > { %v2039_v3 = vrot.slane %v2025_v2, %v17183_v44  ;;  %v2040_v46 = vcombine.low %v2017_v18, %v2032_v35  ;;  %v2041_v45 = vcombine.high %v2017_v18, %v2032_v35  ;;  %v17384_v27 = vrot.slane %v1974_v53, %v17193_v58 }
 0x209   : > { %v2090_v4 = vrot.slane %v2076_v1, %v17183_v44  ;;  %v17387_v50 = vrot.slane %v1975_v23, %v17193_v58  ;;  %v1990_v26 = vcombine.low %v1958_v13, %v1973_v61  ;;  %v1991_v38 = vcombine.high %v1958_v13, %v1973_v61 }
 0x20a   : > { %22546 = vst [vmem:[#allocation33_spill] sm:$0xff] %v17384_v27  ;;  %v17390_v63 = vrot.slane %v2040_v46, %v17193_v58  ;;  %v17393_v56 = vrot.slane %v2041_v45, %v17193_v58  ;;  %v2056_v62 = vcombine.low %v2024_v6, %v2039_v3  ;;  %v2057_v2 = vcombine.high %v2024_v6, %v2039_v3 }
 0x20b   : > { %22547 = vst [vmem:[#allocation34_spill] sm:$0xff] %v17387_v50  ;;  %v17396_v1 = vrot.slane %v1990_v26, %v17193_v58  ;;  %v17399_v48 = vrot.slane %v1991_v38, %v17193_v58  ;;  %v956_v38 = vadd.f32 %v955_v0, %v17180_v43  ;;  %v960_v13 = vadd.f32 %v959_v36, %v17180_v43 }
 0x20c   : > { %v963_v19 = vpop.f32.mrb[20].mxu0  ;;  %22548 = vst [vmem:[#allocation35_spill] sm:$0xff] %v17390_v63  ;;  %22549 = vst [vmem:[#allocation36_spill] sm:$0xff] %v17393_v56  ;;  %v17406_v18 = vrot.slane %v2056_v62, %v17193_v58  ;;  %v17409_v45 = vrot.slane %v2057_v2, %v17193_v58  ;;  %v958_v62 = vadd.f32 %v957_v34, %v17176_v42 }
 0x20d   : > { %v965_v35 = vpop.f32.mrb[21].mxu0  ;;  %22550 = vst [vmem:[#allocation37_spill] sm:$0xff] %v17396_v1  ;;  %22551 = vst [vmem:[#allocation38_spill] sm:$0xff] %v17399_v48  ;;  %v964_v6 = vadd.f32 %v963_v19, %v17176_v42  ;;  %v2091_v23 = vcombine.high %v956_v38, %v22374_v51  ;;  %v2098_v53 = vrot.slane %v956_v38, %v17183_v44 }
 0x20e   : > { %v967_v46 = vpop.f32.mrb[22].mxu0  ;;  %22552 = vst [vmem:[#allocation39_spill] sm:$0xff] %v17406_v18  ;;  %22553 = vst [vmem:[#allocation40_spill] sm:$0xff] %v17409_v45  ;;  %v2142_v3 = vcombine.high %v958_v62, %v22374_v51  ;;  %v2149_v0 = vrot.slane %v958_v62, %v17183_v44  ;;  %v2157_v34 = vcombine.high %v960_v13, %v22374_v51 }
 0x20f   : > { %v969_v61 = vpop.f32.mrb[23].mxu0  ;;  %v2164_v17 = vrot.slane %v960_v13, %v17183_v44  ;;  %v2208_v2 = vcombine.high %v964_v6, %v22374_v51  ;;  %v2215_v26 = vrot.slane %v964_v6, %v17183_v44  ;;  %v2105_v36 = vrot.slane %v2091_v23, %v17183_v44 }
 0x210   : > { %v2106_v10 = vcombine.low %v2083_v47, %v2098_v53  ;;  %v2107_v19 = vcombine.high %v2083_v47, %v2098_v53  ;;  %v2156_v9 = vrot.slane %v2142_v3, %v17183_v44  ;;  %v2171_v38 = vrot.slane %v2157_v34, %v17183_v44 }
 0x211   : > { %v2172_v40 = vcombine.low %v2149_v0, %v2164_v17  ;;  %v2173_v32 = vcombine.high %v2149_v0, %v2164_v17  ;;  %v2222_v62 = vrot.slane %v2208_v2, %v17183_v44  ;;  %v2122_v23 = vcombine.low %v2090_v4, %v2105_v36 }
 0x212   : > { %v17442_v13 = vrot.slane %v2106_v10, %v17193_v58  ;;  %v17445_v6 = vrot.slane %v2107_v19, %v17193_v58  ;;  %v2123_v49 = vcombine.high %v2090_v4, %v2105_v36  ;;  %v2188_v17 = vcombine.low %v2156_v9, %v2171_v38 }
 0x213   : > { %v17448_v53 = vrot.slane %v2172_v40, %v17193_v58  ;;  %v17451_v3 = vrot.slane %v2173_v32, %v17193_v58  ;;  %v2189_v0 = vcombine.high %v2156_v9, %v2171_v38  ;;  %v17454_v34 = vrot.slane %v2122_v23, %v17193_v58 }
 0x214   : > { %v973_v41 = vpop.f32.mrb[24].mxu0  ;;  %22554 = vst [vmem:[#allocation41_spill] sm:$0xff] %v17442_v13  ;;  %22555 = vst [vmem:[#allocation42_spill] sm:$0xff] %v17445_v6  ;;  %v17457_v10 = vrot.slane %v2123_v49, %v17193_v58  ;;  %v17464_v40 = vrot.slane %v2188_v17, %v17193_v58  ;;  %v966_v23 = vadd.f32 %v965_v35, %v17180_v43 }
 0x215   : > { %v17439_v31 = vpop.f32.mrb[25].mxu0  ;;  %22556 = vst [vmem:[#allocation43_spill] sm:$0xff] %v17448_v53  ;;  %22557 = vst [vmem:[#allocation44_spill] sm:$0xff] %v17451_v3  ;;  %v17467_v32 = vrot.slane %v2189_v0, %v17193_v58  ;;  %v968_v17 = vadd.f32 %v967_v46, %v17176_v42  ;;  %v970_v9 = vadd.f32 %v969_v61, %v17180_v43 }
 0x216   : > { %v977_v47 = vpop.f32.mrb[26].mxu0  ;;  %22558 = vst [vmem:[#allocation45_spill] sm:$0xff] %v17454_v34  ;;  %22559 = vst [vmem:[#allocation46_spill] sm:$0xff] %v17457_v10  ;;  %v974_v36 = vadd.f32 %v973_v41, %v17176_v42  ;;  %v2223_v19 = vcombine.high %v966_v23, %v22374_v51  ;;  %v2230_v49 = vrot.slane %v966_v23, %v17183_v44 }
 0x217   : > { %v979_v2 = vpop.f32.mrb[27].mxu0  ;;  %22560 = vst [vmem:[#allocation47_spill] sm:$0xff] %v17464_v40  ;;  %22561 = vst [vmem:[#allocation48_spill] sm:$0xff] %v17467_v32  ;;  %v2274_v38 = vcombine.high %v968_v17, %v22374_v51  ;;  %v2281_v35 = vrot.slane %v968_v17, %v17183_v44  ;;  %v2289_v46 = vcombine.high %v970_v9, %v22374_v51 }
 0x218   : > { %v2296_v0 = vrot.slane %v970_v9, %v17183_v44  ;;  %v2340_v3 = vcombine.high %v974_v36, %v22374_v51  ;;  %v2347_v4 = vrot.slane %v974_v36, %v17183_v44  ;;  %v2237_v41 = vrot.slane %v2223_v19, %v17183_v44 }
 0x219   : > { %v2238_v32 = vcombine.low %v2215_v26, %v2230_v49  ;;  %v2239_v40 = vcombine.high %v2215_v26, %v2230_v49  ;;  %v2288_v23 = vrot.slane %v2274_v38, %v17183_v44  ;;  %v2303_v17 = vrot.slane %v2289_v46, %v17183_v44 }
 0x21a   : > { %v2304_v10 = vcombine.low %v2281_v35, %v2296_v0  ;;  %v2305_v34 = vcombine.high %v2281_v35, %v2296_v0  ;;  %v2354_v9 = vrot.slane %v2340_v3, %v17183_v44  ;;  %v2254_v19 = vcombine.low %v2222_v62, %v2237_v41 }
 0x21b   : > { %v17504_v36 = vrot.slane %v2238_v32, %v17193_v58  ;;  %v17507_v51 = vrot.slane %v2239_v40, %v17193_v58  ;;  %v2255_v26 = vcombine.high %v2222_v62, %v2237_v41  ;;  %v2320_v46 = vcombine.low %v2288_v23, %v2303_v17 }
 0x21c   : > { %v983_v33 = vpop.f32.mrb[28].mxu0  ;;  %v17510_v49 = vrot.slane %v2304_v10, %v17193_v58  ;;  %v17513_v38 = vrot.slane %v2305_v34, %v17193_v58  ;;  %v2321_v0 = vcombine.high %v2288_v23, %v2303_v17  ;;  %v17516_v3 = vrot.slane %v2254_v19, %v17193_v58 }
 0x21d   : > { %v17493_v61 = vpop.f32.mrb[29].mxu0  ;;  %22562 = vst [vmem:[#allocation49_spill] sm:$0xff] %v17504_v36  ;;  %22563 = vst [vmem:[#allocation50_spill] sm:$0xff] %v17507_v51  ;;  %v17519_v35 = vrot.slane %v2255_v26, %v17193_v58  ;;  %v17526_v10 = vrot.slane %v2320_v46, %v17193_v58  ;;  %v976_v19 = vadd.f32 %v17439_v31, %v17180_v43  ;;  %v22570_v40 = vmov 0.0  }
 0x21e   : > { %v17497_v53 = vpop.f32.mrb[30].mxu0  ;;  %22564 = vst [vmem:[#allocation51_spill] sm:$0xff] %v17510_v49  ;;  %22565 = vst [vmem:[#allocation52_spill] sm:$0xff] %v17513_v38  ;;  %v17529_v34 = vrot.slane %v2321_v0, %v17193_v58  ;;  %v978_v26 = vadd.f32 %v977_v47, %v17176_v42  ;;  %v980_v41 = vadd.f32 %v979_v2, %v17180_v43 }
 0x21f   : > { %v17501_v6 = vpop.f32.mrb[31].mxu0  ;;  %22566 = vst [vmem:[#allocation53_spill] sm:$0xff] %v17516_v3  ;;  %22567 = vst [vmem:[#allocation54_spill] sm:$0xff] %v17519_v35  ;;  %v984_v62 = vadd.f32 %v983_v33, %v17176_v42  ;;  %v2355_v17 = vcombine.high %v976_v19, %v22570_v40  ;;  %v2362_v38 = vrot.slane %v976_v19, %v17183_v44 }
 0x220   : > { %22568 = vst [vmem:[#allocation55_spill] sm:$0xff] %v17526_v10  ;;  %22569 = vst [vmem:[#allocation56_spill] sm:$0xff] %v17529_v34  ;;  %v2406_v31 = vcombine.high %v978_v26, %v22570_v40  ;;  %v2413_v47 = vrot.slane %v978_v26, %v17183_v44  ;;  %v2421_v0 = vcombine.high %v980_v41, %v22570_v40 }
 0x221   : > { %v2428_v32 = vrot.slane %v980_v41, %v17183_v44  ;;  %v2472_v2 = vcombine.high %v984_v62, %v22570_v40  ;;  %v2479_v33 = vrot.slane %v984_v62, %v17183_v44  ;;  %v2369_v10 = vrot.slane %v2355_v17, %v17183_v44 }
 0x222   : > { %v2370_v35 = vcombine.low %v2347_v4, %v2362_v38  ;;  %v2371_v19 = vcombine.high %v2347_v4, %v2362_v38  ;;  %v2420_v3 = vrot.slane %v2406_v31, %v17183_v44  ;;  %v2435_v26 = vrot.slane %v2421_v0, %v17183_v44 }
 0x223   : > { %v2436_v51 = vcombine.low %v2413_v47, %v2428_v32  ;;  %v2437_v36 = vcombine.high %v2413_v47, %v2428_v32  ;;  %v2486_v13 = vrot.slane %v2472_v2, %v17183_v44  ;;  %v2386_v62 = vcombine.low %v2354_v9, %v2369_v10 }
 0x224   : > { %v993_v46 = vpop.f32.mrb[32].mxu0  ;;  %v17567_v41 = vrot.slane %v2370_v35, %v17193_v58  ;;  %v17570_v45 = vrot.slane %v2371_v19, %v17193_v58  ;;  %v2387_v18 = vcombine.high %v2354_v9, %v2369_v10  ;;  %v2452_v38 = vcombine.low %v2420_v3, %v2435_v26 }
 0x225   : > { %v17548_v23 = vpop.f32.mrb[33].mxu0  ;;  %v17573_v17 = vrot.slane %v2436_v51, %v17193_v58  ;;  %v17576_v4 = vrot.slane %v2437_v36, %v17193_v58  ;;  %v2453_v0 = vcombine.high %v2420_v3, %v2435_v26  ;;  %v17579_v32 = vrot.slane %v2386_v62, %v17193_v58 }
 0x226   : > { %v17554_v49 = vpop.f32.mrb[34].mxu0  ;;  %22571 = vst [vmem:[#allocation57_spill] sm:$0xff] %v17567_v41  ;;  %22572 = vst [vmem:[#allocation58_spill] sm:$0xff] %v17570_v45  ;;  %v17582_v31 = vrot.slane %v2387_v18, %v17193_v58  ;;  %v17589_v51 = vrot.slane %v2452_v38, %v17193_v58  ;;  %v986_v26 = vadd.f32 %v17493_v61, %v17180_v43 }
 0x227   : > { %v17560_v34 = vpop.f32.mrb[35].mxu0  ;;  %22573 = vst [vmem:[#allocation59_spill] sm:$0xff] %v17573_v17  ;;  %22574 = vst [vmem:[#allocation60_spill] sm:$0xff] %v17576_v4  ;;  %v17592_v36 = vrot.slane %v2453_v0, %v17193_v58  ;;  %v988_v62 = vadd.f32 %v17497_v53, %v17176_v42  ;;  %v990_v3 = vadd.f32 %v17501_v6, %v17180_v43 }
 0x228   : > { %22575 = vst [vmem:[#allocation61_spill] sm:$0xff] %v17579_v32  ;;  %22576 = vst [vmem:[#allocation62_spill] sm:$0xff] %v17582_v31  ;;  %v994_v2 = vadd.f32 %v993_v46, %v17176_v42  ;;  %v2487_v61 = vcombine.high %v986_v26, %v22570_v40  ;;  %v2494_v9 = vrot.slane %v986_v26, %v17183_v44 }
 0x229   : > { %22577 = vst [vmem:[#allocation63_spill] sm:$0xff] %v17589_v51  ;;  %22578 = vst [vmem:[#allocation64_spill] sm:$0xff] %v17592_v36  ;;  %v2538_v53 = vcombine.high %v988_v62, %v22570_v40  ;;  %v2545_v35 = vrot.slane %v988_v62, %v17183_v44  ;;  %v2553_v0 = vcombine.high %v990_v3, %v22570_v40 }
 0x22a   : > { %v2560_v4 = vrot.slane %v990_v3, %v17183_v44  ;;  %v2604_v18 = vcombine.high %v994_v2, %v22570_v40  ;;  %v2611_v6 = vrot.slane %v994_v2, %v17183_v44  ;;  %v2501_v46 = vrot.slane %v2487_v61, %v17183_v44 }
 0x22b   : > { %v2502_v36 = vcombine.low %v2479_v33, %v2494_v9  ;;  %v2503_v51 = vcombine.high %v2479_v33, %v2494_v9  ;;  %v2552_v17 = vrot.slane %v2538_v53, %v17183_v44  ;;  %v2567_v26 = vrot.slane %v2553_v0, %v17183_v44 }
 0x22c   : > { %v1003_v10 = vpop.f32.mrb[36].mxu0  ;;  %v2568_v31 = vcombine.low %v2545_v35, %v2560_v4  ;;  %v2569_v32 = vcombine.high %v2545_v35, %v2560_v4  ;;  %v2618_v62 = vrot.slane %v2604_v18, %v17183_v44  ;;  %v2518_v41 = vcombine.low %v2486_v13, %v2501_v46 }
 0x22d   : > { %v17598_v47 = vpop.f32.mrb[37].mxu0  ;;  %v17632_v45 = vrot.slane %v2502_v36, %v17193_v58  ;;  %v17635_v3 = vrot.slane %v2503_v51, %v17193_v58  ;;  %v2519_v2 = vcombine.high %v2486_v13, %v2501_v46  ;;  %v2584_v0 = vcombine.low %v2552_v17, %v2567_v26 }
 0x22e   : > { %v17608_v38 = vpop.f32.mrb[38].mxu0  ;;  %v17640_v33 = vrot.slane %v2568_v31, %v17193_v58  ;;  %v17643_v9 = vrot.slane %v2569_v32, %v17193_v58  ;;  %v2585_v4 = vcombine.high %v2552_v17, %v2567_v26  ;;  %v17646_v18 = vrot.slane %v2518_v41, %v17193_v58 }
 0x22f   : > { %v17617_v19 = vpop.f32.mrb[39].mxu0  ;;  %22579 = vst [vmem:[#allocation65_spill] sm:$0xff] %v17632_v45  ;;  %22580 = vst [vmem:[#allocation66_spill] sm:$0xff] %v17635_v3  ;;  %v17649_v36 = vrot.slane %v2519_v2, %v17193_v58  ;;  %v17656_v61 = vrot.slane %v2584_v0, %v17193_v58  ;;  %v996_v2 = vadd.f32 %v17548_v23, %v17180_v43 }
 0x230   : > { %22581 = vst [vmem:[#allocation67_spill] sm:$0xff] %v17640_v33  ;;  %22582 = vst [vmem:[#allocation68_spill] sm:$0xff] %v17643_v9  ;;  %v17659_v32 = vrot.slane %v2585_v4, %v17193_v58  ;;  %v998_v0 = vadd.f32 %v17554_v49, %v17176_v42  ;;  %v1000_v41 = vadd.f32 %v17560_v34, %v17180_v43 }
 0x231   : > { %22583 = vst [vmem:[#allocation69_spill] sm:$0xff] %v17646_v18  ;;  %22584 = vst [vmem:[#allocation70_spill] sm:$0xff] %v17649_v36  ;;  %v1004_v46 = vadd.f32 %v1003_v10, %v17176_v42  ;;  %v2619_v51 = vcombine.high %v996_v2, %v22570_v40  ;;  %v2626_v26 = vrot.slane %v996_v2, %v17183_v44 }
 0x232   : > { %22585 = vst [vmem:[#allocation71_spill] sm:$0xff] %v17656_v61  ;;  %22586 = vst [vmem:[#allocation72_spill] sm:$0xff] %v17659_v32  ;;  %v2670_v23 = vcombine.high %v998_v0, %v22570_v40  ;;  %v2677_v13 = vrot.slane %v998_v0, %v17183_v44  ;;  %v2685_v49 = vcombine.high %v1000_v41, %v22570_v40 }
 0x233   : > { %v2692_v4 = vrot.slane %v1000_v41, %v17183_v44  ;;  %v2736_v9 = vcombine.high %v1004_v46, %v22570_v40  ;;  %v2743_v17 = vrot.slane %v1004_v46, %v17183_v44  ;;  %v2633_v34 = vrot.slane %v2619_v51, %v17183_v44 }
 0x234   : > { %v17637_v56 = vpop.f32.mrb[40].mxu0  ;;  %v2634_v32 = vcombine.low %v2611_v6, %v2626_v26  ;;  %v2635_v10 = vcombine.high %v2611_v6, %v2626_v26  ;;  %v2684_v61 = vrot.slane %v2670_v23, %v17183_v44  ;;  %v2699_v2 = vrot.slane %v2685_v49, %v17183_v44 }
 0x235   : > { %v1015_v35 = vpop.f32.mrb[41].mxu0  ;;  %v2700_v36 = vcombine.low %v2677_v13, %v2692_v4  ;;  %v2701_v0 = vcombine.high %v2677_v13, %v2692_v4  ;;  %v2750_v18 = vrot.slane %v2736_v9, %v17183_v44  ;;  %v2650_v51 = vcombine.low %v2618_v62, %v2633_v34 }
 0x236   : > { %v1017_v31 = vpop.f32.mrb[42].mxu0  ;;  %v17699_v41 = vrot.slane %v2634_v32, %v17193_v58  ;;  %v17702_v46 = vrot.slane %v2635_v10, %v17193_v58  ;;  %v2651_v6 = vcombine.high %v2618_v62, %v2633_v34  ;;  %v2716_v13 = vcombine.low %v2684_v61, %v2699_v2 }
 0x237   : > { %v17665_v53 = vpop.f32.mrb[43].mxu0  ;;  %v17707_v23 = vrot.slane %v2700_v36, %v17193_v58  ;;  %v17710_v49 = vrot.slane %v2701_v0, %v17193_v58  ;;  %v2717_v9 = vcombine.high %v2684_v61, %v2699_v2  ;;  %v17715_v32 = vrot.slane %v2650_v51, %v17193_v58 }
 0x238   : > { %v17718_v10 = vrot.slane %v2651_v6, %v17193_v58  ;;  %v17725_v34 = vrot.slane %v2716_v13, %v17193_v58  ;;  %v1006_v51 = vadd.f32 %v17598_v47, %v17180_v43  ;;  %v1008_v6 = vadd.f32 %v17608_v38, %v17176_v42 }
 0x239   : > { %v17728_v0 = vrot.slane %v2717_v9, %v17193_v58  ;;  %v1010_v36 = vadd.f32 %v17617_v19, %v17180_v43  ;;  %v1014_v13 = vadd.f32 %v17637_v56, %v17176_v42  ;;  %v1016_v2 = vadd.f32 %v1015_v35, %v17180_v43 }
 0x23a   : > { %v1018_v62 = vadd.f32 %v1017_v31, %v17176_v42  ;;  %v2751_v47 = vcombine.high %v1006_v51, %v22570_v40  ;;  %v2758_v38 = vrot.slane %v1006_v51, %v17183_v44  ;;  %v2802_v45 = vcombine.high %v1008_v6, %v22570_v40 }
 0x23b   : > { %v2809_v19 = vrot.slane %v1008_v6, %v17183_v44  ;;  %v2817_v56 = vcombine.high %v1010_v36, %v22570_v40  ;;  %v2824_v9 = vrot.slane %v1010_v36, %v17183_v44  ;;  %v2868_v61 = vcombine.high %v1014_v13, %v22570_v40 }
 0x23c   : > { %v17692_v33 = vpop.f32.mrb[44].mxu0  ;;  %v2875_v35 = vrot.slane %v1014_v13, %v17183_v44  ;;  %v2765_v31 = vrot.slane %v2751_v47, %v17183_v44  ;;  %v2766_v1 = vcombine.low %v2743_v17, %v2758_v38  ;;  %v2767_v51 = vcombine.high %v2743_v17, %v2758_v38  ;;  %v17776_v38 = vpop.f32.mrb[1].mxu1 }
 0x23d   : > { %v17696_v3 = vpop.f32.mrb[45].mxu0  ;;  %v2816_v50 = vrot.slane %v2802_v45, %v17183_v44  ;;  %v2831_v6 = vrot.slane %v2817_v56, %v17183_v44  ;;  %v2832_v55 = vcombine.low %v2809_v19, %v2824_v9  ;;  %v2833_v54 = vcombine.high %v2809_v19, %v2824_v9  ;;  %22588 = vst [vmem:[#allocation74_spill] sm:$0xff] %v17776_v38 }
 0x23e   : > { %v17704_v26 = vpop.f32.mrb[46].mxu0  ;;  %v2882_v36 = vrot.slane %v2868_v61, %v17183_v44  ;;  %v17771_v13 = vrot.slane %v2766_v1, %v17193_v58  ;;  %v17774_v47 = vrot.slane %v2767_v51, %v17193_v58  ;;  %v2782_v17 = vcombine.low %v2750_v18, %v2765_v31 }
 0x23f   : > { %v17712_v4 = vpop.f32.mrb[47].mxu0  ;;  %v2783_v45 = vcombine.high %v2750_v18, %v2765_v31  ;;  %v17779_v56 = vrot.slane %v2832_v55, %v17193_v58  ;;  %v17782_v9 = vrot.slane %v2833_v54, %v17193_v58  ;;  %v2848_v61 = vcombine.low %v2816_v50, %v2831_v6 }
 0x240   : > { %v2849_v19 = vcombine.high %v2816_v50, %v2831_v6  ;;  %v17785_v37 = vrot.slane %v2782_v17, %v17193_v58  ;;  %v2934_v31 = vcombine.high %v1018_v62, %v22570_v40  ;;  %v2941_v51 = vrot.slane %v1018_v62, %v17183_v44 }
 0x241   : > { %v17788_v1 = vrot.slane %v2783_v45, %v17193_v58  ;;  %v17795_v55 = vrot.slane %v2848_v61, %v17193_v58  ;;  %v2883_v45 = vcombine.high %v1016_v2, %v22570_v40  ;;  %v2890_v61 = vrot.slane %v1016_v2, %v17183_v44 }
 0x242   : > { %v17798_v54 = vrot.slane %v2849_v19, %v17193_v58  ;;  %v1020_v2 = vadd.f32 %v17665_v53, %v17180_v43  ;;  %v2948_v19 = vrot.slane %v2934_v31, %v17183_v44  ;;  %v1024_v50 = vadd.f32 %v17692_v33, %v17176_v42 }
 0x243   : > { %v2897_v17 = vrot.slane %v2883_v45, %v17183_v44  ;;  %v2898_v38 = vcombine.low %v2875_v35, %v2890_v61  ;;  %v2899_v5 = vcombine.high %v2875_v35, %v2890_v61  ;;  %v22591_v62 = vcombine.low %v17212_v15, %v17215_v16 }
 0x244   : > { %v17752_v63 = vpop.f32.mrb[48].mxu0  ;;  %v15187_v45 = vcombine.high %v17212_v15, %v17215_v16  ;;  %v2949_v33 = vcombine.high %v1020_v2, %v22570_v40  ;;  %v3000_v14 = vcombine.high %v1024_v50, %v22570_v40 }
 0x245   : > { %v17758_v48 = vpop.f32.mrb[49].mxu0  ;;  %v3683_v28 = vrot.slane %v22591_v62, %v17183_v44  ;;  %v17837_v35 = vrot.slane %v2898_v38, %v17193_v58  ;;  %v17840_v53 = vrot.slane %v2899_v5, %v17193_v58  ;;  %v2914_v31 = vcombine.low %v2882_v36, %v2897_v17 }
 0x246   : > { %v17762_v27 = vpop.f32.mrb[50].mxu0  ;;  %v2915_v61 = vcombine.high %v2882_v36, %v2897_v17  ;;  %v17846_v62 = vrot.slane %v1024_v50, %v17183_v44  ;;  %v2963_v38 = vrot.slane %v2949_v33, %v17183_v44  ;;  %v17862_v50 = vpop.f32.mrb[2].mxu1  ;;  %v3691_v5 = vrot.slane %v15187_v45, %v17183_v44 }
 0x247   : > { %v17766_v22 = vpop.f32.mrb[51].mxu0  ;;  %22593 = vst [vmem:[#allocation78_spill] sm:$0xff] %v17840_v53  ;;  %v17849_v15 = vrot.slane %v2914_v31, %v17193_v58  ;;  %22594 = vst [vmem:[#allocation79_spill] sm:$0xff] %v17862_v50  ;;  %v3692_v36 = vcombine.low %v17257_v57, %v17306_v39  ;;  %v17873_v33 = vpop.f32.mrb[3].mxu1  ;;  %v22598_v57 = vcombine.low %v17699_v41, %v17702_v46 }
 0x248   : > { %v17852_v16 = vrot.slane %v2915_v61, %v17193_v58  ;;  %22596 = vst [vmem:[#allocation81_spill] sm:$0xff] %v17873_v33  ;;  %v2981_v31 = vcombine.high %v2948_v19, %v2963_v38  ;;  %v3700_v45 = vcombine.low %v3683_v28, %v3691_v5  ;;  %v1028_v5 = vadd.f32 %v17704_v26, %v17176_v42 }
 0x249   : > { %v3699_v61 = vrot.slane %v3692_v36, %v17193_v58  ;;  %v4467_v39 = vrot.slane %v22598_v57, %v17183_v44  ;;  %v1030_v26 = vadd.f32 %v17712_v4, %v17180_v43 }
 0x24a   : > { %v3066_v57 = vcombine.high %v1028_v5, %v22570_v40 }
 0x24b   : > { %v3081_v4 = vcombine.high %v1030_v26, %v22570_v40 }
 0x24c   : > { %v17810_v18 = vpop.f32.mrb[52].mxu0 }
 0x24d   : > { %v17818_v6 = vpop.f32.mrb[53].mxu0 }
 0x24e   : > { %22589 = vst [vmem:[#allocation75_spill] sm:$0xff] %v17818_v6  ;;  %v17823_v52 = vpop.f32.mrb[54].mxu0 }
 0x24f   : > { %22590 = vst [vmem:[#allocation76_spill] sm:$0xff] %v17823_v52  ;;  %v17834_v6 = vpop.f32.mrb[55].mxu0  ;;  %v2956_v52 = vrot.slane %v1020_v2, %v17183_v44 }
 0x250   : > { %22592 = vst [vmem:[#allocation77_spill] sm:$0xff] %v17834_v6  ;;  %v17860_v6 = vrot.slane %v3000_v14, %v17183_v44 }
 0x251   : > { %v2964_v17 = vcombine.low %v2941_v51, %v2956_v52  ;;  %v2965_v2 = vcombine.high %v2941_v51, %v2956_v52  ;;  %v2980_v51 = vcombine.low %v2948_v19, %v2963_v38  ;;  %v17898_v19 = vrot.slane %v2981_v31, %v17193_v58 }
 0x252   : > { %v3707_v38 = vrot.slane %v3700_v45, %v17193_v58 }
 0x253   : > { %v17876_v14 = vrot.slane %v2964_v17, %v17193_v58  ;;  %v17879_v52 = vrot.slane %v2965_v2, %v17193_v58  ;;  %v22599_v17 = vcombine.high %v17699_v41, %v17702_v46  ;;  %v17895_v2 = vrot.slane %v2980_v51, %v17193_v58  ;;  %22601 = vst [vmem:[#allocation84_spill] sm:$0xff] %v17898_v19 }
 0x254   : > { %v17871_v53 = vpop.f32.mrb[56].mxu0  ;;  %v4476_v41 = vcombine.low %v17715_v32, %v17718_v10  ;;  %v15219_v46 = vcombine.high %v17715_v32, %v17718_v10  ;;  %v3709_v45 = vcombine.high %v3699_v61, %v3707_v38  ;;  %v3708_v10 = vcombine.low %v3699_v61, %v3707_v38 }
 0x255   : > { %22595 = vst [vmem:[#allocation80_spill] sm:$0xff] %v17871_v53  ;;  %v17881_v50 = vpop.f32.mrb[57].mxu0  ;;  %v4475_v33 = vrot.slane %v22599_v17, %v17183_v44  ;;  %v1026_v17 = vadd.f32 %v17696_v3, %v17180_v43  ;;  %v3073_v3 = vrot.slane %v1028_v5, %v17183_v44  ;;  %v3095_v19 = vrot.slane %v3081_v4, %v17183_v44 }
 0x256   : > { %22597 = vst [vmem:[#allocation82_spill] sm:$0xff] %v17881_v50  ;;  %v17892_v53 = vpop.f32.mrb[58].mxu0  ;;  %v4483_v28 = vrot.slane %v4476_v41, %v17183_v44  ;;  %v22603_v41 = vcombine.low %v17222_v20, %v17225_v21 }
 0x257   : > { %22600 = vst [vmem:[#allocation83_spill] sm:$0xff] %v17892_v53  ;;  %v17904_v36 = vpop.f32.mrb[59].mxu0  ;;  %v4492_v51 = vcombine.low %v4467_v39, %v4475_v33  ;;  %v3015_v33 = vcombine.high %v1026_v17, %v22570_v40  ;;  %v3022_v39 = vrot.slane %v1026_v17, %v17183_v44  ;;  %v3088_v17 = vrot.slane %v1030_v26, %v17183_v44 }
 0x258   : > { %22602 = vst [vmem:[#allocation85_spill] sm:$0xff] %v17904_v36  ;;  %v4491_v36 = vrot.slane %v15219_v46, %v17183_v44  ;;  %v3717_v46 = vrot.slane %v22603_v41, %v17183_v44  ;;  %v22606_v41 = vcombine.high %v17222_v20, %v17225_v21 }
 0x259   : > { %v4499_v32 = vrot.slane %v4492_v51, %v17193_v58  ;;  %v3029_v61 = vrot.slane %v3015_v33, %v17183_v44  ;;  %v3030_v38 = vcombine.low %v17846_v62, %v3022_v39  ;;  %v3031_v51 = vcombine.high %v17846_v62, %v3022_v39 }
 0x25a   : > { %v4500_v31 = vcombine.low %v4483_v28, %v4491_v36  ;;  %v3080_v28 = vrot.slane %v3066_v57, %v17183_v44  ;;  %v3096_v20 = vcombine.low %v3073_v3, %v3088_v17 }
 0x25b   : > { %v17950_v50 = vrot.slane %v3030_v38, %v17193_v58  ;;  %v17953_v62 = vrot.slane %v3031_v51, %v17193_v58  ;;  %v3046_v57 = vcombine.low %v17860_v6, %v3029_v61 }
 0x25c   : > { %v17932_v53 = vpop.f32.mrb[60].mxu0  ;;  %v4507_v5 = vrot.slane %v4500_v31, %v17193_v58  ;;  %v3047_v31 = vcombine.high %v17860_v6, %v3029_v61 }
 0x25d   : > { %22604 = vst [vmem:[#allocation86_spill] sm:$0xff] %v17932_v53  ;;  %v17938_v36 = vpop.f32.mrb[61].mxu0  ;;  %v3725_v53 = vrot.slane %v22606_v41, %v17183_v44  ;;  %v17961_v21 = vrot.slane %v3046_v57, %v17193_v58  ;;  %v15230_v41 = vcombine.high %v17950_v50, %v17953_v62 }
 0x25e   : > { %22605 = vst [vmem:[#allocation87_spill] sm:$0xff] %v17938_v36  ;;  %v17947_v33 = vpop.f32.mrb[62].mxu0  ;;  %v4509_v26 = vcombine.high %v4499_v32, %v4507_v5  ;;  %v4508_v36 = vcombine.low %v4499_v32, %v4507_v5  ;;  %v17964_v38 = vrot.slane %v3047_v31, %v17193_v58  ;;  %v17971_v32 = vrot.slane %v3096_v20, %v17193_v58  ;;  %v17973_v5 = vpop.f32.mrb[4].mxu1 }
 0x25f   : > { %22607 = vst [vmem:[#allocation88_spill] sm:$0xff] %v17947_v33  ;;  %v17957_v39 = vpop.f32.mrb[63].mxu0  ;;  %v3112_v31 = vcombine.low %v3080_v28, %v3095_v19  ;;  %v3113_v33 = vcombine.high %v3080_v28, %v3095_v19  ;;  %v17979_v51 = vpop.f32.mrb[5].mxu1  ;;  %v3742_v28 = vcombine.low %v3717_v46, %v3725_v53 }
 0x260   : > { %22608 = vst [vmem:[#allocation89_spill] sm:$0xff] %v17957_v39  ;;  %v15897_v6 = vpack.i.bf16 %v4509_v26, %v3709_v45  ;;  %v15785_v61 = vpack.i.bf16 %v4508_v36, %v3708_v10  ;;  %v3097_v39 = vcombine.high %v3073_v3, %v3088_v17  ;;  %v4776_v4 = vcombine.low %v17961_v21, %v17964_v38 }
 0x261   : > { %v22609_v10 = vcombine.low %v17232_v29, %v17235_v30  ;;  %v22610_v36 = vcombine.high %v17232_v29, %v17235_v30  ;;  %v17993_v26 = vrot.slane %v3112_v31, %v17193_v58  ;;  %v17996_v19 = vrot.slane %v3113_v33, %v17193_v58 }
 0x262   : > { %15898 = vxpose.xlu1.b32.start [1/16] %v15897_v6, 128  ;;  %15786 = vxpose.xlu0.b32.start [1/16] %v15785_v61, 128  ;;  %v17982_v45 = vrot.slane %v3097_v39, %v17193_v58  ;;  %v22611_v39 = vcombine.low %v17707_v23, %v17710_v49  ;;  %v22612_v30 = vcombine.high %v17707_v23, %v17710_v49 }
 0x263   : > { %v3733_v3 = vrot.slane %v22609_v10, %v17183_v44  ;;  %v3741_v17 = vrot.slane %v22610_v36, %v17183_v44  ;;  %v3749_v33 = vrot.slane %v3742_v28, %v17193_v58  ;;  %v22613_v10 = vcombine.low %v17725_v34, %v17728_v0 }
 0x264   : > { %v4517_v20 = vrot.slane %v22611_v39, %v17183_v44  ;;  %v4525_v31 = vrot.slane %v22612_v30, %v17183_v44  ;;  %v18019_v39 = vpop.f32.mrb[6].mxu1  ;;  %v22614_v23 = vcombine.high %v17725_v34, %v17728_v0  ;;  %v1034_v30 = vadd.f32 %v17752_v63, %v17176_v42 }
 0x265   : > { %v3750_v29 = vcombine.low %v3733_v3, %v3741_v17  ;;  %v4533_v36 = vrot.slane %v22613_v10, %v17183_v44  ;;  %v22615_v28 = vcombine.low %v17260_v59, %v17263_v60  ;;  %v22616_v10 = vcombine.high %v17260_v59, %v17263_v60 }
 0x266   : > { %v4541_v49 = vrot.slane %v22614_v23, %v17183_v44  ;;  %v4542_v17 = vcombine.low %v4517_v20, %v4525_v31  ;;  %v22618_v0 = vcombine.high %v17268_v7, %v17271_v8  ;;  %v3132_v61 = vcombine.high %v1034_v30, %v22570_v40 }
 0x267   : > { %v3757_v3 = vrot.slane %v3750_v29, %v17193_v58  ;;  %v3767_v46 = vrot.slane %v22615_v28, %v17183_v44  ;;  %v3775_v53 = vrot.slane %v22616_v10, %v17183_v44  ;;  %v22617_v29 = vcombine.low %v17268_v7, %v17271_v8 }
 0x268   : > { %v3791_v63 = vrot.slane %v22618_v0, %v17183_v44  ;;  %v4549_v31 = vrot.slane %v4542_v17, %v17193_v58  ;;  %v4550_v23 = vcombine.low %v4533_v36, %v4541_v49  ;;  %v3139_v59 = vrot.slane %v1034_v30, %v17183_v44 }
 0x269   : > { %v3783_v34 = vrot.slane %v22617_v29, %v17183_v44  ;;  %v3759_v20 = vcombine.high %v3749_v33, %v3757_v3  ;;  %v3758_v28 = vcombine.low %v3749_v33, %v3757_v3  ;;  %v3792_v60 = vcombine.low %v3767_v46, %v3775_v53  ;;  %v18060_v3 = vpop.f32.mrb[7].mxu1 }
 0x26a   : > { %v4557_v6 = vrot.slane %v4550_v23, %v17193_v58  ;;  %v22619_v29 = vcombine.low %v17771_v13, %v17774_v47  ;;  %v22620_v7 = vcombine.high %v17771_v13, %v17774_v47  ;;  %v22621_v33 = vcombine.low %v17785_v37, %v17788_v1 }
 0x26b   : > { %v3800_v10 = vcombine.low %v3783_v34, %v3791_v63  ;;  %v3146_v53 = vrot.slane %v3132_v61, %v17183_v44  ;;  %v3799_v46 = vrot.slane %v3792_v60, %v17193_v58  ;;  %v22622_v17 = vcombine.high %v17785_v37, %v17788_v1 }
 0x26c   : > { %v4567_v57 = vrot.slane %v22619_v29, %v17183_v44  ;;  %v4575_v8 = vrot.slane %v22620_v7, %v17183_v44  ;;  %v4583_v36 = vrot.slane %v22621_v33, %v17183_v44  ;;  %v4559_v13 = vcombine.high %v4549_v31, %v4557_v6 }
 0x26d   : > { %v3807_v49 = vrot.slane %v3800_v10, %v17193_v58  ;;  %v4591_v30 = vrot.slane %v22622_v17, %v17183_v44  ;;  %v4558_v47 = vcombine.low %v4549_v31, %v4557_v6  ;;  %v1036_v0 = vadd.f32 %v17758_v48, %v17180_v43 }
 0x26e   : > { %v4592_v34 = vcombine.low %v4567_v57, %v4575_v8  ;;  %v1038_v61 = vadd.f32 %v17762_v27, %v17176_v42  ;;  %v15899_v60 = vpack.i.bf16 %v4559_v13, %v3759_v20  ;;  %v1040_v27 = vadd.f32 %v17766_v22, %v17180_v43 }
 0x26f   : > { %v3809_v63 = vcombine.high %v3799_v46, %v3807_v49  ;;  %v4600_v23 = vcombine.low %v4583_v36, %v4591_v30  ;;  %v3808_v29 = vcombine.low %v3799_v46, %v3807_v49  ;;  %v15787_v7 = vpack.i.bf16 %v4558_v47, %v3758_v28 }
 0x270   : > { %v4599_v10 = vrot.slane %v4592_v34, %v17193_v58  ;;  %v3147_v33 = vcombine.high %v1036_v0, %v22570_v40  ;;  %v3154_v1 = vrot.slane %v1036_v0, %v17183_v44  ;;  %v3198_v57 = vcombine.high %v1038_v61, %v22570_v40  ;;  %15900 = vxpose.xlu1.b32.cont [2/16] %v15899_v60, 128 }
 0x271   : > { %v4607_v37 = vrot.slane %v4600_v23, %v17193_v58  ;;  %v3205_v48 = vrot.slane %v1038_v61, %v17183_v44  ;;  %15788 = vxpose.xlu0.b32.cont [2/16] %v15787_v7, 128  ;;  %v22623_v20 = vcombine.low %v17278_v11, %v17281_v12  ;;  %v3213_v13 = vcombine.high %v1040_v27, %v22570_v40 }
 0x272   : > { %v3161_v6 = vrot.slane %v3147_v33, %v17183_v44  ;;  %v3162_v36 = vcombine.low %v3139_v59, %v3154_v1  ;;  %v3163_v46 = vcombine.high %v3139_v59, %v3154_v1  ;;  %v3212_v30 = vrot.slane %v3198_v57, %v17183_v44 }
 0x273   : > { %v3817_v31 = vrot.slane %v22623_v20, %v17183_v44  ;;  %v4609_v28 = vcombine.high %v4599_v10, %v4607_v37  ;;  %v4608_v8 = vcombine.low %v4599_v10, %v4607_v37  ;;  %v3220_v59 = vrot.slane %v1040_v27, %v17183_v44 }
 0x274   : > { %v3178_v49 = vcombine.low %v3146_v53, %v3161_v6  ;;  %v3179_v17 = vcombine.high %v3146_v53, %v3161_v6  ;;  %v18089_v0 = vrot.slane %v3162_v36, %v17193_v58  ;;  %v18092_v22 = vrot.slane %v3163_v46, %v17193_v58 }
 0x275   : > { %v15901_v47 = vpack.i.bf16 %v4609_v28, %v3809_v63  ;;  %v15789_v34 = vpack.i.bf16 %v4608_v8, %v3808_v29  ;;  %v3227_v53 = vrot.slane %v3213_v13, %v17183_v44  ;;  %v22624_v60 = vcombine.high %v17278_v11, %v17281_v12  ;;  %v18122_v28 = vpop.f32.mrb[8].mxu1 }
 0x276   : > { %v18095_v23 = vrot.slane %v3178_v49, %v17193_v58  ;;  %v18098_v61 = vrot.slane %v3179_v17, %v17193_v58  ;;  %v3228_v37 = vcombine.low %v3205_v48, %v3220_v59  ;;  %v3229_v1 = vcombine.high %v3205_v48, %v3220_v59  ;;  %v18134_v17 = vpop.f32.mrb[9].mxu1 }
 0x277   : > { %15902 = vxpose.xlu1.b32.cont [3/16] %v15901_v47, 128  ;;  %15790 = vxpose.xlu0.b32.cont [3/16] %v15789_v34, 128  ;;  %v3825_v7 = vrot.slane %v22624_v60, %v17183_v44  ;;  %v3244_v57 = vcombine.low %v3212_v30, %v3227_v53  ;;  %v3245_v6 = vcombine.high %v3212_v30, %v3227_v53 }
 0x278   : > { %v22625_v27 = vcombine.low %v17290_v24, %v17293_v25  ;;  %v22626_v11 = vcombine.high %v17290_v24, %v17293_v25  ;;  %v18125_v8 = vrot.slane %v3228_v37, %v17193_v58  ;;  %v18128_v36 = vrot.slane %v3229_v1, %v17193_v58 }
 0x279   : > { %v3842_v48 = vcombine.low %v3817_v31, %v3825_v7  ;;  %v22627_v46 = vcombine.low %v17779_v56, %v17782_v9  ;;  %v18137_v30 = vrot.slane %v3244_v57, %v17193_v58  ;;  %v18140_v24 = vrot.slane %v3245_v6, %v17193_v58  ;;  %v18155_v7 = vpop.f32.mrb[10].mxu1 }
 0x27a   : > { %v3833_v20 = vrot.slane %v22625_v27, %v17183_v44  ;;  %v3841_v12 = vrot.slane %v22626_v11, %v17183_v44  ;;  %v22628_v13 = vcombine.high %v17779_v56, %v17782_v9  ;;  %v22629_v53 = vcombine.low %v17795_v55, %v17798_v54  ;;  %v22632_v11 = vld [vmem:[#allocation26_spill] sm:$0xff] }
 0x27b   : > { %v4617_v49 = vrot.slane %v22627_v46, %v17183_v44  ;;  %v3849_v59 = vrot.slane %v3842_v48, %v17193_v58  ;;  %v22630_v1 = vcombine.high %v17795_v55, %v17798_v54  ;;  %v1044_v27 = vadd.f32 %v17810_v18, %v17176_v42  ;;  %v22635_v55 = vld [vmem:[#allocation29_spill] sm:$0xff]  ;;  %v22636_v54 = vld [vmem:[#allocation30_spill] sm:$0xff] }
 0x27c   : > { %v3850_v25 = vcombine.low %v3833_v20, %v3841_v12  ;;  %v4625_v47 = vrot.slane %v22628_v13, %v17183_v44  ;;  %v4633_v60 = vrot.slane %v22629_v53, %v17183_v44  ;;  %v22631_v20 = vld [vmem:[#allocation25_spill] sm:$0xff] }
 0x27d   : > { %v4641_v57 = vrot.slane %v22630_v1, %v17183_v44  ;;  %v22633_v12 = vcombine.low %v22631_v20, %v22632_v11  ;;  %v22634_v46 = vcombine.high %v22631_v20, %v22632_v11  ;;  %v3264_v1 = vcombine.high %v1044_v27, %v22570_v40 }
 0x27e   : > { %v3857_v9 = vrot.slane %v3850_v25, %v17193_v58  ;;  %v4642_v6 = vcombine.low %v4617_v49, %v4625_v47  ;;  %v22637_v49 = vcombine.low %v22635_v55, %v22636_v54  ;;  %v3271_v37 = vrot.slane %v1044_v27, %v17183_v44 }
 0x27f   : > { %v3867_v48 = vrot.slane %v22633_v12, %v17183_v44  ;;  %v3875_v13 = vrot.slane %v22634_v46, %v17183_v44  ;;  %v4650_v53 = vcombine.low %v4633_v60, %v4641_v57  ;;  %v22638_v12 = vcombine.high %v22635_v55, %v22636_v54 }
 0x280   : > { %v3859_v25 = vcombine.high %v3849_v59, %v3857_v9  ;;  %v3858_v56 = vcombine.low %v3849_v59, %v3857_v9  ;;  %v3883_v47 = vrot.slane %v22637_v49, %v17183_v44  ;;  %v4649_v18 = vrot.slane %v4642_v6, %v17193_v58  ;;  %v22639_v59 = vld [vmem:[#allocation78_spill] sm:$0xff] }
 0x281   : > { %v3891_v20 = vrot.slane %v22638_v12, %v17183_v44  ;;  %v4657_v11 = vrot.slane %v4650_v53, %v17193_v58  ;;  %v3892_v60 = vcombine.low %v3867_v48, %v3875_v13  ;;  %v22640_v9 = vcombine.low %v17837_v35, %v22639_v59 }
 0x282   : > { %v22641_v6 = vcombine.high %v17837_v35, %v22639_v59  ;;  %v3278_v27 = vrot.slane %v3264_v1, %v17183_v44  ;;  %v22642_v55 = vcombine.low %v17849_v15, %v17852_v16  ;;  %v22643_v48 = vcombine.high %v17849_v15, %v17852_v16  ;;  %v18206_v35 = vpop.f32.mrb[11].mxu1  ;;  %v22646_v16 = vld [vmem:[#allocation77_spill] sm:$0xff] }
 0x283   : > { %v4667_v57 = vrot.slane %v22640_v9, %v17183_v44  ;;  %v3900_v49 = vcombine.low %v3883_v47, %v3891_v20  ;;  %v4659_v53 = vcombine.high %v4649_v18, %v4657_v11  ;;  %v4658_v12 = vcombine.low %v4649_v18, %v4657_v11  ;;  %v22644_v20 = vld [vmem:[#allocation75_spill] sm:$0xff] }
 0x284   : > { %v4675_v46 = vrot.slane %v22641_v6, %v17183_v44  ;;  %v4683_v54 = vrot.slane %v22642_v55, %v17183_v44  ;;  %v4691_v13 = vrot.slane %v22643_v48, %v17183_v44  ;;  %v3899_v9 = vrot.slane %v3892_v60, %v17193_v58  ;;  %v22645_v6 = vld [vmem:[#allocation76_spill] sm:$0xff] }
 0x285   : > { %v3907_v1 = vrot.slane %v3900_v49, %v17193_v58  ;;  %v1046_v59 = vadd.f32 %v22644_v20, %v17180_v43  ;;  %v1048_v55 = vadd.f32 %v22645_v6, %v17176_v42  ;;  %v15903_v31 = vpack.i.bf16 %v4659_v53, %v3859_v25 }
 0x286   : > { %v4692_v34 = vcombine.low %v4667_v57, %v4675_v46  ;;  %v4700_v47 = vcombine.low %v4683_v54, %v4691_v13  ;;  %v15791_v33 = vpack.i.bf16 %v4658_v12, %v3858_v56  ;;  %v1050_v18 = vadd.f32 %v22646_v16, %v17180_v43 }
 0x287   : > { %v3909_v11 = vcombine.high %v3899_v9, %v3907_v1  ;;  %v3908_v57 = vcombine.low %v3899_v9, %v3907_v1  ;;  %v3279_v46 = vcombine.high %v1046_v59, %v22570_v40  ;;  %15904 = vxpose.xlu1.b32.cont [4/16] %v15903_v31, 128  ;;  %v3286_v49 = vrot.slane %v1046_v59, %v17183_v44 }
 0x288   : > { %v4699_v15 = vrot.slane %v4692_v34, %v17193_v58  ;;  %v4707_v60 = vrot.slane %v4700_v47, %v17193_v58  ;;  %15792 = vxpose.xlu0.b32.cont [4/16] %v15791_v33, 128  ;;  %v3330_v54 = vcombine.high %v1048_v55, %v22570_v40  ;;  %v3337_v25 = vrot.slane %v1048_v55, %v17183_v44 }
 0x289   : > { %v3293_v34 = vrot.slane %v3279_v46, %v17183_v44  ;;  %v3345_v13 = vcombine.high %v1050_v18, %v22570_v40  ;;  %v3294_v53 = vcombine.low %v3271_v37, %v3286_v49  ;;  %v3295_v12 = vcombine.high %v3271_v37, %v3286_v49 }
 0x28a   : > { %v4709_v56 = vcombine.high %v4699_v15, %v4707_v60  ;;  %v4708_v48 = vcombine.low %v4699_v15, %v4707_v60  ;;  %v3344_v9 = vrot.slane %v3330_v54, %v17183_v44  ;;  %v3352_v1 = vrot.slane %v1050_v18, %v17183_v44 }
 0x28b   : > { %v3310_v47 = vcombine.low %v3278_v27, %v3293_v34  ;;  %v3311_v20 = vcombine.high %v3278_v27, %v3293_v34  ;;  %v18226_v59 = vrot.slane %v3294_v53, %v17193_v58  ;;  %v18229_v6 = vrot.slane %v3295_v12, %v17193_v58  ;;  %v22648_v34 = vld [vmem:[#allocation28_spill] sm:$0xff] }
 0x28c   : > { %v15905_v31 = vpack.i.bf16 %v4709_v56, %v3909_v11  ;;  %v15793_v33 = vpack.i.bf16 %v4708_v48, %v3908_v57  ;;  %v3359_v55 = vrot.slane %v3345_v13, %v17183_v44  ;;  %v3360_v15 = vcombine.low %v3337_v25, %v3352_v1  ;;  %v22647_v48 = vld [vmem:[#allocation27_spill] sm:$0xff]  ;;  %v22661_v11 = vld [vmem:[#allocation33_spill] sm:$0xff] }
 0x28d   : > { %v18233_v37 = vrot.slane %v3310_v47, %v17193_v58  ;;  %v18236_v16 = vrot.slane %v3311_v20, %v17193_v58  ;;  %v3361_v18 = vcombine.high %v3337_v25, %v3352_v1  ;;  %v22649_v13 = vcombine.low %v22647_v48, %v22648_v34 }
 0x28e   : > { %15906 = vxpose.xlu1.b32.cont [5/16] %v15905_v31, 128  ;;  %15794 = vxpose.xlu0.b32.cont [5/16] %v15793_v33, 128  ;;  %v18243_v60 = vrot.slane %v3360_v15, %v17193_v58  ;;  %v3376_v57 = vcombine.low %v3344_v9, %v3359_v55  ;;  %v3377_v25 = vcombine.high %v3344_v9, %v3359_v55  ;;  %v22651_v31 = vld [vmem:[#allocation31_spill] sm:$0xff]  ;;  %v22652_v33 = vld [vmem:[#allocation32_spill] sm:$0xff] }
 0x28f   : > { %v18250_v54 = vrot.slane %v3361_v18, %v17193_v58  ;;  %v3917_v53 = vrot.slane %v22649_v13, %v17183_v44  ;;  %v22650_v12 = vcombine.high %v22647_v48, %v22648_v34  ;;  %v22653_v47 = vcombine.low %v22651_v31, %v22652_v33  ;;  %v18278_v48 = vpop.f32.mrb[12].mxu1  ;;  %v22657_v15 = vld [vmem:[#allocation84_spill] sm:$0xff] }
 0x290   : > { %v18253_v56 = vrot.slane %v3376_v57, %v17193_v58  ;;  %v18268_v9 = vrot.slane %v3377_v25, %v17193_v58  ;;  %v22654_v18 = vcombine.high %v22651_v31, %v22652_v33  ;;  %v22655_v13 = vcombine.low %v17876_v14, %v17879_v52  ;;  %v18292_v31 = vpop.f32.mrb[13].mxu1 }
 0x291   : > { %v3925_v1 = vrot.slane %v22650_v12, %v17183_v44  ;;  %v3933_v20 = vrot.slane %v22653_v47, %v17183_v44  ;;  %v22656_v12 = vcombine.high %v17876_v14, %v17879_v52  ;;  %v22658_v55 = vcombine.low %v17895_v2, %v22657_v15  ;;  %v18302_v52 = vpop.f32.mrb[14].mxu1 }
 0x292   : > { %v3941_v57 = vrot.slane %v22654_v18, %v17183_v44  ;;  %v4717_v25 = vrot.slane %v22655_v13, %v17183_v44  ;;  %v22659_v18 = vcombine.high %v17895_v2, %v22657_v15 }
 0x293   : > { %v3942_v34 = vcombine.low %v3917_v53, %v3925_v1  ;;  %v4725_v47 = vrot.slane %v22656_v12, %v17183_v44  ;;  %v4733_v49 = vrot.slane %v22658_v55, %v17183_v44  ;;  %v22660_v55 = vld [vmem:[#allocation80_spill] sm:$0xff]  ;;  %v22662_v53 = vld [vmem:[#allocation34_spill] sm:$0xff] }
 0x294   : > { %v3950_v33 = vcombine.low %v3933_v20, %v3941_v57  ;;  %v4741_v14 = vrot.slane %v22659_v18, %v17183_v44  ;;  %v1054_v46 = vadd.f32 %v22660_v55, %v17176_v42  ;;  %v22663_v27 = vcombine.low %v22661_v11, %v22662_v53  ;;  %v22665_v18 = vld [vmem:[#allocation37_spill] sm:$0xff] }
 0x295   : > { %v3949_v13 = vrot.slane %v3942_v34, %v17193_v58  ;;  %v4742_v12 = vcombine.low %v4717_v25, %v4725_v47  ;;  %v22664_v2 = vcombine.high %v22661_v11, %v22662_v53  ;;  %v22666_v34 = vld [vmem:[#allocation38_spill] sm:$0xff] }
 0x296   : > { %v3967_v10 = vrot.slane %v22663_v27, %v17183_v44  ;;  %v3957_v20 = vrot.slane %v3950_v33, %v17193_v58  ;;  %v4750_v57 = vcombine.low %v4733_v49, %v4741_v14  ;;  %v22667_v25 = vcombine.low %v22665_v18, %v22666_v34 }
 0x297   : > { %v3975_v15 = vrot.slane %v22664_v2, %v17183_v44  ;;  %v4749_v55 = vrot.slane %v4742_v12, %v17193_v58  ;;  %v3396_v1 = vcombine.high %v1054_v46, %v22570_v40  ;;  %v3403_v29 = vrot.slane %v1054_v46, %v17183_v44 }
 0x298   : > { %v3983_v47 = vrot.slane %v22667_v25, %v17183_v44  ;;  %v22668_v27 = vcombine.high %v22665_v18, %v22666_v34  ;;  %v3959_v33 = vcombine.high %v3949_v13, %v3957_v20  ;;  %v4757_v11 = vrot.slane %v4750_v57, %v17193_v58 }
 0x299   : > { %v3958_v53 = vcombine.low %v3949_v13, %v3957_v20  ;;  %v3992_v14 = vcombine.low %v3967_v10, %v3975_v15  ;;  %v3410_v2 = vrot.slane %v3396_v1, %v17183_v44  ;;  %v22669_v12 = vcombine.low %v17950_v50, %v17953_v62  ;;  %v22671_v50 = vld [vmem:[#allocation82_spill] sm:$0xff] }
 0x29a   : > { %v3991_v49 = vrot.slane %v22668_v27, %v17183_v44  ;;  %v4775_v46 = vrot.slane %v15230_v41, %v17183_v44  ;;  %v4759_v18 = vcombine.high %v4749_v55, %v4757_v11  ;;  %v4758_v34 = vcombine.low %v4749_v55, %v4757_v11 }
 0x29b   : > { %v4767_v25 = vrot.slane %v22669_v12, %v17183_v44  ;;  %v3999_v27 = vrot.slane %v3992_v14, %v17193_v58  ;;  %v4783_v10 = vrot.slane %v4776_v4, %v17183_v44  ;;  %v22670_v13 = vcombine.high %v17961_v21, %v17964_v38  ;;  %v18353_v4 = vpop.f32.mrb[15].mxu1 }
 0x29c   : > { %v4000_v63 = vcombine.low %v3983_v47, %v3991_v49  ;;  %v1056_v62 = vadd.f32 %v22671_v50, %v17180_v43  ;;  %v15907_v41 = vpack.i.bf16 %v4759_v18, %v3959_v33  ;;  %v15795_v15 = vpack.i.bf16 %v4758_v34, %v3958_v53  ;;  %v22672_v47 = vld [vmem:[#allocation83_spill] sm:$0xff]  ;;  %v22673_v49 = vld [vmem:[#allocation85_spill] sm:$0xff] }
 0x29d   : > { %v4791_v20 = vrot.slane %v22670_v13, %v17183_v44  ;;  %v4792_v57 = vcombine.low %v4767_v25, %v4775_v46  ;;  %v1058_v55 = vadd.f32 %v22672_v47, %v17176_v42  ;;  %v1060_v11 = vadd.f32 %v22673_v49, %v17180_v43 }
 0x29e   : > { %v4007_v1 = vrot.slane %v4000_v63, %v17193_v58  ;;  %15908 = vxpose.xlu1.b32.cont [6/16] %v15907_v41, 128  ;;  %15796 = vxpose.xlu0.b32.cont [6/16] %v15795_v15, 128  ;;  %v3411_v38 = vcombine.high %v1056_v62, %v22570_v40  ;;  %v3418_v33 = vrot.slane %v1056_v62, %v17183_v44 }
 0x29f   : > { %v4799_v14 = vrot.slane %v4792_v57, %v17193_v58  ;;  %v4800_v12 = vcombine.low %v4783_v10, %v4791_v20  ;;  %v3462_v53 = vcombine.high %v1058_v55, %v22570_v40  ;;  %v3469_v46 = vrot.slane %v1058_v55, %v17183_v44 }
 0x2a0   : > { %v4009_v63 = vcombine.high %v3999_v27, %v4007_v1  ;;  %v4008_v21 = vcombine.low %v3999_v27, %v4007_v1  ;;  %v3477_v18 = vcombine.high %v1060_v11, %v22570_v40  ;;  %v3484_v34 = vrot.slane %v1060_v11, %v17183_v44 }
 0x2a1   : > { %v4807_v25 = vrot.slane %v4800_v12, %v17193_v58  ;;  %v3425_v13 = vrot.slane %v3411_v38, %v17183_v44  ;;  %v3426_v10 = vcombine.low %v3403_v29, %v3418_v33  ;;  %v3427_v27 = vcombine.high %v3403_v29, %v3418_v33 }
 0x2a2   : > { %v3476_v1 = vrot.slane %v3462_v53, %v17183_v44  ;;  %v3491_v50 = vrot.slane %v3477_v18, %v17183_v44  ;;  %v3492_v62 = vcombine.low %v3469_v46, %v3484_v34  ;;  %v3493_v12 = vcombine.high %v3469_v46, %v3484_v34  ;;  %v22674_v18 = vld [vmem:[#allocation35_spill] sm:$0xff]  ;;  %v22675_v34 = vld [vmem:[#allocation36_spill] sm:$0xff] }
 0x2a3   : > { %v4809_v20 = vcombine.high %v4799_v14, %v4807_v25  ;;  %v4808_v57 = vcombine.low %v4799_v14, %v4807_v25  ;;  %v18367_v41 = vrot.slane %v3426_v10, %v17193_v58  ;;  %v18370_v15 = vrot.slane %v3427_v27, %v17193_v58  ;;  %v22691_v25 = vld [vmem:[#allocation42_spill] sm:$0xff] }
 0x2a4   : > { %v3442_v47 = vcombine.low %v3410_v2, %v3425_v13  ;;  %v3443_v55 = vcombine.high %v3410_v2, %v3425_v13  ;;  %v18373_v29 = vrot.slane %v3492_v62, %v17193_v58  ;;  %v18386_v2 = vrot.slane %v3493_v12, %v17193_v58 }
 0x2a5   : > { %v15909_v49 = vpack.i.bf16 %v4809_v20, %v4009_v63  ;;  %v15797_v11 = vpack.i.bf16 %v4808_v57, %v4008_v21  ;;  %v3508_v63 = vcombine.low %v3476_v1, %v3491_v50  ;;  %v3509_v21 = vcombine.high %v3476_v1, %v3491_v50  ;;  %v22688_v50 = vld [vmem:[#allocation86_spill] sm:$0xff] }
 0x2a6   : > { %v18376_v38 = vrot.slane %v3442_v47, %v17193_v58  ;;  %v18379_v14 = vrot.slane %v3443_v55, %v17193_v58  ;;  %v22676_v13 = vcombine.low %v22674_v18, %v22675_v34  ;;  %v22677_v27 = vcombine.high %v22674_v18, %v22675_v34  ;;  %v22678_v47 = vld [vmem:[#allocation39_spill] sm:$0xff]  ;;  %v22679_v55 = vld [vmem:[#allocation40_spill] sm:$0xff] }
 0x2a7   : > { %15910 = vxpose.xlu1.b32.cont [7/16] %v15909_v49, 128  ;;  %15798 = vxpose.xlu0.b32.cont [7/16] %v15797_v11, 128  ;;  %v18401_v57 = vrot.slane %v3508_v63, %v17193_v58  ;;  %v18404_v1 = vrot.slane %v3509_v21, %v17193_v58  ;;  %v22680_v49 = vcombine.low %v22678_v47, %v22679_v55 }
 0x2a8   : > { %v4017_v10 = vrot.slane %v22676_v13, %v17183_v44  ;;  %v4025_v20 = vrot.slane %v22677_v27, %v17183_v44  ;;  %v22681_v12 = vcombine.high %v22678_v47, %v22679_v55  ;;  %v22682_v21 = vcombine.low %v17971_v32, %v17982_v45  ;;  %v18422_v13 = vpop.f32.mrb[16].mxu1 }
 0x2a9   : > { %v4033_v11 = vrot.slane %v22680_v49, %v17183_v44  ;;  %22683 = vst [vmem:[#allocation25_spill] sm:$0xff] %v18422_v13  ;;  %v22684_v49 = vcombine.high %v17971_v32, %v17982_v45  ;;  %v18436_v55 = vpop.f32.mrb[17].mxu1  ;;  %v22687_v27 = vcombine.high %v17993_v26, %v17996_v19  ;;  %v1064_v46 = vadd.f32 %v22688_v50, %v17176_v42 }
 0x2aa   : > { %v4041_v63 = vrot.slane %v22681_v12, %v17183_v44  ;;  %v4042_v18 = vcombine.low %v4017_v10, %v4025_v20  ;;  %v4817_v34 = vrot.slane %v22682_v21, %v17183_v44  ;;  %v22685_v10 = vcombine.low %v17993_v26, %v17996_v19  ;;  %22686 = vst [vmem:[#allocation26_spill] sm:$0xff] %v18436_v55  ;;  %v18445_v32 = vpop.f32.mrb[18].mxu1  ;;  %v22695_v26 = vld [vmem:[#allocation46_spill] sm:$0xff] }
 0x2ab   : > { %v4825_v47 = vrot.slane %v22684_v49, %v17183_v44  ;;  %v4841_v62 = vrot.slane %v22687_v27, %v17183_v44  ;;  %22689 = vst [vmem:[#allocation29_spill] sm:$0xff] %v18445_v32  ;;  %v22690_v49 = vld [vmem:[#allocation41_spill] sm:$0xff] }
 0x2ac   : > { %v4833_v20 = vrot.slane %v22685_v10, %v17183_v44  ;;  %v4049_v12 = vrot.slane %v4042_v18, %v17193_v58  ;;  %v4050_v21 = vcombine.low %v4033_v11, %v4041_v63  ;;  %v22692_v10 = vcombine.low %v22690_v49, %v22691_v25  ;;  %v22694_v18 = vld [vmem:[#allocation45_spill] sm:$0xff] }
 0x2ad   : > { %v4842_v45 = vcombine.low %v4817_v34, %v4825_v47  ;;  %v22693_v11 = vcombine.high %v22690_v49, %v22691_v25  ;;  %v22696_v19 = vcombine.low %v22694_v18, %v22695_v26  ;;  %v3528_v34 = vcombine.high %v1064_v46, %v22570_v40 }
 0x2ae   : > { %v4067_v53 = vrot.slane %v22692_v10, %v17183_v44  ;;  %v4057_v50 = vrot.slane %v4050_v21, %v17193_v58  ;;  %v4850_v33 = vcombine.low %v4833_v20, %v4841_v62  ;;  %v3535_v47 = vrot.slane %v1064_v46, %v17183_v44 }
 0x2af   : > { %v4075_v63 = vrot.slane %v22693_v11, %v17183_v44  ;;  %v4083_v27 = vrot.slane %v22696_v19, %v17183_v44  ;;  %v4849_v32 = vrot.slane %v4842_v45, %v17193_v58  ;;  %v22697_v10 = vcombine.high %v22694_v18, %v22695_v26 }
 0x2b0   : > { %v22698_v11 = vcombine.low %v18089_v0, %v18092_v22  ;;  %v4059_v55 = vcombine.high %v4049_v12, %v4057_v50  ;;  %v4857_v62 = vrot.slane %v4850_v33, %v17193_v58  ;;  %v4058_v20 = vcombine.low %v4049_v12, %v4057_v50  ;;  %v22702_v50 = vld [vmem:[#allocation87_spill] sm:$0xff] }
 0x2b1   : > { %v4091_v25 = vrot.slane %v22697_v10, %v17183_v44  ;;  %v4092_v49 = vcombine.low %v4067_v53, %v4075_v63  ;;  %v3542_v21 = vrot.slane %v3528_v34, %v17183_v44  ;;  %v22699_v18 = vcombine.high %v18089_v0, %v18092_v22  ;;  %v22703_v0 = vld [vmem:[#allocation88_spill] sm:$0xff] }
 0x2b2   : > { %v4867_v19 = vrot.slane %v22698_v11, %v17183_v44  ;;  %v22700_v53 = vcombine.low %v18095_v23, %v18098_v61  ;;  %v4859_v10 = vcombine.high %v4849_v32, %v4857_v62  ;;  %v4858_v11 = vcombine.low %v4849_v32, %v4857_v62 }
 0x2b3   : > { %v4099_v46 = vrot.slane %v4092_v49, %v17193_v58  ;;  %v4100_v45 = vcombine.low %v4083_v27, %v4091_v25  ;;  %v4875_v26 = vrot.slane %v22699_v18, %v17183_v44  ;;  %v22701_v33 = vcombine.high %v18095_v23, %v18098_v61  ;;  %v22704_v49 = vld [vmem:[#allocation89_spill] sm:$0xff] }
 0x2b4   : > { %v4883_v63 = vrot.slane %v22700_v53, %v17183_v44  ;;  %v1066_v27 = vadd.f32 %v22702_v50, %v17180_v43  ;;  %v1068_v22 = vadd.f32 %v22703_v0, %v17176_v42  ;;  %v1070_v18 = vadd.f32 %v22704_v49, %v17180_v43  ;;  %v18493_v53 = vpop.f32.mrb[19].mxu1 }
 0x2b5   : > { %v4891_v12 = vrot.slane %v22701_v33, %v17183_v44  ;;  %v4107_v34 = vrot.slane %v4100_v45, %v17193_v58  ;;  %v4892_v25 = vcombine.low %v4867_v19, %v4875_v26  ;;  %22705 = vst [vmem:[#allocation30_spill] sm:$0xff] %v18493_v53  ;;  %v15911_v32 = vpack.i.bf16 %v4859_v10, %v4059_v55 }
 0x2b6   : > { %v15799_v62 = vpack.i.bf16 %v4858_v11, %v4058_v20  ;;  %v3543_v23 = vcombine.high %v1066_v27, %v22570_v40  ;;  %v3550_v45 = vrot.slane %v1066_v27, %v17183_v44  ;;  %v3594_v43 = vcombine.high %v1068_v22, %v22570_v40 }
 0x2b7   : > { %v4900_v13 = vcombine.low %v4883_v63, %v4891_v12  ;;  %v4109_v61 = vcombine.high %v4099_v46, %v4107_v34  ;;  %v4899_v33 = vrot.slane %v4892_v25, %v17193_v58  ;;  %v4108_v50 = vcombine.low %v4099_v46, %v4107_v34  ;;  %15912 = vxpose.xlu1.b32.cont [8/16] %v15911_v32, 128 }
 0x2b8   : > { %15800 = vxpose.xlu0.b32.cont [8/16] %v15799_v62, 128  ;;  %v3557_v19 = vrot.slane %v3543_v23, %v17183_v44  ;;  %v3558_v26 = vcombine.low %v3535_v47, %v3550_v45  ;;  %v3559_v55 = vcombine.high %v3535_v47, %v3550_v45  ;;  %v3601_v20 = vrot.slane %v1068_v22, %v17183_v44 }
 0x2b9   : > { %v4907_v42 = vrot.slane %v4900_v13, %v17193_v58  ;;  %v3609_v63 = vcombine.high %v1070_v18, %v22570_v40  ;;  %v3608_v13 = vrot.slane %v3594_v43, %v17183_v44  ;;  %v3616_v25 = vrot.slane %v1070_v18, %v17183_v44  ;;  %v22708_v43 = vld [vmem:[#allocation44_spill] sm:$0xff] }
 0x2ba   : > { %v3574_v12 = vcombine.low %v3542_v21, %v3557_v19  ;;  %v3575_v46 = vcombine.high %v3542_v21, %v3557_v19  ;;  %v18504_v27 = vrot.slane %v3558_v26, %v17193_v58  ;;  %v18507_v34 = vrot.slane %v3559_v55, %v17193_v58  ;;  %v22707_v19 = vld [vmem:[#allocation43_spill] sm:$0xff] }
 0x2bb   : > { %v4909_v10 = vcombine.high %v4899_v33, %v4907_v42  ;;  %v4908_v11 = vcombine.low %v4899_v33, %v4907_v42  ;;  %v3623_v62 = vrot.slane %v3609_v63, %v17183_v44  ;;  %v3624_v23 = vcombine.low %v3601_v20, %v3616_v25  ;;  %v22735_v21 = vld [vmem:[#allocation79_spill] sm:$0xff] }
 0x2bc   : > { %v18512_v22 = vrot.slane %v3574_v12, %v17193_v58  ;;  %v18515_v49 = vrot.slane %v3575_v46, %v17193_v58  ;;  %v3625_v33 = vcombine.high %v3601_v20, %v3616_v25  ;;  %v22709_v26 = vcombine.low %v22707_v19, %v22708_v43  ;;  %v22712_v20 = vld [vmem:[#allocation47_spill] sm:$0xff]  ;;  %v22713_v12 = vld [vmem:[#allocation48_spill] sm:$0xff] }
 0x2bd   : > { %v15913_v0 = vpack.i.bf16 %v4909_v10, %v4109_v61  ;;  %v15801_v47 = vpack.i.bf16 %v4908_v11, %v4108_v50  ;;  %v18527_v50 = vrot.slane %v3624_v23, %v17193_v58  ;;  %v3640_v45 = vcombine.low %v3608_v13, %v3623_v62 }
 0x2be   : > { %v3641_v42 = vcombine.high %v3608_v13, %v3623_v62  ;;  %v4117_v55 = vrot.slane %v22709_v26, %v17183_v44  ;;  %v18534_v63 = vrot.slane %v3625_v33, %v17193_v58  ;;  %v22711_v10 = vcombine.high %v22707_v19, %v22708_v43  ;;  %v1104_v26 = vld [vmem:[%s22720_s8] sm:$0x3] }
 0x2bf   : > { %15914 = vxpose.xlu1.b32.cont [9/16] %v15913_v0, 128  ;;  %15802 = vxpose.xlu0.b32.cont [9/16] %v15801_v47, 128  ;;  %22706 = vst [vmem:[#allocation78_spill] sm:$0xff] %v18527_v50  ;;  %v22714_v46 = vcombine.low %v22712_v20, %v22713_v12  ;;  %v22715_v13 = vcombine.high %v22712_v20, %v22713_v12  ;;  %v18569_v12 = vpop.f32.mrb[20].mxu1 }
 0x2c0   : > { %22710 = vst [vmem:[#allocation75_spill] sm:$0xff] %v18534_v63  ;;  %v4125_v11 = vrot.slane %v22711_v10, %v17183_v44  ;;  %v18549_v47 = vrot.slane %v3640_v45, %v17193_v58  ;;  %v18552_v62 = vrot.slane %v3641_v42, %v17193_v58  ;;  %v22718_v23 = vcombine.low %v18125_v8, %v18128_v36 }
 0x2c1   : > { %v4133_v25 = vrot.slane %v22714_v46, %v17183_v44  ;;  %v4141_v0 = vrot.slane %v22715_v13, %v17183_v44  ;;  %v22719_v19 = vcombine.high %v18125_v8, %v18128_v36  ;;  %22721 = vst [vmem:[#allocation27_spill] sm:$0xff] %v18569_v12  ;;  %v22722_v36 = vcombine.low %v18137_v30, %v18140_v24  ;;  %v22725_v46 = vld [vmem:[#allocation24_spill] sm:$0xff] }
 0x2c2   : > { %22716 = vst [vmem:[#allocation76_spill] sm:$0xff] %v18549_v47  ;;  %22717 = vst [vmem:[#allocation77_spill] sm:$0xff] %v18552_v62  ;;  %v4917_v33 = vrot.slane %v22718_v23, %v17183_v44  ;;  %v4142_v10 = vcombine.low %v4117_v55, %v4125_v11  ;;  %v22723_v23 = vcombine.high %v18137_v30, %v18140_v24  ;;  %v18583_v55 = vpop.f32.mrb[21].mxu1  ;;  %v22726_v42 = vsub.s32 0, %v22725_v46  ;;  %v22729_v30 = vld [vmem:[#allocation49_spill] sm:$0xff]  ;;  %v22730_v24 = vld [vmem:[#allocation50_spill] sm:$0xff] }
 0x2c3   : > { %v4925_v43 = vrot.slane %v22719_v19, %v17183_v44  ;;  %v4150_v20 = vcombine.low %v4133_v25, %v4141_v0  ;;  %v4933_v13 = vrot.slane %v22722_v36, %v17183_v44  ;;  %22724 = vst [vmem:[#allocation28_spill] sm:$0xff] %v18583_v55  ;;  %v18591_v45 = vpop.f32.mrb[22].mxu1  ;;  %v22728_v36 = vsub.s32 1, %v22725_v46  ;;  %v22734_v46 = vld [vmem:[#allocation74_spill] sm:$0xff]  ;;  %v22736_v62 = vld [vmem:[#allocation53_spill] sm:$0xff] }
 0x2c4   : > { %v4941_v19 = vrot.slane %v22723_v23, %v17183_v44  ;;  %v4149_v11 = vrot.slane %v4142_v10, %v17193_v58  ;;  %v18589_v8 = vrot.slane %v1104_v26, %v22726_v42  ;;  %22727 = vst [vmem:[#allocation31_spill] sm:$0xff] %v18591_v45  ;;  %v22731_v23 = vcombine.low %v22729_v30, %v22730_v24  ;;  %v22737_v47 = vld [vmem:[#allocation54_spill] sm:$0xff] }
 0x2c5   : > { %v4157_v25 = vrot.slane %v4150_v20, %v17193_v58  ;;  %v4942_v0 = vcombine.low %v4917_v33, %v4925_v43  ;;  %v18595_v18 = vrot.slane %v1104_v26, %v22728_v36  ;;  %v22732_v33 = vcombine.high %v22729_v30, %v22730_v24 }
 0x2c6   : > { %v4950_v61 = vcombine.low %v4933_v13, %v4941_v19  ;;  %v4167_v32 = vrot.slane %v22731_v23, %v17183_v44  ;;  %v22733_v13 = vld [vmem:[#allocation73_spill] sm:$0xff]  ;;  %v1315_v23 = vadd.f32 %v22735_v21, %v18589_v8  ;;  %v22738_v30 = vcombine.low %v22736_v62, %v22737_v47 }
 0x2c7   : > { %v4175_v43 = vrot.slane %v22732_v33, %v17183_v44  ;;  %v4159_v10 = vcombine.high %v4149_v11, %v4157_v25  ;;  %v4949_v42 = vrot.slane %v4942_v0, %v17193_v58  ;;  %v4158_v20 = vcombine.low %v4149_v11, %v4157_v25 }
 0x2c8   : > { %v1311_v19 = vadd.f32 %v22733_v13, %v18589_v8  ;;  %v4957_v26 = vrot.slane %v4950_v61, %v17193_v58  ;;  %v1313_v36 = vadd.f32 %v22734_v46, %v18595_v18  ;;  %v4183_v24 = vrot.slane %v22738_v30, %v17183_v44 }
 0x2c9   : > { %v22739_v25 = vcombine.high %v22736_v62, %v22737_v47  ;;  %v4192_v0 = vcombine.low %v4167_v32, %v4175_v43  ;;  %v5518_v30 = vcombine.high %v1315_v23, %v22570_v40  ;;  %v5525_v45 = vrot.slane %v1315_v23, %v17183_v44  ;;  %v18629_v47 = vpop.f32.mrb[23].mxu1 }
 0x2ca   : > { %v5452_v33 = vcombine.high %v1311_v19, %v22570_v40  ;;  %v5459_v11 = vrot.slane %v1311_v19, %v17183_v44  ;;  %v4959_v13 = vcombine.high %v4949_v42, %v4957_v26  ;;  %v4958_v46 = vcombine.low %v4949_v42, %v4957_v26 }
 0x2cb   : > { %v4191_v61 = vrot.slane %v22739_v25, %v17183_v44  ;;  %v5467_v63 = vcombine.high %v1313_v36, %v22570_v40  ;;  %v5474_v21 = vrot.slane %v1313_v36, %v17183_v44  ;;  %v5532_v62 = vrot.slane %v5518_v30, %v17183_v44 }
 0x2cc   : > { %v5466_v50 = vrot.slane %v5452_v33, %v17183_v44  ;;  %v15915_v55 = vpack.i.bf16 %v4959_v13, %v4159_v10  ;;  %v15803_v19 = vpack.i.bf16 %v4958_v46, %v4158_v20  ;;  %v4199_v43 = vrot.slane %v4192_v0, %v17193_v58 }
 0x2cd   : > { %v5481_v12 = vrot.slane %v5467_v63, %v17183_v44  ;;  %v5482_v53 = vcombine.low %v5459_v11, %v5474_v21  ;;  %v5483_v32 = vcombine.high %v5459_v11, %v5474_v21  ;;  %v4200_v42 = vcombine.low %v4183_v24, %v4191_v61 }
 0x2ce   : > { %15916 = vxpose.xlu1.b32.cont [10/16] %v15915_v55, 128  ;;  %15804 = vxpose.xlu0.b32.cont [10/16] %v15803_v19, 128  ;;  %v22740_v63 = vcombine.low %v18226_v59, %v18229_v6  ;;  %v22741_v11 = vcombine.high %v18226_v59, %v18229_v6  ;;  %v22743_v25 = vcombine.high %v18233_v37, %v18236_v16 }
 0x2cf   : > { %v5490_v26 = vrot.slane %v5482_v53, %v17193_v58  ;;  %v5498_v36 = vcombine.low %v5466_v50, %v5481_v12  ;;  %v5499_v33 = vcombine.high %v5466_v50, %v5481_v12  ;;  %v5497_v10 = vrot.slane %v5483_v32, %v17193_v58 }
 0x2d0   : > { %v4207_v20 = vrot.slane %v4200_v42, %v17193_v58  ;;  %v4967_v23 = vrot.slane %v22740_v63, %v17183_v44  ;;  %v4975_v24 = vrot.slane %v22741_v11, %v17183_v44  ;;  %v22742_v50 = vcombine.low %v18233_v37, %v18236_v16 }
 0x2d1   : > { %v5506_v55 = vrot.slane %v5498_v36, %v17193_v58  ;;  %v5513_v53 = vrot.slane %v5499_v33, %v17193_v58  ;;  %v4991_v61 = vrot.slane %v22743_v25, %v17183_v44  ;;  %v7564_v0 = vcombine.low %v5490_v26, %v5497_v10  ;;  %v22744_v33 = vld [vmem:[#allocation81_spill] sm:$0xff] }
 0x2d2   : > { %v4983_v12 = vrot.slane %v22742_v50, %v17183_v44  ;;  %v15250_v13 = vcombine.high %v5490_v26, %v5497_v10  ;;  %v4209_v46 = vcombine.high %v4199_v43, %v4207_v20  ;;  %v4992_v21 = vcombine.low %v4967_v23, %v4975_v24 }
 0x2d3   : > { %v7580_v59 = vcombine.low %v5506_v55, %v5513_v53  ;;  %v15251_v6 = vcombine.high %v5506_v55, %v5513_v53  ;;  %v4208_v19 = vcombine.low %v4199_v43, %v4207_v20  ;;  %v7571_v32 = vrot.slane %v7564_v0, %v17183_v44 }
 0x2d4   : > { %v5000_v30 = vcombine.low %v4983_v12, %v4991_v61  ;;  %v7579_v42 = vrot.slane %v15250_v13, %v17183_v44  ;;  %v4999_v36 = vrot.slane %v4992_v21, %v17193_v58  ;;  %v1317_v63 = vadd.f32 %v22744_v33, %v18595_v18 }
 0x2d5   : > { %v7587_v37 = vrot.slane %v7580_v59, %v17183_v44  ;;  %v7595_v16 = vrot.slane %v15251_v6, %v17183_v44  ;;  %v1321_v10 = vadd.f32 %v17973_v5, %v18589_v8 }
 0x2d6   : > { %v5007_v26 = vrot.slane %v5000_v30, %v17193_v58  ;;  %v7596_v23 = vcombine.low %v7571_v32, %v7579_v42  ;;  %v5533_v43 = vcombine.high %v1317_v63, %v22570_v40  ;;  %v5540_v20 = vrot.slane %v1317_v63, %v17183_v44  ;;  %v18683_v63 = vpop.f32.mrb[24].mxu1 }
 0x2d7   : > { %v7604_v11 = vcombine.low %v7587_v37, %v7595_v16  ;;  %v5584_v13 = vcombine.high %v1321_v10, %v22570_v40  ;;  %v1323_v37 = vadd.f32 %v17979_v51, %v18595_v18  ;;  %v1325_v16 = vadd.f32 %v18019_v39, %v18589_v8 }
 0x2d8   : > { %v5009_v24 = vcombine.high %v4999_v36, %v5007_v26  ;;  %v5008_v55 = vcombine.low %v4999_v36, %v5007_v26  ;;  %v18667_v53 = vrot.slane %v7596_v23, %v17193_v58  ;;  %v5547_v50 = vrot.slane %v5533_v43, %v17183_v44  ;;  %v22745_v26 = vld [vmem:[#allocation51_spill] sm:$0xff]  ;;  %v22746_v23 = vld [vmem:[#allocation52_spill] sm:$0xff] }
 0x2d9   : > { %v5548_v12 = vcombine.low %v5525_v45, %v5540_v20  ;;  %v5549_v25 = vcombine.high %v5525_v45, %v5540_v20  ;;  %v18671_v61 = vrot.slane %v7604_v11, %v17193_v58  ;;  %v5591_v45 = vrot.slane %v1321_v10, %v17183_v44  ;;  %v18694_v20 = vpop.f32.mrb[25].mxu1 }
 0x2da   : > { %v15917_v0 = vpack.i.bf16 %v5009_v24, %v4209_v46  ;;  %v15805_v5 = vpack.i.bf16 %v5008_v55, %v4208_v19  ;;  %v5564_v6 = vcombine.low %v5532_v62, %v5547_v50  ;;  %v5565_v30 = vcombine.high %v5532_v62, %v5547_v50  ;;  %v18698_v50 = vpop.f32.mrb[26].mxu1 }
 0x2db   : > { %v5556_v21 = vrot.slane %v5548_v12, %v17193_v58  ;;  %v5563_v59 = vrot.slane %v5549_v25, %v17193_v58  ;;  %v7612_v32 = vcombine.low %v18667_v53, %v18671_v61  ;;  %v7613_v42 = vcombine.high %v18667_v53, %v18671_v61  ;;  %v18702_v39 = vpop.f32.mrb[27].mxu1 }
 0x2dc   : > { %15918 = vxpose.xlu1.b32.cont [11/16] %v15917_v0, 128  ;;  %15806 = vxpose.xlu0.b32.cont [11/16] %v15805_v5, 128  ;;  %v5572_v46 = vrot.slane %v5564_v6, %v17193_v58  ;;  %v5579_v19 = vrot.slane %v5565_v30, %v17193_v58  ;;  %v5598_v62 = vrot.slane %v5584_v13, %v17183_v44 }
 0x2dd   : > { %v7614_v36 = vcombine.low %v5556_v21, %v5563_v59  ;;  %v15252_v33 = vcombine.high %v5556_v21, %v5563_v59  ;;  %v22747_v10 = vcombine.low %v22745_v26, %v22746_v23  ;;  %v5599_v51 = vcombine.high %v1323_v37, %v22570_v40  ;;  %22748 = vst [vmem:[#allocation32_spill] sm:$0xff] %v18702_v39 }
 0x2de   : > { %v7630_v55 = vcombine.low %v5572_v46, %v5579_v19  ;;  %v15253_v53 = vcombine.high %v5572_v46, %v5579_v19  ;;  %v5606_v12 = vrot.slane %v1323_v37, %v17183_v44  ;;  %v5650_v5 = vcombine.high %v1325_v16, %v22570_v40 }
 0x2df   : > { %v4217_v43 = vrot.slane %v22747_v10, %v17183_v44  ;;  %v7621_v11 = vrot.slane %v7614_v36, %v17183_v44  ;;  %v7629_v24 = vrot.slane %v15252_v33, %v17183_v44  ;;  %v5613_v13 = vrot.slane %v5599_v51, %v17183_v44 }
 0x2e0   : > { %v7637_v25 = vrot.slane %v7630_v55, %v17183_v44  ;;  %v7645_v61 = vrot.slane %v15253_v53, %v17183_v44  ;;  %v5614_v21 = vcombine.low %v5591_v45, %v5606_v12  ;;  %v5615_v59 = vcombine.high %v5591_v45, %v5606_v12  ;;  %v22751_v55 = vld [vmem:[#allocation56_spill] sm:$0xff] }
 0x2e1   : > { %v7646_v0 = vcombine.low %v7621_v11, %v7629_v24  ;;  %v18709_v6 = vrot.slane %v1325_v16, %v17183_v44  ;;  %v18713_v19 = vrot.slane %v5650_v5, %v17183_v44  ;;  %v22749_v36 = vcombine.high %v22745_v26, %v22746_v23  ;;  %v22750_v24 = vld [vmem:[#allocation55_spill] sm:$0xff] }
 0x2e2   : > { %v7654_v46 = vcombine.low %v7637_v25, %v7645_v61  ;;  %v5622_v37 = vrot.slane %v5614_v21, %v17193_v58  ;;  %v5629_v10 = vrot.slane %v5615_v59, %v17193_v58  ;;  %v5630_v11 = vcombine.low %v5598_v62, %v5613_v13 }
 0x2e3   : > { %v7653_v30 = vrot.slane %v7646_v0, %v17193_v58  ;;  %v4225_v33 = vrot.slane %v22749_v36, %v17183_v44  ;;  %v5631_v45 = vcombine.high %v5598_v62, %v5613_v13  ;;  %v22752_v53 = vcombine.low %v22750_v24, %v22751_v55 }
 0x2e4   : > { %v7661_v16 = vrot.slane %v7654_v46, %v17193_v58  ;;  %v22753_v12 = vcombine.high %v22750_v24, %v22751_v55  ;;  %v5638_v23 = vrot.slane %v5630_v11, %v17193_v58  ;;  %v7664_v0 = vcombine.low %v5622_v37, %v5629_v10 }
 0x2e5   : > { %v4233_v51 = vrot.slane %v22752_v53, %v17183_v44  ;;  %v4242_v26 = vcombine.low %v4217_v43, %v4225_v33  ;;  %v5645_v61 = vrot.slane %v5631_v45, %v17193_v58  ;;  %v15254_v5 = vcombine.high %v5622_v37, %v5629_v10 }
 0x2e6   : > { %v4241_v25 = vrot.slane %v22753_v12, %v17183_v44  ;;  %v7662_v62 = vcombine.low %v7653_v30, %v7661_v16  ;;  %v7663_v13 = vcombine.high %v7653_v30, %v7661_v16  ;;  %v7671_v46 = vrot.slane %v7664_v0, %v17183_v44 }
 0x2e7   : > { %v4249_v21 = vrot.slane %v4242_v26, %v17193_v58  ;;  %v7679_v36 = vrot.slane %v15254_v5, %v17183_v44  ;;  %v7680_v53 = vcombine.low %v5638_v23, %v5645_v61  ;;  %v15255_v39 = vcombine.high %v5638_v23, %v5645_v61  ;;  %v18759_v61 = vpop.f32.mrb[28].mxu1 }
 0x2e8   : > { %v4250_v59 = vcombine.low %v4233_v51, %v4241_v25  ;;  %v9164_v24 = vpack.c.bf16 %v7662_v62, %v7612_v32  ;;  %v9180_v55 = vpack.c.bf16 %v7663_v13, %v7613_v42  ;;  %v22754_v33 = vcombine.low %v18243_v60, %v18250_v54 }
 0x2e9   : > { %v7687_v30 = vrot.slane %v7680_v53, %v17183_v44  ;;  %v7695_v10 = vrot.slane %v15255_v39, %v17183_v44  ;;  %v7696_v11 = vcombine.low %v7671_v46, %v7679_v36  ;;  %v22755_v45 = vcombine.high %v18243_v60, %v18250_v54 }
 0x2ea   : > { %v4257_v43 = vrot.slane %v4250_v59, %v17193_v58  ;;  %v5017_v37 = vrot.slane %v22754_v33, %v17183_v44  ;;  %9196 = vst [vmem:[#allocation3] sm:$0xff] %v9164_v24  ;;  %9212 = vst [vmem:[#allocation3 + $0x80] sm:$0xff] %v9180_v55  ;;  %v22756_v42 = vcombine.low %v18253_v56, %v18268_v9 }
 0x2eb   : > { %v5025_v16 = vrot.slane %v22755_v45, %v17183_v44  ;;  %v22757_v12 = vcombine.high %v18253_v56, %v18268_v9  ;;  %v18755_v26 = vrot.slane %v7696_v11, %v17193_v58  ;;  %v7704_v23 = vcombine.low %v7687_v30, %v7695_v10  ;;  %v18767_v9 = vpop.f32.mrb[29].mxu1 }
 0x2ec   : > { %v4259_v32 = vcombine.high %v4249_v21, %v4257_v43  ;;  %v5033_v51 = vrot.slane %v22756_v42, %v17183_v44  ;;  %v4258_v39 = vcombine.low %v4249_v21, %v4257_v43  ;;  %v1327_v54 = vadd.f32 %v18060_v3, %v18595_v18  ;;  %v18777_v36 = vpop.f32.mrb[30].mxu1 }
 0x2ed   : > { %v5041_v25 = vrot.slane %v22757_v12, %v17183_v44  ;;  %v5042_v60 = vcombine.low %v5017_v37, %v5025_v16  ;;  %v1331_v5 = vadd.f32 %v18122_v28, %v18589_v8  ;;  %v1333_v62 = vadd.f32 %v18134_v17, %v18595_v18  ;;  %v18785_v55 = vpop.f32.mrb[31].mxu1 }
 0x2ee   : > { %v1335_v56 = vadd.f32 %v18155_v7, %v18589_v8  ;;  %v18770_v13 = vrot.slane %v7704_v23, %v17193_v58  ;;  %v5665_v3 = vcombine.high %v1327_v54, %v22570_v40  ;;  %v5672_v46 = vrot.slane %v1327_v54, %v17183_v44 }
 0x2ef   : > { %v5050_v0 = vcombine.low %v5033_v51, %v5041_v25  ;;  %v5049_v21 = vrot.slane %v5042_v60, %v17193_v58  ;;  %v5716_v28 = vcombine.high %v1331_v5, %v22570_v40  ;;  %v5723_v24 = vrot.slane %v1331_v5, %v17183_v44 }
 0x2f0   : > { %v7712_v17 = vcombine.low %v18755_v26, %v18770_v13  ;;  %v7713_v7 = vcombine.high %v18755_v26, %v18770_v13  ;;  %v5679_v53 = vrot.slane %v5665_v3, %v17183_v44  ;;  %v5680_v37 = vcombine.low %v18709_v6, %v5672_v46 }
 0x2f1   : > { %v5057_v59 = vrot.slane %v5050_v0, %v17193_v58  ;;  %v5681_v30 = vcombine.high %v18709_v6, %v5672_v46  ;;  %v5730_v45 = vrot.slane %v5716_v28, %v17183_v44  ;;  %v5731_v60 = vcombine.high %v1333_v62, %v22570_v40 }
 0x2f2   : > { %v5696_v10 = vcombine.low %v18713_v19, %v5679_v53  ;;  %v5697_v11 = vcombine.high %v18713_v19, %v5679_v53  ;;  %v5688_v51 = vrot.slane %v5680_v37, %v17193_v58  ;;  %v5738_v6 = vrot.slane %v1333_v62, %v17183_v44 }
 0x2f3   : > { %v5059_v43 = vcombine.high %v5049_v21, %v5057_v59  ;;  %v5058_v33 = vcombine.low %v5049_v21, %v5057_v59  ;;  %v5695_v12 = vrot.slane %v5681_v30, %v17193_v58  ;;  %v5782_v46 = vcombine.high %v1335_v56, %v22570_v40 }
 0x2f4   : > { %v5704_v25 = vrot.slane %v5696_v10, %v17193_v58  ;;  %v5711_v23 = vrot.slane %v5697_v11, %v17193_v58  ;;  %v5747_v59 = vcombine.high %v5723_v24, %v5738_v6  ;;  %v18807_v10 = vrot.slane %v1335_v56, %v17183_v44 }
 0x2f5   : > { %v15919_v16 = vpack.i.bf16 %v5059_v43, %v4259_v32  ;;  %v15807_v42 = vpack.i.bf16 %v5058_v33, %v4258_v39  ;;  %v7714_v54 = vcombine.low %v5688_v51, %v5695_v12  ;;  %v15256_v19 = vcombine.high %v5688_v51, %v5695_v12  ;;  %v22759_v51 = vld [vmem:[#allocation58_spill] sm:$0xff] }
 0x2f6   : > { %v7730_v0 = vcombine.low %v5704_v25, %v5711_v23  ;;  %v15257_v5 = vcombine.high %v5704_v25, %v5711_v23  ;;  %v5745_v32 = vrot.slane %v5731_v60, %v17183_v44  ;;  %v5746_v39 = vcombine.low %v5723_v24, %v5738_v6 }
 0x2f7   : > { %15920 = vxpose.xlu1.b32.cont [12/16] %v15919_v16, 128  ;;  %15808 = vxpose.xlu0.b32.cont [12/16] %v15807_v42, 128  ;;  %v7721_v21 = vrot.slane %v7714_v54, %v17183_v44  ;;  %v7729_v3 = vrot.slane %v15256_v19, %v17183_v44  ;;  %v5761_v37 = vrot.slane %v5747_v59, %v17193_v58  ;;  %v22758_v42 = vld [vmem:[#allocation57_spill] sm:$0xff]  ;;  %v18832_v59 = vpop.f32.mrb[32].mxu1 }
 0x2f8   : > { %v7737_v28 = vrot.slane %v7730_v0, %v17183_v44  ;;  %v7745_v62 = vrot.slane %v15257_v5, %v17183_v44  ;;  %v5754_v53 = vrot.slane %v5746_v39, %v17193_v58  ;;  %v5762_v43 = vcombine.low %v5730_v45, %v5745_v32  ;;  %v22762_v0 = vld [vmem:[#allocation61_spill] sm:$0xff]  ;;  %v22763_v5 = vld [vmem:[#allocation62_spill] sm:$0xff] }
 0x2f9   : > { %v7746_v33 = vcombine.low %v7721_v21, %v7729_v3  ;;  %v5763_v30 = vcombine.high %v5730_v45, %v5745_v32  ;;  %v18811_v24 = vrot.slane %v5782_v46, %v17183_v44  ;;  %v22760_v12 = vcombine.low %v22758_v42, %v22759_v51 }
 0x2fa   : > { %v7754_v11 = vcombine.low %v7737_v28, %v7745_v62  ;;  %v5770_v16 = vrot.slane %v5762_v43, %v17193_v58  ;;  %v7764_v6 = vcombine.low %v5754_v53, %v5761_v37  ;;  %v15258_v45 = vcombine.high %v5754_v53, %v5761_v37  ;;  %v18836_v43 = vpop.f32.mrb[33].mxu1 }
 0x2fb   : > { %v4267_v25 = vrot.slane %v22760_v12, %v17183_v44  ;;  %v7753_v23 = vrot.slane %v7746_v33, %v17193_v58  ;;  %v5777_v60 = vrot.slane %v5763_v30, %v17193_v58  ;;  %v22761_v54 = vcombine.high %v22758_v42, %v22759_v51 }
 0x2fc   : > { %v7761_v56 = vrot.slane %v7754_v11, %v17193_v58  ;;  %v22764_v32 = vcombine.low %v22762_v0, %v22763_v5  ;;  %v22765_v21 = vcombine.high %v22762_v0, %v22763_v5  ;;  %v7771_v46 = vrot.slane %v7764_v6, %v17183_v44  ;;  %v18844_v0 = vpop.f32.mrb[34].mxu1 }
 0x2fd   : > { %v4275_v19 = vrot.slane %v22761_v54, %v17183_v44  ;;  %v7779_v28 = vrot.slane %v15258_v45, %v17183_v44  ;;  %v7780_v62 = vcombine.low %v5770_v16, %v5777_v60  ;;  %v15259_v53 = vcombine.high %v5770_v16, %v5777_v60  ;;  %v18854_v45 = vpop.f32.mrb[35].mxu1 }
 0x2fe   : > { %v4283_v39 = vrot.slane %v22764_v32, %v17183_v44  ;;  %v4291_v3 = vrot.slane %v22765_v21, %v17183_v44  ;;  %v7762_v33 = vcombine.low %v7753_v23, %v7761_v56  ;;  %v7763_v37 = vcombine.high %v7753_v23, %v7761_v56 }
 0x2ff   : > { %v4292_v30 = vcombine.low %v4267_v25, %v4275_v19  ;;  %v7787_v42 = vrot.slane %v7780_v62, %v17183_v44  ;;  %v7795_v51 = vrot.slane %v15259_v53, %v17183_v44  ;;  %v7796_v12 = vcombine.low %v7771_v46, %v7779_v28 }
 0x300   : > { %v4300_v11 = vcombine.low %v4283_v39, %v4291_v3  ;;  %v22766_v54 = vcombine.low %v18367_v41, %v18370_v15  ;;  %v9165_v16 = vpack.c.bf16 %v7762_v33, %v7712_v17  ;;  %v9181_v25 = vpack.c.bf16 %v7763_v37, %v7713_v7 }
 0x301   : > { %v4299_v23 = vrot.slane %v4292_v30, %v17193_v58  ;;  %v18857_v56 = vrot.slane %v7796_v12, %v17193_v58  ;;  %v7804_v19 = vcombine.low %v7787_v42, %v7795_v51  ;;  %v22767_v5 = vcombine.high %v18367_v41, %v18370_v15 }
 0x302   : > { %v5067_v6 = vrot.slane %v22766_v54, %v17183_v44  ;;  %v4307_v60 = vrot.slane %v4300_v11, %v17193_v58  ;;  %v22768_v26 = vcombine.low %v18376_v38, %v18379_v14  ;;  %9197 = vst [vmem:[#allocation3 + $0x8] sm:$0xff] %v9165_v16  ;;  %9213 = vst [vmem:[#allocation3 + $0x88] sm:$0xff] %v9181_v25 }
 0x303   : > { %v5075_v32 = vrot.slane %v22767_v5, %v17183_v44  ;;  %v22769_v7 = vcombine.high %v18376_v38, %v18379_v14  ;;  %v1337_v3 = vadd.f32 %v18206_v35, %v18595_v18  ;;  %v18874_v41 = vrot.slane %v7804_v19, %v17193_v58 }
 0x304   : > { %v5083_v13 = vrot.slane %v22768_v26, %v17183_v44  ;;  %v4309_v17 = vcombine.high %v4299_v23, %v4307_v60  ;;  %v4308_v21 = vcombine.low %v4299_v23, %v4307_v60  ;;  %v1341_v46 = vadd.f32 %v18278_v48, %v18589_v8 }
 0x305   : > { %v5091_v39 = vrot.slane %v22769_v7, %v17183_v44  ;;  %v5092_v15 = vcombine.low %v5067_v6, %v5075_v32  ;;  %v1343_v28 = vadd.f32 %v18292_v31, %v18595_v18  ;;  %v5797_v53 = vcombine.high %v1337_v3, %v22570_v40 }
 0x306   : > { %v5804_v38 = vrot.slane %v1337_v3, %v17183_v44  ;;  %v7812_v14 = vcombine.low %v18857_v56, %v18874_v41  ;;  %v7813_v35 = vcombine.high %v18857_v56, %v18874_v41  ;;  %v5848_v11 = vcombine.high %v1341_v46, %v22570_v40  ;;  %v22782_v41 = vld [vmem:[#allocation25_spill] sm:$0xff] }
 0x307   : > { %v5100_v62 = vcombine.low %v5083_v13, %v5091_v39  ;;  %v5099_v33 = vrot.slane %v5092_v15, %v17193_v58  ;;  %v5811_v48 = vrot.slane %v5797_v53, %v17183_v44  ;;  %v5855_v42 = vrot.slane %v1341_v46, %v17183_v44 }
 0x308   : > { %v5812_v30 = vcombine.low %v18807_v10, %v5804_v38  ;;  %v5813_v31 = vcombine.high %v18807_v10, %v5804_v38  ;;  %v5863_v51 = vcombine.high %v1343_v28, %v22570_v40  ;;  %v5862_v60 = vrot.slane %v5848_v11, %v17183_v44 }
 0x309   : > { %v5107_v37 = vrot.slane %v5100_v62, %v17193_v58  ;;  %v5828_v25 = vcombine.low %v18811_v24, %v5811_v48  ;;  %v5829_v23 = vcombine.high %v18811_v24, %v5811_v48  ;;  %v5870_v10 = vrot.slane %v1343_v28, %v17183_v44  ;;  %v18905_v62 = vpop.f32.mrb[36].mxu1 }
 0x30a   : > { %v5820_v6 = vrot.slane %v5812_v30, %v17193_v58  ;;  %v5827_v16 = vrot.slane %v5813_v31, %v17193_v58  ;;  %v5877_v39 = vrot.slane %v5863_v51, %v17183_v44  ;;  %v18908_v38 = vpop.f32.mrb[37].mxu1  ;;  %v1345_v30 = vadd.f32 %v18302_v52, %v18589_v8  ;;  %v22770_v51 = vld [vmem:[#allocation59_spill] sm:$0xff] }
 0x30b   : > { %v5109_v12 = vcombine.high %v5099_v33, %v5107_v37  ;;  %v5108_v54 = vcombine.low %v5099_v33, %v5107_v37  ;;  %v5836_v13 = vrot.slane %v5828_v25, %v17193_v58  ;;  %v5843_v7 = vrot.slane %v5829_v23, %v17193_v58 }
 0x30c   : > { %v7814_v32 = vcombine.low %v5820_v6, %v5827_v16  ;;  %v15260_v26 = vcombine.high %v5820_v6, %v5827_v16  ;;  %v5878_v3 = vcombine.low %v5855_v42, %v5870_v10  ;;  %v5879_v46 = vcombine.high %v5855_v42, %v5870_v10  ;;  %v18922_v10 = vpop.f32.mrb[38].mxu1 }
 0x30d   : > { %v15921_v19 = vpack.i.bf16 %v5109_v12, %v4309_v17  ;;  %v15809_v5 = vpack.i.bf16 %v5108_v54, %v4308_v21  ;;  %v7830_v17 = vcombine.low %v5836_v13, %v5843_v7  ;;  %v15261_v21 = vcombine.high %v5836_v13, %v5843_v7  ;;  %v22771_v12 = vld [vmem:[#allocation60_spill] sm:$0xff] }
 0x30e   : > { %v7821_v15 = vrot.slane %v7814_v32, %v17183_v44  ;;  %v7829_v24 = vrot.slane %v15260_v26, %v17183_v44  ;;  %v5886_v28 = vrot.slane %v5878_v3, %v17193_v58  ;;  %v5894_v53 = vcombine.low %v5862_v60, %v5877_v39  ;;  %v18926_v32 = vpop.f32.mrb[39].mxu1 }
 0x30f   : > { %15922 = vxpose.xlu1.b32.cont [13/16] %v15921_v19, 128  ;;  %15810 = vxpose.xlu0.b32.cont [13/16] %v15809_v5, 128  ;;  %v5893_v37 = vrot.slane %v5879_v46, %v17193_v58  ;;  %v5895_v48 = vcombine.high %v5862_v60, %v5877_v39  ;;  %v7837_v31 = vrot.slane %v7830_v17, %v17183_v44  ;;  %v22774_v17 = vld [vmem:[#allocation63_spill] sm:$0xff] }
 0x310   : > { %v7846_v33 = vcombine.low %v7821_v15, %v7829_v24  ;;  %v7845_v11 = vrot.slane %v15261_v21, %v17183_v44  ;;  %v5902_v42 = vrot.slane %v5894_v53, %v17193_v58  ;;  %v22772_v54 = vcombine.low %v22770_v51, %v22771_v12  ;;  %v22775_v21 = vld [vmem:[#allocation64_spill] sm:$0xff] }
 0x311   : > { %v5909_v25 = vrot.slane %v5895_v48, %v17193_v58  ;;  %v7864_v23 = vcombine.low %v5886_v28, %v5893_v37  ;;  %v15262_v60 = vcombine.high %v5886_v28, %v5893_v37  ;;  %v5914_v19 = vcombine.high %v1345_v30, %v22570_v40 }
 0x312   : > { %v4317_v6 = vrot.slane %v22772_v54, %v17183_v44  ;;  %v7853_v16 = vrot.slane %v7846_v33, %v17193_v58  ;;  %v7854_v52 = vcombine.low %v7837_v31, %v7845_v11  ;;  %v5921_v5 = vrot.slane %v1345_v30, %v17183_v44 }
 0x313   : > { %v7871_v26 = vrot.slane %v7864_v23, %v17183_v44  ;;  %v7879_v13 = vrot.slane %v15262_v60, %v17183_v44  ;;  %v7880_v7 = vcombine.low %v5902_v42, %v5909_v25  ;;  %v15263_v39 = vcombine.high %v5902_v42, %v5909_v25 }
 0x314   : > { %v7861_v3 = vrot.slane %v7854_v52, %v17193_v58  ;;  %v5928_v15 = vrot.slane %v5914_v19, %v17183_v44  ;;  %v22773_v24 = vcombine.high %v22770_v51, %v22771_v12  ;;  %v22776_v28 = vcombine.low %v22774_v17, %v22775_v21 }
 0x315   : > { %v7887_v33 = vrot.slane %v7880_v7, %v17183_v44  ;;  %v7895_v37 = vrot.slane %v15263_v39, %v17183_v44  ;;  %v7896_v48 = vcombine.low %v7871_v26, %v7879_v13  ;;  %v22777_v30 = vcombine.high %v22774_v17, %v22775_v21  ;;  %v22784_v17 = vld [vmem:[#allocation29_spill] sm:$0xff] }
 0x316   : > { %v4325_v46 = vrot.slane %v22773_v24, %v17183_v44  ;;  %v4333_v53 = vrot.slane %v22776_v28, %v17183_v44  ;;  %v7862_v11 = vcombine.low %v7853_v16, %v7861_v3  ;;  %v7863_v42 = vcombine.high %v7853_v16, %v7861_v3  ;;  %v22783_v24 = vld [vmem:[#allocation26_spill] sm:$0xff] }
 0x317   : > { %v4341_v31 = vrot.slane %v22777_v30, %v17183_v44  ;;  %v22778_v51 = vcombine.low %v18373_v29, %v18386_v2  ;;  %v18951_v25 = vrot.slane %v7896_v48, %v17193_v58  ;;  %v7904_v23 = vcombine.low %v7887_v33, %v7895_v37 }
 0x318   : > { %v4342_v54 = vcombine.low %v4317_v6, %v4325_v46  ;;  %v22779_v52 = vcombine.high %v18373_v29, %v18386_v2  ;;  %v9166_v16 = vpack.c.bf16 %v7862_v11, %v7812_v14  ;;  %v9182_v6 = vpack.c.bf16 %v7863_v42, %v7813_v35  ;;  %v18993_v11 = vpop.f32.mrb[40].mxu1 }
 0x319   : > { %v5117_v12 = vrot.slane %v22778_v51, %v17183_v44  ;;  %v4350_v60 = vcombine.low %v4333_v53, %v4341_v31  ;;  %v22780_v13 = vcombine.low %v18401_v57, %v18404_v1  ;;  %v18969_v39 = vrot.slane %v7904_v23, %v17193_v58 }
 0x31a   : > { %v5125_v19 = vrot.slane %v22779_v52, %v17183_v44  ;;  %v4349_v26 = vrot.slane %v4342_v54, %v17193_v58  ;;  %v22781_v2 = vcombine.high %v18401_v57, %v18404_v1  ;;  %9198 = vst [vmem:[#allocation3 + $0x10] sm:$0xff] %v9166_v16  ;;  %9214 = vst [vmem:[#allocation3 + $0x90] sm:$0xff] %v9182_v6 }
 0x31b   : > { %v5133_v7 = vrot.slane %v22780_v13, %v17183_v44  ;;  %v4357_v29 = vrot.slane %v4350_v60, %v17193_v58  ;;  %v1347_v56 = vadd.f32 %v18353_v4, %v18595_v18  ;;  %v1351_v35 = vadd.f32 %v22782_v41, %v18589_v8 }
 0x31c   : > { %v5141_v14 = vrot.slane %v22781_v2, %v17183_v44  ;;  %v5142_v3 = vcombine.low %v5117_v12, %v5125_v19  ;;  %v1353_v46 = vadd.f32 %v22783_v24, %v18595_v18  ;;  %v1355_v21 = vadd.f32 %v22784_v17, %v18589_v8  ;;  %v18998_v12 = vpop.f32.mrb[41].mxu1 }
 0x31d   : > { %v7912_v28 = vcombine.low %v18951_v25, %v18969_v39  ;;  %v7913_v57 = vcombine.high %v18951_v25, %v18969_v39  ;;  %v4359_v1 = vcombine.high %v4349_v26, %v4357_v29  ;;  %v4358_v4 = vcombine.low %v4349_v26, %v4357_v29  ;;  %v22797_v39 = vld [vmem:[#allocation30_spill] sm:$0xff] }
 0x31e   : > { %v5149_v53 = vrot.slane %v5142_v3, %v17193_v58  ;;  %v5150_v33 = vcombine.low %v5133_v7, %v5141_v14  ;;  %v5929_v37 = vcombine.high %v1347_v56, %v22570_v40  ;;  %v5936_v48 = vrot.slane %v1347_v56, %v17183_v44  ;;  %v19002_v7 = vpop.f32.mrb[42].mxu1 }
 0x31f   : > { %v5980_v30 = vcombine.high %v1351_v35, %v22570_v40  ;;  %v5987_v31 = vrot.slane %v1351_v35, %v17183_v44  ;;  %v5995_v51 = vcombine.high %v1353_v46, %v22570_v40  ;;  %v6002_v19 = vrot.slane %v1353_v46, %v17183_v44  ;;  %v19007_v56 = vpop.f32.mrb[43].mxu1 }
 0x320   : > { %v5157_v42 = vrot.slane %v5150_v33, %v17193_v58  ;;  %v5943_v54 = vrot.slane %v5929_v37, %v17183_v44  ;;  %v5944_v23 = vcombine.low %v5921_v5, %v5936_v48  ;;  %v5945_v60 = vcombine.high %v5921_v5, %v5936_v48 }
 0x321   : > { %v5994_v52 = vrot.slane %v5980_v30, %v17183_v44  ;;  %v6009_v14 = vrot.slane %v5995_v51, %v17183_v44  ;;  %v6010_v3 = vcombine.low %v5987_v31, %v6002_v19 }
 0x322   : > { %v5159_v16 = vcombine.high %v5149_v53, %v5157_v42  ;;  %v5158_v6 = vcombine.low %v5149_v53, %v5157_v42  ;;  %v5960_v26 = vcombine.low %v5928_v15, %v5943_v54  ;;  %v5961_v13 = vcombine.high %v5928_v15, %v5943_v54  ;;  %v19015_v54 = vpop.f32.mrb[44].mxu1 }
 0x323   : > { %v5952_v29 = vrot.slane %v5944_v23, %v17193_v58  ;;  %v5959_v2 = vrot.slane %v5945_v60, %v17193_v58  ;;  %v6011_v15 = vcombine.high %v5987_v31, %v6002_v19  ;;  %v6018_v53 = vrot.slane %v6010_v3, %v17193_v58  ;;  %v19020_v60 = vpop.f32.mrb[45].mxu1  ;;  %v22786_v3 = vld [vmem:[#allocation66_spill] sm:$0xff] }
 0x324   : > { %v15923_v5 = vpack.i.bf16 %v5159_v16, %v4359_v1  ;;  %v15811_v41 = vpack.i.bf16 %v5158_v6, %v4358_v4  ;;  %v5968_v35 = vrot.slane %v5960_v26, %v17193_v58  ;;  %v5975_v24 = vrot.slane %v5961_v13, %v17193_v58  ;;  %v19023_v13 = vpop.f32.mrb[46].mxu1 }
 0x325   : > { %v7914_v46 = vcombine.low %v5952_v29, %v5959_v2  ;;  %v15264_v17 = vcombine.high %v5952_v29, %v5959_v2  ;;  %v6026_v48 = vcombine.low %v5994_v52, %v6009_v14  ;;  %v6025_v1 = vrot.slane %v6011_v15, %v17193_v58 }
 0x326   : > { %15924 = vxpose.xlu1.b32.cont [14/16] %v15923_v5, 128  ;;  %15812 = vxpose.xlu0.b32.cont [14/16] %v15811_v41, 128  ;;  %v7930_v33 = vcombine.low %v5968_v35, %v5975_v24  ;;  %v15265_v37 = vcombine.high %v5968_v35, %v5975_v24  ;;  %v6027_v4 = vcombine.high %v5994_v52, %v6009_v14  ;;  %v22785_v14 = vld [vmem:[#allocation65_spill] sm:$0xff]  ;;  %v19033_v35 = vpop.f32.mrb[47].mxu1 }
 0x327   : > { %v7921_v30 = vrot.slane %v7914_v46, %v17183_v44  ;;  %v7929_v42 = vrot.slane %v15264_v17, %v17183_v44  ;;  %v6034_v23 = vrot.slane %v6026_v48, %v17193_v58  ;;  %v7964_v6 = vcombine.low %v6018_v53, %v6025_v1 }
 0x328   : > { %v7937_v51 = vrot.slane %v7930_v33, %v17183_v44  ;;  %v7945_v31 = vrot.slane %v15265_v37, %v17183_v44  ;;  %v6041_v16 = vrot.slane %v6027_v4, %v17193_v58  ;;  %v15266_v26 = vcombine.high %v6018_v53, %v6025_v1  ;;  %v19038_v53 = vpop.f32.mrb[48].mxu1 }
 0x329   : > { %v7946_v19 = vcombine.low %v7921_v30, %v7929_v42  ;;  %v6046_v52 = vcombine.high %v1355_v21, %v22570_v40  ;;  %v19027_v2 = vrot.slane %v1355_v21, %v17183_v44  ;;  %v22787_v5 = vcombine.low %v22785_v14, %v22786_v3  ;;  %v19046_v42 = vpop.f32.mrb[49].mxu1 }
 0x32a   : > { %v7954_v29 = vcombine.low %v7937_v51, %v7945_v31  ;;  %v7971_v46 = vrot.slane %v7964_v6, %v17183_v44  ;;  %v7979_v17 = vrot.slane %v15266_v26, %v17183_v44  ;;  %v7980_v15 = vcombine.low %v6034_v23, %v6041_v16  ;;  %v22789_v51 = vld [vmem:[#allocation69_spill] sm:$0xff]  ;;  %v22790_v31 = vld [vmem:[#allocation70_spill] sm:$0xff] }
 0x32b   : > { %v4367_v41 = vrot.slane %v22787_v5, %v17183_v44  ;;  %v7953_v24 = vrot.slane %v7946_v19, %v17193_v58  ;;  %v15267_v21 = vcombine.high %v6034_v23, %v6041_v16  ;;  %v6060_v37 = vrot.slane %v6046_v52, %v17183_v44 }
 0x32c   : > { %v7961_v33 = vrot.slane %v7954_v29, %v17193_v58  ;;  %v22788_v48 = vcombine.high %v22785_v14, %v22786_v3  ;;  %v7987_v1 = vrot.slane %v7980_v15, %v17183_v44  ;;  %v7996_v4 = vcombine.low %v7971_v46, %v7979_v17 }
 0x32d   : > { %v22791_v19 = vcombine.low %v22789_v51, %v22790_v31  ;;  %v22792_v23 = vcombine.high %v22789_v51, %v22790_v31  ;;  %v7995_v52 = vrot.slane %v15267_v21, %v17183_v44  ;;  %v22793_v46 = vcombine.low %v18504_v27, %v18507_v34 }
 0x32e   : > { %v4375_v30 = vrot.slane %v22788_v48, %v17183_v44  ;;  %v7962_v26 = vcombine.low %v7953_v24, %v7961_v33  ;;  %v7963_v29 = vcombine.high %v7953_v24, %v7961_v33  ;;  %v19059_v3 = vrot.slane %v7996_v4, %v17193_v58 }
 0x32f   : > { %v4383_v6 = vrot.slane %v22791_v19, %v17183_v44  ;;  %v4391_v16 = vrot.slane %v22792_v23, %v17183_v44  ;;  %v5167_v17 = vrot.slane %v22793_v46, %v17183_v44  ;;  %v22794_v15 = vcombine.high %v18504_v27, %v18507_v34  ;;  %v22799_v19 = vld [vmem:[#allocation28_spill] sm:$0xff]  ;;  %v19094_v23 = vpop.f32.mrb[50].mxu1 }
 0x330   : > { %v4392_v14 = vcombine.low %v4367_v41, %v4375_v30  ;;  %v9167_v24 = vpack.c.bf16 %v7962_v26, %v7912_v28  ;;  %v9183_v41 = vpack.c.bf16 %v7963_v29, %v7913_v57  ;;  %v8004_v33 = vcombine.low %v7987_v1, %v7995_v52  ;;  %v22798_v1 = vld [vmem:[#allocation27_spill] sm:$0xff]  ;;  %v19097_v29 = vpop.f32.mrb[51].mxu1 }
 0x331   : > { %v4400_v5 = vcombine.low %v4383_v6, %v4391_v16  ;;  %v5175_v48 = vrot.slane %v22794_v15, %v17183_v44  ;;  %v22795_v4 = vcombine.low %v18512_v22, %v18515_v49  ;;  %v22796_v27 = vcombine.high %v18512_v22, %v18515_v49 }
 0x332   : > { %v4399_v21 = vrot.slane %v4392_v14, %v17193_v58  ;;  %9199 = vst [vmem:[#allocation3 + $0x18] sm:$0xff] %v9167_v24  ;;  %9215 = vst [vmem:[#allocation3 + $0x98] sm:$0xff] %v9183_v41  ;;  %v19086_v25 = vrot.slane %v8004_v33, %v17193_v58  ;;  %v1357_v57 = vadd.f32 %v22797_v39, %v18595_v18 }
 0x333   : > { %v4407_v30 = vrot.slane %v4400_v5, %v17193_v58  ;;  %v5183_v51 = vrot.slane %v22795_v4, %v17183_v44  ;;  %v5191_v34 = vrot.slane %v22796_v27, %v17183_v44  ;;  %v5192_v28 = vcombine.low %v5167_v17, %v5175_v48 }
 0x334   : > { %v1361_v31 = vadd.f32 %v22798_v1, %v18589_v8  ;;  %v1363_v6 = vadd.f32 %v22799_v19, %v18595_v18  ;;  %v8012_v52 = vcombine.low %v19059_v3, %v19086_v25  ;;  %v8013_v14 = vcombine.high %v19059_v3, %v19086_v25  ;;  %v19116_v19 = vpop.f32.mrb[52].mxu1 }
 0x335   : > { %v4409_v16 = vcombine.high %v4399_v21, %v4407_v30  ;;  %v5199_v22 = vrot.slane %v5192_v28, %v17193_v58  ;;  %v5200_v49 = vcombine.low %v5183_v51, %v5191_v34  ;;  %v4408_v26 = vcombine.low %v4399_v21, %v4407_v30 }
 0x336   : > { %v6061_v5 = vcombine.high %v1357_v57, %v22570_v40  ;;  %v6068_v17 = vrot.slane %v1357_v57, %v17183_v44  ;;  %v6112_v15 = vcombine.high %v1361_v31, %v22570_v40  ;;  %v6119_v24 = vrot.slane %v1361_v31, %v17183_v44 }
 0x337   : > { %v5207_v46 = vrot.slane %v5200_v49, %v17193_v58  ;;  %v6127_v41 = vcombine.high %v1363_v6, %v22570_v40  ;;  %v6134_v28 = vrot.slane %v1363_v6, %v17183_v44 }
 0x338   : > { %v6075_v48 = vrot.slane %v6061_v5, %v17183_v44  ;;  %v6076_v30 = vcombine.low %v19027_v2, %v6068_v17  ;;  %v6077_v4 = vcombine.high %v19027_v2, %v6068_v17  ;;  %v6126_v34 = vrot.slane %v6112_v15, %v17183_v44 }
 0x339   : > { %v5209_v33 = vcombine.high %v5199_v22, %v5207_v46  ;;  %v5208_v21 = vcombine.low %v5199_v22, %v5207_v46  ;;  %v6141_v2 = vrot.slane %v6127_v41, %v17183_v44  ;;  %v6142_v5 = vcombine.low %v6119_v24, %v6134_v28 }
 0x33a   : > { %v6092_v51 = vcombine.low %v6060_v37, %v6075_v48  ;;  %v6093_v27 = vcombine.high %v6060_v37, %v6075_v48  ;;  %v6084_v1 = vrot.slane %v6076_v30, %v17193_v58  ;;  %v6091_v31 = vrot.slane %v6077_v4, %v17193_v58  ;;  %v19125_v4 = vpop.f32.mrb[53].mxu1 }
 0x33b   : > { %v15925_v39 = vpack.i.bf16 %v5209_v33, %v4409_v16  ;;  %v15813_v57 = vpack.i.bf16 %v5208_v21, %v4408_v26  ;;  %v6143_v6 = vcombine.high %v6119_v24, %v6134_v28  ;;  %v6150_v17 = vrot.slane %v6142_v5, %v17193_v58 }
 0x33c   : > { %v6100_v22 = vrot.slane %v6092_v51, %v17193_v58  ;;  %v6107_v49 = vrot.slane %v6093_v27, %v17193_v58  ;;  %v8014_v37 = vcombine.low %v6084_v1, %v6091_v31  ;;  %v15268_v46 = vcombine.high %v6084_v1, %v6091_v31  ;;  %v22800_v27 = vld [vmem:[#allocation31_spill] sm:$0xff] }
 0x33d   : > { %15926 = vxpose.xlu1.b32.cont [15/16] %v15925_v39, 128  ;;  %15814 = vxpose.xlu0.b32.cont [15/16] %v15813_v57, 128  ;;  %v6158_v15 = vcombine.low %v6126_v34, %v6141_v2  ;;  %v6157_v21 = vrot.slane %v6143_v6, %v17193_v58  ;;  %v6159_v30 = vcombine.high %v6126_v34, %v6141_v2 }
 0x33e   : > { %v8030_v16 = vcombine.low %v6100_v22, %v6107_v49  ;;  %v15269_v26 = vcombine.high %v6100_v22, %v6107_v49  ;;  %v8021_v48 = vrot.slane %v8014_v37, %v17183_v44  ;;  %v8029_v33 = vrot.slane %v15268_v46, %v17183_v44 }
 0x33f   : > { %v6166_v24 = vrot.slane %v6158_v15, %v17193_v58  ;;  %v1365_v28 = vadd.f32 %v22800_v27, %v18589_v8  ;;  %v6173_v57 = vrot.slane %v6159_v30, %v17193_v58  ;;  %v8064_v1 = vcombine.low %v6150_v17, %v6157_v21  ;;  %v22802_v15 = vld [vmem:[#allocation68_spill] sm:$0xff]  ;;  %v22805_v27 = vld [vmem:[#allocation71_spill] sm:$0xff] }
 0x340   : > { %v8037_v41 = vrot.slane %v8030_v16, %v17183_v44  ;;  %v8045_v51 = vrot.slane %v15269_v26, %v17183_v44  ;;  %v8046_v39 = vcombine.low %v8021_v48, %v8029_v33  ;;  %v15270_v31 = vcombine.high %v6150_v17, %v6157_v21  ;;  %v22801_v17 = vld [vmem:[#allocation67_spill] sm:$0xff] }
 0x341   : > { %v6178_v49 = vcombine.high %v1365_v28, %v22570_v40  ;;  %v19135_v34 = vrot.slane %v1365_v28, %v17183_v44  ;;  %v8071_v5 = vrot.slane %v8064_v1, %v17183_v44  ;;  %v8080_v46 = vcombine.low %v6166_v24, %v6173_v57  ;;  %v22806_v28 = vld [vmem:[#allocation72_spill] sm:$0xff] }
 0x342   : > { %v8054_v22 = vcombine.low %v8037_v41, %v8045_v51  ;;  %v8053_v2 = vrot.slane %v8046_v39, %v17193_v58  ;;  %v8079_v37 = vrot.slane %v15270_v31, %v17183_v44  ;;  %v15271_v16 = vcombine.high %v6166_v24, %v6173_v57  ;;  %v19157_v57 = vpop.f32.mrb[54].mxu1 }
 0x343   : > { %v19142_v26 = vrot.slane %v6178_v49, %v17183_v44  ;;  %v22803_v48 = vcombine.low %v22801_v17, %v22802_v15  ;;  %v8087_v21 = vrot.slane %v8080_v46, %v17183_v44  ;;  %v22804_v41 = vcombine.high %v22801_v17, %v22802_v15  ;;  %v22810_v15 = vld [vmem:[#allocation78_spill] sm:$0xff] }
 0x344   : > { %v8061_v6 = vrot.slane %v8054_v22, %v17193_v58  ;;  %v8096_v30 = vcombine.low %v8071_v5, %v8079_v37  ;;  %v22807_v24 = vcombine.low %v22805_v27, %v22806_v28  ;;  %v8095_v22 = vrot.slane %v15271_v16, %v17183_v44  ;;  %v19164_v37 = vpop.f32.mrb[55].mxu1 }
 0x345   : > { %v4417_v33 = vrot.slane %v22803_v48, %v17183_v44  ;;  %v4425_v51 = vrot.slane %v22804_v41, %v17183_v44  ;;  %v22808_v49 = vcombine.high %v22805_v27, %v22806_v28  ;;  %22809 = vst [vmem:[#allocation84_spill] sm:$0xff] %v19164_v37  ;;  %v22811_v48 = vld [vmem:[#allocation75_spill] sm:$0xff]  ;;  %v22814_v28 = vld [vmem:[#allocation76_spill] sm:$0xff] }
 0x346   : > { %v4433_v39 = vrot.slane %v22807_v24, %v17183_v44  ;;  %v8062_v1 = vcombine.low %v8053_v2, %v8061_v6  ;;  %v8063_v31 = vcombine.high %v8053_v2, %v8061_v6  ;;  %v19167_v46 = vrot.slane %v8096_v30, %v17193_v58 }
 0x347   : > { %v4441_v5 = vrot.slane %v22808_v49, %v17183_v44  ;;  %v4442_v17 = vcombine.low %v4417_v33, %v4425_v51  ;;  %v22812_v41 = vcombine.low %v22810_v15, %v22811_v48  ;;  %v22813_v2 = vcombine.high %v22810_v15, %v22811_v48  ;;  %v22815_v49 = vld [vmem:[#allocation77_spill] sm:$0xff] }
 0x348   : > { %v9168_v16 = vpack.c.bf16 %v8062_v1, %v8012_v52  ;;  %v9184_v30 = vpack.c.bf16 %v8063_v31, %v8013_v14  ;;  %v8104_v27 = vcombine.low %v8087_v21, %v8095_v22  ;;  %v22817_v15 = vcombine.high %v22814_v28, %v22815_v49  ;;  %v19200_v21 = vpop.f32.mrb[56].mxu1 }
 0x349   : > { %v5217_v24 = vrot.slane %v22812_v41, %v17183_v44  ;;  %v5225_v6 = vrot.slane %v22813_v2, %v17183_v44  ;;  %v4450_v33 = vcombine.low %v4433_v39, %v4441_v5  ;;  %v4449_v51 = vrot.slane %v4442_v17, %v17193_v58 }
 0x34a   : > { %v22816_v41 = vcombine.low %v22814_v28, %v22815_v49  ;;  %v5241_v48 = vrot.slane %v22817_v15, %v17183_v44  ;;  %9200 = vst [vmem:[#allocation3 + $0x20] sm:$0xff] %v9168_v16  ;;  %9216 = vst [vmem:[#allocation3 + $0xa0] sm:$0xff] %v9184_v30  ;;  %v19193_v3 = vrot.slane %v8104_v27, %v17193_v58 }
 0x34b   : > { %v5242_v2 = vcombine.low %v5217_v24, %v5225_v6  ;;  %v4457_v25 = vrot.slane %v4450_v33, %v17193_v58  ;;  %v1367_v52 = vadd.f32 %v18629_v47, %v18595_v18  ;;  %v1371_v14 = vadd.f32 %v18683_v63, %v18589_v8 }
 0x34c   : > { %v5233_v37 = vrot.slane %v22816_v41, %v17183_v44  ;;  %v1373_v31 = vadd.f32 %v18694_v20, %v18595_v18  ;;  %v1375_v22 = vadd.f32 %v18698_v50, %v18589_v8  ;;  %v8112_v5 = vcombine.low %v19167_v46, %v19193_v3 }
 0x34d   : > { %v5249_v39 = vrot.slane %v5242_v2, %v17193_v58  ;;  %v8113_v47 = vcombine.high %v19167_v46, %v19193_v3  ;;  %v4459_v17 = vcombine.high %v4449_v51, %v4457_v25  ;;  %v4458_v24 = vcombine.low %v4449_v51, %v4457_v25 }
 0x34e   : > { %v5250_v1 = vcombine.low %v5233_v37, %v5241_v48  ;;  %v6193_v6 = vcombine.high %v1367_v52, %v22570_v40  ;;  %v6200_v37 = vrot.slane %v1367_v52, %v17183_v44  ;;  %v6244_v16 = vcombine.high %v1371_v14, %v22570_v40  ;;  %v19224_v52 = vpop.f32.mrb[57].mxu1 }
 0x34f   : > { %v6251_v20 = vrot.slane %v1371_v14, %v17183_v44  ;;  %v6259_v50 = vcombine.high %v1373_v31, %v22570_v40  ;;  %v6266_v41 = vrot.slane %v1373_v31, %v17183_v44  ;;  %v1383_v46 = vadd.f32 %v18767_v9, %v18595_v18 }
 0x350   : > { %v5257_v63 = vrot.slane %v5250_v1, %v17193_v58  ;;  %v6207_v33 = vrot.slane %v6193_v6, %v17183_v44  ;;  %v6208_v28 = vcombine.low %v19135_v34, %v6200_v37  ;;  %v6209_v51 = vcombine.high %v19135_v34, %v6200_v37 }
 0x351   : > { %v6258_v49 = vrot.slane %v6244_v16, %v17183_v44  ;;  %v6273_v1 = vrot.slane %v6259_v50, %v17183_v44  ;;  %v6275_v31 = vcombine.high %v6251_v20, %v6266_v41  ;;  %v19232_v16 = vpop.f32.mrb[58].mxu1  ;;  %v6310_v50 = vcombine.high %v1375_v22, %v22570_v40 }
 0x352   : > { %v5259_v30 = vcombine.high %v5249_v39, %v5257_v63  ;;  %v5258_v27 = vcombine.low %v5249_v39, %v5257_v63  ;;  %v6216_v2 = vrot.slane %v6208_v28, %v17193_v58  ;;  %v6224_v25 = vcombine.low %v19142_v26, %v6207_v33 }
 0x353   : > { %v6223_v14 = vrot.slane %v6209_v51, %v17193_v58  ;;  %v6225_v39 = vcombine.high %v19142_v26, %v6207_v33  ;;  %v6274_v63 = vcombine.low %v6251_v20, %v6266_v41  ;;  %v6291_v26 = vcombine.high %v6258_v49, %v6273_v1  ;;  %v19238_v41 = vpop.f32.mrb[59].mxu1 }
 0x354   : > { %v15927_v15 = vpack.i.bf16 %v5259_v30, %v4459_v17  ;;  %v15815_v48 = vpack.i.bf16 %v5258_v27, %v4458_v24  ;;  %v6232_v34 = vrot.slane %v6224_v25, %v17193_v58  ;;  %v6289_v30 = vrot.slane %v6275_v31, %v17193_v58 }
 0x355   : > { %v6239_v17 = vrot.slane %v6225_v39, %v17193_v58  ;;  %v8114_v24 = vcombine.low %v6216_v2, %v6223_v14  ;;  %v15272_v6 = vcombine.high %v6216_v2, %v6223_v14  ;;  %v6282_v37 = vrot.slane %v6274_v63, %v17193_v58 }
 0x356   : > { %15928 = vxpose.xlu1.b32.end [16/16] %v15927_v15, 128  ;;  %15816 = vxpose.xlu0.b32.end [16/16] %v15815_v48, 128  ;;  %v6290_v27 = vcombine.low %v6258_v49, %v6273_v1  ;;  %v6305_v48 = vrot.slane %v6291_v26, %v17193_v58  ;;  %v6317_v1 = vrot.slane %v1375_v22, %v17183_v44  ;;  %v19251_v26 = vpop.f32.mrb[60].mxu1 }
 0x357   : > { %v8121_v33 = vrot.slane %v8114_v24, %v17183_v44  ;;  %v8129_v28 = vrot.slane %v15272_v6, %v17183_v44  ;;  %v8130_v51 = vcombine.low %v6232_v34, %v6239_v17  ;;  %v15273_v20 = vcombine.high %v6232_v34, %v6239_v17 }
 0x358   : > { %v6298_v15 = vrot.slane %v6290_v27, %v17193_v58  ;;  %v8164_v2 = vcombine.low %v6282_v37, %v6289_v30  ;;  %v15274_v25 = vcombine.high %v6282_v37, %v6289_v30  ;;  %v6324_v27 = vrot.slane %v6310_v50, %v17183_v44  ;;  %v22818_v37 = vld [vmem:[#allocation32_spill] sm:$0xff] }
 0x359   : > { %v8137_v14 = vrot.slane %v8130_v51, %v17183_v44  ;;  %v8145_v49 = vrot.slane %v15273_v20, %v17183_v44  ;;  %v8146_v39 = vcombine.low %v8121_v33, %v8129_v28  ;;  %v1377_v30 = vadd.f32 %v22818_v37, %v18595_v18 }
 0x35a   : > { %v8171_v63 = vrot.slane %v8164_v2, %v17183_v44  ;;  %v8179_v31 = vrot.slane %v15274_v25, %v17183_v44  ;;  %v8180_v34 = vcombine.low %v6298_v15, %v6305_v48  ;;  %v15275_v17 = vcombine.high %v6298_v15, %v6305_v48 }
 0x35b   : > { %v8153_v24 = vrot.slane %v8146_v39, %v17193_v58  ;;  %v8154_v6 = vcombine.low %v8137_v14, %v8145_v49  ;;  %v1381_v51 = vadd.f32 %v18759_v61, %v18589_v8  ;;  %v6325_v15 = vcombine.high %v1377_v30, %v22570_v40 }
 0x35c   : > { %v8187_v33 = vrot.slane %v8180_v34, %v17183_v44  ;;  %v8195_v22 = vrot.slane %v15275_v17, %v17183_v44  ;;  %v8196_v28 = vcombine.low %v8171_v63, %v8179_v31  ;;  %v6332_v48 = vrot.slane %v1377_v30, %v17183_v44 }
 0x35d   : > { %v8161_v20 = vrot.slane %v8154_v6, %v17193_v58  ;;  %v6376_v25 = vcombine.high %v1381_v51, %v22570_v40  ;;  %v6339_v39 = vrot.slane %v6325_v15, %v17183_v44  ;;  %v6383_v34 = vrot.slane %v1381_v51, %v17183_v44  ;;  %v19289_v51 = vpop.f32.mrb[61].mxu1 }
 0x35e   : > { %v19261_v50 = vrot.slane %v8196_v28, %v17193_v58  ;;  %v8204_v2 = vcombine.low %v8187_v33, %v8195_v22  ;;  %v6340_v63 = vcombine.low %v6317_v1, %v6332_v48  ;;  %v6341_v61 = vcombine.high %v6317_v1, %v6332_v48 }
 0x35f   : > { %v8162_v14 = vcombine.low %v8153_v24, %v8161_v20  ;;  %v8163_v49 = vcombine.high %v8153_v24, %v8161_v20  ;;  %v6390_v17 = vrot.slane %v6376_v25, %v17183_v44  ;;  %v6356_v30 = vcombine.low %v6324_v27, %v6339_v39 }
 0x360   : > { %v19266_v31 = vrot.slane %v8204_v2, %v17193_v58  ;;  %v6348_v24 = vrot.slane %v6340_v63, %v17193_v58  ;;  %v6355_v22 = vrot.slane %v6341_v61, %v17193_v58  ;;  %v6357_v28 = vcombine.high %v6324_v27, %v6339_v39 }
 0x361   : > { %v9169_v6 = vpack.c.bf16 %v8162_v14, %v8112_v5  ;;  %v9185_v37 = vpack.c.bf16 %v8163_v49, %v8113_v47  ;;  %v6364_v5 = vrot.slane %v6356_v30, %v17193_v58  ;;  %v1385_v3 = vadd.f32 %v18777_v36, %v18589_v8 }
 0x362   : > { %v8212_v33 = vcombine.low %v19261_v50, %v19266_v31  ;;  %v8213_v1 = vcombine.high %v19261_v50, %v19266_v31  ;;  %v1387_v47 = vadd.f32 %v18785_v55, %v18595_v18  ;;  %v6371_v20 = vrot.slane %v6357_v28, %v17193_v58  ;;  %v19298_v55 = vpop.f32.mrb[62].mxu1 }
 0x363   : > { %9201 = vst [vmem:[#allocation3 + $0x28] sm:$0xff] %v9169_v6  ;;  %9217 = vst [vmem:[#allocation3 + $0xa8] sm:$0xff] %v9185_v37  ;;  %v8214_v15 = vcombine.low %v6348_v24, %v6355_v22  ;;  %v15276_v48 = vcombine.high %v6348_v24, %v6355_v22  ;;  %v1391_v27 = vadd.f32 %v18832_v59, %v18589_v8  ;;  %v19305_v24 = vpop.f32.mrb[63].mxu1 }
 0x364   : > { %v6391_v50 = vcombine.high %v1383_v46, %v22570_v40  ;;  %v6398_v2 = vrot.slane %v1383_v46, %v17183_v44  ;;  %v8230_v25 = vcombine.low %v6364_v5, %v6371_v20  ;;  %v15277_v14 = vcombine.high %v6364_v5, %v6371_v20 }
 0x365   : > { %v8221_v9 = vrot.slane %v8214_v15, %v17183_v44  ;;  %v8229_v36 = vrot.slane %v15276_v48, %v17183_v44  ;;  %v6442_v31 = vcombine.high %v1385_v3, %v22570_v40  ;;  %v6449_v37 = vrot.slane %v1385_v3, %v17183_v44 }
 0x366   : > { %v6405_v49 = vrot.slane %v6391_v50, %v17183_v44  ;;  %v6406_v39 = vcombine.low %v6383_v34, %v6398_v2  ;;  %v6407_v63 = vcombine.high %v6383_v34, %v6398_v2  ;;  %v8237_v59 = vrot.slane %v8230_v25, %v17183_v44 }
 0x367   : > { %v8245_v61 = vrot.slane %v15277_v14, %v17183_v44  ;;  %v8246_v6 = vcombine.low %v8221_v9, %v8229_v36  ;;  %v6456_v20 = vrot.slane %v6442_v31, %v17183_v44  ;;  %v6457_v9 = vcombine.high %v1387_v47, %v22570_v40 }
 0x368   : > { %v6414_v30 = vrot.slane %v6406_v39, %v17193_v58  ;;  %v6421_v22 = vrot.slane %v6407_v63, %v17193_v58  ;;  %v6422_v28 = vcombine.low %v6390_v17, %v6405_v49  ;;  %v6423_v5 = vcombine.high %v6390_v17, %v6405_v49 }
 0x369   : > { %v8253_v46 = vrot.slane %v8246_v6, %v17193_v58  ;;  %v8254_v34 = vcombine.low %v8237_v59, %v8245_v61  ;;  %v6464_v36 = vrot.slane %v1387_v47, %v17183_v44  ;;  %v6471_v31 = vrot.slane %v6457_v9, %v17183_v44 }
 0x36a   : > { %v6430_v15 = vrot.slane %v6422_v28, %v17193_v58  ;;  %v6437_v48 = vrot.slane %v6423_v5, %v17193_v58  ;;  %v8264_v50 = vcombine.low %v6414_v30, %v6421_v22  ;;  %v15278_v2 = vcombine.high %v6414_v30, %v6421_v22 }
 0x36b   : > { %v8261_v3 = vrot.slane %v8254_v34, %v17193_v58  ;;  %v6472_v59 = vcombine.low %v6449_v37, %v6464_v36  ;;  %v6473_v22 = vcombine.high %v6449_v37, %v6464_v36  ;;  %v6488_v34 = vcombine.low %v6456_v20, %v6471_v31 }
 0x36c   : > { %v8271_v25 = vrot.slane %v8264_v50, %v17183_v44  ;;  %v8279_v17 = vrot.slane %v15278_v2, %v17183_v44  ;;  %v8280_v14 = vcombine.low %v6430_v15, %v6437_v48  ;;  %v15279_v49 = vcombine.high %v6430_v15, %v6437_v48 }
 0x36d   : > { %v8262_v39 = vcombine.low %v8253_v46, %v8261_v3  ;;  %v8263_v63 = vcombine.high %v8253_v46, %v8261_v3  ;;  %v6480_v47 = vrot.slane %v6472_v59, %v17193_v58  ;;  %v6487_v15 = vrot.slane %v6473_v22, %v17193_v58 }
 0x36e   : > { %v8287_v61 = vrot.slane %v8280_v14, %v17183_v44  ;;  %v8295_v6 = vrot.slane %v15279_v49, %v17183_v44  ;;  %v8296_v30 = vcombine.low %v8271_v25, %v8279_v17  ;;  %v6489_v46 = vcombine.high %v6456_v20, %v6471_v31 }
 0x36f   : > { %v9170_v28 = vpack.c.bf16 %v8262_v39, %v8212_v33  ;;  %v9186_v5 = vpack.c.bf16 %v8263_v63, %v8213_v1  ;;  %v6496_v48 = vrot.slane %v6488_v34, %v17193_v58  ;;  %v6508_v3 = vcombine.high %v1391_v27, %v22570_v40 }
 0x370   : > { %v8303_v50 = vrot.slane %v8296_v30, %v17193_v58  ;;  %v8304_v2 = vcombine.low %v8287_v61, %v8295_v6  ;;  %v6515_v9 = vrot.slane %v1391_v27, %v17183_v44  ;;  %v1393_v33 = vadd.f32 %v18836_v43, %v18595_v18 }
 0x371   : > { %9202 = vst [vmem:[#allocation3 + $0x30] sm:$0xff] %v9170_v28  ;;  %9218 = vst [vmem:[#allocation3 + $0xb0] sm:$0xff] %v9186_v5  ;;  %v6503_v37 = vrot.slane %v6489_v46, %v17193_v58  ;;  %v8314_v36 = vcombine.low %v6480_v47, %v6487_v15  ;;  %v15280_v25 = vcombine.high %v6480_v47, %v6487_v15 }
 0x372   : > { %v8311_v1 = vrot.slane %v8304_v2, %v17193_v58  ;;  %v6522_v17 = vrot.slane %v6508_v3, %v17183_v44  ;;  %v6523_v20 = vcombine.high %v1393_v33, %v22570_v40  ;;  %v6530_v14 = vrot.slane %v1393_v33, %v17183_v44 }
 0x373   : > { %v8321_v63 = vrot.slane %v8314_v36, %v17183_v44  ;;  %v8329_v27 = vrot.slane %v15280_v25, %v17183_v44  ;;  %v8330_v31 = vcombine.low %v6496_v48, %v6503_v37  ;;  %v15281_v43 = vcombine.high %v6496_v48, %v6503_v37 }
 0x374   : > { %v8312_v49 = vcombine.low %v8303_v50, %v8311_v1  ;;  %v8313_v39 = vcombine.high %v8303_v50, %v8311_v1  ;;  %v6537_v59 = vrot.slane %v6523_v20, %v17183_v44  ;;  %v6538_v61 = vcombine.low %v6515_v9, %v6530_v14 }
 0x375   : > { %v8346_v6 = vcombine.low %v8321_v63, %v8329_v27  ;;  %v6539_v30 = vcombine.high %v6515_v9, %v6530_v14  ;;  %v1395_v22 = vadd.f32 %v18844_v0, %v18589_v8  ;;  %v1397_v28 = vadd.f32 %v18854_v45, %v18595_v18 }
 0x376   : > { %v8337_v5 = vrot.slane %v8330_v31, %v17183_v44  ;;  %v8345_v47 = vrot.slane %v15281_v43, %v17183_v44  ;;  %v6546_v34 = vrot.slane %v6538_v61, %v17193_v58  ;;  %v6554_v50 = vcombine.low %v6522_v17, %v6537_v59 }
 0x377   : > { %v8353_v2 = vrot.slane %v8346_v6, %v17193_v58  ;;  %v6553_v15 = vrot.slane %v6539_v30, %v17193_v58  ;;  %v6555_v46 = vcombine.high %v6522_v17, %v6537_v59  ;;  %v6574_v0 = vcombine.high %v1395_v22, %v22570_v40 }
 0x378   : > { %v8354_v48 = vcombine.low %v8337_v5, %v8345_v47  ;;  %v6562_v3 = vrot.slane %v6554_v50, %v17193_v58  ;;  %v6581_v9 = vrot.slane %v1395_v22, %v17183_v44  ;;  %v6589_v25 = vcombine.high %v1397_v28, %v22570_v40 }
 0x379   : > { %v6569_v45 = vrot.slane %v6555_v46, %v17193_v58  ;;  %v8364_v33 = vcombine.low %v6546_v34, %v6553_v15  ;;  %v15282_v1 = vcombine.high %v6546_v34, %v6553_v15  ;;  %v6588_v36 = vrot.slane %v6574_v0, %v17183_v44 }
 0x37a   : > { %v8361_v37 = vrot.slane %v8354_v48, %v17193_v58  ;;  %v6596_v20 = vrot.slane %v1397_v28, %v17183_v44  ;;  %v6603_v59 = vrot.slane %v6589_v25, %v17183_v44  ;;  %v1401_v0 = vadd.f32 %v18905_v62, %v18589_v8 }
 0x37b   : > { %v8371_v17 = vrot.slane %v8364_v33, %v17183_v44  ;;  %v8379_v14 = vrot.slane %v15282_v1, %v17183_v44  ;;  %v8380_v63 = vcombine.low %v6562_v3, %v6569_v45  ;;  %v15283_v27 = vcombine.high %v6562_v3, %v6569_v45 }
 0x37c   : > { %v8362_v31 = vcombine.low %v8353_v2, %v8361_v37  ;;  %v8363_v43 = vcombine.high %v8353_v2, %v8361_v37  ;;  %v6604_v61 = vcombine.low %v6581_v9, %v6596_v20  ;;  %v6605_v5 = vcombine.high %v6581_v9, %v6596_v20 }
 0x37d   : > { %v8387_v6 = vrot.slane %v8380_v63, %v17183_v44  ;;  %v8395_v30 = vrot.slane %v15283_v27, %v17183_v44  ;;  %v8396_v22 = vcombine.low %v8371_v17, %v8379_v14  ;;  %v6620_v50 = vcombine.low %v6588_v36, %v6603_v59 }
 0x37e   : > { %v9171_v47 = vpack.c.bf16 %v8362_v31, %v8312_v49  ;;  %v9187_v34 = vpack.c.bf16 %v8363_v43, %v8313_v39  ;;  %v6612_v28 = vrot.slane %v6604_v61, %v17193_v58  ;;  %v6619_v48 = vrot.slane %v6605_v5, %v17193_v58 }
 0x37f   : > { %v8403_v15 = vrot.slane %v8396_v22, %v17193_v58  ;;  %v8404_v46 = vcombine.low %v8387_v6, %v8395_v30  ;;  %v6621_v2 = vcombine.high %v6588_v36, %v6603_v59  ;;  %v6628_v3 = vrot.slane %v6620_v50, %v17193_v58 }
 0x380   : > { %9203 = vst [vmem:[#allocation3 + $0x38] sm:$0xff] %v9171_v47  ;;  %9219 = vst [vmem:[#allocation3 + $0xb8] sm:$0xff] %v9187_v34  ;;  %v1403_v49 = vadd.f32 %v18908_v38, %v18595_v18  ;;  %v1405_v39 = vadd.f32 %v18922_v10, %v18589_v8  ;;  %v8414_v33 = vcombine.low %v6612_v28, %v6619_v48 }
 0x381   : > { %v8411_v9 = vrot.slane %v8404_v46, %v17193_v58  ;;  %v6635_v45 = vrot.slane %v6621_v2, %v17193_v58  ;;  %v15284_v1 = vcombine.high %v6612_v28, %v6619_v48  ;;  %v6640_v37 = vcombine.high %v1401_v0, %v22570_v40 }
 0x382   : > { %v6647_v36 = vrot.slane %v1401_v0, %v17183_v44  ;;  %v8421_v62 = vrot.slane %v8414_v33, %v17183_v44  ;;  %v6655_v63 = vcombine.high %v1403_v49, %v22570_v40  ;;  %v6662_v31 = vrot.slane %v1403_v49, %v17183_v44 }
 0x383   : > { %v8412_v25 = vcombine.low %v8403_v15, %v8411_v9  ;;  %v8413_v20 = vcombine.high %v8403_v15, %v8411_v9  ;;  %v8429_v17 = vrot.slane %v15284_v1, %v17183_v44  ;;  %v8430_v38 = vcombine.low %v6628_v3, %v6635_v45 }
 0x384   : > { %v15285_v14 = vcombine.high %v6628_v3, %v6635_v45  ;;  %v6654_v10 = vrot.slane %v6640_v37, %v17183_v44  ;;  %v6706_v43 = vcombine.high %v1405_v39, %v22570_v40  ;;  %v6669_v6 = vrot.slane %v6655_v63, %v17183_v44 }
 0x385   : > { %v8446_v27 = vcombine.low %v8421_v62, %v8429_v17  ;;  %v8437_v59 = vrot.slane %v8430_v38, %v17183_v44  ;;  %v6713_v30 = vrot.slane %v1405_v39, %v17183_v44  ;;  %v6670_v5 = vcombine.low %v6647_v36, %v6662_v31 }
 0x386   : > { %v8445_v61 = vrot.slane %v15285_v14, %v17183_v44  ;;  %v6671_v47 = vcombine.high %v6647_v36, %v6662_v31  ;;  %v6720_v34 = vrot.slane %v6706_v43, %v17183_v44  ;;  %v6686_v50 = vcombine.low %v6654_v10, %v6669_v6 }
 0x387   : > { %v8453_v22 = vrot.slane %v8446_v27, %v17193_v58  ;;  %v6687_v15 = vcombine.high %v6654_v10, %v6669_v6  ;;  %v1407_v46 = vadd.f32 %v18926_v32, %v18595_v18  ;;  %v6678_v48 = vrot.slane %v6670_v5, %v17193_v58 }
 0x388   : > { %v8454_v28 = vcombine.low %v8437_v59, %v8445_v61  ;;  %v6685_v2 = vrot.slane %v6671_v47, %v17193_v58  ;;  %v1411_v3 = vadd.f32 %v18993_v11, %v18589_v8  ;;  %v1413_v0 = vadd.f32 %v18998_v12, %v18595_v18 }
 0x389   : > { %v6694_v39 = vrot.slane %v6686_v50, %v17193_v58  ;;  %v6701_v9 = vrot.slane %v6687_v15, %v17193_v58  ;;  %v6721_v32 = vcombine.high %v1407_v46, %v22570_v40  ;;  %v6728_v1 = vrot.slane %v1407_v46, %v17183_v44 }
 0x38a   : > { %v8461_v49 = vrot.slane %v8454_v28, %v17193_v58  ;;  %v8464_v45 = vcombine.low %v6678_v48, %v6685_v2  ;;  %v15286_v33 = vcombine.high %v6678_v48, %v6685_v2  ;;  %v6772_v47 = vcombine.high %v1411_v3, %v22570_v40 }
 0x38b   : > { %v8480_v62 = vcombine.low %v6694_v39, %v6701_v9  ;;  %v15287_v17 = vcombine.high %v6694_v39, %v6701_v9  ;;  %v6735_v38 = vrot.slane %v6721_v32, %v17183_v44  ;;  %v6736_v14 = vcombine.low %v6713_v30, %v6728_v1 }
 0x38c   : > { %v8462_v37 = vcombine.low %v8453_v22, %v8461_v49  ;;  %v8463_v36 = vcombine.high %v8453_v22, %v8461_v49  ;;  %v8471_v11 = vrot.slane %v8464_v45, %v17183_v44  ;;  %v8479_v12 = vrot.slane %v15286_v33, %v17183_v44 }
 0x38d   : > { %v8487_v27 = vrot.slane %v8480_v62, %v17183_v44  ;;  %v8495_v31 = vrot.slane %v15287_v17, %v17183_v44  ;;  %v6737_v59 = vcombine.high %v6713_v30, %v6728_v1  ;;  %v6744_v61 = vrot.slane %v6736_v14, %v17193_v58 }
 0x38e   : > { %v9172_v10 = vpack.c.bf16 %v8462_v37, %v8412_v25  ;;  %v9188_v63 = vpack.c.bf16 %v8463_v36, %v8413_v20  ;;  %v8496_v43 = vcombine.low %v8471_v11, %v8479_v12  ;;  %v6752_v6 = vcombine.low %v6720_v34, %v6735_v38 }
 0x38f   : > { %v8504_v22 = vcombine.low %v8487_v27, %v8495_v31  ;;  %v6753_v5 = vcombine.high %v6720_v34, %v6735_v38  ;;  %v6751_v25 = vrot.slane %v6737_v59, %v17193_v58  ;;  %v6779_v50 = vrot.slane %v1411_v3, %v17183_v44 }
 0x390   : > { %9204 = vst [vmem:[#allocation3 + $0x40] sm:$0xff] %v9172_v10  ;;  %9220 = vst [vmem:[#allocation3 + $0xc0] sm:$0xff] %v9188_v63  ;;  %v8503_v28 = vrot.slane %v8496_v43, %v17193_v58  ;;  %v6760_v20 = vrot.slane %v6752_v6, %v17193_v58  ;;  %v6786_v46 = vrot.slane %v6772_v47, %v17183_v44 }
 0x391   : > { %v8511_v15 = vrot.slane %v8504_v22, %v17193_v58  ;;  %v6767_v30 = vrot.slane %v6753_v5, %v17193_v58  ;;  %v8514_v48 = vcombine.low %v6744_v61, %v6751_v25  ;;  %v15288_v2 = vcombine.high %v6744_v61, %v6751_v25 }
 0x392   : > { %v6787_v34 = vcombine.high %v1413_v0, %v22570_v40  ;;  %v6794_v49 = vrot.slane %v1413_v0, %v17183_v44  ;;  %v1415_v11 = vadd.f32 %v19002_v7, %v18589_v8  ;;  %v1417_v25 = vadd.f32 %v19007_v56, %v18595_v18 }
 0x393   : > { %v8512_v39 = vcombine.low %v8503_v28, %v8511_v15  ;;  %v8513_v9 = vcombine.high %v8503_v28, %v8511_v15  ;;  %v8530_v45 = vcombine.low %v6760_v20, %v6767_v30  ;;  %v15289_v33 = vcombine.high %v6760_v20, %v6767_v30 }
 0x394   : > { %v8521_v32 = vrot.slane %v8514_v48, %v17183_v44  ;;  %v8529_v3 = vrot.slane %v15288_v2, %v17183_v44  ;;  %v6801_v1 = vrot.slane %v6787_v34, %v17183_v44  ;;  %v6802_v37 = vcombine.low %v6779_v50, %v6794_v49 }
 0x395   : > { %v8537_v36 = vrot.slane %v8530_v45, %v17183_v44  ;;  %v8545_v62 = vrot.slane %v15289_v33, %v17183_v44  ;;  %v6803_v17 = vcombine.high %v6779_v50, %v6794_v49  ;;  %v6838_v27 = vcombine.high %v1415_v11, %v22570_v40 }
 0x396   : > { %v8546_v0 = vcombine.low %v8521_v32, %v8529_v3  ;;  %v6810_v12 = vrot.slane %v6802_v37, %v17193_v58  ;;  %v6818_v38 = vcombine.low %v6786_v46, %v6801_v1  ;;  %v6819_v14 = vcombine.high %v6786_v46, %v6801_v1 }
 0x397   : > { %v8554_v10 = vcombine.low %v8537_v36, %v8545_v62  ;;  %v6817_v63 = vrot.slane %v6803_v17, %v17193_v58  ;;  %v6845_v61 = vrot.slane %v1415_v11, %v17183_v44  ;;  %v6852_v5 = vrot.slane %v6838_v27, %v17183_v44 }
 0x398   : > { %v8553_v31 = vrot.slane %v8546_v0, %v17193_v58  ;;  %v6826_v43 = vrot.slane %v6818_v38, %v17193_v58  ;;  %v6833_v59 = vrot.slane %v6819_v14, %v17193_v58  ;;  %v1421_v20 = vadd.f32 %v19015_v54, %v18589_v8 }
 0x399   : > { %v8561_v7 = vrot.slane %v8554_v10, %v17193_v58  ;;  %v8564_v6 = vcombine.low %v6810_v12, %v6817_v63  ;;  %v15290_v22 = vcombine.high %v6810_v12, %v6817_v63  ;;  %v6853_v34 = vcombine.high %v1417_v25, %v22570_v40 }
 0x39a   : > { %v8580_v47 = vcombine.low %v6826_v43, %v6833_v59  ;;  %v15291_v28 = vcombine.high %v6826_v43, %v6833_v59  ;;  %v6860_v56 = vrot.slane %v1417_v25, %v17183_v44  ;;  %v6904_v3 = vcombine.high %v1421_v20, %v22570_v40 }
 0x39b   : > { %v8562_v50 = vcombine.low %v8553_v31, %v8561_v7  ;;  %v8563_v15 = vcombine.high %v8553_v31, %v8561_v7  ;;  %v8571_v30 = vrot.slane %v8564_v6, %v17183_v44  ;;  %v8579_v46 = vrot.slane %v15290_v22, %v17183_v44 }
 0x39c   : > { %v8587_v48 = vrot.slane %v8580_v47, %v17183_v44  ;;  %v8595_v2 = vrot.slane %v15291_v28, %v17183_v44  ;;  %v6867_v54 = vrot.slane %v6853_v34, %v17183_v44  ;;  %v6868_v37 = vcombine.low %v6845_v61, %v6860_v56 }
 0x39d   : > { %v9173_v49 = vpack.c.bf16 %v8562_v50, %v8512_v39  ;;  %v9189_v45 = vpack.c.bf16 %v8563_v15, %v8513_v9  ;;  %v8596_v33 = vcombine.low %v8571_v30, %v8579_v46  ;;  %v6869_v36 = vcombine.high %v6845_v61, %v6860_v56 }
 0x39e   : > { %v8604_v32 = vcombine.low %v8587_v48, %v8595_v2  ;;  %v6911_v62 = vrot.slane %v1421_v20, %v17183_v44  ;;  %v6884_v39 = vcombine.low %v6852_v5, %v6867_v54  ;;  %v6885_v9 = vcombine.high %v6852_v5, %v6867_v54 }
 0x39f   : > { %9205 = vst [vmem:[#allocation3 + $0x48] sm:$0xff] %v9173_v49  ;;  %9221 = vst [vmem:[#allocation3 + $0xc8] sm:$0xff] %v9189_v45  ;;  %v8603_v1 = vrot.slane %v8596_v33, %v17193_v58  ;;  %v6918_v11 = vrot.slane %v6904_v3, %v17183_v44  ;;  %v6876_v0 = vrot.slane %v6868_v37, %v17193_v58 }
 0x3a0   : > { %v8611_v17 = vrot.slane %v8604_v32, %v17193_v58  ;;  %v6883_v12 = vrot.slane %v6869_v36, %v17193_v58  ;;  %v1423_v38 = vadd.f32 %v19020_v60, %v18595_v18  ;;  %v1425_v14 = vadd.f32 %v19023_v13, %v18589_v8 }
 0x3a1   : > { %v6892_v27 = vrot.slane %v6884_v39, %v17193_v58  ;;  %v6899_v31 = vrot.slane %v6885_v9, %v17193_v58  ;;  %v1427_v54 = vadd.f32 %v19033_v35, %v18595_v18  ;;  %v1431_v36 = vadd.f32 %v19038_v53, %v18589_v8 }
 0x3a2   : > { %v8612_v10 = vcombine.low %v8603_v1, %v8611_v17  ;;  %v8613_v63 = vcombine.high %v8603_v1, %v8611_v17  ;;  %v8614_v43 = vcombine.low %v6876_v0, %v6883_v12  ;;  %v15292_v59 = vcombine.high %v6876_v0, %v6883_v12 }
 0x3a3   : > { %v6919_v61 = vcombine.high %v1423_v38, %v22570_v40  ;;  %v8630_v7 = vcombine.low %v6892_v27, %v6899_v31  ;;  %v15293_v6 = vcombine.high %v6892_v27, %v6899_v31  ;;  %v6926_v22 = vrot.slane %v1423_v38, %v17183_v44 }
 0x3a4   : > { %v8621_v5 = vrot.slane %v8614_v43, %v17183_v44  ;;  %v8629_v60 = vrot.slane %v15292_v59, %v17183_v44  ;;  %v6970_v47 = vcombine.high %v1425_v14, %v22570_v40  ;;  %v6977_v48 = vrot.slane %v1425_v14, %v17183_v44 }
 0x3a5   : > { %v6933_v13 = vrot.slane %v6919_v61, %v17183_v44  ;;  %v8637_v28 = vrot.slane %v8630_v7, %v17183_v44  ;;  %v8645_v25 = vrot.slane %v15293_v6, %v17183_v44  ;;  %v6934_v20 = vcombine.low %v6911_v62, %v6926_v22 }
 0x3a6   : > { %v6935_v50 = vcombine.high %v6911_v62, %v6926_v22  ;;  %v8646_v15 = vcombine.low %v8621_v5, %v8629_v60  ;;  %v6984_v45 = vrot.slane %v6970_v47, %v17183_v44  ;;  %v6985_v39 = vcombine.high %v1427_v54, %v22570_v40 }
 0x3a7   : > { %v6950_v30 = vcombine.low %v6918_v11, %v6933_v13  ;;  %v6951_v46 = vcombine.high %v6918_v11, %v6933_v13  ;;  %v8654_v2 = vcombine.low %v8637_v28, %v8645_v25  ;;  %v6942_v34 = vrot.slane %v6934_v20, %v17193_v58 }
 0x3a8   : > { %v6949_v49 = vrot.slane %v6935_v50, %v17193_v58  ;;  %v8653_v33 = vrot.slane %v8646_v15, %v17193_v58  ;;  %v6992_v14 = vrot.slane %v1427_v54, %v17183_v44  ;;  %v6999_v27 = vrot.slane %v6985_v39, %v17183_v44 }
 0x3a9   : > { %v6958_v56 = vrot.slane %v6950_v30, %v17193_v58  ;;  %v6965_v32 = vrot.slane %v6951_v46, %v17193_v58  ;;  %v8661_v3 = vrot.slane %v8654_v2, %v17193_v58  ;;  %v7036_v60 = vcombine.high %v1431_v36, %v22570_v40 }
 0x3aa   : > { %v8664_v1 = vcombine.low %v6942_v34, %v6949_v49  ;;  %v15294_v37 = vcombine.high %v6942_v34, %v6949_v49  ;;  %v7000_v61 = vcombine.low %v6977_v48, %v6992_v14  ;;  %v7001_v7 = vcombine.high %v6977_v48, %v6992_v14 }
 0x3ab   : > { %v8680_v62 = vcombine.low %v6958_v56, %v6965_v32  ;;  %v15295_v17 = vcombine.high %v6958_v56, %v6965_v32  ;;  %v8662_v9 = vcombine.low %v8653_v33, %v8661_v3  ;;  %v8663_v11 = vcombine.high %v8653_v33, %v8661_v3 }
 0x3ac   : > { %v8671_v0 = vrot.slane %v8664_v1, %v17183_v44  ;;  %v8679_v12 = vrot.slane %v15294_v37, %v17183_v44  ;;  %v7016_v6 = vcombine.low %v6984_v45, %v6999_v27  ;;  %v7017_v5 = vcombine.high %v6984_v45, %v6999_v27 }
 0x3ad   : > { %v8687_v38 = vrot.slane %v8680_v62, %v17183_v44  ;;  %v8695_v35 = vrot.slane %v15295_v17, %v17183_v44  ;;  %v9174_v31 = vpack.c.bf16 %v8662_v9, %v8612_v10  ;;  %v9190_v53 = vpack.c.bf16 %v8663_v11, %v8613_v63 }
 0x3ae   : > { %v8696_v43 = vcombine.low %v8671_v0, %v8679_v12  ;;  %v7043_v13 = vrot.slane %v1431_v36, %v17183_v44  ;;  %v7008_v28 = vrot.slane %v7000_v61, %v17193_v58  ;;  %v7015_v10 = vrot.slane %v7001_v7, %v17193_v58 }
 0x3af   : > { %v8704_v59 = vcombine.low %v8687_v38, %v8695_v35  ;;  %9206 = vst [vmem:[#allocation3 + $0x50] sm:$0xff] %v9174_v31  ;;  %9222 = vst [vmem:[#allocation3 + $0xd0] sm:$0xff] %v9190_v53  ;;  %v7024_v63 = vrot.slane %v7016_v6, %v17193_v58  ;;  %v7031_v25 = vrot.slane %v7017_v5, %v17193_v58 }
 0x3b0   : > { %v8703_v22 = vrot.slane %v8696_v43, %v17193_v58  ;;  %v7050_v20 = vrot.slane %v7036_v60, %v17183_v44  ;;  %v1433_v50 = vadd.f32 %v19046_v42, %v18595_v18  ;;  %v1435_v15 = vadd.f32 %v19094_v23, %v18589_v8 }
 0x3b1   : > { %v8711_v47 = vrot.slane %v8704_v59, %v17193_v58  ;;  %v8714_v48 = vcombine.low %v7008_v28, %v7015_v10  ;;  %v15296_v2 = vcombine.high %v7008_v28, %v7015_v10  ;;  %v8730_v34 = vcombine.low %v7024_v63, %v7031_v25 }
 0x3b2   : > { %v15297_v49 = vcombine.high %v7024_v63, %v7031_v25  ;;  %v7051_v45 = vcombine.high %v1433_v50, %v22570_v40  ;;  %v7058_v32 = vrot.slane %v1433_v50, %v17183_v44  ;;  %v7102_v3 = vcombine.high %v1435_v15, %v22570_v40 }
 0x3b3   : > { %v8712_v30 = vcombine.low %v8703_v22, %v8711_v47  ;;  %v8713_v46 = vcombine.high %v8703_v22, %v8711_v47  ;;  %v8721_v33 = vrot.slane %v8714_v48, %v17183_v44  ;;  %v8729_v56 = vrot.slane %v15296_v2, %v17183_v44 }
 0x3b4   : > { %v8737_v54 = vrot.slane %v8730_v34, %v17183_v44  ;;  %v8745_v42 = vrot.slane %v15297_v49, %v17183_v44  ;;  %v7065_v23 = vrot.slane %v7051_v45, %v17183_v44  ;;  %v7066_v37 = vcombine.low %v7043_v13, %v7058_v32 }
 0x3b5   : > { %v8746_v1 = vcombine.low %v8721_v33, %v8729_v56  ;;  %v7067_v36 = vcombine.high %v7043_v13, %v7058_v32  ;;  %v7109_v62 = vrot.slane %v1435_v15, %v17183_v44  ;;  %v7116_v11 = vrot.slane %v7102_v3, %v17183_v44 }
 0x3b6   : > { %v8754_v17 = vcombine.low %v8737_v54, %v8745_v42  ;;  %v7082_v39 = vcombine.low %v7050_v20, %v7065_v23  ;;  %v7083_v9 = vcombine.high %v7050_v20, %v7065_v23  ;;  %v7074_v12 = vrot.slane %v7066_v37, %v17193_v58  ;;  %v19530_v42 = vpop.trf.xlu1 }
 0x3b7   : > { %v8753_v0 = vrot.slane %v8746_v1, %v17193_v58  ;;  %v7081_v38 = vrot.slane %v7067_v36, %v17193_v58  ;;  %v1437_v35 = vadd.f32 %v19097_v29, %v18595_v18  ;;  %v1441_v53 = vadd.f32 %v19116_v19, %v18589_v8  ;;  %v19536_v36 = vpop.trf.xlu0 }
 0x3b8   : > { %v8761_v14 = vrot.slane %v8754_v17, %v17193_v58  ;;  %v7090_v27 = vrot.slane %v7082_v39, %v17193_v58  ;;  %v7097_v31 = vrot.slane %v7083_v9, %v17193_v58  ;;  %v1443_v1 = vadd.f32 %v19125_v4, %v18595_v18 }
 0x3b9   : > { %v8764_v43 = vcombine.low %v7074_v12, %v7081_v38  ;;  %v15298_v59 = vcombine.high %v7074_v12, %v7081_v38  ;;  %v7117_v61 = vcombine.high %v1437_v35, %v22570_v40  ;;  %v7124_v13 = vrot.slane %v1437_v35, %v17183_v44 }
 0x3ba   : > { %v8762_v7 = vcombine.low %v8753_v0, %v8761_v14  ;;  %v8763_v6 = vcombine.high %v8753_v0, %v8761_v14  ;;  %v8780_v22 = vcombine.low %v7090_v27, %v7097_v31  ;;  %v15299_v5 = vcombine.high %v7090_v27, %v7097_v31 }
 0x3bb   : > { %v8771_v60 = vrot.slane %v8764_v43, %v17183_v44  ;;  %v8779_v29 = vrot.slane %v15298_v59, %v17183_v44  ;;  %v7131_v47 = vrot.slane %v7117_v61, %v17183_v44  ;;  %v7132_v20 = vcombine.low %v7109_v62, %v7124_v13  ;;  %v22819_v61 = vld [vmem:[#allocation84_spill] sm:$0xff] }
 0x3bc   : > { %v9175_v28 = vpack.c.bf16 %v8762_v7, %v8712_v30  ;;  %v9191_v10 = vpack.c.bf16 %v8763_v6, %v8713_v46  ;;  %v8787_v19 = vrot.slane %v8780_v22, %v17183_v44  ;;  %v8795_v63 = vrot.slane %v15299_v5, %v17183_v44  ;;  %v19549_v6 = vpop.trf.xlu1 }
 0x3bd   : > { %v8796_v25 = vcombine.low %v8771_v60, %v8779_v29  ;;  %v7133_v50 = vcombine.high %v7109_v62, %v7124_v13  ;;  %v7148_v15 = vcombine.low %v7116_v11, %v7131_v47  ;;  %v7149_v2 = vcombine.high %v7116_v11, %v7131_v47  ;;  %v19553_v13 = vpop.trf.xlu0 }
 0x3be   : > { %9207 = vst [vmem:[#allocation3 + $0x58] sm:$0xff] %v9175_v28  ;;  %9223 = vst [vmem:[#allocation3 + $0xd8] sm:$0xff] %v9191_v10  ;;  %v8804_v48 = vcombine.low %v8787_v19, %v8795_v63  ;;  %v7168_v34 = vcombine.high %v1441_v53, %v22570_v40  ;;  %v7140_v45 = vrot.slane %v7132_v20, %v17193_v58 }
 0x3bf   : > { %v8803_v49 = vrot.slane %v8796_v25, %v17193_v58  ;;  %v7147_v30 = vrot.slane %v7133_v50, %v17193_v58  ;;  %v7156_v46 = vrot.slane %v7148_v15, %v17193_v58  ;;  %v7163_v56 = vrot.slane %v7149_v2, %v17193_v58 }
 0x3c0   : > { %v8811_v33 = vrot.slane %v8804_v48, %v17193_v58  ;;  %v7175_v32 = vrot.slane %v1441_v53, %v17183_v44  ;;  %v7182_v54 = vrot.slane %v7168_v34, %v17183_v44  ;;  %v1445_v37 = vadd.f32 %v19157_v57, %v18589_v8 }
 0x3c1   : > { %v8814_v23 = vcombine.low %v7140_v45, %v7147_v30  ;;  %v15300_v3 = vcombine.high %v7140_v45, %v7147_v30  ;;  %v8830_v39 = vcombine.low %v7156_v46, %v7163_v56  ;;  %v15301_v9 = vcombine.high %v7156_v46, %v7163_v56 }
 0x3c2   : > { %v8812_v62 = vcombine.low %v8803_v49, %v8811_v33  ;;  %v8813_v17 = vcombine.high %v8803_v49, %v8811_v33  ;;  %v7183_v12 = vcombine.high %v1443_v1, %v22570_v40  ;;  %v7190_v4 = vrot.slane %v1443_v1, %v17183_v44 }
 0x3c3   : > { %v8821_v11 = vrot.slane %v8814_v23, %v17183_v44  ;;  %v8829_v0 = vrot.slane %v15300_v3, %v17183_v44  ;;  %v8837_v38 = vrot.slane %v8830_v39, %v17183_v44  ;;  %v8845_v35 = vrot.slane %v15301_v9, %v17183_v44  ;;  %v19570_v39 = vpop.trf.xlu0 }
 0x3c4   : > { %v7197_v57 = vrot.slane %v7183_v12, %v17183_v44  ;;  %v7234_v27 = vcombine.high %v1445_v37, %v22570_v40  ;;  %v7241_v31 = vrot.slane %v1445_v37, %v17183_v44  ;;  %v7198_v43 = vcombine.low %v7175_v32, %v7190_v4 }
 0x3c5   : > { %v8846_v14 = vcombine.low %v8821_v11, %v8829_v0  ;;  %v8854_v53 = vcombine.low %v8837_v38, %v8845_v35  ;;  %v7199_v59 = vcombine.high %v7175_v32, %v7190_v4  ;;  %v1447_v7 = vadd.f32 %v22819_v61, %v18595_v18 }
 0x3c6   : > { %v7214_v5 = vcombine.low %v7182_v54, %v7197_v57  ;;  %v7215_v60 = vcombine.high %v7182_v54, %v7197_v57  ;;  %v7248_v29 = vrot.slane %v7234_v27, %v17183_v44  ;;  %v7206_v28 = vrot.slane %v7198_v43, %v17193_v58  ;;  %v19565_v54 = vpop.trf.xlu1 }
 0x3c7   : > { %v8853_v22 = vrot.slane %v8846_v14, %v17193_v58  ;;  %v8861_v47 = vrot.slane %v8854_v53, %v17193_v58  ;;  %v7213_v10 = vrot.slane %v7199_v59, %v17193_v58  ;;  %v7249_v25 = vcombine.high %v1447_v7, %v22570_v40 }
 0x3c8   : > { %v7222_v19 = vrot.slane %v7214_v5, %v17193_v58  ;;  %v7229_v63 = vrot.slane %v7215_v60, %v17193_v58  ;;  %v7256_v20 = vrot.slane %v1447_v7, %v17183_v44  ;;  %v1451_v11 = vadd.f32 %v19200_v21, %v18589_v8  ;;  %v19589_v60 = vpop.trf.xlu0 }
 0x3c9   : > { %v8862_v50 = vcombine.low %v8853_v22, %v8861_v47  ;;  %v8863_v15 = vcombine.high %v8853_v22, %v8861_v47  ;;  %v8864_v48 = vcombine.low %v7206_v28, %v7213_v10  ;;  %v15302_v2 = vcombine.high %v7206_v28, %v7213_v10 }
 0x3ca   : > { %v8880_v34 = vcombine.low %v7222_v19, %v7229_v63  ;;  %v15303_v49 = vcombine.high %v7222_v19, %v7229_v63  ;;  %v7263_v45 = vrot.slane %v7249_v25, %v17183_v44  ;;  %v7264_v30 = vcombine.low %v7241_v31, %v7256_v20 }
 0x3cb   : > { %v9176_v46 = vpack.c.bf16 %v8862_v50, %v8812_v62  ;;  %v9192_v33 = vpack.c.bf16 %v8863_v15, %v8813_v17  ;;  %v8871_v56 = vrot.slane %v8864_v48, %v17183_v44  ;;  %v8879_v32 = vrot.slane %v15302_v2, %v17183_v44 }
 0x3cc   : > { %v8887_v23 = vrot.slane %v8880_v34, %v17183_v44  ;;  %v8895_v3 = vrot.slane %v15303_v49, %v17183_v44  ;;  %v7265_v1 = vcombine.high %v7241_v31, %v7256_v20  ;;  %v7272_v37 = vrot.slane %v7264_v30, %v17193_v58 }
 0x3cd   : > { %9208 = vst [vmem:[#allocation3 + $0x60] sm:$0xff] %v9176_v46  ;;  %9224 = vst [vmem:[#allocation3 + $0xe0] sm:$0xff] %v9192_v33  ;;  %v8896_v9 = vcombine.low %v8871_v56, %v8879_v32  ;;  %v7280_v62 = vcombine.low %v7248_v29, %v7263_v45  ;;  %v7281_v17 = vcombine.high %v7248_v29, %v7263_v45 }
 0x3ce   : > { %v8904_v0 = vcombine.low %v8887_v23, %v8895_v3  ;;  %v7279_v12 = vrot.slane %v7265_v1, %v17193_v58  ;;  %v1453_v38 = vadd.f32 %v19224_v52, %v18595_v18  ;;  %v1455_v35 = vadd.f32 %v19232_v16, %v18589_v8  ;;  %v19585_v52 = vpop.trf.xlu1  ;;  %v19610_v1 = vpop.trf.xlu0 }
 0x3cf   : > { %v8903_v4 = vrot.slane %v8896_v9, %v17193_v58  ;;  %v7288_v14 = vrot.slane %v7280_v62, %v17193_v58  ;;  %v7295_v57 = vrot.slane %v7281_v17, %v17193_v58  ;;  %v7300_v21 = vcombine.high %v1451_v11, %v22570_v40 }
 0x3d0   : > { %v8911_v27 = vrot.slane %v8904_v0, %v17193_v58  ;;  %v8914_v31 = vcombine.low %v7272_v37, %v7279_v12  ;;  %v15304_v53 = vcombine.high %v7272_v37, %v7279_v12  ;;  %v7307_v61 = vrot.slane %v1451_v11, %v17183_v44 }
 0x3d1   : > { %v8930_v43 = vcombine.low %v7288_v14, %v7295_v57  ;;  %v15305_v59 = vcombine.high %v7288_v14, %v7295_v57  ;;  %v7314_v28 = vrot.slane %v7300_v21, %v17183_v44  ;;  %v7315_v10 = vcombine.high %v1453_v38, %v22570_v40 }
 0x3d2   : > { %v8912_v7 = vcombine.low %v8903_v4, %v8911_v27  ;;  %v8913_v16 = vcombine.high %v8903_v4, %v8911_v27  ;;  %v8921_v22 = vrot.slane %v8914_v31, %v17183_v44  ;;  %v8929_v5 = vrot.slane %v15304_v53, %v17183_v44  ;;  %v19604_v56 = vpop.trf.xlu1 }
 0x3d3   : > { %v8937_v29 = vrot.slane %v8930_v43, %v17183_v44  ;;  %v8945_v47 = vrot.slane %v15305_v59, %v17183_v44  ;;  %v7322_v63 = vrot.slane %v1453_v38, %v17183_v44  ;;  %v7366_v25 = vcombine.high %v1455_v35, %v22570_v40 }
 0x3d4   : > { %v8946_v19 = vcombine.low %v8921_v22, %v8929_v5  ;;  %v7329_v50 = vrot.slane %v7315_v10, %v17183_v44  ;;  %v7373_v15 = vrot.slane %v1455_v35, %v17183_v44  ;;  %v1457_v48 = vadd.f32 %v19238_v41, %v18595_v18 }
 0x3d5   : > { %v8954_v20 = vcombine.low %v8937_v29, %v8945_v47  ;;  %v7330_v34 = vcombine.low %v7307_v61, %v7322_v63  ;;  %v7331_v49 = vcombine.high %v7307_v61, %v7322_v63  ;;  %v7380_v45 = vrot.slane %v7366_v25, %v17183_v44 }
 0x3d6   : > { %v8953_v2 = vrot.slane %v8946_v19, %v17193_v58  ;;  %v7346_v46 = vcombine.low %v7314_v28, %v7329_v50  ;;  %v7347_v33 = vcombine.high %v7314_v28, %v7329_v50  ;;  %v7381_v3 = vcombine.high %v1457_v48, %v22570_v40  ;;  %v19620_v5 = vpop.trf.xlu1  ;;  %v19627_v28 = vpop.trf.xlu0 }
 0x3d7   : > { %v8961_v30 = vrot.slane %v8954_v20, %v17193_v58  ;;  %v7338_v32 = vrot.slane %v7330_v34, %v17193_v58  ;;  %v7345_v23 = vrot.slane %v7331_v49, %v17193_v58  ;;  %v7388_v41 = vrot.slane %v1457_v48, %v17183_v44 }
 0x3d8   : > { %v7354_v62 = vrot.slane %v7346_v46, %v17193_v58  ;;  %v7361_v17 = vrot.slane %v7347_v33, %v17193_v58  ;;  %v7395_v12 = vrot.slane %v7381_v3, %v17183_v44  ;;  %v1461_v29 = vadd.f32 %v19251_v26, %v18589_v8 }
 0x3d9   : > { %v8962_v37 = vcombine.low %v8953_v2, %v8961_v30  ;;  %v8963_v9 = vcombine.high %v8953_v2, %v8961_v30  ;;  %v8964_v11 = vcombine.low %v7338_v32, %v7345_v23  ;;  %v15306_v0 = vcombine.high %v7338_v32, %v7345_v23 }
 0x3da   : > { %v7396_v38 = vcombine.low %v7373_v15, %v7388_v41  ;;  %v8980_v14 = vcombine.low %v7354_v62, %v7361_v17  ;;  %v15307_v57 = vcombine.high %v7354_v62, %v7361_v17  ;;  %v7397_v53 = vcombine.high %v7373_v15, %v7388_v41  ;;  %v19641_v33 = vpop.trf.xlu1 }
 0x3db   : > { %v9177_v35 = vpack.c.bf16 %v8962_v37, %v8912_v7  ;;  %v9193_v4 = vpack.c.bf16 %v8963_v9, %v8913_v16  ;;  %v8971_v27 = vrot.slane %v8964_v11, %v17183_v44  ;;  %v8979_v31 = vrot.slane %v15306_v0, %v17183_v44  ;;  %v19646_v37 = vpop.trf.xlu0 }
 0x3dc   : > { %v7404_v21 = vrot.slane %v7396_v38, %v17193_v58  ;;  %v8987_v43 = vrot.slane %v8980_v14, %v17183_v44  ;;  %v8995_v59 = vrot.slane %v15307_v57, %v17183_v44  ;;  %v7412_v61 = vcombine.low %v7380_v45, %v7395_v12 }
 0x3dd   : > { %9209 = vst [vmem:[#allocation3 + $0x68] sm:$0xff] %v9177_v35  ;;  %9225 = vst [vmem:[#allocation3 + $0xe8] sm:$0xff] %v9193_v4  ;;  %v7413_v22 = vcombine.high %v7380_v45, %v7395_v12  ;;  %v8996_v7 = vcombine.low %v8971_v27, %v8979_v31  ;;  %v7411_v16 = vrot.slane %v7397_v53, %v17193_v58 }
 0x3de   : > { %v1463_v47 = vadd.f32 %v19289_v51, %v18595_v18  ;;  %v9004_v10 = vcombine.low %v8987_v43, %v8995_v59  ;;  %v7420_v19 = vrot.slane %v7412_v61, %v17193_v58  ;;  %v1465_v25 = vadd.f32 %v19298_v55, %v18589_v8  ;;  %v19658_v59 = vpop.trf.xlu1 }
 0x3df   : > { %v7427_v63 = vrot.slane %v7413_v22, %v17193_v58  ;;  %v9003_v20 = vrot.slane %v8996_v7, %v17193_v58  ;;  %v9014_v50 = vcombine.low %v7404_v21, %v7411_v16  ;;  %v15308_v15 = vcombine.high %v7404_v21, %v7411_v16 }
 0x3e0   : > { %v9011_v48 = vrot.slane %v9004_v10, %v17193_v58  ;;  %v7432_v51 = vcombine.high %v1461_v29, %v22570_v40  ;;  %v7439_v45 = vrot.slane %v1461_v29, %v17183_v44  ;;  %v7447_v3 = vcombine.high %v1463_v47, %v22570_v40  ;;  %v19662_v29 = vpop.trf.xlu0 }
 0x3e1   : > { %v9030_v26 = vcombine.low %v7420_v19, %v7427_v63  ;;  %v15309_v2 = vcombine.high %v7420_v19, %v7427_v63  ;;  %v9021_v34 = vrot.slane %v9014_v50, %v17183_v44  ;;  %v9029_v49 = vrot.slane %v15308_v15, %v17183_v44 }
 0x3e2   : > { %v9012_v30 = vcombine.low %v9003_v20, %v9011_v48  ;;  %v9013_v46 = vcombine.high %v9003_v20, %v9011_v48  ;;  %v7446_v23 = vrot.slane %v7432_v51, %v17183_v44  ;;  %v7454_v41 = vrot.slane %v1463_v47, %v17183_v44 }
 0x3e3   : > { %v9037_v8 = vrot.slane %v9030_v26, %v17183_v44  ;;  %v9045_v55 = vrot.slane %v15309_v2, %v17183_v44  ;;  %v9046_v32 = vcombine.low %v9021_v34, %v9029_v49  ;;  %v7498_v62 = vcombine.high %v1465_v25, %v22570_v40  ;;  %v19672_v34 = vpop.trf.xlu1 }
 0x3e4   : > { %v7505_v17 = vrot.slane %v1465_v25, %v17183_v44  ;;  %v7461_v0 = vrot.slane %v7447_v3, %v17183_v44  ;;  %v7462_v12 = vcombine.low %v7439_v45, %v7454_v41  ;;  %v7463_v38 = vcombine.high %v7439_v45, %v7454_v41 }
 0x3e5   : > { %v9054_v9 = vcombine.low %v9037_v8, %v9045_v55  ;;  %v9053_v11 = vrot.slane %v9046_v32, %v17193_v58  ;;  %v7512_v4 = vrot.slane %v7498_v62, %v17183_v44  ;;  %v1467_v14 = vadd.f32 %v19305_v24, %v18595_v18 }
 0x3e6   : > { %v7470_v57 = vrot.slane %v7462_v12, %v17193_v58  ;;  %v7477_v27 = vrot.slane %v7463_v38, %v17193_v58  ;;  %v7478_v31 = vcombine.low %v7446_v23, %v7461_v0  ;;  %v7479_v53 = vcombine.high %v7446_v23, %v7461_v0 }
 0x3e7   : > { %v9061_v35 = vrot.slane %v9054_v9, %v17193_v58  ;;  %v7513_v25 = vcombine.high %v1467_v14, %v22570_v40  ;;  %v7520_v20 = vrot.slane %v1467_v14, %v17183_v44  ;;  %v15933_v26 = vunpack.i.h.bf16 %v19530_v42  ;;  %v19684_v38 = vpop.trf.xlu1 }
 0x3e8   : > { %v7486_v61 = vrot.slane %v7478_v31, %v17193_v58  ;;  %v7493_v22 = vrot.slane %v7479_v53, %v17193_v58  ;;  %v9064_v7 = vcombine.low %v7470_v57, %v7477_v27  ;;  %v15310_v16 = vcombine.high %v7470_v57, %v7477_v27 }
 0x3e9   : > { %v9062_v21 = vcombine.low %v9053_v11, %v9061_v35  ;;  %v9063_v43 = vcombine.high %v9053_v11, %v9061_v35  ;;  %v7527_v2 = vrot.slane %v7513_v25, %v17183_v44  ;;  %v7528_v51 = vcombine.low %v7505_v17, %v7520_v20 }
 0x3ea   : > { %v9071_v24 = vrot.slane %v9064_v7, %v17183_v44  ;;  %v9079_v10 = vrot.slane %v15310_v16, %v17183_v44  ;;  %v9080_v19 = vcombine.low %v7486_v61, %v7493_v22  ;;  %v15311_v63 = vcombine.high %v7486_v61, %v7493_v22 }
 0x3eb   : > { %v9178_v47 = vpack.c.bf16 %v9062_v21, %v9012_v30  ;;  %v9194_v18 = vpack.c.bf16 %v9063_v43, %v9013_v46  ;;  %v7529_v30 = vcombine.high %v7505_v17, %v7520_v20  ;;  %v19675_v46 = vpop.trf.xlu0  ;;  %v7536_v40 = vrot.slane %v7528_v51, %v17193_v58 }
 0x3ec   : > { %v9087_v50 = vrot.slane %v9080_v19, %v17183_v44  ;;  %v9095_v15 = vrot.slane %v15311_v63, %v17183_v44  ;;  %v9096_v48 = vcombine.low %v9071_v24, %v9079_v10  ;;  %v7544_v8 = vcombine.low %v7512_v4, %v7527_v2  ;;  %v19699_v19 = vpop.trf.xlu1 }
 0x3ed   : > { %9210 = vst [vmem:[#allocation3 + $0x70] sm:$0xff] %v9178_v47  ;;  %9226 = vst [vmem:[#allocation3 + $0xf0] sm:$0xff] %v9194_v18  ;;  %v7543_v32 = vrot.slane %v7529_v30, %v17193_v58  ;;  %v7545_v23 = vcombine.high %v7512_v4, %v7527_v2  ;;  %v15930_v41 = vunpack.i.l.bf16 %v19530_v42  ;;  %v15821_v9 = vunpack.i.h.bf16 %v19536_v36 }
 0x3ee   : > { %v9103_v49 = vrot.slane %v9096_v48, %v17193_v58  ;;  %v9104_v45 = vcombine.low %v9087_v50, %v9095_v15  ;;  %v7552_v3 = vrot.slane %v7544_v8, %v17193_v58  ;;  %v15818_v4 = vunpack.i.l.bf16 %v19536_v36 }
 0x3ef   : > { %v7559_v17 = vrot.slane %v7545_v23, %v17193_v58  ;;  %v9114_v0 = vcombine.low %v7536_v40, %v7543_v32  ;;  %v15312_v12 = vcombine.high %v7536_v40, %v7543_v32  ;;  %v19688_v27 = vpop.trf.xlu0  ;;  %v15938_v31 = vunpack.i.h.bf16 %v19549_v6 }
 0x3f0   : > { %v9111_v55 = vrot.slane %v9104_v45, %v17193_v58  ;;  %v15935_v43 = vunpack.i.l.bf16 %v19549_v6  ;;  %v15826_v61 = vunpack.i.h.bf16 %v19553_v13  ;;  %v15823_v36 = vunpack.i.l.bf16 %v19553_v13 }
 0x3f1   : > { %v9121_v35 = vrot.slane %v9114_v0, %v17183_v44  ;;  %v9130_v14 = vcombine.low %v7552_v3, %v7559_v17  ;;  %v15313_v57 = vcombine.high %v7552_v3, %v7559_v17  ;;  %v9129_v42 = vrot.slane %v15312_v12, %v17183_v44 }
 0x3f2   : > { %v9112_v62 = vcombine.low %v9103_v49, %v9111_v55  ;;  %v9113_v11 = vcombine.high %v9103_v49, %v9111_v55  ;;  %v5405_v7 = vpack.c.bf16 %v15938_v31, %v15933_v26  ;;  %v5404_v47 = vpack.c.bf16 %v15935_v43, %v15930_v41 }
 0x3f3   : > { %v9137_v53 = vrot.slane %v9130_v14, %v17183_v44  ;;  %v9145_v21 = vrot.slane %v15313_v57, %v17183_v44  ;;  %v9146_v22 = vcombine.low %v9121_v35, %v9129_v42  ;;  %v5389_v18 = vpack.c.bf16 %v15826_v61, %v15821_v9  ;;  %v19704_v20 = vpop.trf.xlu0 }
 0x3f4   : > { %5437 = vst [vmem:[#allocation2 + $0x88] sm:$0xff] %v5405_v7  ;;  %v15943_v10 = vunpack.i.h.bf16 %v19565_v54  ;;  %5436 = vst [vmem:[#allocation2 + $0x80] sm:$0xff] %v5404_v47  ;;  %v5388_v6 = vpack.c.bf16 %v15823_v36, %v15818_v4  ;;  %v15940_v63 = vunpack.i.l.bf16 %v19565_v54  ;;  %v15831_v25 = vunpack.i.h.bf16 %v19570_v39 }
 0x3f5   : > { %v9154_v16 = vcombine.low %v9137_v53, %v9145_v21  ;;  %v9153_v24 = vrot.slane %v9146_v22, %v17193_v58  ;;  %5421 = vst [vmem:[#allocation2 + $0x8] sm:$0xff] %v5389_v18  ;;  %v15828_v13 = vunpack.i.l.bf16 %v19570_v39  ;;  %v15948_v50 = vunpack.i.h.bf16 %v19585_v52  ;;  %v19712_v39 = vpop.trf.xlu1 }
 0x3f6   : > { %5420 = vst [vmem:[#allocation2] sm:$0xff] %v5388_v6  ;;  %v15945_v26 = vunpack.i.l.bf16 %v19585_v52  ;;  %v15833_v54 = vunpack.i.l.bf16 %v19589_v60  ;;  %v15953_v40 = vunpack.i.h.bf16 %v19604_v56  ;;  %v15950_v55 = vunpack.i.l.bf16 %v19604_v56 }
 0x3f7   : > { %v9161_v44 = vrot.slane %v9154_v16, %v17193_v58  ;;  %v5407_v2 = vpack.c.bf16 %v15948_v50, %v15943_v10  ;;  %v15836_v58 = vunpack.i.h.bf16 %v19589_v60  ;;  %v15841_v52 = vunpack.i.h.bf16 %v19610_v1  ;;  %v19716_v32 = vpop.trf.xlu0 }
 0x3f8   : > { %v5406_v45 = vpack.c.bf16 %v15945_v26, %v15940_v63  ;;  %v5390_v8 = vpack.c.bf16 %v15833_v54, %v15828_v13  ;;  %v15838_v60 = vunpack.i.l.bf16 %v19610_v1  ;;  %v15958_v23 = vunpack.i.h.bf16 %v19620_v5 }
 0x3f9   : > { %v9162_v15 = vcombine.low %v9153_v24, %v9161_v44  ;;  %v9163_v48 = vcombine.high %v9153_v24, %v9161_v44  ;;  %5439 = vst [vmem:[#allocation2 + $0x98] sm:$0xff] %v5407_v2  ;;  %v5391_v30 = vpack.c.bf16 %v15836_v58, %v15831_v25  ;;  %v15955_v3 = vunpack.i.l.bf16 %v19620_v5  ;;  %v19726_v35 = vpop.trf.xlu1 }
 0x3fa   : > { %5438 = vst [vmem:[#allocation2 + $0x90] sm:$0xff] %v5406_v45  ;;  %5422 = vst [vmem:[#allocation2 + $0x10] sm:$0xff] %v5390_v8  ;;  %v15846_v41 = vunpack.i.h.bf16 %v19627_v28  ;;  %v5409_v9 = vpack.c.bf16 %v15958_v23, %v15953_v40  ;;  %v15963_v17 = vunpack.i.h.bf16 %v19641_v33  ;;  %v15960_v12 = vunpack.i.l.bf16 %v19641_v33 }
 0x3fb   : > { %v9179_v51 = vpack.c.bf16 %v9162_v15, %v9112_v62  ;;  %v9195_v49 = vpack.c.bf16 %v9163_v48, %v9113_v11  ;;  %5423 = vst [vmem:[#allocation2 + $0x18] sm:$0xff] %v5391_v30  ;;  %v15843_v62 = vunpack.i.l.bf16 %v19627_v28  ;;  %v5408_v11 = vpack.c.bf16 %v15955_v3, %v15950_v55  ;;  %v19730_v57 = vpop.trf.xlu0 }
 0x3fc   : > { %v5393_v56 = vpack.c.bf16 %v15846_v41, %v15841_v52  ;;  %5441 = vst [vmem:[#allocation2 + $0xa8] sm:$0xff] %v5409_v9  ;;  %v15851_v1 = vunpack.i.h.bf16 %v19646_v37  ;;  %v15848_v5 = vunpack.i.l.bf16 %v19646_v37  ;;  %v15968_v14 = vunpack.i.h.bf16 %v19658_v59 }
 0x3fd   : > { %9211 = vst [vmem:[#allocation3 + $0x78] sm:$0xff] %v9179_v51  ;;  %9227 = vst [vmem:[#allocation3 + $0xf8] sm:$0xff] %v9195_v49  ;;  %v5392_v0 = vpack.c.bf16 %v15843_v62, %v15838_v60  ;;  %v15965_v28 = vunpack.i.l.bf16 %v19658_v59  ;;  %v15856_v4 = vunpack.i.h.bf16 %v19662_v29  ;;  %v15853_v33 = vunpack.i.l.bf16 %v19662_v29  ;;  %v15994_v7 = vpop.trf.xlu1 }
 0x3fe   : > { %5440 = vst [vmem:[#allocation2 + $0xa0] sm:$0xff] %v5408_v11  ;;  %5425 = vst [vmem:[#allocation2 + $0x28] sm:$0xff] %v5393_v56  ;;  %v5411_v42 = vpack.c.bf16 %v15968_v14, %v15963_v17  ;;  %v15973_v21 = vunpack.i.h.bf16 %v19672_v34  ;;  %v15970_v37 = vunpack.i.l.bf16 %v19672_v34  ;;  %v15861_v61 = vunpack.i.h.bf16 %v19675_v46 }
 0x3ff   : > { %5424 = vst [vmem:[#allocation2 + $0x20] sm:$0xff] %v5392_v0  ;;  %v5410_v31 = vpack.c.bf16 %v15965_v28, %v15960_v12  ;;  %v5395_v53 = vpack.c.bf16 %v15856_v4, %v15851_v1  ;;  %v5394_v43 = vpack.c.bf16 %v15853_v33, %v15848_v5  ;;  %v15858_v22 = vunpack.i.l.bf16 %v19675_v46  ;;  %v15882_v47 = vpop.trf.xlu0 }
 0x400   : > { %5443 = vst [vmem:[#allocation2 + $0xb8] sm:$0xff] %v5411_v42  ;;  %v15978_v59 = vunpack.i.h.bf16 %v19684_v38  ;;  %v15975_v29 = vunpack.i.l.bf16 %v19684_v38  ;;  %v15866_v16 = vunpack.i.h.bf16 %v19688_v27  ;;  %v15863_v18 = vunpack.i.l.bf16 %v19688_v27 }
 0x401   : > { %5442 = vst [vmem:[#allocation2 + $0xb0] sm:$0xff] %v5410_v31  ;;  %5427 = vst [vmem:[#allocation2 + $0x38] sm:$0xff] %v5395_v53  ;;  %v15983_v10 = vunpack.i.h.bf16 %v19699_v19  ;;  %v15980_v46 = vunpack.i.l.bf16 %v19699_v19  ;;  %v15871_v6 = vunpack.i.h.bf16 %v19704_v20  ;;  %v15868_v38 = vunpack.i.l.bf16 %v19704_v20  ;;  %v15999_v13 = vpop.trf.xlu1 }
 0x402   : > { %5426 = vst [vmem:[#allocation2 + $0x30] sm:$0xff] %v5394_v43  ;;  %v5413_v36 = vpack.c.bf16 %v15978_v59, %v15973_v21  ;;  %v5412_v24 = vpack.c.bf16 %v15975_v29, %v15970_v37  ;;  %v5397_v34 = vpack.c.bf16 %v15866_v16, %v15861_v61  ;;  %v5396_v44 = vpack.c.bf16 %v15863_v18, %v15858_v22 }
 0x403   : > { %v15988_v63 = vunpack.i.h.bf16 %v19712_v39  ;;  %v15985_v25 = vunpack.i.l.bf16 %v19712_v39  ;;  %v15876_v27 = vunpack.i.h.bf16 %v19716_v32  ;;  %v15873_v15 = vunpack.i.l.bf16 %v19716_v32  ;;  %v15887_v48 = vpop.trf.xlu0 }
 0x404   : > { %5445 = vst [vmem:[#allocation2 + $0xc8] sm:$0xff] %v5413_v36  ;;  %5444 = vst [vmem:[#allocation2 + $0xc0] sm:$0xff] %v5412_v24  ;;  %v15993_v2 = vunpack.i.h.bf16 %v19726_v35  ;;  %v15990_v20 = vunpack.i.l.bf16 %v19726_v35  ;;  %v15881_v51 = vunpack.i.h.bf16 %v19730_v57  ;;  %v15878_v49 = vunpack.i.l.bf16 %v19730_v57 }
 0x405   : > { %5429 = vst [vmem:[#allocation2 + $0x48] sm:$0xff] %v5397_v34  ;;  %5428 = vst [vmem:[#allocation2 + $0x40] sm:$0xff] %v5396_v44  ;;  %v5415_v50 = vpack.c.bf16 %v15988_v63, %v15983_v10  ;;  %v5414_v26 = vpack.c.bf16 %v15985_v25, %v15980_v46  ;;  %v5399_v19 = vpack.c.bf16 %v15876_v27, %v15871_v6  ;;  %v15998_v54 = vunpack.i.h.bf16 %v15994_v7  ;;  %v16004_v8 = vpop.trf.xlu1 }
 0x406   : > { %v5398_v58 = vpack.c.bf16 %v15873_v15, %v15868_v38  ;;  %v15995_v45 = vunpack.i.l.bf16 %v15994_v7  ;;  %v15886_v30 = vunpack.i.h.bf16 %v15882_v47  ;;  %v15883_v39 = vunpack.i.l.bf16 %v15882_v47 }
 0x407   : > { %5447 = vst [vmem:[#allocation2 + $0xd8] sm:$0xff] %v5415_v50  ;;  %5446 = vst [vmem:[#allocation2 + $0xd0] sm:$0xff] %v5414_v26  ;;  %v5417_v40 = vpack.c.bf16 %v15998_v54, %v15993_v2  ;;  %v16003_v32 = vunpack.i.h.bf16 %v15999_v13  ;;  %v15892_v60 = vpop.trf.xlu0  ;;  %v16000_v3 = vunpack.i.l.bf16 %v15999_v13  ;;  %v15891_v41 = vunpack.i.h.bf16 %v15887_v48 }
 0x408   : > { %5431 = vst [vmem:[#allocation2 + $0x58] sm:$0xff] %v5399_v19  ;;  %5430 = vst [vmem:[#allocation2 + $0x50] sm:$0xff] %v5398_v58  ;;  %v5416_v55 = vpack.c.bf16 %v15995_v45, %v15990_v20  ;;  %v5401_v52 = vpack.c.bf16 %v15886_v30, %v15881_v51  ;;  %v5400_v23 = vpack.c.bf16 %v15883_v39, %v15878_v49  ;;  %v15888_v9 = vunpack.i.l.bf16 %v15887_v48 }
 0x409   : > { %5449 = vst [vmem:[#allocation2 + $0xe8] sm:$0xff] %v5417_v40  ;;  %v16008_v62 = vunpack.i.h.bf16 %v16004_v8  ;;  %v16005_v11 = vunpack.i.l.bf16 %v16004_v8  ;;  %v15896_v56 = vunpack.i.h.bf16 %v15892_v60  ;;  %v15893_v0 = vunpack.i.l.bf16 %v15892_v60 }
 0x40a   : > { %5448 = vst [vmem:[#allocation2 + $0xe0] sm:$0xff] %v5416_v55  ;;  %5433 = vst [vmem:[#allocation2 + $0x68] sm:$0xff] %v5401_v52 }
 0x40b   : > { %5432 = vst [vmem:[#allocation2 + $0x60] sm:$0xff] %v5400_v23  ;;  %v5419_v17 = vpack.c.bf16 %v16008_v62, %v16003_v32  ;;  %v5418_v12 = vpack.c.bf16 %v16005_v11, %v16000_v3  ;;  %v5403_v1 = vpack.c.bf16 %v15896_v56, %v15891_v41  ;;  %v5402_v35 = vpack.c.bf16 %v15893_v0, %v15888_v9 }
 0x40d   : > { %5451 = vst [vmem:[#allocation2 + $0xf8] sm:$0xff] %v5419_v17  ;;  %5450 = vst [vmem:[#allocation2 + $0xf0] sm:$0xff] %v5418_v12 }
 0x40e   : > { %5435 = vst [vmem:[#allocation2 + $0x78] sm:$0xff] %v5403_v1  ;;  %5434 = vst [vmem:[#allocation2 + $0x70] sm:$0xff] %v5402_v35 }
 0x40f PF: > { %v16153_v5 = vld [vmem:[#allocation8 + $0x4] ss:$8 sps:$4 sm:$0xff]   ;;  %v16155_v14 = vld [vmem:[#allocation8] ss:$8 sps:$4 sm:$0xff]   ;;  %v16156_v57 = vld [vmem:[#allocation8 + $0x14] ss:$8 sps:$4 sm:$0xff]  }
 0x410   : > { %9534 = vmatprep.subr.bf16.mxu0 %v16153_v5  ;;  %s22820_s17 = sld [smem:[#allocation20_spill]]  ;;  %v16158_v28 = vld [vmem:[#allocation8 + $0x10] ss:$8 sps:$4 sm:$0xff]   ;;  %v16159_v4 = vld [vmem:[#allocation8 + $0x24] ss:$8 sps:$4 sm:$0xff]   ;;  %v22470_v3 = vmov 0  }
 0x411   : > { %9535 = vmatpush1.bf16.msra.mxu0 %v16155_v14  ;;  %v16161_v42 = vld [vmem:[#allocation8 + $0x20] ss:$8 sps:$4 sm:$0xff]   ;;  %v16162_v33 = vld [vmem:[#allocation8 + $0x34] ss:$8 sps:$4 sm:$0xff]   ;;  %v16164_v31 = vld [vmem:[#allocation8 + $0x30] ss:$8 sps:$4 sm:$0xff]   ;;  %11461 = vmatprep.mubr.bf16.mxu1 %v22470_v3 }
 0x412   : > { %9536 = vmatprep.subr.bf16.mxu0 %v16156_v57  ;;  %v16165_v53 = vld [vmem:[#allocation8 + $0x44] ss:$8 sps:$4 sm:$0xff]   ;;  %v16167_v21 = vld [vmem:[#allocation8 + $0x40] ss:$8 sps:$4 sm:$0xff]   ;;  %v16168_v43 = vld [vmem:[#allocation8 + $0x54] ss:$8 sps:$4 sm:$0xff]   ;;  %v9284_v57 = vlaneseq }
 0x413   : > { %v16170_v37 = vld [vmem:[#allocation8 + $0x50] ss:$8 sps:$4 sm:$0xff]   ;;  %v16171_v61 = vld [vmem:[#allocation8 + $0x64] ss:$8 sps:$4 sm:$0xff]   ;;  %v16173_v59 = vld [vmem:[#allocation8 + $0x60] ss:$8 sps:$4 sm:$0xff]  }
 0x414   : > { %v16174_v7 = vld [vmem:[#allocation8 + $0x74] ss:$8 sps:$4 sm:$0xff]   ;;  %v16176_v29 = vld [vmem:[#allocation8 + $0x70] ss:$8 sps:$4 sm:$0xff]   ;;  %v16177_v16 = vld [vmem:[#allocation8 + $0x84] ss:$8 sps:$4 sm:$0xff]  }
 0x415   : > { %9537 = vmatpush1.bf16.msra.mxu0 %v16158_v28  ;;  %v16179_v47 = vld [vmem:[#allocation8 + $0x80] ss:$8 sps:$4 sm:$0xff]   ;;  %v16180_v36 = vld [vmem:[#allocation8 + $0x94] ss:$8 sps:$4 sm:$0xff]   ;;  %v16182_v18 = vld [vmem:[#allocation8 + $0x90] ss:$8 sps:$4 sm:$0xff]  }
 0x416   : > { %9538 = vmatprep.subr.bf16.mxu0 %v16159_v4  ;;  %s15314_s4 = sshll.u32 %s22820_s17, 7  ;;  %v16183_v24 = vld [vmem:[#allocation8 + $0xa4] ss:$8 sps:$4 sm:$0xff]   ;;  %v16185_v34 = vld [vmem:[#allocation8 + $0xa0] ss:$8 sps:$4 sm:$0xff]   ;;  %v11400_v32 = vld [vmem:[#allocation2 + $0x18] sm:$0xff] }
 0x417   : > { %s19757_s24 = scalar_lea.vmem %s17115_s29, %s15314_s4 [#allocation5]  ;;  %v16186_v10 = vld [vmem:[#allocation8 + $0xb4] ss:$8 sps:$4 sm:$0xff]   ;;  %v16188_v44 = vld [vmem:[#allocation8 + $0xb0] ss:$8 sps:$4 sm:$0xff]   ;;  %v16189_v46 = vld [vmem:[#allocation8 + $0xc4] ss:$8 sps:$4 sm:$0xff]  }
 0x418   : > { %v16203_v22 = vld [vmem:[%s19757_s24 + $0x4] ss:$8 sps:$4 sm:$0xff]   ;;  %v16191_v6 = vld [vmem:[#allocation8 + $0xc0] ss:$8 sps:$4 sm:$0xff]   ;;  %v16192_v38 = vld [vmem:[#allocation8 + $0xd4] ss:$8 sps:$4 sm:$0xff]  }
 0x419   : > { %9539 = vmatpush1.bf16.msra.mxu0 %v16161_v42  ;;  %9566 = vmatprep.mubr.bf16.mxu0 %v16203_v22  ;;  %v16194_v63 = vld [vmem:[#allocation8 + $0xd0] ss:$8 sps:$4 sm:$0xff]   ;;  %v16195_v25 = vld [vmem:[#allocation8 + $0xe4] ss:$8 sps:$4 sm:$0xff]   ;;  %v16197_v27 = vld [vmem:[#allocation8 + $0xe0] ss:$8 sps:$4 sm:$0xff]  }
 0x41a   : > { %9540 = vmatprep.subr.bf16.mxu0 %v16162_v33  ;;  %v16198_v13 = vld [vmem:[#allocation8 + $0xf4] ss:$8 sps:$4 sm:$0xff]   ;;  %v16200_v50 = vld [vmem:[#allocation8 + $0xf0] ss:$8 sps:$4 sm:$0xff]   ;;  %v16201_v15 = vld [vmem:[%s19757_s24] ss:$8 sps:$4 sm:$0xff]  }
 0x41b   : > { %v16204_v48 = vld [vmem:[%s19757_s24 + $0x14] ss:$8 sps:$4 sm:$0xff]   ;;  %v16206_v26 = vld [vmem:[%s19757_s24 + $0x10] ss:$8 sps:$4 sm:$0xff]   ;;  %v16207_v19 = vld [vmem:[%s19757_s24 + $0x24] ss:$8 sps:$4 sm:$0xff]  }
 0x41c   : > { %v16209_v2 = vld [vmem:[%s19757_s24 + $0x20] ss:$8 sps:$4 sm:$0xff]   ;;  %v16210_v58 = vld [vmem:[%s19757_s24 + $0x34] ss:$8 sps:$4 sm:$0xff]   ;;  %v16212_v20 = vld [vmem:[%s19757_s24 + $0x30] ss:$8 sps:$4 sm:$0xff]  }
 0x41d   : > { %9541 = vmatpush1.bf16.msra.mxu0 %v16164_v31  ;;  %v16213_v51 = vld [vmem:[%s19757_s24 + $0x44] ss:$8 sps:$4 sm:$0xff]   ;;  %v16215_v49 = vld [vmem:[%s19757_s24 + $0x40] ss:$8 sps:$4 sm:$0xff]   ;;  %v16216_v54 = vld [vmem:[%s19757_s24 + $0x54] ss:$8 sps:$4 sm:$0xff]  }
 0x41e   : > { %9542 = vmatprep.subr.bf16.mxu0 %v16165_v53  ;;  %v16218_v45 = vld [vmem:[%s19757_s24 + $0x50] ss:$8 sps:$4 sm:$0xff]   ;;  %v16219_v30 = vld [vmem:[%s19757_s24 + $0x64] ss:$8 sps:$4 sm:$0xff]   ;;  %v16221_v40 = vld [vmem:[%s19757_s24 + $0x60] ss:$8 sps:$4 sm:$0xff]  }
 0x41f   : > { %v16222_v39 = vld [vmem:[%s19757_s24 + $0x74] ss:$8 sps:$4 sm:$0xff]   ;;  %v16224_v8 = vld [vmem:[%s19757_s24 + $0x70] ss:$8 sps:$4 sm:$0xff]   ;;  %v11398_v55 = vld [vmem:[#allocation2 + $0x8] sm:$0xff]  ;;  %v9285_v28 = vshrl.u32 %v9284_v57, 7 }
 0x420   : > { %11429 = vmatprep.subr.bf16.mxu1 %v11398_v55  ;;  %v11397_v52 = vld [vmem:[#allocation2] sm:$0xff]  ;;  %v11399_v60 = vld [vmem:[#allocation2 + $0x10] sm:$0xff]  ;;  %v11402_v23 = vld [vmem:[#allocation2 + $0x28] sm:$0xff]  ;;  %s22822_s14 = sld [smem:[#allocation112_spill]]  ;;  %s22965_s12 = sld [smem:[#allocation116_spill]] }
 0x421   : > { %9543 = vmatpush1.bf16.msra.mxu0 %v16167_v21  ;;  %11430 = vmatpush1.bf16.msra.mxu1 %v11397_v52  ;;  %v11401_v41 = vld [vmem:[#allocation2 + $0x20] sm:$0xff]  ;;  %v11404_v9 = vld [vmem:[#allocation2 + $0x38] sm:$0xff]  ;;  %v11403_v62 = vld [vmem:[#allocation2 + $0x30] sm:$0xff]  ;;  %v19776_v4 = vsub.s32 0, %v9285_v28  ;;  %v19781_v33 = vsub.s32 1, %v9285_v28  ;;  %s22968_s1 = sld [smem:[#allocation117_spill]] }
 0x422   : > { %9544 = vmatprep.subr.bf16.mxu0 %v16168_v43  ;;  %11431 = vmatprep.subr.bf16.mxu1 %v11400_v32  ;;  %v11406_v11 = vld [vmem:[#allocation2 + $0x48] sm:$0xff]  ;;  %v11405_v56 = vld [vmem:[#allocation2 + $0x40] sm:$0xff]  ;;  %v11408_v17 = vld [vmem:[#allocation2 + $0x58] sm:$0xff]  ;;  %v16782_v43 = vmov 1983009808   ;;  %s22969_s8 = sld [smem:[#allocation118_spill]] }
 0x423   : > { %v11407_v0 = vld [vmem:[#allocation2 + $0x50] sm:$0xff]  ;;  %v11410_v12 = vld [vmem:[#allocation2 + $0x68] sm:$0xff]  ;;  %v11409_v1 = vld [vmem:[#allocation2 + $0x60] sm:$0xff]  ;;  %22821 = vst [vmem:[#allocation90_spill] sm:$0xff] %v19776_v4  ;;  %s22970_s4 = sld [smem:[#allocation21_spill]]  ;;  %s15470_s24 = sshll.u32 %s22820_s17, 5 }
 0x424   : > { %v11412_v35 = vld [vmem:[#allocation2 + $0x78] sm:$0xff]  ;;  %v11411_v5 = vld [vmem:[#allocation2 + $0x70] sm:$0xff]  ;;  %v11414_v14 = vld [vmem:[#allocation2 + $0x88] sm:$0xff]  ;;  %22823 = vst [vmem:[#allocation91_spill] sm:$0xff] %v19781_v33  ;;  %s14944_s9 = sshll.u32 %s17132_s10, 4  ;;  %s22971_s29 = sld [smem:[#allocation22_spill]]  ;;  %s22255_s9 = int_to_ptr.vmem [resolvable:$true] %s14944_s9 }
 0x425   : > { %9545 = vmatpush1.bf16.msra.mxu0 %v16170_v37  ;;  %11432 = vmatpush1.bf16.msra.mxu1 %v11399_v60  ;;  %v9767_v37 = vunpack.c.l.s4 %v16782_v43  ;;  %s22972_s30 = sld [smem:[#allocation119_spill]]  ;;  %s16639_s6 = scalar_lea.vmem %s22255_s9, 4096 }
 0x426   : > { %9546 = vmatprep.subr.bf16.mxu0 %v16171_v61  ;;  %11433 = vmatprep.subr.bf16.mxu1 %v11402_v23  ;;  %v9282_v42 = vld [vmem:[%s22822_s14] sm:$0x3]  ;;  %p16640_p4 = scmp.ne.s32.totalorder %s22255_s9, %s16639_s6  ;;  %s16785_s11 = smov [#allocation14]  }
 0x427   : > { %v19784_v31 = vrot.slane %v9282_v42, %v19776_v4  ;;  %v19787_v53 = vrot.slane %v9282_v42, %v19781_v33 }
 0x429   : > { %9547 = vmatpush1.bf16.msra.mxu0 %v16173_v59  ;;  %11434 = vmatpush1.bf16.msra.mxu1 %v11401_v41  ;;  %s15464_s13 = sshll.u32 %s22970_s4, 6 }
 0x42a   : > { %9548 = vmatprep.subr.bf16.mxu0 %v16174_v7  ;;  %11435 = vmatprep.subr.bf16.mxu1 %v11404_v9  ;;  %s14941_s17 = sadd.s32 %s15470_s24, %s15464_s13  ;;  %p22973_p6 = scmp.ne.s32.totalorder %s22971_s29, 0 }
 0x42b   : > { %s15465_s14 = sshll.u32 %s14941_s17, 7 }
 0x42c   : > { %s22264_s23 = scalar_lea.hbm %s22972_s30, %s15465_s14  ;;  %p16641_p10 = pnand %p16640_p4, %p22973_p6 }
 0x42d   : > { %9549 = vmatpush1.bf16.msra.mxu0 %v16176_v29  ;;  %11436 = vmatpush1.bf16.msra.mxu1 %v11403_v62  ;;  %v16783_v29 = vmov 1934713408  }
 0x42e   : > { %9550 = vmatprep.subr.bf16.mxu0 %v16177_v16  ;;  %11437 = vmatprep.subr.bf16.mxu1 %v11406_v11  ;;  %v9782_v16 = vunpack.c.l.s4 %v16783_v29  ;;  %p16642_p13 = pneg %p16641_p10 }
 0x431   : > { %9551 = vmatpush1.bf16.msra.mxu0 %v16179_v47  ;;  %11438 = vmatpush1.bf16.msra.mxu1 %v11405_v56 }
 0x432   : > { %9552 = vmatprep.subr.bf16.mxu0 %v16180_v36  ;;  %11439 = vmatprep.subr.bf16.mxu1 %v11408_v17 }
 0x435   : > { %9553 = vmatpush1.bf16.msra.mxu0 %v16182_v18  ;;  %11440 = vmatpush1.bf16.msra.mxu1 %v11407_v0  ;;  %v9768_v18 = vunpack.c.0.s8 %v9767_v37 }
 0x436   : > { %9554 = vmatprep.subr.bf16.mxu0 %v16183_v24  ;;  %11441 = vmatprep.subr.bf16.mxu1 %v11410_v12 }
 0x439   : > { %9555 = vmatpush1.bf16.msra.mxu0 %v16185_v34  ;;  %11442 = vmatpush1.bf16.msra.mxu1 %v11409_v1 }
 0x43a   : > { %9556 = vmatprep.subr.bf16.mxu0 %v16186_v10  ;;  %11443 = vmatprep.subr.bf16.mxu1 %v11412_v35 }
 0x43d   : > { %9557 = vmatpush1.bf16.msra.mxu0 %v16188_v44  ;;  %11444 = vmatpush1.bf16.msra.mxu1 %v11411_v5 }
 0x43e   : > { %9558 = vmatprep.subr.bf16.mxu0 %v16189_v46  ;;  %11542 = vmatprep.subr.bf16.mxu1 %v11414_v14 }
 0x441   : > { %9559 = vmatpush1.bf16.msra.mxu0 %v16191_v6  ;;  %v9783_v6 = vunpack.c.0.s8 %v9782_v16 }
 0x442   : > { %9560 = vmatprep.subr.bf16.mxu0 %v16192_v38 }
 0x445   : > { %9561 = vmatpush1.bf16.msra.mxu0 %v16194_v63  ;;  %v19793_v63 = vsub.s32 %v9768_v18, %v9285_v28 }
 0x446   : > { %9562 = vmatprep.subr.bf16.mxu0 %v16195_v25 }
 0x447   : > { %22824 = vst [vmem:[#allocation92_spill] sm:$0xff] %v19793_v63 }
 0x449   : > { %9563 = vmatpush1.bf16.msra.mxu0 %v16197_v27  ;;  %v19797_v27 = vpack.i.b16 %v22470_v3, %v22470_v3 }
 0x44a   : > { %9564 = vmatprep.subr.bf16.mxu0 %v16198_v13 }
 0x44d   : > { %9565 = vmatpush1.bf16.msra.mxu0 %v16200_v50 }
 0x450   : > { %9567 = vmatmul.mubr.bf16.vlgmr.msra.gmra.mrb[0].mxu0 %v16201_v15 }
 0x451   : > { %9576 = vmatprep.mubr.bf16.mxu0 %v16204_v48 }
 0x458   : > { %9577 = vmatmul.mubr.bf16.gmra.mrb[4].mxu0 %v16206_v26 }
 0x459   : > { %9586 = vmatprep.mubr.bf16.mxu0 %v16207_v19 }
 0x460   : > { %9587 = vmatmul.mubr.bf16.gmra.mrb[8].mxu0 %v16209_v2 }
 0x461   : > { %9596 = vmatprep.mubr.bf16.mxu0 %v16210_v58 }
 0x468   : > { %9597 = vmatmul.mubr.bf16.gmra.mrb[12].mxu0 %v16212_v20  ;;  %v19801_v20 = vsub.s32 %v9783_v6, %v9285_v28 }
 0x469   : > { %9606 = vmatprep.mubr.bf16.mxu0 %v16213_v51 }
 0x46a   : > { %22825 = vst [vmem:[#allocation93_spill] sm:$0xff] %v19801_v20 }
 0x470   : > { %9607 = vmatmul.mubr.bf16.gmra.mrb[16].mxu0 %v16215_v49 }
 0x471   : > { %9616 = vmatprep.mubr.bf16.mxu0 %v16216_v54 }
 0x478   : > { %9617 = vmatmul.mubr.bf16.gmra.mrb[20].mxu0 %v16218_v45 }
 0x479   : > { %9626 = vmatprep.mubr.bf16.mxu0 %v16219_v30 }
 0x480   : > { %9627 = vmatmul.mubr.bf16.gmra.mrb[24].mxu0 %v16221_v40 }
 0x481   : > { %9636 = vmatprep.mubr.bf16.mxu0 %v16222_v39 }
 0x488   : > { %9637 = vmatmul.mubr.bf16.gmra.mrb[28].mxu0 %v16224_v8 }
 0x523   : > { %v9568_v21 = vpop.f32.mrb[0].mxu0 }
 0x524   : > { %v9569_v61 = vadd.f32 %v9568_v21, %v19784_v31  ;;  %v9570_v22 = vpop.f32.mrb[1].mxu0 }
 0x525   : > { %v9571_v59 = vadd.f32 %v9570_v22, %v19787_v53  ;;  %v9572_v7 = vpop.f32.mrb[2].mxu0 }
 0x526   : > { %v9573_v47 = vadd.f32 %v9572_v7, %v19784_v31  ;;  %v9574_v36 = vpop.f32.mrb[3].mxu0  ;;  %v9647_v34 = vmul.f32 0.088388346, %v9569_v61 }
 0x527   : > { %v9575_v24 = vadd.f32 %v9574_v36, %v19787_v53  ;;  %v9648_v44 = vmul.f32 0.088388346, %v9571_v59 }
 0x528   : > { %v9649_v10 = vmul.f32 0.088388346, %v9573_v47 }
 0x529   : > { %v9650_v46 = vmul.f32 0.088388346, %v9575_v24 }
 0x52a   : > { %v9679_v38 = vpack.c.bf16 %v9649_v10, %v9647_v34 }
 0x52b   : > { %v9680_v25 = vpack.c.bf16 %v9650_v46, %v9648_v44  ;;  %v9578_v13 = vpop.f32.mrb[4].mxu0 }
 0x52c   : > { %v9699_v50 = vshrl.u32 %v9679_v38, 16  ;;  %v9579_v15 = vadd.f32 %v9578_v13, %v19784_v31  ;;  %v9580_v48 = vpop.f32.mrb[5].mxu0 }
 0x52d   : > { %v9697_v26 = vpack.i.b16 %v9680_v25, %v9679_v38  ;;  %v9700_v19 = vshrl.u32 %v9680_v25, 16  ;;  %v9581_v2 = vadd.f32 %v9580_v48, %v19787_v53  ;;  %v9582_v58 = vpop.f32.mrb[6].mxu0 }
 0x52e   : > { %v9583_v51 = vadd.f32 %v9582_v58, %v19784_v31  ;;  %v9584_v49 = vpop.f32.mrb[7].mxu0  ;;  %v9651_v40 = vmul.f32 0.088388346, %v9579_v15 }
 0x52f   : > { %v9701_v54 = vpack.i.b16 %v9700_v19, %v9699_v50  ;;  %v9765_v45 = vcombine.high %v9697_v26, %v19797_v27  ;;  %v9772_v30 = vrot.slane %v9697_v26, %v19793_v63  ;;  %v9585_v8 = vadd.f32 %v9584_v49, %v19787_v53 }
 0x530   : > { %v9653_v39 = vmul.f32 0.088388346, %v9583_v51  ;;  %v9652_v60 = vmul.f32 0.088388346, %v9581_v2 }
 0x531   : > { %v9779_v55 = vrot.slane %v9765_v45, %v19793_v63  ;;  %v9780_v52 = vcombine.high %v9772_v30, %v22470_v3  ;;  %v9814_v32 = vcombine.high %v9701_v54, %v19797_v27  ;;  %v19811_v23 = vrot.slane %v9772_v30, %v19801_v20 }
 0x532   : > { %v9821_v41 = vrot.slane %v9701_v54, %v19793_v63  ;;  %v9681_v9 = vpack.c.bf16 %v9653_v39, %v9651_v40  ;;  %v9654_v62 = vmul.f32 0.088388346, %v9585_v8 }
 0x533   : > { %v19815_v11 = vrot.slane %v9780_v52, %v19801_v20  ;;  %v9795_v56 = vcombine.high %v9779_v55, %v22470_v3  ;;  %v19819_v17 = vrot.slane %v9779_v55, %v19801_v20  ;;  %v9828_v0 = vrot.slane %v9814_v32, %v19793_v63  ;;  %v9588_v12 = vpop.f32.mrb[8].mxu0 }
 0x534   : > { %v9829_v1 = vcombine.high %v9821_v41, %v22470_v3  ;;  %v19824_v35 = vrot.slane %v9821_v41, %v19801_v20  ;;  %v9713_v5 = vshrl.u32 %v9681_v9, 16  ;;  %v9682_v14 = vpack.c.bf16 %v9654_v62, %v9652_v60  ;;  %v9590_v57 = vpop.f32.mrb[9].mxu0 }
 0x535   : > { %v19827_v28 = vrot.slane %v9795_v56, %v19801_v20  ;;  %v9844_v42 = vcombine.high %v9828_v0, %v22470_v3  ;;  %v19831_v21 = vrot.slane %v9828_v0, %v19801_v20  ;;  %v10549_v43 = vcombine.low %v19811_v23, %v19815_v11  ;;  %v9592_v37 = vpop.f32.mrb[10].mxu0 }
 0x536   : > { %v19836_v61 = vrot.slane %v9829_v1, %v19801_v20  ;;  %v15365_v22 = vcombine.high %v19811_v23, %v19815_v11  ;;  %v9711_v59 = vpack.i.b16 %v9682_v14, %v9681_v9  ;;  %v9714_v7 = vshrl.u32 %v9682_v14, 16  ;;  %v9594_v29 = vpop.f32.mrb[11].mxu0 }
 0x537   : > { %v19841_v16 = vrot.slane %v9844_v42, %v19801_v20  ;;  %v10565_v47 = vcombine.low %v19819_v17, %v19827_v28  ;;  %v15366_v36 = vcombine.high %v19819_v17, %v19827_v28  ;;  %v9589_v18 = vadd.f32 %v9588_v12, %v19784_v31 }
 0x538   : > { %v10598_v24 = vcombine.low %v19824_v35, %v19836_v61  ;;  %v15367_v34 = vcombine.high %v19824_v35, %v19836_v61  ;;  %v9715_v10 = vpack.i.b16 %v9714_v7, %v9713_v5  ;;  %v9863_v44 = vcombine.high %v9711_v59, %v19797_v27 }
 0x539   : > { %v9870_v46 = vrot.slane %v9711_v59, %v19793_v63  ;;  %v9655_v6 = vmul.f32 0.088388346, %v9589_v18  ;;  %v9591_v38 = vadd.f32 %v9590_v57, %v19787_v53  ;;  %v9593_v25 = vadd.f32 %v9592_v37, %v19784_v31 }
 0x53a   : > { %v9877_v13 = vrot.slane %v9863_v44, %v19793_v63  ;;  %v9912_v50 = vcombine.high %v9715_v10, %v19797_v27  ;;  %v9919_v15 = vrot.slane %v9715_v10, %v19793_v63  ;;  %v9595_v48 = vadd.f32 %v9594_v29, %v19787_v53 }
 0x53b   : > { %v9878_v26 = vcombine.high %v9870_v46, %v22470_v3  ;;  %v19862_v19 = vrot.slane %v9870_v46, %v19801_v20  ;;  %v9656_v2 = vmul.f32 0.088388346, %v9591_v38  ;;  %v9657_v58 = vmul.f32 0.088388346, %v9593_v25  ;;  %v9598_v51 = vpop.f32.mrb[12].mxu0 }
 0x53c   : > { %v9893_v49 = vcombine.high %v9877_v13, %v22470_v3  ;;  %v19866_v54 = vrot.slane %v9877_v13, %v19801_v20  ;;  %v9926_v45 = vrot.slane %v9912_v50, %v19793_v63  ;;  %v9927_v30 = vcombine.high %v9919_v15, %v22470_v3  ;;  %v9600_v40 = vpop.f32.mrb[13].mxu0 }
 0x53d   : > { %v19871_v39 = vrot.slane %v9878_v26, %v19801_v20  ;;  %v19874_v8 = vrot.slane %v9919_v15, %v19801_v20  ;;  %v9683_v55 = vpack.c.bf16 %v9657_v58, %v9655_v6  ;;  %v9658_v52 = vmul.f32 0.088388346, %v9595_v48  ;;  %v9602_v32 = vpop.f32.mrb[14].mxu0 }
 0x53e   : > { %v19877_v60 = vrot.slane %v9893_v49, %v19801_v20  ;;  %v19880_v41 = vrot.slane %v9927_v30, %v19801_v20  ;;  %v9942_v9 = vcombine.high %v9926_v45, %v22470_v3  ;;  %v19884_v62 = vrot.slane %v9926_v45, %v19801_v20  ;;  %v9604_v56 = vpop.f32.mrb[15].mxu0 }
 0x53f   : > { %v10647_v0 = vcombine.low %v19862_v19, %v19871_v39  ;;  %v15369_v12 = vcombine.high %v19862_v19, %v19871_v39  ;;  %v9721_v1 = vshrl.u32 %v9683_v55, 16  ;;  %v9684_v5 = vpack.c.bf16 %v9658_v52, %v9656_v2 }
 0x540   : > { %v19891_v14 = vrot.slane %v9942_v9, %v19801_v20  ;;  %v10663_v57 = vcombine.low %v19866_v54, %v19877_v60  ;;  %v9599_v18 = vadd.f32 %v9598_v51, %v19784_v31  ;;  %v9601_v10 = vadd.f32 %v9600_v40, %v19787_v53 }
 0x541   : > { %v9719_v7 = vpack.i.b16 %v9684_v5, %v9683_v55  ;;  %v9722_v29 = vshrl.u32 %v9684_v5, 16  ;;  %v9603_v44 = vadd.f32 %v9602_v32, %v19784_v31  ;;  %v9605_v46 = vadd.f32 %v9604_v56, %v19787_v53 }
 0x542   : > { %v19906_v6 = vrot.slane %v10549_v43, %v19793_v63  ;;  %v9659_v50 = vmul.f32 0.088388346, %v9599_v18  ;;  %v9660_v48 = vmul.f32 0.088388346, %v9601_v10  ;;  %v10572_v23 = vrot.slane %v10565_v47, %v19793_v63 }
 0x543   : > { %v9723_v38 = vpack.i.b16 %v9722_v29, %v9721_v1  ;;  %v9961_v25 = vcombine.high %v9719_v7, %v19797_v27  ;;  %v9968_v13 = vrot.slane %v9719_v7, %v19793_v63  ;;  %v9608_v15 = vpop.f32.mrb[16].mxu0  ;;  %v9661_v26 = vmul.f32 0.088388346, %v9603_v44 }
 0x544   : > { %v9662_v2 = vmul.f32 0.088388346, %v9605_v46  ;;  %v9609_v58 = vadd.f32 %v9608_v15, %v19784_v31  ;;  %v9610_v30 = vpop.f32.mrb[17].mxu0  ;;  %v10580_v47 = vrot.slane %v15366_v36, %v19793_v63 }
 0x545   : > { %v9975_v51 = vrot.slane %v9961_v25, %v19793_v63  ;;  %v9976_v49 = vcombine.high %v9968_v13, %v22470_v3  ;;  %v19914_v45 = vrot.slane %v9968_v13, %v19801_v20  ;;  %v10010_v43 = vcombine.high %v9723_v38, %v19797_v27  ;;  %v9612_v9 = vpop.f32.mrb[18].mxu0 }
 0x546   : > { %v10017_v40 = vrot.slane %v9723_v38, %v19793_v63  ;;  %v9685_v55 = vpack.c.bf16 %v9661_v26, %v9659_v50  ;;  %v9686_v52 = vpack.c.bf16 %v9662_v2, %v9660_v48  ;;  %v9663_v32 = vmul.f32 0.088388346, %v9609_v58  ;;  %v19926_v29 = vpop.f32.mrb[19].mxu0 }
 0x547   : > { %v19919_v56 = vrot.slane %v9976_v49, %v19801_v20  ;;  %v9991_v1 = vcombine.high %v9975_v51, %v22470_v3  ;;  %v19923_v5 = vrot.slane %v9975_v51, %v19801_v20  ;;  %v10024_v7 = vrot.slane %v10010_v43, %v19793_v63 }
 0x548   : > { %v10025_v18 = vcombine.high %v10017_v40, %v22470_v3  ;;  %v19930_v10 = vrot.slane %v10017_v40, %v19801_v20  ;;  %v9729_v44 = vshrl.u32 %v9685_v55, 16  ;;  %v9727_v46 = vpack.i.b16 %v9686_v52, %v9685_v55 }
 0x549   : > { %v19933_v38 = vrot.slane %v9991_v1, %v19801_v20  ;;  %v10040_v25 = vcombine.high %v10024_v7, %v22470_v3  ;;  %v19937_v13 = vrot.slane %v10024_v7, %v19801_v20  ;;  %v9730_v26 = vshrl.u32 %v9686_v52, 16 }
 0x54a   : > { %v19942_v15 = vrot.slane %v10025_v18, %v19801_v20  ;;  %v10059_v2 = vcombine.high %v9727_v46, %v19797_v27  ;;  %v10066_v43 = vrot.slane %v9727_v46, %v19793_v63  ;;  %v9611_v49 = vadd.f32 %v9610_v30, %v19787_v53 }
 0x54b   : > { %v19948_v58 = vrot.slane %v10040_v25, %v19801_v20  ;;  %v9618_v40 = vpop.f32.mrb[20].mxu0  ;;  %v9731_v1 = vpack.i.b16 %v9730_v26, %v9729_v44  ;;  %v9613_v46 = vadd.f32 %v9612_v9, %v19784_v31  ;;  %v10564_v30 = vrot.slane %v15365_v22, %v19793_v63 }
 0x54c   : > { %v10073_v7 = vrot.slane %v10059_v2, %v19793_v63  ;;  %v9620_v18 = vpop.f32.mrb[21].mxu0  ;;  %v10074_v25 = vcombine.high %v10066_v43, %v22470_v3  ;;  %v19962_v51 = vrot.slane %v10066_v43, %v19801_v20  ;;  %v9664_v43 = vmul.f32 0.088388346, %v9611_v49 }
 0x54d   : > { %v9622_v48 = vpop.f32.mrb[22].mxu0  ;;  %v10108_v44 = vcombine.high %v9731_v1, %v19797_v27  ;;  %v10115_v26 = vrot.slane %v9731_v1, %v19793_v63  ;;  %v9665_v59 = vmul.f32 0.088388346, %v9613_v46  ;;  %v10589_v36 = vcombine.low %v10572_v23, %v10580_v47 }
 0x54e   : > { %v10089_v50 = vcombine.high %v10073_v7, %v22470_v3  ;;  %v19968_v55 = vrot.slane %v10073_v7, %v19801_v20  ;;  %v19972_v2 = vpop.f32.mrb[23].mxu0  ;;  %v19975_v52 = vrot.slane %v10074_v25, %v19801_v20  ;;  %v9621_v23 = vadd.f32 %v9620_v18, %v19787_v53 }
 0x54f   : > { %v10122_v7 = vrot.slane %v10108_v44, %v19793_v63  ;;  %v10123_v37 = vcombine.high %v10115_v26, %v22470_v3  ;;  %v19987_v1 = vrot.slane %v10115_v26, %v19801_v20  ;;  %v9687_v46 = vpack.c.bf16 %v9665_v59, %v9663_v32 }
 0x550   : > { %v19982_v9 = vrot.slane %v10089_v50, %v19801_v20  ;;  %v10605_v26 = vrot.slane %v10598_v24, %v19793_v63  ;;  %v15368_v44 = vcombine.high %v19831_v21, %v19841_v16  ;;  %v9615_v24 = vadd.f32 %v19926_v29, %v19787_v53 }
 0x551   : > { %v19998_v11 = vrot.slane %v10123_v37, %v19801_v20  ;;  %v10138_v22 = vcombine.high %v10122_v7, %v22470_v3  ;;  %v20002_v50 = vrot.slane %v10122_v7, %v19801_v20  ;;  %v9737_v59 = vshrl.u32 %v9687_v46, 16 }
 0x552   : > { %v10581_v37 = vcombine.low %v19906_v6, %v10564_v30  ;;  %v10613_v6 = vrot.slane %v15367_v34, %v19793_v63  ;;  %v10614_v30 = vcombine.low %v19831_v21, %v19841_v16  ;;  %v9619_v7 = vadd.f32 %v9618_v40, %v19784_v31 }
 0x553   : > { %v20013_v32 = vpop.f32.mrb[24].mxu0  ;;  %v20016_v49 = vrot.slane %v10138_v22, %v19801_v20  ;;  %v10596_v35 = vrot.slane %v10589_v36, %v19801_v20  ;;  %v10629_v25 = vrot.slane %v15368_v44, %v19793_v63  ;;  %v9666_v3 = vmul.f32 0.088388346, %v9615_v24 }
 0x554   : > { %v20026_v17 = vpop.f32.mrb[25].mxu0  ;;  %v10588_v28 = vrot.slane %v10581_v37, %v19801_v20  ;;  %v10621_v61 = vrot.slane %v10614_v30, %v19793_v63  ;;  %v10630_v34 = vcombine.low %v10605_v26, %v10613_v6  ;;  %v9623_v37 = vadd.f32 %v9622_v48, %v19784_v31 }
 0x555   : > { %v20035_v22 = vpop.f32.mrb[26].mxu0  ;;  %v9667_v21 = vmul.f32 0.088388346, %v9619_v7  ;;  %v20049_v16 = vmul.f32 0.088388346, %v9621_v23  ;;  %v10654_v18 = vrot.slane %v10647_v0, %v19793_v63  ;;  %v9688_v30 = vpack.c.bf16 %v9666_v3, %v9664_v43 }
 0x556   : > { %v20043_v47 = vpop.f32.mrb[27].mxu0  ;;  %v10597_v29 = vcombine.low %v10588_v28, %v10596_v35  ;;  %v10637_v40 = vrot.slane %v10630_v34, %v19801_v20  ;;  %v9669_v42 = vmul.f32 0.088388346, %v9623_v37  ;;  %v10638_v36 = vcombine.low %v10621_v61, %v10629_v25 }
 0x557   : > { %v10662_v48 = vrot.slane %v15369_v12, %v19793_v63  ;;  %v10670_v44 = vrot.slane %v10663_v57, %v19793_v63  ;;  %v22826_v28 = vcombine.high %v19866_v54, %v19877_v60  ;;  %v22827_v3 = vcombine.low %v19874_v8, %v19880_v41 }
 0x558   : > { %v11337_v26 = vshrl.u32 %v10597_v29, 16  ;;  %v20064_v7 = vpack.c.bf16 %v9669_v42, %v9667_v21  ;;  %v10645_v39 = vrot.slane %v10638_v36, %v19801_v20  ;;  %v9735_v12 = vpack.i.b16 %v9688_v30, %v9687_v46 }
 0x559   : > { %v10678_v0 = vrot.slane %v22826_v28, %v19793_v63  ;;  %v10703_v43 = vrot.slane %v22827_v3, %v19793_v63  ;;  %v9738_v25 = vshrl.u32 %v9688_v30, 16  ;;  %v10679_v57 = vcombine.low %v10654_v18, %v10662_v48 }
 0x55a   : > { %v9745_v42 = vshrl.u32 %v20064_v7, 16  ;;  %v22828_v54 = vcombine.high %v19874_v8, %v19880_v41  ;;  %v10712_v23 = vcombine.low %v19884_v62, %v19891_v14  ;;  %v10646_v61 = vcombine.low %v10637_v40, %v10645_v39 }
 0x55b   : > { %v20074_v19 = vpop.f32.mrb[28].mxu0  ;;  %v10687_v24 = vcombine.low %v10670_v44, %v10678_v0  ;;  %v9739_v34 = vpack.i.b16 %v9738_v25, %v9737_v59  ;;  %v10157_v46 = vcombine.high %v9735_v12, %v19797_v27  ;;  %v10164_v37 = vrot.slane %v9735_v12, %v19793_v63  ;;  %v11413_v44 = vld [vmem:[#allocation2 + $0x80] sm:$0xff]  ;;  %v11416_v12 = vld [vmem:[#allocation2 + $0x98] sm:$0xff] }
 0x55c   : > { %v20077_v6 = vpop.f32.mrb[29].mxu0  ;;  %v10711_v60 = vrot.slane %v22828_v54, %v19793_v63  ;;  %v10686_v18 = vrot.slane %v10679_v57, %v19801_v20  ;;  %v10719_v8 = vrot.slane %v10712_v23, %v19793_v63  ;;  %v15372_v41 = vcombine.high %v19884_v62, %v19891_v14 }
 0x55d   : > { %v20086_v35 = vpop.f32.mrb[30].mxu0  ;;  %v10694_v36 = vrot.slane %v10687_v24, %v19801_v20  ;;  %v11335_v30 = vpack.i.b16 %v10646_v61, %v10597_v29  ;;  %v11338_v48 = vshrl.u32 %v10646_v61, 16  ;;  %v10171_v59 = vrot.slane %v10157_v46, %v19793_v63 }
 0x55e   : > { %v20090_v21 = vpop.f32.mrb[31].mxu0  ;;  %v22829_v40 = vmov 0   ;;  %v20100_v0 = vrot.slane %v10164_v37, %v19801_v20  ;;  %v10206_v3 = vcombine.high %v9739_v34, %v19797_v27  ;;  %v10213_v39 = vrot.slane %v9739_v34, %v19793_v63 }
 0x55f   : > { %v10172_v28 = vcombine.high %v10164_v37, %v22829_v40  ;;  %v20104_v25 = vcombine.low %v10686_v18, %v10694_v36  ;;  %v20106_v57 = vpack.i.b16 %v11338_v48, %v11337_v26  ;;  %11462 = vmatmul.mubr.bf16.vlgmr.msra.gmra.mrb[0].mxu1 %v11335_v30  ;;  %v10187_v14 = vcombine.high %v10171_v59, %v22829_v40  ;;  %v11415_v18 = vld [vmem:[#allocation2 + $0x90] sm:$0xff] }
 0x560   : > { %v20113_v29 = vrot.slane %v10171_v59, %v19801_v20  ;;  %11543 = vmatpush1.bf16.msra.mxu1 %v11413_v44  ;;  %v10220_v24 = vrot.slane %v10206_v3, %v19793_v63  ;;  %v10221_v54 = vcombine.high %v10213_v39, %v22829_v40  ;;  %v20118_v23 = vrot.slane %v10213_v39, %v19801_v20  ;;  %v11418_v59 = vld [vmem:[#allocation2 + $0xa8] sm:$0xff] }
 0x561   : > { %v20109_v62 = vrot.slane %v10172_v28, %v19801_v20  ;;  %11471 = vmatprep.mubr.bf16.mxu1 %v22829_v40  ;;  %v20123_v61 = vrot.slane %v10187_v14, %v19801_v20  ;;  %11544 = vmatprep.subr.bf16.mxu1 %v11416_v12  ;;  %v10727_v37 = vrot.slane %v15372_v41, %v19793_v63 }
 0x562   : > { %v20131_v36 = vrot.slane %v10221_v54, %v19801_v20  ;;  %v10236_v30 = vcombine.high %v10220_v24, %v22829_v40  ;;  %v20135_v48 = vrot.slane %v10220_v24, %v19801_v20  ;;  %v10728_v44 = vcombine.low %v10703_v43, %v10711_v60 }
 0x563   : > { %v10941_v34 = vcombine.low %v20100_v0, %v20109_v62  ;;  %v15381_v46 = vcombine.high %v20100_v0, %v20109_v62  ;;  %v10957_v28 = vcombine.low %v20113_v29, %v20123_v61  ;;  %v10736_v39 = vcombine.low %v10719_v8, %v10727_v37  ;;  %v11417_v37 = vld [vmem:[#allocation2 + $0xa0] sm:$0xff] }
 0x564   : > { %v9625_v41 = vadd.f32 %v19972_v2, %v19787_v53  ;;  %v20144_v12 = vrot.slane %v10236_v30, %v19801_v20  ;;  %v10735_v60 = vrot.slane %v10728_v44, %v19801_v20  ;;  %11545 = vmatpush1.bf16.msra.mxu1 %v11415_v18  ;;  %v9629_v8 = vadd.f32 %v20013_v32, %v19784_v31 }
 0x565   : > { %v10743_v24 = vrot.slane %v10736_v39, %v19801_v20  ;;  %v9631_v2 = vadd.f32 %v20026_v17, %v19787_v53  ;;  %11546 = vmatprep.subr.bf16.mxu1 %v11418_v59  ;;  %v9633_v30 = vadd.f32 %v20035_v22, %v19784_v31  ;;  %v22830_v26 = vcombine.low %v19914_v45, %v19919_v56  ;;  %v11420_v59 = vld [vmem:[#allocation2 + $0xb8] sm:$0xff] }
 0x566   : > { %v9670_v54 = vmul.f32 0.088388346, %v9625_v41  ;;  %v22831_v18 = vcombine.high %v19914_v45, %v19919_v56  ;;  %v22832_v32 = vcombine.low %v19923_v5, %v19933_v38  ;;  %v9671_v43 = vmul.f32 0.088388346, %v9629_v8 }
 0x567   : > { %v10752_v44 = vrot.slane %v22830_v26, %v19793_v63  ;;  %v20170_v41 = vcombine.low %v10735_v60, %v10743_v24  ;;  %v20173_v14 = vmul.f32 0.088388346, %v9631_v2  ;;  %v9673_v3 = vmul.f32 0.088388346, %v9633_v30 }
 0x568   : > { %v10760_v39 = vrot.slane %v22831_v18, %v19793_v63  ;;  %v10768_v17 = vrot.slane %v22832_v32, %v19793_v63  ;;  %v9690_v22 = vpack.c.bf16 %v9670_v54, %v20049_v16  ;;  %v22833_v26 = vcombine.high %v19923_v5, %v19933_v38  ;;  %11547 = vmatpush1.bf16.msra.mxu1 %v11417_v37  ;;  %v11419_v5 = vld [vmem:[#allocation2 + $0xb0] sm:$0xff] }
 0x569   : > { %v22834_v18 = vcombine.low %v19930_v10, %v19942_v15  ;;  %v11343_v60 = vpack.i.b16 %v20170_v41, %v20104_v25  ;;  %v22835_v54 = vcombine.high %v19930_v10, %v19942_v15  ;;  %11548 = vmatprep.subr.bf16.mxu1 %v11420_v59  ;;  %v20190_v38 = vpack.c.bf16 %v9673_v3, %v9671_v43 }
 0x56a   : > { %v10776_v45 = vrot.slane %v22833_v26, %v19793_v63  ;;  %v10777_v56 = vcombine.low %v10752_v44, %v10760_v39  ;;  %v9743_v16 = vpack.i.b16 %v9690_v22, %v20064_v7  ;;  %v9746_v24 = vshrl.u32 %v9690_v22, 16  ;;  %v11422_v44 = vld [vmem:[#allocation2 + $0xc8] sm:$0xff] }
 0x56b   : > { %v10801_v32 = vrot.slane %v22834_v18, %v19793_v63  ;;  %v10809_v8 = vrot.slane %v22835_v54, %v19793_v63  ;;  %v10810_v37 = vcombine.low %v19937_v13, %v19948_v58  ;;  %11472 = vmatmul.mubr.bf16.gmra.mrb[4].mxu1 %v11343_v60  ;;  %v15376_v15 = vcombine.high %v19937_v13, %v19948_v58  ;;  %v11421_v13 = vld [vmem:[#allocation2 + $0xc0] sm:$0xff]  ;;  %v11424_v60 = vld [vmem:[#allocation2 + $0xd8] sm:$0xff] }
 0x56c   : > { %v10784_v2 = vrot.slane %v10777_v56, %v19801_v20  ;;  %v10785_v30 = vcombine.low %v10768_v17, %v10776_v45  ;;  %v9747_v39 = vpack.i.b16 %v9746_v24, %v9745_v42  ;;  %v10255_v22 = vcombine.high %v9743_v16, %v19797_v27  ;;  %11481 = vmatprep.mubr.bf16.mxu1 %v22829_v40 }
 0x56d   : > { %v10262_v10 = vrot.slane %v9743_v16, %v19793_v63  ;;  %v9753_v3 = vshrl.u32 %v20190_v38, 16  ;;  %v10817_v17 = vrot.slane %v10810_v37, %v19793_v63  ;;  %v10826_v59 = vcombine.low %v10801_v32, %v10809_v8  ;;  %11549 = vmatpush1.bf16.msra.mxu1 %v11419_v5 }
 0x56e   : > { %v10792_v43 = vrot.slane %v10785_v30, %v19801_v20  ;;  %v10269_v7 = vrot.slane %v10255_v22, %v19793_v63  ;;  %v10304_v45 = vcombine.high %v9747_v39, %v19797_v27  ;;  %11550 = vmatprep.subr.bf16.mxu1 %v11422_v44  ;;  %v10311_v58 = vrot.slane %v9747_v39, %v19793_v63 }
 0x56f   : > { %v10270_v42 = vcombine.high %v10262_v10, %v22829_v40  ;;  %v20208_v26 = vrot.slane %v10262_v10, %v19801_v20  ;;  %v10825_v18 = vrot.slane %v15376_v15, %v19793_v63  ;;  %v10833_v32 = vrot.slane %v10826_v59, %v19801_v20  ;;  %v11423_v15 = vld [vmem:[#allocation2 + $0xd0] sm:$0xff] }
 0x570   : > { %v20212_v56 = vcombine.low %v10784_v2, %v10792_v43  ;;  %v10285_v24 = vcombine.high %v10269_v7, %v22829_v40  ;;  %v20221_v54 = vrot.slane %v10269_v7, %v19801_v20  ;;  %v10318_v8 = vrot.slane %v10304_v45, %v19793_v63  ;;  %v11426_v7 = vld [vmem:[#allocation2 + $0xe8] sm:$0xff] }
 0x571   : > { %v20217_v16 = vrot.slane %v10270_v42, %v19801_v20  ;;  %v10319_v5 = vcombine.high %v10311_v58, %v22829_v40  ;;  %v20226_v2 = vrot.slane %v10311_v58, %v19801_v20  ;;  %v10834_v30 = vcombine.low %v10817_v17, %v10825_v18  ;;  %11551 = vmatpush1.bf16.msra.mxu1 %v11421_v13 }
 0x572   : > { %v9635_v37 = vadd.f32 %v20043_v47, %v19787_v53  ;;  %v20231_v44 = vrot.slane %v10285_v24, %v19801_v20  ;;  %v10334_v39 = vcombine.high %v10318_v8, %v22829_v40  ;;  %v20235_v22 = vrot.slane %v10318_v8, %v19801_v20  ;;  %11552 = vmatprep.subr.bf16.mxu1 %v11424_v60 }
 0x573   : > { %v11039_v10 = vcombine.low %v20208_v26, %v20217_v16  ;;  %v20240_v43 = vrot.slane %v10319_v5, %v19801_v20  ;;  %v15385_v47 = vcombine.high %v20208_v26, %v20217_v16  ;;  %v10841_v17 = vrot.slane %v10834_v30, %v19801_v20 }
 0x574   : > { %v9674_v59 = vmul.f32 0.088388346, %v9635_v37  ;;  %v20246_v42 = vrot.slane %v10334_v39, %v19801_v20  ;;  %v11055_v45 = vcombine.low %v20221_v54, %v20231_v44  ;;  %v15386_v13 = vcombine.high %v20221_v54, %v20231_v44 }
 0x575   : > { %v9639_v58 = vadd.f32 %v20074_v19, %v19784_v31  ;;  %v11088_v18 = vcombine.low %v20226_v2, %v20240_v43  ;;  %v20258_v24 = vcombine.low %v10833_v32, %v10841_v17  ;;  %11553 = vmatpush1.bf16.msra.mxu1 %v11423_v15  ;;  %v9641_v30 = vadd.f32 %v20077_v6, %v19787_v53 }
 0x576   : > { %v9692_v8 = vpack.c.bf16 %v9674_v59, %v20173_v14  ;;  %v9643_v37 = vadd.f32 %v20086_v35, %v19784_v31  ;;  %v22836_v19 = vcombine.low %v19962_v51, %v19975_v52  ;;  %11554 = vmatprep.subr.bf16.mxu1 %v11426_v7  ;;  %v22837_v15 = vcombine.high %v19962_v51, %v19975_v52 }
 0x577   : > { %v9675_v5 = vmul.f32 0.088388346, %v9639_v58  ;;  %v11351_v32 = vpack.i.b16 %v20258_v24, %v20212_v56  ;;  %v20276_v59 = vmul.f32 0.088388346, %v9641_v30  ;;  %v22838_v35 = vcombine.low %v19968_v55, %v19982_v9  ;;  %v11428_v30 = vld [vmem:[#allocation2 + $0xf8] sm:$0xff] }
 0x578   : > { %v10850_v39 = vrot.slane %v22836_v19, %v19793_v63  ;;  %v9751_v17 = vpack.i.b16 %v9692_v8, %v20190_v38  ;;  %v9754_v14 = vshrl.u32 %v9692_v8, 16  ;;  %v10858_v6 = vrot.slane %v22837_v15, %v19793_v63  ;;  %v11425_v38 = vld [vmem:[#allocation2 + $0xe0] sm:$0xff] }
 0x579   : > { %v9677_v31 = vmul.f32 0.088388346, %v9643_v37  ;;  %v10866_v58 = vrot.slane %v22838_v35, %v19793_v63  ;;  %v22839_v7 = vcombine.high %v19968_v55, %v19982_v9  ;;  %11482 = vmatmul.mubr.bf16.gmra.mrb[8].mxu1 %v11351_v32  ;;  %v22840_v35 = vcombine.low %v19987_v1, %v19998_v11 }
 0x57a   : > { %v9755_v8 = vpack.i.b16 %v9754_v14, %v9753_v3  ;;  %v10353_v60 = vcombine.high %v9751_v17, %v19797_v27  ;;  %v10360_v51 = vrot.slane %v9751_v17, %v19793_v63  ;;  %v10875_v52 = vcombine.low %v10850_v39, %v10858_v6  ;;  %11491 = vmatprep.mubr.bf16.mxu1 %v22829_v40 }
 0x57b   : > { %v10874_v19 = vrot.slane %v22839_v7, %v19793_v63  ;;  %v20289_v37 = vpack.c.bf16 %v9677_v31, %v9675_v5  ;;  %v10899_v55 = vrot.slane %v22840_v35, %v19793_v63  ;;  %v22841_v9 = vcombine.high %v19987_v1, %v19998_v11  ;;  %11555 = vmatpush1.bf16.msra.mxu1 %v11425_v38  ;;  %v11427_v1 = vld [vmem:[#allocation2 + $0xf0] sm:$0xff] }
 0x57c   : > { %v10367_v32 = vrot.slane %v10353_v60, %v19793_v63  ;;  %v10368_v39 = vcombine.high %v10360_v51, %v22829_v40  ;;  %v20302_v17 = vrot.slane %v10360_v51, %v19801_v20  ;;  %v10402_v5 = vcombine.high %v9755_v8, %v19797_v27  ;;  %11556 = vmatprep.subr.bf16.mxu1 %v11428_v30 }
 0x57d   : > { %v10883_v15 = vcombine.low %v10866_v58, %v10874_v19  ;;  %v10907_v3 = vrot.slane %v22841_v9, %v19793_v63  ;;  %v10409_v14 = vrot.slane %v9755_v8, %v19793_v63  ;;  %v9761_v6 = vshrl.u32 %v20289_v37, 16 }
 0x57e   : > { %v10882_v31 = vrot.slane %v10875_v52, %v19801_v20  ;;  %v20310_v11 = vrot.slane %v10368_v39, %v19801_v20  ;;  %v10383_v60 = vcombine.high %v10367_v32, %v22829_v40  ;;  %v20314_v7 = vrot.slane %v10367_v32, %v19801_v20 }
 0x57f   : > { %v10890_v58 = vrot.slane %v10883_v15, %v19801_v20  ;;  %v10416_v19 = vrot.slane %v10402_v5, %v19793_v63  ;;  %v10417_v38 = vcombine.high %v10409_v14, %v22829_v40  ;;  %v20319_v8 = vrot.slane %v10409_v14, %v19801_v20  ;;  %11557 = vmatpush1.bf16.msra.mxu1 %v11427_v1 }
 0x580   : > { %v10908_v52 = vcombine.low %v20002_v50, %v20016_v49  ;;  %v20326_v30 = vrot.slane %v10383_v60, %v19801_v20  ;;  %v11137_v9 = vcombine.low %v20302_v17, %v20310_v11  ;;  %v15389_v39 = vcombine.high %v20302_v17, %v20310_v11 }
 0x581   : > { %v20321_v51 = vcombine.low %v10882_v31, %v10890_v58  ;;  %v10432_v15 = vcombine.high %v10416_v19, %v22829_v40  ;;  %v20330_v35 = vrot.slane %v10416_v19, %v19801_v20  ;;  %v20335_v32 = vrot.slane %v10417_v38, %v19801_v20 }
 0x582   : > { %v10915_v5 = vrot.slane %v10908_v52, %v19793_v63  ;;  %v15380_v14 = vcombine.high %v20002_v50, %v20016_v49  ;;  %v11153_v58 = vcombine.low %v20314_v7, %v20326_v30  ;;  %v15390_v1 = vcombine.high %v20314_v7, %v20326_v30 }
 0x583   : > { %v20343_v31 = vrot.slane %v10432_v15, %v19801_v20  ;;  %v10924_v60 = vcombine.low %v10899_v55, %v10907_v3  ;;  %v9645_v49 = vadd.f32 %v20090_v21, %v19787_v53  ;;  %v10948_v15 = vrot.slane %v10941_v34, %v19793_v63 }
 0x584   : > { %v10923_v52 = vrot.slane %v15380_v14, %v19793_v63  ;;  %v10956_v55 = vrot.slane %v15381_v46, %v19793_v63  ;;  %v10964_v3 = vrot.slane %v10957_v28, %v19793_v63  ;;  %v22842_v53 = vcombine.high %v20113_v29, %v20123_v61 }
 0x585   : > { %v10931_v50 = vrot.slane %v10924_v60, %v19801_v20  ;;  %v9678_v38 = vmul.f32 0.088388346, %v9645_v49  ;;  %v22843_v34 = vcombine.low %v20118_v23, %v20131_v36  ;;  %v22844_v0 = vcombine.high %v20118_v23, %v20131_v36 }
 0x586   : > { %v10932_v14 = vcombine.low %v10915_v5, %v10923_v52  ;;  %v10972_v21 = vrot.slane %v22842_v53, %v19793_v63  ;;  %v10973_v19 = vcombine.low %v10948_v15, %v10956_v55  ;;  %v11006_v46 = vcombine.low %v20135_v48, %v20144_v12 }
 0x587   : > { %v10997_v60 = vrot.slane %v22843_v34, %v19793_v63  ;;  %v11005_v62 = vrot.slane %v22844_v0, %v19793_v63  ;;  %v15384_v28 = vcombine.high %v20135_v48, %v20144_v12  ;;  %v9694_v61 = vpack.c.bf16 %v9678_v38, %v20276_v59 }
 0x588   : > { %v10939_v29 = vrot.slane %v10932_v14, %v19801_v20  ;;  %v10981_v5 = vcombine.low %v10964_v3, %v10972_v21  ;;  %v11046_v52 = vrot.slane %v11039_v10, %v19793_v63  ;;  %v10980_v49 = vrot.slane %v10973_v19, %v19801_v20 }
 0x589   : > { %v11013_v23 = vrot.slane %v11006_v46, %v19793_v63  ;;  %v11021_v36 = vrot.slane %v15384_v28, %v19793_v63  ;;  %v11022_v15 = vcombine.low %v10997_v60, %v11005_v62  ;;  %v9759_v48 = vpack.i.b16 %v9694_v61, %v20289_v37 }
 0x58a   : > { %v20394_v55 = vcombine.low %v10931_v50, %v10939_v29  ;;  %v9762_v12 = vshrl.u32 %v9694_v61, 16  ;;  %v10988_v59 = vrot.slane %v10981_v5, %v19801_v20  ;;  %v11054_v10 = vrot.slane %v15385_v47, %v19793_v63 }
 0x58b   : > { %v11029_v38 = vrot.slane %v11022_v15, %v19801_v20  ;;  %v11030_v3 = vcombine.low %v11013_v23, %v11021_v36  ;;  %v11062_v19 = vrot.slane %v11055_v45, %v19793_v63  ;;  %v10451_v14 = vcombine.high %v9759_v48, %v19797_v27 }
 0x58c   : > { %v11359_v50 = vpack.i.b16 %v20394_v55, %v20321_v51  ;;  %v9763_v37 = vpack.i.b16 %v9762_v12, %v9761_v6  ;;  %v10458_v53 = vrot.slane %v9759_v48, %v19793_v63  ;;  %v20411_v21 = vcombine.low %v10980_v49, %v10988_v59 }
 0x58d   : > { %v11037_v34 = vrot.slane %v11030_v3, %v19801_v20  ;;  %v11070_v26 = vrot.slane %v15386_v13, %v19793_v63  ;;  %v11071_v16 = vcombine.low %v11046_v52, %v11054_v10  ;;  %v10465_v47 = vrot.slane %v10451_v14, %v19793_v63 }
 0x58e   : > { %11492 = vmatmul.mubr.bf16.gmra.mrb[12].mxu1 %v11359_v50  ;;  %v10466_v45 = vcombine.high %v10458_v53, %v22829_v40  ;;  %v10473_v6 = vrot.slane %v10458_v53, %v19801_v20  ;;  %v10500_v60 = vcombine.high %v9763_v37, %v19797_v27  ;;  %v10507_v0 = vrot.slane %v9763_v37, %v19793_v63 }
 0x58f   : > { %11501 = vmatprep.mubr.bf16.mxu1 %v22829_v40  ;;  %v20424_v62 = vcombine.low %v11029_v38, %v11037_v34  ;;  %v11078_v46 = vrot.slane %v11071_v16, %v19801_v20  ;;  %v11079_v54 = vcombine.low %v11062_v19, %v11070_v26  ;;  %v10481_v13 = vcombine.high %v10465_v47, %v22829_v40 }
 0x590   : > { %v10480_v44 = vrot.slane %v10466_v45, %v19801_v20  ;;  %v10488_v28 = vrot.slane %v10465_v47, %v19801_v20  ;;  %v10514_v29 = vrot.slane %v10500_v60, %v19793_v63  ;;  %v10515_v61 = vcombine.high %v10507_v0, %v22829_v40 }
 0x591   : > { %v10522_v27 = vrot.slane %v10507_v0, %v19801_v20  ;;  %v11367_v5 = vpack.i.b16 %v20424_v62, %v20411_v21  ;;  %v11086_v52 = vrot.slane %v11079_v54, %v19801_v20  ;;  %v10495_v49 = vrot.slane %v10481_v13, %v19801_v20 }
 0x592   : > { %v10530_v23 = vcombine.high %v10514_v29, %v22829_v40  ;;  %v10537_v36 = vrot.slane %v10514_v29, %v19801_v20  ;;  %v11235_v15 = vcombine.low %v10473_v6, %v10480_v44  ;;  %v10529_v48 = vrot.slane %v10515_v61, %v19801_v20 }
 0x593   : > { %v15393_v12 = vcombine.high %v10473_v6, %v10480_v44  ;;  %v20440_v59 = vcombine.low %v11078_v46, %v11086_v52  ;;  %v11095_v38 = vrot.slane %v11088_v18, %v19793_v63  ;;  %v11251_v10 = vcombine.low %v10488_v28, %v10495_v49 }
 0x594   : > { %v10544_v3 = vrot.slane %v10530_v23, %v19801_v20  ;;  %v15394_v19 = vcombine.high %v10488_v28, %v10495_v49  ;;  %v22845_v50 = vcombine.high %v20226_v2, %v20240_v43  ;;  %v11284_v14 = vcombine.low %v10522_v27, %v10529_v48 }
 0x595   : > { %v15395_v53 = vcombine.high %v10522_v27, %v10529_v48  ;;  %v11104_v34 = vcombine.low %v20235_v22, %v20246_v42  ;;  %v15388_v26 = vcombine.high %v20235_v22, %v20246_v42  ;;  %v11144_v18 = vrot.slane %v11137_v9, %v19793_v63 }
 0x596   : > { %v11103_v37 = vrot.slane %v22845_v50, %v19793_v63  ;;  %11502 = vmatmul.mubr.bf16.gmra.mrb[16].mxu1 %v11367_v5  ;;  %v11152_v2 = vrot.slane %v15389_v39, %v19793_v63  ;;  %v11160_v43 = vrot.slane %v11153_v58, %v19793_v63  ;;  %v11168_v9 = vrot.slane %v15390_v1, %v19793_v63 }
 0x597   : > { %11511 = vmatprep.mubr.bf16.mxu1 %v22829_v40  ;;  %v11111_v22 = vrot.slane %v11104_v34, %v19793_v63  ;;  %v11119_v42 = vrot.slane %v15388_v26, %v19793_v63  ;;  %v22846_v17 = vcombine.low %v20319_v8, %v20335_v32  ;;  %v22847_v58 = vcombine.high %v20319_v8, %v20335_v32 }
 0x598   : > { %v11120_v16 = vcombine.low %v11095_v38, %v11103_v37  ;;  %v11169_v47 = vcombine.low %v11144_v18, %v11152_v2  ;;  %v11202_v6 = vcombine.low %v20330_v35, %v20343_v31  ;;  %v11177_v0 = vcombine.low %v11160_v43, %v11168_v9 }
 0x599   : > { %v11193_v11 = vrot.slane %v22846_v17, %v19793_v63  ;;  %v11201_v45 = vrot.slane %v22847_v58, %v19793_v63  ;;  %v11128_v60 = vcombine.low %v11111_v22, %v11119_v42  ;;  %v15392_v7 = vcombine.high %v20330_v35, %v20343_v31 }
 0x59a   : > { %v11127_v39 = vrot.slane %v11120_v16, %v19801_v20  ;;  %v11242_v30 = vrot.slane %v11235_v15, %v19793_v63  ;;  %v11176_v1 = vrot.slane %v11169_v47, %v19801_v20  ;;  %v11209_v46 = vrot.slane %v11202_v6, %v19793_v63 }
 0x59b   : > { %v11218_v54 = vcombine.low %v11193_v11, %v11201_v45  ;;  %v11250_v44 = vrot.slane %v15393_v12, %v19793_v63  ;;  %v11135_v8 = vrot.slane %v11128_v60, %v19801_v20  ;;  %v11184_v32 = vrot.slane %v11177_v0, %v19801_v20 }
 0x59c   : > { %v11217_v13 = vrot.slane %v15392_v7, %v19793_v63  ;;  %v11258_v28 = vrot.slane %v11251_v10, %v19793_v63  ;;  %v11266_v35 = vrot.slane %v15394_v19, %v19793_v63  ;;  %v11291_v61 = vrot.slane %v11284_v14, %v19793_v63 }
 0x59d   : > { %v11225_v29 = vrot.slane %v11218_v54, %v19801_v20  ;;  %v11267_v31 = vcombine.low %v11242_v30, %v11250_v44  ;;  %v11136_v27 = vcombine.low %v11127_v39, %v11135_v8  ;;  %v11185_v5 = vcombine.low %v11176_v1, %v11184_v32 }
 0x59e   : > { %v11226_v52 = vcombine.low %v11209_v46, %v11217_v13  ;;  %v11299_v49 = vrot.slane %v15395_v53, %v19793_v63  ;;  %v11275_v15 = vcombine.low %v11258_v28, %v11266_v35  ;;  %v11300_v48 = vcombine.low %v10537_v36, %v10544_v3  ;;  %v12079_v28 = vld [vmem:[#allocation3 + $0x40] sm:$0xff]  ;;  %v12080_v35 = vld [vmem:[#allocation3 + $0x48] sm:$0xff] }
 0x59f   : > { %v11274_v23 = vrot.slane %v11267_v31, %v19801_v20  ;;  %v15396_v12 = vcombine.high %v10537_v36, %v10544_v3  ;;  %v11375_v38 = vpack.i.b16 %v11136_v27, %v20440_v59  ;;  %v11346_v19 = vshrl.u32 %v20170_v41, 16  ;;  %15471 = vmatprep.subr.bf16.mxu0 %v12079_v28 }
 0x5a0   : > { %v11233_v10 = vrot.slane %v11226_v52, %v19801_v20  ;;  %v11316_v50 = vcombine.low %v11291_v61, %v11299_v49  ;;  %v11282_v37 = vrot.slane %v11275_v15, %v19801_v20  ;;  %v11307_v14 = vrot.slane %v11300_v48, %v19793_v63  ;;  %v12081_v49 = vld [vmem:[#allocation3 + $0x50] sm:$0xff] }
 0x5a1   : > { %v11315_v34 = vrot.slane %v15396_v12, %v19793_v63  ;;  %v11353_v53 = vshrl.u32 %v20212_v56, 16  ;;  %11512 = vmatmul.mubr.bf16.gmra.mrb[20].mxu1 %v11375_v38  ;;  %v22848_v36 = vshrl.u32 %v20104_v25, 16  ;;  %v11354_v18 = vshrl.u32 %v20258_v24, 16  ;;  %v12073_v48 = vld [vmem:[#allocation3 + $0x10] sm:$0xff]  ;;  %v12082_v12 = vld [vmem:[#allocation3 + $0x58] sm:$0xff] }
 0x5a2   : > { %v11234_v26 = vcombine.low %v11225_v29, %v11233_v10  ;;  %v11323_v16 = vrot.slane %v11316_v50, %v19801_v20  ;;  %11521 = vmatprep.mubr.bf16.mxu1 %v22829_v40  ;;  %v11283_v41 = vcombine.low %v11274_v23, %v11282_v37  ;;  %v11361_v43 = vshrl.u32 %v20321_v51, 16  ;;  %v12071_v29 = vld [vmem:[#allocation3] sm:$0xff]  ;;  %v12074_v38 = vld [vmem:[#allocation3 + $0x18] sm:$0xff] }
 0x5a3   : > { %v11347_v3 = vpack.i.b16 %v11346_v19, %v22848_v36  ;;  %v11324_v2 = vcombine.low %v11307_v14, %v11315_v34  ;;  %v11362_v22 = vshrl.u32 %v20394_v55, 16  ;;  %v11355_v9 = vpack.i.b16 %v11354_v18, %v11353_v53  ;;  %15472 = vmatpush3.bf16.msra.mxu0 %v12071_v29  ;;  %v12083_v10 = vld [vmem:[#allocation3 + $0x60] sm:$0xff]  ;;  %v12084_v19 = vld [vmem:[#allocation3 + $0x68] sm:$0xff]  ;;  %v12085_v53 = vld [vmem:[#allocation3 + $0x70] sm:$0xff] }
 0x5a4   : > { %v11383_v42 = vpack.i.b16 %v11234_v26, %v11185_v5  ;;  %v11369_v56 = vshrl.u32 %v20411_v21, 16  ;;  %v11370_v17 = vshrl.u32 %v20424_v62, 16  ;;  %v11377_v39 = vshrl.u32 %v20440_v59, 16  ;;  %15473 = vmatprep.subr.bf16.mxu0 %v12080_v35  ;;  %v12075_v50 = vld [vmem:[#allocation3 + $0x20] sm:$0xff]  ;;  %v12076_v34 = vld [vmem:[#allocation3 + $0x28] sm:$0xff]  ;;  %v12077_v18 = vld [vmem:[#allocation3 + $0x30] sm:$0xff] }
 0x5a5   : > { %v11331_v11 = vrot.slane %v11324_v2, %v19801_v20  ;;  %v11363_v25 = vpack.i.b16 %v11362_v22, %v11361_v43  ;;  %v11378_v24 = vshrl.u32 %v11136_v27, 16  ;;  %v11385_v58 = vshrl.u32 %v11185_v5, 16  ;;  %v12072_v27 = vld [vmem:[#allocation3 + $0x8] sm:$0xff]  ;;  %v12095_v37 = vld [vmem:[#allocation3 + $0xc0] sm:$0xff]  ;;  %v12086_v2 = vld [vmem:[#allocation3 + $0x78] sm:$0xff] }
 0x5a6   : > { %v11371_v47 = vpack.i.b16 %v11370_v17, %v11369_v56  ;;  %v11386_v45 = vshrl.u32 %v11234_v26, 16  ;;  %v11393_v55 = vshrl.u32 %v11283_v41, 16  ;;  %15535 = vmatprep.subr.bf16.mxu1 %v12095_v37  ;;  %v12087_v14 = vld [vmem:[#allocation3 + $0x80] sm:$0xff]  ;;  %v12096_v22 = vld [vmem:[#allocation3 + $0xc8] sm:$0xff]  ;;  %v12078_v56 = vld [vmem:[#allocation3 + $0x38] sm:$0xff] }
 0x5a7   : > { %v11332_v6 = vcombine.low %v11323_v16, %v11331_v11  ;;  %v11379_v60 = vpack.i.b16 %v11378_v24, %v11377_v39  ;;  %15474 = vmatpush3.bf16.msra.mxu0 %v12072_v27  ;;  %v12089_v17 = vld [vmem:[#allocation3 + $0x90] sm:$0xff] }
 0x5a8   : > { %v11387_v51 = vpack.i.b16 %v11386_v45, %v11385_v58  ;;  %15475 = vmatprep.subr.bf16.mxu0 %v12081_v49  ;;  %v12090_v45 = vld [vmem:[#allocation3 + $0x98] sm:$0xff] }
 0x5a9   : > { %v11391_v0 = vpack.i.b16 %v11332_v6, %v11283_v41  ;;  %v11394_v7 = vshrl.u32 %v11332_v6, 16  ;;  %11522 = vmatmul.mubr.bf16.gmra.mrb[24].mxu1 %v11383_v42  ;;  %v12088_v42 = vld [vmem:[#allocation3 + $0x88] sm:$0xff] }
 0x5aa   : > { %11531 = vmatprep.mubr.bf16.mxu1 %v22829_v40 }
 0x5ab   : > { %v11395_v21 = vpack.i.b16 %v11394_v7, %v11393_v55  ;;  %15476 = vmatpush3.bf16.msra.mxu0 %v12073_v48  ;;  %v12092_v7 = vld [vmem:[#allocation3 + $0xa8] sm:$0xff] }
 0x5ac   : > { %15477 = vmatprep.subr.bf16.mxu0 %v12082_v12 }
 0x5af   : > { %15478 = vmatpush3.bf16.msra.mxu0 %v12074_v38 }
 0x5b0   : > { %15479 = vmatprep.subr.bf16.mxu0 %v12083_v10 }
 0x5b1   : > { %11532 = vmatmul.mubr.bf16.gmra.mrb[28].mxu1 %v11391_v0  ;;  %v12100_v0 = vld [vmem:[#allocation3 + $0xe8] sm:$0xff] }
 0x5b2   : > { %11574 = vmatprep.mubr.bf16.mxu1 %v22829_v40 }
 0x5b3   : > { %15480 = vmatpush3.bf16.msra.mxu0 %v12075_v50 }
 0x5b4   : > { %15481 = vmatprep.subr.bf16.mxu0 %v12084_v19 }
 0x5b7   : > { %15482 = vmatpush3.bf16.msra.mxu0 %v12076_v34 }
 0x5b8   : > { %15483 = vmatprep.subr.bf16.mxu0 %v12085_v53 }
 0x5b9   : > { %11575 = vmatmul.mubr.bf16.vlgmr.msra.gmra.mrb[32].mxu1 %v20106_v57 }
 0x5ba   : > { %11584 = vmatprep.mubr.bf16.mxu1 %v22829_v40  ;;  %15536 = vmatpush3.bf16.msra.mxu1 %v12087_v14 }
 0x5bb   : > { %15484 = vmatpush3.bf16.msra.mxu0 %v12077_v18  ;;  %15537 = vmatprep.subr.bf16.mxu1 %v12096_v22 }
 0x5bc   : > { %15485 = vmatprep.subr.bf16.mxu0 %v12086_v2 }
 0x5be   : > { %15538 = vmatpush3.bf16.msra.mxu1 %v12088_v42 }
 0x5bf   : > { %15486 = vmatpush3.bf16.msra.mxu0 %v12078_v56 }
 0x5c1   : > { %11585 = vmatmul.mubr.bf16.gmra.mrb[36].mxu1 %v11347_v3 }
 0x5c2   : > { %11594 = vmatprep.mubr.bf16.mxu1 %v22829_v40 }
 0x5c9   : > { %11595 = vmatmul.mubr.bf16.gmra.mrb[40].mxu1 %v11355_v9  ;;  %v12097_v9 = vld [vmem:[#allocation3 + $0xd0] sm:$0xff] }
 0x5ca   : > { %11604 = vmatprep.mubr.bf16.mxu1 %v22829_v40  ;;  %15539 = vmatprep.subr.bf16.mxu1 %v12097_v9 }
 0x5cb   : > { %15540 = vmatpush3.bf16.msra.mxu1 %v12089_v17 }
 0x5d1   : > { %11605 = vmatmul.mubr.bf16.gmra.mrb[44].mxu1 %v11363_v25  ;;  %v12098_v25 = vld [vmem:[#allocation3 + $0xd8] sm:$0xff] }
 0x5d2   : > { %11614 = vmatprep.mubr.bf16.mxu1 %v22829_v40  ;;  %15541 = vmatprep.subr.bf16.mxu1 %v12098_v25 }
 0x5d3   : > { %15542 = vmatpush3.bf16.msra.mxu1 %v12090_v45 }
 0x5d9   : > { %11615 = vmatmul.mubr.bf16.gmra.mrb[48].mxu1 %v11371_v47 }
 0x5da   : > { %11624 = vmatprep.mubr.bf16.mxu1 %v22829_v40 }
 0x5e1   : > { %11625 = vmatmul.mubr.bf16.gmra.mrb[52].mxu1 %v11379_v60  ;;  %v12099_v60 = vld [vmem:[#allocation3 + $0xe0] sm:$0xff] }
 0x5e2   : > { %11634 = vmatprep.mubr.bf16.mxu1 %v22829_v40  ;;  %15543 = vmatprep.subr.bf16.mxu1 %v12099_v60 }
 0x5e9   : > { %11635 = vmatmul.mubr.bf16.gmra.mrb[56].mxu1 %v11387_v51  ;;  %v12091_v51 = vld [vmem:[#allocation3 + $0xa0] sm:$0xff] }
 0x5ea   : > { %11644 = vmatprep.mubr.bf16.mxu1 %v22829_v40  ;;  %15544 = vmatpush3.bf16.msra.mxu1 %v12091_v51 }
 0x5eb   : > { %15545 = vmatprep.subr.bf16.mxu1 %v12100_v0 }
 0x5ee   : > { %15546 = vmatpush3.bf16.msra.mxu1 %v12092_v7 }
 0x5f1   : > { %11645 = vmatmul.mubr.bf16.gmra.mrb[60].mxu1 %v11395_v21 }
 0x632   : > { %v20528_v57 = vpop.f32.mrb[0].mxu1 }
 0x633   : > { %v20530_v62 = vpop.f32.mrb[1].mxu1 }
 0x634   : > { %v20532_v59 = vpop.f32.mrb[2].mxu1  ;;  %v11655_v30 = vmax.f32 %v20528_v57, %v20530_v62 }
 0x635   : > { %v20536_v1 = vpop.f32.mrb[3].mxu1 }
 0x636   : > { %11656 = vmax.xlane.f32.xlu0 %v11655_v30  ;;  %v11658_v46 = vmax.f32 %v20532_v59, %v20536_v1 }
 0x63a   : > { %11659 = vmax.xlane.f32.xlu0 %v11658_v46 }
 0x63e   : > { %v20540_v54 = vpop.f32.mrb[4].mxu1 }
 0x63f   : > { %v20542_v40 = vpop.f32.mrb[5].mxu1 }
 0x640   : > { %v20544_v44 = vpop.f32.mrb[6].mxu1  ;;  %v11661_v8 = vmax.f32 %v20540_v54, %v20542_v40 }
 0x641   : > { %v20548_v32 = vpop.f32.mrb[7].mxu1 }
 0x642   : > { %11662 = vmax.xlane.f32.xlu0 %v11661_v8  ;;  %v11664_v13 = vmax.f32 %v20544_v44, %v20548_v32 }
 0x64c   : > { %v20552_v31 = vpop.f32.mrb[8].mxu1 }
 0x64d   : > { %v20554_v61 = vpop.f32.mrb[9].mxu1 }
 0x64e   : > { %v20556_v5 = vpop.f32.mrb[10].mxu1  ;;  %v11667_v52 = vmax.f32 %v20552_v31, %v20554_v61 }
 0x64f   : > { %v20560_v23 = vpop.f32.mrb[11].mxu1 }
 0x650   : > { %v11670_v15 = vmax.f32 %v20556_v5, %v20560_v23 }
 0x661   : > { %v20564_v26 = vpop.f32.mrb[12].mxu1 }
 0x662   : > { %v20566_v16 = vpop.f32.mrb[13].mxu1 }
 0x663   : > { %v20568_v36 = vpop.f32.mrb[14].mxu1  ;;  %v11673_v3 = vmax.f32 %v20564_v26, %v20566_v16 }
 0x664   : > { %v20572_v41 = vpop.f32.mrb[15].mxu1 }
 0x665   : > { %v11676_v43 = vmax.f32 %v20568_v36, %v20572_v41 }
 0x669   : > { %v20576_v11 = vpop.f32.mrb[16].mxu1 }
 0x66a   : > { %v20578_v39 = vpop.f32.mrb[17].mxu1 }
 0x66b   : > { %v20580_v24 = vpop.f32.mrb[18].mxu1  ;;  %v11679_v47 = vmax.f32 %v20576_v11, %v20578_v39 }
 0x66c   : > { %v20584_v58 = vpop.f32.mrb[19].mxu1 }
 0x66d   : > { %v11682_v6 = vmax.f32 %v20580_v24, %v20584_v58 }
 0x674   : > { %v20588_v55 = vpop.f32.mrb[20].mxu1 }
 0x675   : > { %v20590_v21 = vpop.f32.mrb[21].mxu1 }
 0x676   : > { %v20592_v30 = vpop.f32.mrb[22].mxu1  ;;  %v11685_v46 = vmax.f32 %v20588_v55, %v20590_v21 }
 0x677   : > { %v20596_v8 = vpop.f32.mrb[23].mxu1 }
 0x67c   : > { %v20600_v29 = vpop.f32.mrb[24].mxu1 }
 0x67d   : > { %v20602_v35 = vpop.f32.mrb[25].mxu1 }
 0x67e   : > { %v20604_v27 = vpop.f32.mrb[26].mxu1 }
 0x67f   : > { %v20608_v48 = vpop.f32.mrb[27].mxu1 }
 0x680   : > { %22849 = vst [vmem:[#allocation94_spill] sm:$0xff] %v20608_v48 }
 0x684   : > { %v20612_v38 = vpop.f32.mrb[28].mxu1 }
 0x685   : > { %22850 = vst [vmem:[#allocation95_spill] sm:$0xff] %v20612_v38  ;;  %v20614_v10 = vpop.f32.mrb[29].mxu1 }
 0x686   : > { %22851 = vst [vmem:[#allocation96_spill] sm:$0xff] %v20614_v10  ;;  %v20616_v50 = vpop.f32.mrb[30].mxu1 }
 0x687   : > { %v20620_v37 = vpop.f32.mrb[31].mxu1 }
 0x68c   : > { %v20624_v34 = vpop.f32.mrb[32].mxu1 }
 0x68d   : > { %v20626_v53 = vpop.f32.mrb[33].mxu1 }
 0x68e   : > { %v20628_v18 = vpop.f32.mrb[34].mxu1  ;;  %v11703_v2 = vmax.f32 %v20624_v34, %v20626_v53 }
 0x68f   : > { %v20632_v22 = vpop.f32.mrb[35].mxu1 }
 0x690   : > { %11704 = vmax.xlane.f32.xlu1 %v11703_v2  ;;  %v11706_v42 = vmax.f32 %v20628_v18, %v20632_v22 }
 0x694   : > { %11707 = vmax.xlane.f32.xlu1 %v11706_v42  ;;  %v20636_v9 = vpop.f32.mrb[36].mxu1 }
 0x695   : > { %v20638_v56 = vpop.f32.mrb[37].mxu1 }
 0x696   : > { %v20640_v17 = vpop.f32.mrb[38].mxu1  ;;  %v11709_v25 = vmax.f32 %v20636_v9, %v20638_v56 }
 0x697   : > { %v20644_v45 = vpop.f32.mrb[39].mxu1 }
 0x698   : > { %11665 = vmax.xlane.f32.xlu1 %v11664_v13  ;;  %11710 = vmax.xlane.f32.xlu0 %v11709_v25  ;;  %v11712_v60 = vmax.f32 %v20640_v17, %v20644_v45 }
 0x69c   : > { %11668 = vmax.xlane.f32.xlu0 %v11667_v52  ;;  %11713 = vmax.xlane.f32.xlu1 %v11712_v60  ;;  %v20654_v51 = vpop.f32.mrb[40].mxu1 }
 0x69d   : > { %v20656_v0 = vpop.f32.mrb[41].mxu1 }
 0x69e   : > { %v20658_v7 = vpop.f32.mrb[42].mxu1  ;;  %v11715_v2 = vmax.f32 %v20654_v51, %v20656_v0 }
 0x69f   : > { %v20662_v42 = vpop.f32.mrb[43].mxu1 }
 0x6a0   : > { %11671 = vmax.xlane.f32.xlu1 %v11670_v15  ;;  %11716 = vmax.xlane.f32.xlu0 %v11715_v2  ;;  %v11718_v13 = vmax.f32 %v20658_v7, %v20662_v42  ;;  %v12101_v15 = vld [vmem:[#allocation3 + $0xf0] sm:$0xff] }
 0x6a1   : > { %v12093_v2 = vld [vmem:[#allocation3 + $0xb0] sm:$0xff]  ;;  %15547 = vmatprep.subr.bf16.mxu1 %v12101_v15  ;;  %v12102_v15 = vld [vmem:[#allocation3 + $0xf8] sm:$0xff] }
 0x6a2   : > { %15548 = vmatpush3.bf16.msra.mxu1 %v12093_v2  ;;  %v12094_v2 = vld [vmem:[#allocation3 + $0xb8] sm:$0xff] }
 0x6a3   : > { %15549 = vmatprep.subr.bf16.mxu1 %v12102_v15  ;;  %v22854_v15 = vmax.f32 %v20592_v30, %v20596_v8 }
 0x6a4   : > { %11674 = vmax.xlane.f32.xlu0 %v11673_v3  ;;  %11719 = vmax.xlane.f32.xlu1 %v11718_v13  ;;  %v20672_v52 = vpop.f32.mrb[44].mxu1 }
 0x6a5   : > { %v20674_v25 = vpop.f32.mrb[45].mxu1 }
 0x6a6   : > { %v20676_v60 = vpop.f32.mrb[46].mxu1  ;;  %v11721_v14 = vmax.f32 %v20672_v52, %v20674_v25  ;;  %15550 = vmatpush3.bf16.msra.mxu1 %v12094_v2 }
 0x6a7   : > { %v20680_v19 = vpop.f32.mrb[47].mxu1 }
 0x6a8   : > { %11677 = vmax.xlane.f32.xlu1 %v11676_v43  ;;  %11722 = vmax.xlane.f32.xlu0 %v11721_v14  ;;  %v11724_v3 = vmax.f32 %v20676_v60, %v20680_v19 }
 0x6ac   : > { %11680 = vmax.xlane.f32.xlu0 %v11679_v47  ;;  %11725 = vmax.xlane.f32.xlu1 %v11724_v3  ;;  %v20690_v13 = vpop.f32.mrb[48].mxu1 }
 0x6ad   : > { %v20692_v12 = vpop.f32.mrb[49].mxu1 }
 0x6ae   : > { %v20694_v49 = vpop.f32.mrb[50].mxu1  ;;  %v11727_v43 = vmax.f32 %v20690_v13, %v20692_v12 }
 0x6af   : > { %v20698_v14 = vpop.f32.mrb[51].mxu1 }
 0x6b0   : > { %11683 = vmax.xlane.f32.xlu1 %v11682_v6  ;;  %11728 = vmax.xlane.f32.xlu0 %v11727_v43  ;;  %v11730_v47 = vmax.f32 %v20694_v49, %v20698_v14 }
 0x6b4   : > { %11686 = vmax.xlane.f32.xlu0 %v11685_v46  ;;  %11731 = vmax.xlane.f32.xlu1 %v11730_v47  ;;  %v20708_v3 = vpop.f32.mrb[52].mxu1  ;;  %v22855_v47 = vmax.f32 %v20600_v29, %v20602_v35 }
 0x6b5   : > { %v20710_v28 = vpop.f32.mrb[53].mxu1 }
 0x6b6   : > { %22852 = vst [vmem:[#allocation97_spill] sm:$0xff] %v20710_v28  ;;  %v20712_v33 = vpop.f32.mrb[54].mxu1  ;;  %v11733_v6 = vmax.f32 %v20708_v3, %v20710_v28 }
 0x6b7   : > { %v20716_v43 = vpop.f32.mrb[55].mxu1 }
 0x6b8   : > { %22853 = vst [vmem:[#allocation98_spill] sm:$0xff] %v20716_v43  ;;  %11689 = vmax.xlane.f32.xlu1 %v22854_v15  ;;  %11734 = vmax.xlane.f32.xlu0 %v11733_v6  ;;  %v11736_v46 = vmax.f32 %v20712_v33, %v20716_v43  ;;  %v22860_v6 = vmax.f32 %v20604_v27, %v20608_v48 }
 0x6bc   : > { %11692 = vmax.xlane.f32.xlu0 %v22855_v47  ;;  %11737 = vmax.xlane.f32.xlu1 %v11736_v46  ;;  %v20726_v2 = vpop.f32.mrb[56].mxu1  ;;  %v22861_v46 = vmax.f32 %v20612_v38, %v20614_v10 }
 0x6bd   : > { %22856 = vst [vmem:[#allocation99_spill] sm:$0xff] %v20726_v2  ;;  %v20728_v4 = vpop.f32.mrb[57].mxu1 }
 0x6be   : > { %22857 = vst [vmem:[#allocation100_spill] sm:$0xff] %v20728_v4  ;;  %v20730_v20 = vpop.f32.mrb[58].mxu1  ;;  %v11739_v63 = vmax.f32 %v20726_v2, %v20728_v4 }
 0x6bf   : > { %22858 = vst [vmem:[#allocation101_spill] sm:$0xff] %v20730_v20  ;;  %v20734_v28 = vpop.f32.mrb[59].mxu1 }
 0x6c0   : > { %22859 = vst [vmem:[#allocation102_spill] sm:$0xff] %v20734_v28  ;;  %11695 = vmax.xlane.f32.xlu1 %v22860_v6  ;;  %11740 = vmax.xlane.f32.xlu0 %v11739_v63  ;;  %v11742_v15 = vmax.f32 %v20730_v20, %v20734_v28 }
 0x6c3   : > { %v11657_v48 = vpop.xlane.xlu0 %11656 }
 0x6c4   : > { %11698 = vmax.xlane.f32.xlu0 %v22861_v46  ;;  %11743 = vmax.xlane.f32.xlu1 %v11742_v15  ;;  %v20744_v47 = vpop.f32.mrb[60].mxu1  ;;  %v11751_v63 = vsub.f32 %v20528_v57, %v11657_v48  ;;  %v11752_v28 = vsub.f32 %v20530_v62, %v11657_v48  ;;  %v22866_v46 = vmax.f32 %v20616_v50, %v20620_v37 }
 0x6c5   : > { %22862 = vst [vmem:[#allocation103_spill] sm:$0xff] %v20744_v47  ;;  %v20746_v43 = vpop.f32.mrb[61].mxu1 }
 0x6c6   : > { %22863 = vst [vmem:[#allocation104_spill] sm:$0xff] %v20746_v43  ;;  %v20748_v4 = vpop.f32.mrb[62].mxu1  ;;  %v11745_v2 = vmax.f32 %v20744_v47, %v20746_v43  ;;  %v11815_v20 = vmul.f32 1.442695, %v11751_v63  ;;  %v11817_v10 = vmul.f32 1.442695, %v11752_v28 }
 0x6c7   : > { %22864 = vst [vmem:[#allocation105_spill] sm:$0xff] %v20748_v4  ;;  %v20752_v6 = vpop.f32.mrb[63].mxu1  ;;  %v11660_v38 = vpop.xlane.xlu0 %11659 }
 0x6c8   : > { %22865 = vst [vmem:[#allocation106_spill] sm:$0xff] %v20752_v6  ;;  %11701 = vmax.xlane.f32.xlu1 %v22866_v46  ;;  %11746 = vmax.xlane.f32.xlu0 %v11745_v2  ;;  %v11748_v15 = vmax.f32 %v20748_v4, %v20752_v6  ;;  %16273 = vpow2.f32 %v11815_v20  ;;  %v11753_v43 = vsub.f32 %v20532_v59, %v11660_v38 }
 0x6c9   : > { %v11754_v47 = vsub.f32 %v20536_v1, %v11660_v38  ;;  %16275 = vpow2.f32 %v11817_v10 }
 0x6ca   : > { %v11819_v57 = vmul.f32 1.442695, %v11753_v43 }
 0x6cb   : > { %v11821_v62 = vmul.f32 1.442695, %v11754_v47 }
 0x6cc   : > { %11749 = vmax.xlane.f32.xlu1 %v11748_v15  ;;  %16277 = vpow2.f32 %v11819_v57 }
 0x6cd   : > { %16279 = vpow2.f32 %v11821_v62 }
 0x6cf   : > { %v11663_v48 = vpop.xlane.xlu0 %11662 }
 0x6d0   : > { %v11755_v2 = vsub.f32 %v20540_v54, %v11663_v48  ;;  %v11756_v46 = vsub.f32 %v20542_v40, %v11663_v48 }
 0x6d2   : > { %v16274_v6 = vpop.eup %16273  ;;  %v11823_v63 = vmul.f32 1.442695, %v11755_v2  ;;  %v11825_v28 = vmul.f32 1.442695, %v11756_v46 }
 0x6d3   : > { %v16276_v4 = vpop.eup %16275 }
 0x6d4   : > { %16281 = vpow2.f32 %v11823_v63  ;;  %v11943_v20 = vadd.f32 %v16276_v4, %v16274_v6 }
 0x6d5   : > { %16283 = vpow2.f32 %v11825_v28 }
 0x6d6   : > { %v16278_v59 = vpop.eup %16277  ;;  %11944 = vadd.xlane.f32.xlu0 %v11943_v20 }
 0x6d7   : > { %v16280_v1 = vpop.eup %16279  ;;  %v12039_v38 = vpack.c.bf16 %v16278_v59, %v16274_v6 }
 0x6d8   : > { %v12040_v10 = vpack.c.bf16 %v16280_v1, %v16276_v4  ;;  %v11946_v43 = vadd.f32 %v16280_v1, %v16278_v59 }
 0x6da   : > { %12135 = vmatprep.mubr.bf16.mxu0 %v12040_v10  ;;  %11947 = vadd.xlane.f32.xlu1 %v11946_v43 }
 0x6db   : > { %12136 = vmatmul.mubr.bf16.vlgmr.msra.gmra.mrb[32].mxu0 %v12039_v38 }
 0x6de   : > { %v20765_v47 = vpop.eup %16281 }
 0x6df   : > { %v20767_v54 = vpop.eup %16283 }
 0x6e0   : > { %v11949_v40 = vadd.f32 %v20767_v54, %v20765_v47 }
 0x6e2   : > { %11950 = vadd.xlane.f32.xlu0 %v11949_v40 }
 0x71d   : > { %v11705_v15 = vpop.xlane.xlu1 %11704 }
 0x71e   : > { %v11783_v57 = vsub.f32 %v20624_v34, %v11705_v15  ;;  %v11784_v62 = vsub.f32 %v20626_v53, %v11705_v15 }
 0x720   : > { %v11879_v48 = vmul.f32 1.442695, %v11783_v57  ;;  %v11881_v6 = vmul.f32 1.442695, %v11784_v62 }
 0x721   : > { %v11708_v4 = vpop.xlane.xlu1 %11707 }
 0x722   : > { %16285 = vpow2.f32 %v11879_v48  ;;  %v11785_v2 = vsub.f32 %v20628_v18, %v11708_v4  ;;  %v11786_v46 = vsub.f32 %v20632_v22, %v11708_v4 }
 0x723   : > { %16287 = vpow2.f32 %v11881_v6 }
 0x724   : > { %v11883_v63 = vmul.f32 1.442695, %v11785_v2  ;;  %v11885_v28 = vmul.f32 1.442695, %v11786_v46 }
 0x725   : > { %v11666_v20 = vpop.xlane.xlu1 %11665  ;;  %v11711_v59 = vpop.xlane.xlu0 %11710 }
 0x726   : > { %16289 = vpow2.f32 %v11883_v63  ;;  %v11757_v1 = vsub.f32 %v20544_v44, %v11666_v20  ;;  %v11758_v34 = vsub.f32 %v20548_v32, %v11666_v20  ;;  %v11787_v53 = vsub.f32 %v20636_v9, %v11711_v59 }
 0x727   : > { %16291 = vpow2.f32 %v11885_v28  ;;  %v11788_v38 = vsub.f32 %v20638_v56, %v11711_v59 }
 0x728   : > { %v11827_v10 = vmul.f32 1.442695, %v11757_v1  ;;  %v11829_v43 = vmul.f32 1.442695, %v11758_v34  ;;  %v11887_v18 = vmul.f32 1.442695, %v11787_v53 }
 0x729   : > { %v11889_v40 = vmul.f32 1.442695, %v11788_v38  ;;  %v11669_v22 = vpop.xlane.xlu0 %11668  ;;  %v11714_v15 = vpop.xlane.xlu1 %11713 }
 0x72a   : > { %16293 = vpow2.f32 %v11827_v10  ;;  %v11759_v57 = vsub.f32 %v20552_v31, %v11669_v22  ;;  %v11760_v62 = vsub.f32 %v20554_v61, %v11669_v22  ;;  %v11789_v44 = vsub.f32 %v20640_v17, %v11714_v15 }
 0x72b   : > { %16295 = vpow2.f32 %v11829_v43  ;;  %v11790_v32 = vsub.f32 %v20644_v45, %v11714_v15 }
 0x72c   : > { %v16286_v9 = vpop.eup %16285  ;;  %16297 = vpow2.f32 %v11887_v18  ;;  %v11831_v48 = vmul.f32 1.442695, %v11759_v57  ;;  %v11833_v56 = vmul.f32 1.442695, %v11760_v62  ;;  %v11891_v6 = vmul.f32 1.442695, %v11789_v44 }
 0x72d   : > { %v16288_v4 = vpop.eup %16287  ;;  %16299 = vpow2.f32 %v11889_v40  ;;  %v11893_v2 = vmul.f32 1.442695, %v11790_v32  ;;  %v11672_v46 = vpop.xlane.xlu1 %11671 }
 0x72e   : > { %v11717_v63 = vpop.xlane.xlu0 %11716  ;;  %16301 = vpow2.f32 %v11831_v48  ;;  %v11761_v31 = vsub.f32 %v20556_v5, %v11672_v46  ;;  %v11762_v61 = vsub.f32 %v20560_v23, %v11672_v46  ;;  %v20787_v28 = vadd.f32 %v16288_v4, %v16286_v9 }
 0x72f   : > { %v11791_v17 = vsub.f32 %v20654_v51, %v11717_v63  ;;  %16303 = vpow2.f32 %v11833_v56  ;;  %v11792_v45 = vsub.f32 %v20656_v0, %v11717_v63 }
 0x730   : > { %v16290_v20 = vpop.eup %16289  ;;  %16305 = vpow2.f32 %v11891_v6  ;;  %v11835_v59 = vmul.f32 1.442695, %v11761_v31  ;;  %v11837_v1 = vmul.f32 1.442695, %v11762_v61 }
 0x731   : > { %v11895_v34 = vmul.f32 1.442695, %v11791_v17  ;;  %v16292_v53 = vpop.eup %16291  ;;  %16307 = vpow2.f32 %v11893_v2  ;;  %v11897_v38 = vmul.f32 1.442695, %v11792_v45  ;;  %v11720_v43 = vpop.xlane.xlu1 %11719  ;;  %v12055_v5 = vpack.c.bf16 %v16290_v20, %v16286_v9 }
 0x732   : > { %v11675_v10 = vpop.xlane.xlu0 %11674  ;;  %16309 = vpow2.f32 %v11835_v59  ;;  %v11793_v0 = vsub.f32 %v20658_v7, %v11720_v43  ;;  %v11794_v18 = vsub.f32 %v20662_v42, %v11720_v43  ;;  %v12056_v40 = vpack.c.bf16 %v16292_v53, %v16288_v4 }
 0x733   : > { %v11763_v23 = vsub.f32 %v20564_v26, %v11675_v10  ;;  %v11764_v51 = vsub.f32 %v20566_v16, %v11675_v10  ;;  %16311 = vpow2.f32 %v11837_v1  ;;  %v20793_v22 = vadd.f32 %v16292_v53, %v16290_v20 }
 0x734   : > { %v16294_v15 = vpop.eup %16293  ;;  %16313 = vpow2.f32 %v11895_v34  ;;  %v11899_v44 = vmul.f32 1.442695, %v11793_v0  ;;  %v11901_v9 = vmul.f32 1.442695, %v11794_v18  ;;  %12232 = vmatprep.mubr.bf16.mxu1 %v12056_v40 }
 0x735   : > { %v11839_v57 = vmul.f32 1.442695, %v11763_v23  ;;  %v11841_v62 = vmul.f32 1.442695, %v11764_v51  ;;  %v16296_v32 = vpop.eup %16295  ;;  %16315 = vpow2.f32 %v11897_v38  ;;  %v11678_v26 = vpop.xlane.xlu1 %11677  ;;  %v12041_v16 = vpack.c.bf16 %v16294_v15, %v20765_v47  ;;  %12233 = vmatmul.mubr.bf16.vlgmr.msra.gmra.mrb[64].mxu1 %v12055_v5 }
 0x736   : > { %v11723_v48 = vpop.xlane.xlu0 %11722  ;;  %v16298_v7 = vpop.eup %16297  ;;  %v11765_v42 = vsub.f32 %v20568_v36, %v11678_v26  ;;  %v11766_v56 = vsub.f32 %v20572_v41, %v11678_v26  ;;  %v12042_v46 = vpack.c.bf16 %v16296_v32, %v20767_v54  ;;  %v11952_v63 = vadd.f32 %v16296_v32, %v16294_v15 }
 0x737   : > { %16317 = vpow2.f32 %v11839_v57  ;;  %v11795_v6 = vsub.f32 %v20672_v52, %v11723_v48  ;;  %v16300_v4 = vpop.eup %16299  ;;  %v11796_v2 = vsub.f32 %v20674_v25, %v11723_v48 }
 0x738   : > { %16319 = vpow2.f32 %v11841_v62  ;;  %v20801_v31 = vpop.eup %16301  ;;  %v11843_v47 = vmul.f32 1.442695, %v11765_v42  ;;  %v11845_v61 = vmul.f32 1.442695, %v11766_v56  ;;  %12143 = vmatprep.mubr.bf16.mxu0 %v12042_v46  ;;  %11953 = vadd.xlane.f32.xlu1 %v11952_v63  ;;  %v20803_v20 = vadd.f32 %v16300_v4, %v16298_v7 }
 0x739   : > { %16321 = vpow2.f32 %v11899_v44  ;;  %v11903_v17 = vmul.f32 1.442695, %v11795_v6  ;;  %v16304_v45 = vpop.eup %16303  ;;  %v11905_v36 = vmul.f32 1.442695, %v11796_v2  ;;  %v11726_v52 = vpop.xlane.xlu1 %11725  ;;  %12144 = vmatmul.mubr.bf16.gmra.mrb[36].mxu0 %v12041_v16 }
 0x73a   : > { %16323 = vpow2.f32 %v11901_v9  ;;  %v11681_v41 = vpop.xlane.xlu0 %11680  ;;  %v16306_v59 = vpop.eup %16305  ;;  %v11797_v1 = vsub.f32 %v20676_v60, %v11726_v52  ;;  %v11798_v53 = vsub.f32 %v20680_v19, %v11726_v52  ;;  %v11955_v38 = vadd.f32 %v16304_v45, %v20801_v31 }
 0x73b   : > { %16325 = vpow2.f32 %v11843_v47  ;;  %v11767_v25 = vsub.f32 %v20576_v11, %v11681_v41  ;;  %v11768_v54 = vsub.f32 %v20578_v39, %v11681_v41  ;;  %v16308_v34 = vpop.eup %16307  ;;  %v12057_v10 = vpack.c.bf16 %v16306_v59, %v16298_v7 }
 0x73c   : > { %16327 = vpow2.f32 %v11845_v61  ;;  %v16310_v43 = vpop.eup %16309  ;;  %v11907_v51 = vmul.f32 1.442695, %v11797_v1  ;;  %v11909_v18 = vmul.f32 1.442695, %v11798_v53  ;;  %v12058_v11 = vpack.c.bf16 %v16308_v34, %v16300_v4  ;;  %11956 = vadd.xlane.f32.xlu0 %v11955_v38 }
 0x73d   : > { %16329 = vpow2.f32 %v11903_v17  ;;  %v11847_v5 = vmul.f32 1.442695, %v11767_v25  ;;  %v11849_v23 = vmul.f32 1.442695, %v11768_v54  ;;  %v16312_v0 = vpop.eup %16311  ;;  %v11684_v39 = vpop.xlane.xlu1 %11683  ;;  %v12043_v60 = vpack.c.bf16 %v16310_v43, %v20801_v31 }
 0x73e   : > { %16331 = vpow2.f32 %v11905_v36  ;;  %v11729_v40 = vpop.xlane.xlu0 %11728  ;;  %v20811_v15 = vpop.eup %16313  ;;  %v11769_v19 = vsub.f32 %v20580_v24, %v11684_v39  ;;  %v11770_v57 = vsub.f32 %v20584_v58, %v11684_v39  ;;  %12240 = vmatprep.mubr.bf16.mxu1 %v12058_v11  ;;  %v12044_v9 = vpack.c.bf16 %v16312_v0, %v16304_v45 }
 0x73f   : > { %16333 = vpow2.f32 %v11847_v5  ;;  %v11799_v62 = vsub.f32 %v20690_v13, %v11729_v40  ;;  %v16316_v44 = vpop.eup %16315  ;;  %v11800_v32 = vsub.f32 %v20692_v12, %v11729_v40  ;;  %v11958_v26 = vadd.f32 %v16312_v0, %v16310_v43  ;;  %12241 = vmatmul.mubr.bf16.gmra.mrb[68].mxu1 %v12057_v10  ;;  %v22867_v10 = vld [vmem:[#allocation97_spill] sm:$0xff] }
 0x740   : > { %16335 = vpow2.f32 %v11849_v23  ;;  %v11851_v16 = vmul.f32 1.442695, %v11769_v19  ;;  %v11853_v7 = vmul.f32 1.442695, %v11770_v57  ;;  %12151 = vmatprep.mubr.bf16.mxu0 %v12044_v9  ;;  %v20819_v6 = vadd.f32 %v16308_v34, %v16306_v59 }
 0x741   : > { %v20817_v48 = vpop.eup %16317  ;;  %16337 = vpow2.f32 %v11907_v51  ;;  %v11911_v42 = vmul.f32 1.442695, %v11799_v62  ;;  %v11913_v24 = vmul.f32 1.442695, %v11800_v32  ;;  %11959 = vadd.xlane.f32.xlu1 %v11958_v26  ;;  %v11732_v13 = vpop.xlane.xlu1 %11731  ;;  %v20822_v12 = vadd.f32 %v16316_v44, %v20811_v15  ;;  %12152 = vmatmul.mubr.bf16.gmra.mrb[40].mxu0 %v12043_v60  ;;  %v22868_v32 = vld [vmem:[#allocation98_spill] sm:$0xff] }
 0x742   : > { %v16320_v56 = vpop.eup %16319  ;;  %16339 = vpow2.f32 %v11909_v18  ;;  %v11687_v58 = vpop.xlane.xlu0 %11686  ;;  %v11801_v63 = vsub.f32 %v20694_v49, %v11732_v13  ;;  %v11802_v47 = vsub.f32 %v20698_v14, %v11732_v13 }
 0x743   : > { %v16322_v4 = vpop.eup %16321  ;;  %16341 = vpow2.f32 %v11851_v16  ;;  %v11771_v2 = vsub.f32 %v20588_v55, %v11687_v58  ;;  %v11772_v46 = vsub.f32 %v20590_v21, %v11687_v58  ;;  %v11961_v61 = vadd.f32 %v16320_v56, %v20817_v48 }
 0x744   : > { %v16324_v31 = vpop.eup %16323  ;;  %16343 = vpow2.f32 %v11853_v7  ;;  %v12059_v17 = vpack.c.bf16 %v16322_v4, %v20811_v15  ;;  %v11915_v52 = vmul.f32 1.442695, %v11801_v63  ;;  %v11917_v55 = vmul.f32 1.442695, %v11802_v47 }
 0x745   : > { %v16326_v45 = vpop.eup %16325  ;;  %16345 = vpow2.f32 %v11911_v42  ;;  %v11855_v36 = vmul.f32 1.442695, %v11771_v2  ;;  %v11857_v41 = vmul.f32 1.442695, %v11772_v46  ;;  %v12060_v25 = vpack.c.bf16 %v16324_v31, %v16316_v44  ;;  %11962 = vadd.xlane.f32.xlu0 %v11961_v61  ;;  %v11690_v21 = vpop.xlane.xlu1 %11689  ;;  %v22869_v46 = vld [vmem:[#allocation94_spill] sm:$0xff] }
 0x746   : > { %v16328_v59 = vpop.eup %16327  ;;  %16347 = vpow2.f32 %v11913_v24  ;;  %v11735_v49 = vpop.xlane.xlu0 %11734  ;;  %v12045_v54 = vpack.c.bf16 %v16326_v45, %v20817_v48  ;;  %v11773_v14 = vsub.f32 %v20592_v30, %v11690_v21  ;;  %v11774_v34 = vsub.f32 %v20596_v8, %v11690_v21 }
 0x747   : > { %v20831_v1 = vpop.eup %16329  ;;  %16349 = vpow2.f32 %v11855_v36  ;;  %v11803_v53 = vsub.f32 %v20708_v3, %v11735_v49  ;;  %12248 = vmatprep.mubr.bf16.mxu1 %v12060_v25  ;;  %v11804_v43 = vsub.f32 %v22867_v10, %v11735_v49  ;;  %v12046_v5 = vpack.c.bf16 %v16328_v59, %v16320_v56  ;;  %v22873_v10 = vld [vmem:[#allocation96_spill] sm:$0xff] }
 0x748   : > { %v16332_v38 = vpop.eup %16331  ;;  %16351 = vpow2.f32 %v11857_v41  ;;  %v11964_v23 = vadd.f32 %v16328_v59, %v16326_v45  ;;  %12249 = vmatmul.mubr.bf16.gmra.mrb[72].mxu1 %v12059_v17  ;;  %v11859_v0 = vmul.f32 1.442695, %v11773_v14  ;;  %v11861_v18 = vmul.f32 1.442695, %v11774_v34  ;;  %v22871_v17 = vld [vmem:[#allocation100_spill] sm:$0xff] }
 0x749   : > { %v20837_v51 = vpop.eup %16333  ;;  %16353 = vpow2.f32 %v11915_v52  ;;  %v11919_v11 = vmul.f32 1.442695, %v11803_v53  ;;  %v11921_v30 = vmul.f32 1.442695, %v11804_v43  ;;  %12159 = vmatprep.mubr.bf16.mxu0 %v12046_v5  ;;  %v11738_v3 = vpop.xlane.xlu1 %11737  ;;  %v20839_v40 = vadd.f32 %v16324_v31, %v16322_v4  ;;  %v22870_v31 = vld [vmem:[#allocation99_spill] sm:$0xff]  ;;  %v22874_v5 = vld [vmem:[#allocation101_spill] sm:$0xff] }
 0x74a   : > { %v16336_v39 = vpop.eup %16335  ;;  %16355 = vpow2.f32 %v11917_v55  ;;  %11965 = vadd.xlane.f32.xlu1 %v11964_v23  ;;  %v11693_v8 = vpop.xlane.xlu0 %11692  ;;  %v20842_v60 = vadd.f32 %v16332_v38, %v20831_v1  ;;  %12160 = vmatmul.mubr.bf16.gmra.mrb[44].mxu0 %v12045_v54  ;;  %v11805_v62 = vsub.f32 %v20712_v33, %v11738_v3  ;;  %v11806_v9 = vsub.f32 %v22868_v32, %v11738_v3  ;;  %v22872_v53 = vld [vmem:[#allocation95_spill] sm:$0xff] }
 0x74b   : > { %v16338_v15 = vpop.eup %16337  ;;  %16357 = vpow2.f32 %v11859_v0  ;;  %v11775_v19 = vsub.f32 %v20600_v29, %v11693_v8  ;;  %v11776_v57 = vsub.f32 %v20602_v35, %v11693_v8  ;;  %v11967_v26 = vadd.f32 %v16336_v39, %v20837_v51 }
 0x74c   : > { %v16340_v44 = vpop.eup %16339  ;;  %16359 = vpow2.f32 %v11861_v18  ;;  %v12061_v48 = vpack.c.bf16 %v16338_v15, %v20831_v1  ;;  %v11923_v56 = vmul.f32 1.442695, %v11805_v62  ;;  %v11925_v29 = vmul.f32 1.442695, %v11806_v9 }
 0x74d   : > { %v16342_v16 = vpop.eup %16341  ;;  %16361 = vpow2.f32 %v11919_v11  ;;  %v11863_v7 = vmul.f32 1.442695, %v11775_v19  ;;  %v11865_v42 = vmul.f32 1.442695, %v11776_v57  ;;  %v12062_v58 = vpack.c.bf16 %v16340_v44, %v16332_v38  ;;  %11968 = vadd.xlane.f32.xlu0 %v11967_v26  ;;  %v11696_v35 = vpop.xlane.xlu1 %11695 }
 0x74e   : > { %v16344_v24 = vpop.eup %16343  ;;  %16363 = vpow2.f32 %v11921_v30  ;;  %v11741_v33 = vpop.xlane.xlu0 %11740  ;;  %v12047_v13 = vpack.c.bf16 %v16342_v16, %v20837_v51  ;;  %v11777_v2 = vsub.f32 %v20604_v27, %v11696_v35  ;;  %v11778_v63 = vsub.f32 %v22869_v46, %v11696_v35 }
 0x74f   : > { %v20851_v4 = vpop.eup %16345  ;;  %16365 = vpow2.f32 %v11863_v7  ;;  %v11807_v47 = vsub.f32 %v22870_v31, %v11741_v33  ;;  %12256 = vmatprep.mubr.bf16.mxu1 %v12062_v58  ;;  %v11808_v45 = vsub.f32 %v22871_v17, %v11741_v33  ;;  %v12048_v36 = vpack.c.bf16 %v16344_v24, %v16336_v39  ;;  %v22878_v31 = vld [vmem:[#allocation105_spill] sm:$0xff] }
 0x750   : > { %v16348_v61 = vpop.eup %16347  ;;  %16367 = vpow2.f32 %v11865_v42  ;;  %v11970_v41 = vadd.f32 %v16344_v24, %v16342_v16  ;;  %12257 = vmatmul.mubr.bf16.gmra.mrb[76].mxu1 %v12061_v48  ;;  %v11867_v59 = vmul.f32 1.442695, %v11777_v2  ;;  %v11869_v55 = vmul.f32 1.442695, %v11778_v63  ;;  %v22876_v16 = vld [vmem:[#allocation103_spill] sm:$0xff] }
 0x751   : > { %v20857_v52 = vpop.eup %16349  ;;  %16369 = vpow2.f32 %v11923_v56  ;;  %v11927_v25 = vmul.f32 1.442695, %v11807_v47  ;;  %v11929_v27 = vmul.f32 1.442695, %v11808_v45  ;;  %12167 = vmatprep.mubr.bf16.mxu0 %v12048_v36  ;;  %11992 = vadd.xlane.f32.xlu0 %v20787_v28  ;;  %v11744_v54 = vpop.xlane.xlu1 %11743  ;;  %v20861_v1 = vadd.f32 %v16348_v61, %v20851_v4  ;;  %v22875_v28 = vld [vmem:[#allocation102_spill] sm:$0xff]  ;;  %v22877_v56 = vld [vmem:[#allocation104_spill] sm:$0xff] }
 0x752   : > { %v16352_v21 = vpop.eup %16351  ;;  %16371 = vpow2.f32 %v11925_v29  ;;  %v11699_v49 = vpop.xlane.xlu0 %11698  ;;  %v20863_v14 = vadd.f32 %v16340_v44, %v16338_v15  ;;  %11971 = vadd.xlane.f32.xlu1 %v11970_v41  ;;  %12168 = vmatmul.mubr.bf16.gmra.mrb[48].mxu0 %v12047_v13  ;;  %v11809_v23 = vsub.f32 %v22874_v5, %v11744_v54  ;;  %v11810_v0 = vsub.f32 %v22875_v28, %v11744_v54 }
 0x753   : > { %v16354_v34 = vpop.eup %16353  ;;  %16373 = vpow2.f32 %v11867_v59  ;;  %v11779_v38 = vsub.f32 %v22872_v53, %v11699_v49  ;;  %v11780_v43 = vsub.f32 %v22873_v10, %v11699_v49  ;;  %v20871_v11 = vadd.f32 %v16352_v21, %v20857_v52 }
 0x754   : > { %v16356_v51 = vpop.eup %16355  ;;  %16375 = vpow2.f32 %v11869_v55  ;;  %v12063_v18 = vpack.c.bf16 %v16354_v34, %v20851_v4  ;;  %v11931_v3 = vmul.f32 1.442695, %v11809_v23  ;;  %v11933_v19 = vmul.f32 1.442695, %v11810_v0 }
 0x755   : > { %v16358_v39 = vpop.eup %16357  ;;  %16377 = vpow2.f32 %v11927_v25  ;;  %v11871_v30 = vmul.f32 1.442695, %v11779_v38  ;;  %v11873_v8 = vmul.f32 1.442695, %v11780_v43  ;;  %v12064_v57 = vpack.c.bf16 %v16356_v51, %v16348_v61  ;;  %v11702_v62 = vpop.xlane.xlu1 %11701  ;;  %v22879_v61 = vld [vmem:[#allocation106_spill] sm:$0xff] }
 0x756   : > { %v16360_v15 = vpop.eup %16359  ;;  %16379 = vpow2.f32 %v11929_v27  ;;  %v11747_v44 = vpop.xlane.xlu0 %11746  ;;  %v12049_v32 = vpack.c.bf16 %v16358_v39, %v20857_v52  ;;  %11995 = vadd.xlane.f32.xlu1 %v20793_v22  ;;  %v11781_v26 = vsub.f32 %v20616_v50, %v11702_v62  ;;  %v11782_v48 = vsub.f32 %v20620_v37, %v11702_v62 }
 0x757   : > { %v16362_v9 = vpop.eup %16361  ;;  %16381 = vpow2.f32 %v11871_v30  ;;  %v11811_v7 = vsub.f32 %v22876_v16, %v11747_v44  ;;  %12264 = vmatprep.mubr.bf16.mxu1 %v12064_v57  ;;  %v11812_v24 = vsub.f32 %v22877_v56, %v11747_v44  ;;  %v12050_v29 = vpack.c.bf16 %v16360_v15, %v16352_v21  ;;  %v16230_v44 = vld [vmem:[#allocation13 + $0x14] ss:$8 sps:$4 sm:$0xff]   ;;  %v16231_v56 = vld [vmem:[#allocation13 + $0x20] ss:$8 sps:$4 sm:$0xff]  }
 0x758   : > { %v16364_v42 = vpop.eup %16363  ;;  %16383 = vpow2.f32 %v11873_v8  ;;  %v20879_v58 = vadd.f32 %v16360_v15, %v16358_v39  ;;  %12265 = vmatmul.mubr.bf16.gmra.mrb[80].mxu1 %v12063_v18  ;;  %v11875_v33 = vmul.f32 1.442695, %v11781_v26  ;;  %v11877_v13 = vmul.f32 1.442695, %v11782_v48  ;;  %v16225_v8 = vld [vmem:[#allocation13] ss:$8 sps:$4 sm:$0xff]  }
 0x759   : > { %v16366_v35 = vpop.eup %16365  ;;  %16385 = vpow2.f32 %v11931_v3  ;;  %v11935_v22 = vmul.f32 1.442695, %v11811_v7  ;;  %v11937_v50 = vmul.f32 1.442695, %v11812_v24  ;;  %12175 = vmatprep.mubr.bf16.mxu0 %v12050_v29  ;;  %v11750_v37 = vpop.xlane.xlu1 %11749  ;;  %v20881_v2 = vadd.f32 %v16356_v51, %v16354_v34  ;;  %v16227_v3 = vld [vmem:[#allocation13 + $0x4] ss:$8 sps:$4 sm:$0xff]  }
 0x75a   : > { %v16368_v4 = vpop.eup %16367  ;;  %16387 = vpow2.f32 %v11933_v19  ;;  %v20883_v46 = vadd.f32 %v16364_v42, %v16362_v9  ;;  %12176 = vmatmul.mubr.bf16.gmra.mrb[52].mxu0 %v12049_v32  ;;  %v11813_v47 = vsub.f32 %v22878_v31, %v11750_v37  ;;  %v11814_v17 = vsub.f32 %v22879_v61, %v11750_v37  ;;  %14437 = vmatprep.subr.bf16.mxu0 %v16227_v3  ;;  %v16236_v24 = vld [vmem:[#allocation13 + $0x34] ss:$8 sps:$4 sm:$0xff]   ;;  %v16237_v29 = vld [vmem:[#allocation13 + $0x40] ss:$8 sps:$4 sm:$0xff]   ;;  %v16263_v31 = vld [vmem:[#allocation13 + $0xc4] ss:$8 sps:$4 sm:$0xff]  }
 0x75b   : > { %v16370_v63 = vpop.eup %16369  ;;  %16389 = vpow2.f32 %v11875_v33  ;;  %v11979_v45 = vadd.f32 %v16368_v4, %v16366_v35  ;;  %14438 = vmatpush1.bf16.msra.mxu0 %v16225_v8  ;;  %15599 = vmatprep.subr.bf16.mxu1 %v16227_v3  ;;  %v16245_v33 = vld [vmem:[#allocation13 + $0x64] ss:$8 sps:$4 sm:$0xff]   ;;  %v16255_v37 = vld [vmem:[#allocation13 + $0xa0] ss:$8 sps:$4 sm:$0xff]  }
 0x75c   : > { %v16372_v36 = vpop.eup %16371  ;;  %16391 = vpow2.f32 %v11877_v13  ;;  %v12065_v41 = vpack.c.bf16 %v16370_v63, %v16362_v9  ;;  %v11939_v59 = vmul.f32 1.442695, %v11813_v47  ;;  %v11941_v55 = vmul.f32 1.442695, %v11814_v17  ;;  %v16228_v9 = vld [vmem:[#allocation13 + $0x10] ss:$8 sps:$4 sm:$0xff]   ;;  %14439 = vmatprep.subr.bf16.mxu0 %v16230_v44  ;;  %15615 = vmatpush1.bf16.msra.mxu1 %v16225_v8 }
 0x75d   : > { %v16374_v52 = vpop.eup %16373  ;;  %16393 = vpow2.f32 %v11935_v22  ;;  %v12066_v25 = vpack.c.bf16 %v16372_v36, %v16364_v42  ;;  %11980 = vadd.xlane.f32.xlu0 %v11979_v45  ;;  %v20887_v49 = vadd.f32 %v16372_v36, %v16370_v63  ;;  %v16233_v42 = vld [vmem:[#allocation13 + $0x24] ss:$8 sps:$4 sm:$0xff]   ;;  %15600 = vmatprep.subr.bf16.mxu1 %v16230_v44  ;;  %v16249_v13 = vld [vmem:[#allocation13 + $0x80] ss:$8 sps:$4 sm:$0xff]   ;;  %v16260_v63 = vld [vmem:[#allocation13 + $0xb4] ss:$8 sps:$4 sm:$0xff]  }
 0x75e   : > { %v16376_v21 = vpop.eup %16375  ;;  %16395 = vpow2.f32 %v11937_v50  ;;  %v12051_v27 = vpack.c.bf16 %v16374_v52, %v16366_v35  ;;  %v16242_v35 = vld [vmem:[#allocation13 + $0x54] ss:$8 sps:$4 sm:$0xff]   ;;  %v16251_v22 = vld [vmem:[#allocation13 + $0x84] ss:$8 sps:$4 sm:$0xff]   ;;  %v16261_v47 = vld [vmem:[#allocation13 + $0xc0] ss:$8 sps:$4 sm:$0xff]  }
 0x75f   : > { %v16378_v54 = vpop.eup %16377  ;;  %16397 = vpow2.f32 %v11939_v59  ;;  %12272 = vmatprep.mubr.bf16.mxu1 %v12066_v25  ;;  %v12052_v34 = vpack.c.bf16 %v16376_v21, %v16368_v4  ;;  %v11982_v53 = vadd.f32 %v16376_v21, %v16374_v52  ;;  %14440 = vmatpush1.bf16.msra.mxu0 %v16228_v9  ;;  %v16252_v4 = vld [vmem:[#allocation13 + $0x90] ss:$8 sps:$4 sm:$0xff]   ;;  %v16254_v50 = vld [vmem:[#allocation13 + $0x94] ss:$8 sps:$4 sm:$0xff]   ;;  %v16267_v25 = vld [vmem:[#allocation13 + $0xe0] ss:$8 sps:$4 sm:$0xff]  }
 0x760   : > { %v16380_v38 = vpop.eup %16379  ;;  %16399 = vpow2.f32 %v11941_v55  ;;  %12273 = vmatmul.mubr.bf16.gmra.mrb[84].mxu1 %v12065_v41  ;;  %14441 = vmatprep.subr.bf16.mxu0 %v16233_v42  ;;  %v16264_v17 = vld [vmem:[#allocation13 + $0xd0] ss:$8 sps:$4 sm:$0xff]   ;;  %v16266_v45 = vld [vmem:[#allocation13 + $0xd4] ss:$8 sps:$4 sm:$0xff]   ;;  %v16269_v41 = vld [vmem:[#allocation13 + $0xe4] ss:$8 sps:$4 sm:$0xff]  }
 0x761   : > { %v16382_v10 = vpop.eup %16381  ;;  %12183 = vmatprep.mubr.bf16.mxu0 %v12052_v34  ;;  %v20889_v43 = vadd.f32 %v16380_v38, %v16378_v54  ;;  %11998 = vadd.xlane.f32.xlu0 %v20803_v20 }
 0x762   : > { %v16384_v5 = vpop.eup %16383  ;;  %11983 = vadd.xlane.f32.xlu1 %v11982_v53  ;;  %12184 = vmatmul.mubr.bf16.gmra.mrb[56].mxu0 %v12051_v27  ;;  %v16270_v27 = vld [vmem:[#allocation13 + $0xf0] ss:$8 sps:$4 sm:$0xff]  }
 0x763   : > { %v16386_v23 = vpop.eup %16385  ;;  %v11985_v51 = vadd.f32 %v16384_v5, %v16382_v10  ;;  %14442 = vmatpush1.bf16.msra.mxu0 %v16231_v56  ;;  %15616 = vmatpush1.bf16.msra.mxu1 %v16228_v9 }
 0x764   : > { %v16388_v28 = vpop.eup %16387  ;;  %v12067_v0 = vpack.c.bf16 %v16386_v23, %v16378_v54  ;;  %15601 = vmatprep.subr.bf16.mxu1 %v16233_v42  ;;  %14443 = vmatprep.subr.bf16.mxu0 %v16236_v24  ;;  %v11945_v54 = vpop.xlane.xlu0 %11944 }
 0x765   : > { %v16390_v18 = vpop.eup %16389  ;;  %v12068_v39 = vpack.c.bf16 %v16388_v28, %v16380_v38  ;;  %v20892_v30 = vadd.f32 %v16388_v28, %v16386_v23  ;;  %11974 = vadd.xlane.f32.xlu0 %v20871_v11  ;;  %16401 = vrcp.f32 %v11945_v54 }
 0x766   : > { %v16392_v15 = vpop.eup %16391  ;;  %12001 = vadd.xlane.f32.xlu1 %v20819_v6  ;;  %v12053_v19 = vpack.c.bf16 %v16390_v18, %v16382_v10 }
 0x767   : > { %v16394_v57 = vpop.eup %16393  ;;  %12280 = vmatprep.mubr.bf16.mxu1 %v12068_v39  ;;  %v12054_v20 = vpack.c.bf16 %v16392_v15, %v16384_v5  ;;  %v11988_v62 = vadd.f32 %v16392_v15, %v16390_v18  ;;  %15617 = vmatpush1.bf16.msra.mxu1 %v16231_v56  ;;  %v11948_v53 = vpop.xlane.xlu1 %11947 }
 0x768   : > { %v16396_v32 = vpop.eup %16395  ;;  %12281 = vmatmul.mubr.bf16.gmra.mrb[88].mxu1 %v12067_v0  ;;  %15602 = vmatprep.subr.bf16.mxu1 %v16236_v24  ;;  %16403 = vrcp.f32 %v11948_v53 }
 0x769   : > { %v16398_v26 = vpop.eup %16397  ;;  %12191 = vmatprep.mubr.bf16.mxu0 %v12054_v20  ;;  %v12033_v48 = vadd.f32 %v16396_v32, %v16394_v57  ;;  %12004 = vadd.xlane.f32.xlu0 %v20822_v12  ;;  %v16234_v12 = vld [vmem:[#allocation13 + $0x30] ss:$8 sps:$4 sm:$0xff]  }
 0x76a   : > { %v16400_v16 = vpop.eup %16399  ;;  %11977 = vadd.xlane.f32.xlu1 %v20879_v58  ;;  %v12069_v6 = vpack.c.bf16 %v16398_v26, %v16394_v57  ;;  %12192 = vmatmul.mubr.bf16.gmra.mrb[60].mxu0 %v12053_v19  ;;  %v16239_v58 = vld [vmem:[#allocation13 + $0x44] ss:$8 sps:$4 sm:$0xff]  }
 0x76b   : > { %v12070_v11 = vpack.c.bf16 %v16400_v16, %v16396_v32  ;;  %v12036_v7 = vadd.f32 %v16400_v16, %v16398_v26  ;;  %14444 = vmatpush1.bf16.msra.mxu0 %v16234_v12  ;;  %15618 = vmatpush1.bf16.msra.mxu1 %v16234_v12 }
 0x76c   : > { %14445 = vmatprep.subr.bf16.mxu0 %v16239_v58  ;;  %15603 = vmatprep.subr.bf16.mxu1 %v16239_v58 }
 0x76d   : > { %12288 = vmatprep.mubr.bf16.mxu1 %v12070_v11  ;;  %11986 = vadd.xlane.f32.xlu0 %v11985_v51 }
 0x76e   : > { %12007 = vadd.xlane.f32.xlu1 %v20839_v40  ;;  %v16240_v40 = vld [vmem:[#allocation13 + $0x50] ss:$8 sps:$4 sm:$0xff]  }
 0x76f   : > { %14446 = vmatpush1.bf16.msra.mxu0 %v16237_v29  ;;  %15619 = vmatpush1.bf16.msra.mxu1 %v16237_v29  ;;  %v11951_v34 = vpop.xlane.xlu0 %11950  ;;  %v16402_v44 = vpop.eup %16401 }
 0x770   : > { %12289 = vmatmul.mubr.bf16.gmra.mrb[92].mxu1 %v12069_v6  ;;  %14447 = vmatprep.subr.bf16.mxu0 %v16242_v35  ;;  %16405 = vrcp.f32 %v11951_v34 }
 0x771   : > { %12010 = vadd.xlane.f32.xlu0 %v20842_v60  ;;  %v16243_v60 = vld [vmem:[#allocation13 + $0x60] ss:$8 sps:$4 sm:$0xff]   ;;  %15604 = vmatprep.subr.bf16.mxu1 %v16242_v35 }
 0x772   : > { %11989 = vadd.xlane.f32.xlu1 %v11988_v62  ;;  %v16404_v32 = vpop.eup %16403 }
 0x773   : > { %14448 = vmatpush1.bf16.msra.mxu0 %v16240_v40  ;;  %15620 = vmatpush1.bf16.msra.mxu1 %v16240_v40 }
 0x774   : > { %14449 = vmatprep.subr.bf16.mxu0 %v16245_v33  ;;  %15605 = vmatprep.subr.bf16.mxu1 %v16245_v33 }
 0x775   : > { %12016 = vadd.xlane.f32.xlu0 %v20861_v1  ;;  %v16246_v1 = vld [vmem:[#allocation13 + $0x70] ss:$8 sps:$4 sm:$0xff]  }
 0x776   : > { %12013 = vadd.xlane.f32.xlu1 %v20863_v14  ;;  %v16248_v14 = vld [vmem:[#allocation13 + $0x74] ss:$8 sps:$4 sm:$0xff]  }
 0x777   : > { %14450 = vmatpush1.bf16.msra.mxu0 %v16243_v60  ;;  %15621 = vmatpush1.bf16.msra.mxu1 %v16243_v60 }
 0x778   : > { %14451 = vmatprep.subr.bf16.mxu0 %v16248_v14  ;;  %15606 = vmatprep.subr.bf16.mxu1 %v16248_v14 }
 0x779   : > { %12028 = vadd.xlane.f32.xlu0 %v20889_v43 }
 0x77a   : > { %12019 = vadd.xlane.f32.xlu1 %v20881_v2  ;;  %v16257_v2 = vld [vmem:[#allocation13 + $0xa4] ss:$8 sps:$4 sm:$0xff]   ;;  %v20911_v9 = vpop.eup %16405 }
 0x77b   : > { %14452 = vmatpush1.bf16.msra.mxu0 %v16246_v1  ;;  %15622 = vmatpush1.bf16.msra.mxu1 %v16246_v1 }
 0x77c   : > { %14453 = vmatprep.subr.bf16.mxu0 %v16251_v22  ;;  %15607 = vmatprep.subr.bf16.mxu1 %v16251_v22 }
 0x77d   : > { %12022 = vadd.xlane.f32.xlu0 %v20883_v46  ;;  %v16258_v46 = vld [vmem:[#allocation13 + $0xb0] ss:$8 sps:$4 sm:$0xff]  }
 0x77e   : > { %12031 = vadd.xlane.f32.xlu1 %v20892_v30 }
 0x77f   : > { %14454 = vmatpush1.bf16.msra.mxu0 %v16249_v13  ;;  %15623 = vmatpush1.bf16.msra.mxu1 %v16249_v13 }
 0x780   : > { %14455 = vmatprep.subr.bf16.mxu0 %v16254_v50  ;;  %15608 = vmatprep.subr.bf16.mxu1 %v16254_v50 }
 0x781   : > { %12034 = vadd.xlane.f32.xlu0 %v12033_v48 }
 0x782   : > { %12025 = vadd.xlane.f32.xlu1 %v20887_v49  ;;  %v16272_v49 = vld [vmem:[#allocation13 + $0xf4] ss:$8 sps:$4 sm:$0xff]  }
 0x783   : > { %14456 = vmatpush1.bf16.msra.mxu0 %v16252_v4  ;;  %15624 = vmatpush1.bf16.msra.mxu1 %v16252_v4 }
 0x784   : > { %14457 = vmatprep.subr.bf16.mxu0 %v16257_v2  ;;  %15609 = vmatprep.subr.bf16.mxu1 %v16257_v2 }
 0x786   : > { %12037 = vadd.xlane.f32.xlu1 %v12036_v7 }
 0x787   : > { %14458 = vmatpush1.bf16.msra.mxu0 %v16255_v37  ;;  %15625 = vmatpush1.bf16.msra.mxu1 %v16255_v37 }
 0x788   : > { %14459 = vmatprep.subr.bf16.mxu0 %v16260_v63  ;;  %15610 = vmatprep.subr.bf16.mxu1 %v16260_v63 }
 0x78b   : > { %14460 = vmatpush1.bf16.msra.mxu0 %v16258_v46  ;;  %15626 = vmatpush1.bf16.msra.mxu1 %v16258_v46 }
 0x78c   : > { %14461 = vmatprep.subr.bf16.mxu0 %v16263_v31  ;;  %15611 = vmatprep.subr.bf16.mxu1 %v16263_v31 }
 0x78f   : > { %14462 = vmatpush1.bf16.msra.mxu0 %v16261_v47  ;;  %15627 = vmatpush1.bf16.msra.mxu1 %v16261_v47 }
 0x790   : > { %14463 = vmatprep.subr.bf16.mxu0 %v16266_v45  ;;  %15612 = vmatprep.subr.bf16.mxu1 %v16266_v45 }
 0x793   : > { %14464 = vmatpush1.bf16.msra.mxu0 %v16264_v17  ;;  %15628 = vmatpush1.bf16.msra.mxu1 %v16264_v17 }
 0x794   : > { %14465 = vmatprep.subr.bf16.mxu0 %v16269_v41  ;;  %15613 = vmatprep.subr.bf16.mxu1 %v16269_v41 }
 0x797   : > { %14466 = vmatpush1.bf16.msra.mxu0 %v16267_v25  ;;  %15629 = vmatpush1.bf16.msra.mxu1 %v16267_v25 }
 0x798   : > { %14467 = vmatprep.subr.bf16.mxu0 %v16272_v49  ;;  %15614 = vmatprep.subr.bf16.mxu1 %v16272_v49 }
 0x79b   : > { %14468 = vmatpush1.bf16.msra.mxu0 %v16270_v27  ;;  %15630 = vmatpush1.bf16.msra.mxu1 %v16270_v27 }
 0x7ae   : > { %v15487_v61 = vpop.f32.mrb[32].mxu0 }
 0x7af   : > { %v15488_v36 = vpop.f32.mrb[33].mxu0 }
 0x7b0   : > { %v20907_v52 = vadd.f32 %v15488_v36, %v15487_v61  ;;  %v15490_v59 = vpop.f32.mrb[34].mxu0  ;;  %v22493_v61 = vmov 0.0  }
 0x7b1   : > { %v15491_v55 = vpop.f32.mrb[35].mxu0 }
 0x7b2   : > { %v20909_v21 = vadd.f32 %v15491_v55, %v15490_v59  ;;  %v12329_v1 = vmul.f32 %v16402_v44, %v20907_v52 }
 0x7b4   : > { %v12330_v14 = vmul.f32 %v16404_v32, %v20909_v21  ;;  %v12361_v17 = vcombine.high %v12329_v1, %v22493_v61  ;;  %v22882_v21 = vld [vmem:[#allocation92_spill] sm:$0xff] }
 0x7b5   : > { %v12368_v27 = vrot.slane %v12329_v1, %v22882_v21 }
 0x7b6   : > { %v12427_v45 = vcombine.high %v12330_v14, %v22493_v61 }
 0x7c5   : > { %v11954_v10 = vpop.xlane.xlu1 %11953 }
 0x7c6   : > { %16407 = vrcp.f32 %v11954_v10 }
 0x7c9   : > { %v11957_v38 = vpop.xlane.xlu0 %11956 }
 0x7ca   : > { %16409 = vrcp.f32 %v11957_v38 }
 0x7ce   : > { %v11960_v5 = vpop.xlane.xlu1 %11959 }
 0x7cf   : > { %16411 = vrcp.f32 %v11960_v5 }
 0x7d0   : > { %v20913_v16 = vpop.eup %16407 }
 0x7d2   : > { %v11963_v43 = vpop.xlane.xlu0 %11962 }
 0x7d3   : > { %16413 = vrcp.f32 %v11963_v43 }
 0x7d4   : > { %v20915_v6 = vpop.eup %16409 }
 0x7d7   : > { %v11966_v51 = vpop.xlane.xlu1 %11965 }
 0x7d8   : > { %16415 = vrcp.f32 %v11966_v51 }
 0x7d9   : > { %v20917_v11 = vpop.eup %16411 }
 0x7da   : > { %v11969_v23 = vpop.xlane.xlu0 %11968 }
 0x7db   : > { %16417 = vrcp.f32 %v11969_v23 }
 0x7dd   : > { %v20919_v7 = vpop.eup %16413 }
 0x7de   : > { %v11993_v0 = vpop.xlane.xlu0 %11992 }
 0x7df   : > { %v11972_v28 = vpop.xlane.xlu1 %11971  ;;  %16419 = vrcp.f32 %v11993_v0  ;;  %v12434_v0 = vrot.slane %v12330_v14, %v22882_v21 }
 0x7e0   : > { %16421 = vrcp.f32 %v11972_v28  ;;  %v12375_v28 = vrot.slane %v12361_v17, %v22882_v21 }
 0x7e2   : > { %v20921_v12 = vpop.eup %16415 }
 0x7e3   : > { %v11996_v39 = vpop.xlane.xlu1 %11995 }
 0x7e4   : > { %16423 = vrcp.f32 %v11996_v39 }
 0x7e5   : > { %v20923_v24 = vpop.eup %16417 }
 0x7e9   : > { %v16420_v29 = vpop.eup %16419 }
 0x7ea   : > { %v11981_v18 = vpop.xlane.xlu0 %11980  ;;  %v20925_v58 = vpop.eup %16421 }
 0x7eb   : > { %16425 = vrcp.f32 %v11981_v18  ;;  %v12441_v18 = vrot.slane %v12427_v45, %v22882_v21 }
 0x7ee   : > { %v11999_v30 = vpop.xlane.xlu0 %11998  ;;  %v16424_v60 = vpop.eup %16423 }
 0x7ef   : > { %v11984_v8 = vpop.xlane.xlu1 %11983  ;;  %16427 = vrcp.f32 %v11999_v30 }
 0x7f0   : > { %16429 = vrcp.f32 %v11984_v8 }
 0x7f2   : > { %v11975_v3 = vpop.xlane.xlu0 %11974 }
 0x7f3   : > { %v12002_v15 = vpop.xlane.xlu1 %12001  ;;  %16431 = vrcp.f32 %v11975_v3 }
 0x7f4   : > { %16433 = vrcp.f32 %v12002_v15 }
 0x7f5   : > { %v20927_v33 = vpop.eup %16425 }
 0x7f6   : > { %v12005_v19 = vpop.xlane.xlu0 %12004  ;;  %22880 = vst [vmem:[#allocation97_spill] sm:$0xff] %v20927_v33 }
 0x7f7   : > { %v11978_v57 = vpop.xlane.xlu1 %11977  ;;  %16435 = vrcp.f32 %v12005_v19 }
 0x7f8   : > { %16437 = vrcp.f32 %v11978_v57 }
 0x7f9   : > { %v20931_v13 = vpop.eup %16427 }
 0x7fa   : > { %v11987_v20 = vpop.xlane.xlu0 %11986  ;;  %v20933_v4 = vpop.eup %16429 }
 0x7fb   : > { %v12008_v62 = vpop.xlane.xlu1 %12007  ;;  %16439 = vrcp.f32 %v11987_v20  ;;  %22881 = vst [vmem:[#allocation98_spill] sm:$0xff] %v20933_v4 }
 0x7fc   : > { %16441 = vrcp.f32 %v12008_v62 }
 0x7fd   : > { %v20935_v2 = vpop.eup %16431 }
 0x7fe   : > { %v12011_v26 = vpop.xlane.xlu0 %12010  ;;  %v20937_v47 = vpop.eup %16433 }
 0x7ff   : > { %v11990_v48 = vpop.xlane.xlu1 %11989  ;;  %16443 = vrcp.f32 %v12011_v26  ;;  %v22885_v26 = vld [vmem:[#allocation93_spill] sm:$0xff] }
 0x800   : > { %16445 = vrcp.f32 %v11990_v48 }
 0x801   : > { %v20941_v41 = vpop.eup %16435 }
 0x802   : > { %v12017_v42 = vpop.xlane.xlu0 %12016  ;;  %v20943_v25 = vpop.eup %16437 }
 0x803   : > { %v12014_v56 = vpop.xlane.xlu1 %12013  ;;  %16447 = vrcp.f32 %v12017_v42 }
 0x804   : > { %16449 = vrcp.f32 %v12014_v56 }
 0x805   : > { %v20946_v34 = vpop.eup %16439 }
 0x806   : > { %v12029_v40 = vpop.xlane.xlu0 %12028  ;;  %22883 = vst [vmem:[#allocation94_spill] sm:$0xff] %v20946_v34  ;;  %v20950_v51 = vpop.eup %16441 }
 0x807   : > { %v12020_v35 = vpop.xlane.xlu1 %12019  ;;  %16451 = vrcp.f32 %v12029_v40 }
 0x808   : > { %v15551_v22 = vpop.f32.mrb[64].mxu1  ;;  %16453 = vrcp.f32 %v12020_v35 }
 0x809   : > { %v15552_v37 = vpop.f32.mrb[65].mxu1  ;;  %v20955_v30 = vpop.eup %16443 }
 0x80a   : > { %v12023_v50 = vpop.xlane.xlu0 %12022  ;;  %v15553_v46 = vadd.f32 %v15552_v37, %v15551_v22  ;;  %v15554_v31 = vpop.f32.mrb[66].mxu1 }
 0x80b   : > { %v12032_v63 = vpop.xlane.xlu1 %12031  ;;  %v15555_v36 = vpop.f32.mrb[67].mxu1  ;;  %16455 = vrcp.f32 %v12023_v50 }
 0x80c   : > { %v12345_v52 = vmul.f32 %v16420_v29, %v15553_v46  ;;  %v15556_v59 = vadd.f32 %v15555_v36, %v15554_v31  ;;  %v15493_v55 = vpop.f32.mrb[36].mxu0  ;;  %16457 = vrcp.f32 %v12032_v63  ;;  %v20959_v57 = vpop.eup %16445 }
 0x80d   : > { %v15494_v49 = vpop.f32.mrb[37].mxu0  ;;  %22884 = vst [vmem:[#allocation99_spill] sm:$0xff] %v20959_v57  ;;  %v20963_v32 = vpop.eup %16447 }
 0x80e   : > { %v12035_v54 = vpop.xlane.xlu0 %12034  ;;  %v12376_v53 = vcombine.high %v12345_v52, %v22493_v61  ;;  %v12383_v38 = vrot.slane %v12345_v52, %v22882_v21  ;;  %v12346_v10 = vmul.f32 %v16424_v60, %v15556_v59  ;;  %v15495_v43 = vadd.f32 %v15494_v49, %v15493_v55  ;;  %v15496_v23 = vpop.f32.mrb[38].mxu0 }
 0x80f   : > { %v12026_v5 = vpop.xlane.xlu1 %12025  ;;  %16459 = vrcp.f32 %v12035_v54  ;;  %v15497_v39 = vpop.f32.mrb[39].mxu0 }
 0x810   : > { %v12390_v8 = vrot.slane %v12376_v53, %v22882_v21  ;;  %v12391_v3 = vcombine.low %v12368_v27, %v12383_v38  ;;  %v12392_v15 = vcombine.high %v12368_v27, %v12383_v38  ;;  %v12442_v19 = vcombine.high %v12346_v10, %v22493_v61  ;;  %v20967_v35 = vpop.eup %16449 }
 0x811   : > { %v12449_v20 = vrot.slane %v12346_v10, %v22882_v21  ;;  %v12331_v62 = vmul.f32 %v20911_v9, %v15495_v43  ;;  %16461 = vrcp.f32 %v12026_v5  ;;  %v15498_v44 = vadd.f32 %v15497_v39, %v15496_v23  ;;  %v20971_v37 = vpop.eup %16451 }
 0x812   : > { %v12399_v48 = vrot.slane %v12391_v3, %v22885_v26  ;;  %v12406_v42 = vrot.slane %v12392_v15, %v22885_v26  ;;  %v12407_v56 = vcombine.low %v12375_v28, %v12390_v8  ;;  %v12408_v29 = vcombine.high %v12375_v28, %v12390_v8  ;;  %v15557_v40 = vpop.f32.mrb[68].mxu1  ;;  %22886 = vst [vmem:[#allocation100_spill] sm:$0xff] %v20971_v37  ;;  %v20979_v52 = vpop.eup %16453 }
 0x813   : > { %v12456_v60 = vrot.slane %v12442_v19, %v22882_v21  ;;  %v12457_v1 = vcombine.low %v12434_v0, %v12449_v20  ;;  %v12458_v14 = vcombine.high %v12434_v0, %v12449_v20  ;;  %v12493_v22 = vcombine.high %v12331_v62, %v22493_v61  ;;  %v15558_v9 = vpop.f32.mrb[69].mxu1  ;;  %v12038_v50 = vpop.xlane.xlu1 %12037 }
 0x814   : > { %v20974_v46 = vrot.slane %v12407_v56, %v22885_v26  ;;  %v20977_v63 = vrot.slane %v12408_v29, %v22885_v26  ;;  %v13417_v31 = vcombine.low %v12399_v48, %v12406_v42  ;;  %v15397_v17 = vcombine.high %v12399_v48, %v12406_v42  ;;  %v15560_v45 = vpop.f32.mrb[70].mxu1  ;;  %v15499_v36 = vpop.f32.mrb[40].mxu0 }
 0x815   : > { %v20982_v59 = vrot.slane %v12457_v1, %v22885_v26  ;;  %v20985_v55 = vrot.slane %v12458_v14, %v22885_v26  ;;  %v12473_v27 = vcombine.low %v12441_v18, %v12456_v60  ;;  %v12474_v49 = vcombine.high %v12441_v18, %v12456_v60  ;;  %v15561_v54 = vpop.f32.mrb[71].mxu1  ;;  %v15500_v53 = vpop.f32.mrb[41].mxu0 }
 0x816   : > { %v20987_v38 = vpop.eup %16455  ;;  %v12500_v5 = vrot.slane %v12331_v62, %v22882_v21  ;;  %v12507_v23 = vrot.slane %v12493_v22, %v22882_v21  ;;  %v15502_v28 = vpop.f32.mrb[42].mxu0  ;;  %v12332_v19 = vmul.f32 %v20913_v16, %v15498_v44  ;;  %v15559_v20 = vadd.f32 %v15558_v9, %v15557_v40 }
 0x817   : > { %v20995_v0 = vpop.eup %16457  ;;  %v20998_v39 = vrot.slane %v12473_v27, %v22885_v26  ;;  %v21001_v18 = vrot.slane %v12474_v49, %v22885_v26  ;;  %v15503_v15 = vpop.f32.mrb[43].mxu0  ;;  %16463 = vrcp.f32 %v12038_v50  ;;  %v15562_v62 = vadd.f32 %v15561_v54, %v15560_v45 }
 0x818   : > { %22887 = vst [vmem:[#allocation95_spill] sm:$0xff] %v20995_v0  ;;  %v15501_v29 = vadd.f32 %v15500_v53, %v15499_v36  ;;  %v15504_v60 = vadd.f32 %v15503_v15, %v15502_v28  ;;  %v12559_v1 = vcombine.high %v12332_v19, %v22493_v61  ;;  %v12566_v14 = vrot.slane %v12332_v19, %v22882_v21 }
 0x819   : > { %v21008_v48 = vpop.eup %16459  ;;  %v12347_v22 = vmul.f32 %v20931_v13, %v15559_v20  ;;  %v12348_v16 = vmul.f32 %v20937_v47, %v15562_v62  ;;  %v21023_v27 = vrot.slane %v13417_v31, %v22882_v21  ;;  %v21026_v36 = vrot.slane %v15397_v17, %v22882_v21 }
 0x81a   : > { %22888 = vst [vmem:[#allocation96_spill] sm:$0xff] %v21008_v48  ;;  %v12333_v9 = vmul.f32 %v20915_v6, %v15501_v29  ;;  %v12334_v50 = vmul.f32 %v20917_v11, %v15504_v60  ;;  %v12573_v49 = vrot.slane %v12559_v1, %v22882_v21 }
 0x81b   : > { %v15563_v44 = vpop.f32.mrb[72].mxu1  ;;  %v21018_v40 = vpop.eup %16461  ;;  %v12508_v13 = vcombine.high %v12347_v22, %v22493_v61  ;;  %v12515_v47 = vrot.slane %v12347_v22, %v22882_v21  ;;  %v12574_v54 = vcombine.high %v12348_v16, %v22493_v61  ;;  %v12581_v6 = vrot.slane %v12348_v16, %v22882_v21 }
 0x81c   : > { %v15564_v45 = vpop.f32.mrb[73].mxu1  ;;  %v12625_v11 = vcombine.high %v12333_v9, %v22493_v61  ;;  %v21035_v31 = vrot.slane %v12333_v9, %v22882_v21  ;;  %v12691_v17 = vcombine.high %v12334_v50, %v22493_v61  ;;  %v21044_v42 = vrot.slane %v12334_v50, %v22882_v21 }
 0x81d   : > { %v15566_v53 = vpop.f32.mrb[74].mxu1  ;;  %v15505_v28 = vpop.f32.mrb[44].mxu0  ;;  %v12522_v20 = vrot.slane %v12508_v13, %v22882_v21  ;;  %v12523_v62 = vcombine.low %v12500_v5, %v12515_v47  ;;  %v12524_v29 = vcombine.high %v12500_v5, %v12515_v47  ;;  %v12588_v60 = vrot.slane %v12574_v54, %v22882_v21 }
 0x81e   : > { %v15567_v15 = vpop.f32.mrb[75].mxu1  ;;  %v15506_v19 = vpop.f32.mrb[45].mxu0  ;;  %v12589_v22 = vcombine.low %v12566_v14, %v12581_v6  ;;  %v12590_v56 = vcombine.high %v12566_v14, %v12581_v6  ;;  %v21041_v16 = vrot.slane %v12625_v11, %v22882_v21 }
 0x81f   : > { %v15508_v1 = vpop.f32.mrb[46].mxu0  ;;  %v21047_v3 = vrot.slane %v12523_v62, %v22885_v26  ;;  %v21050_v8 = vrot.slane %v12524_v29, %v22885_v26  ;;  %v12539_v13 = vcombine.low %v12507_v23, %v12522_v20  ;;  %v12540_v5 = vcombine.high %v12507_v23, %v12522_v20 }
 0x820   : > { %v15509_v9 = vpop.f32.mrb[47].mxu0  ;;  %v21053_v47 = vrot.slane %v12589_v22, %v22885_v26  ;;  %v21056_v14 = vrot.slane %v12590_v56, %v22885_v26  ;;  %v12605_v54 = vcombine.low %v12573_v49, %v12588_v60  ;;  %v12606_v6 = vcombine.high %v12573_v49, %v12588_v60 }
 0x821   : > { %v21058_v11 = vpop.eup %16463  ;;  %v21061_v50 = vrot.slane %v12539_v13, %v22885_v26  ;;  %v21064_v62 = vrot.slane %v12540_v5, %v22885_v26  ;;  %v12705_v29 = vrot.slane %v12691_v17, %v22882_v21  ;;  %v15568_v22 = vadd.f32 %v15567_v15, %v15566_v53 }
 0x822   : > { %22889 = vst [vmem:[#allocation101_spill] sm:$0xff] %v21058_v11  ;;  %v21071_v56 = vrot.slane %v12605_v54, %v22885_v26  ;;  %v21074_v49 = vrot.slane %v12606_v6, %v22885_v26  ;;  %v15565_v54 = vadd.f32 %v15564_v45, %v15563_v44  ;;  %v15507_v10 = vadd.f32 %v15506_v19, %v15505_v28 }
 0x823   : > { %v15569_v20 = vpop.f32.mrb[76].mxu1  ;;  %v15510_v23 = vadd.f32 %v15509_v9, %v15508_v1  ;;  %v12350_v45 = vmul.f32 %v20950_v51, %v15568_v22  ;;  %v22890_v60 = vcombine.low %v20974_v46, %v20977_v63  ;;  %v22891_v28 = vcombine.high %v20974_v46, %v20977_v63 }
 0x824   : > { %v15570_v13 = vpop.f32.mrb[77].mxu1  ;;  %v12349_v5 = vmul.f32 %v20941_v41, %v15565_v54  ;;  %v12335_v34 = vmul.f32 %v20919_v7, %v15507_v10 }
 0x825   : > { %v15572_v61 = vpop.f32.mrb[78].mxu1  ;;  %v21085_v43 = vpop.f32.mrb[48].mxu0  ;;  %v15571_v57 = vadd.f32 %v15570_v13, %v15569_v20  ;;  %v21102_v53 = vrot.slane %v22890_v60, %v22882_v21  ;;  %v21108_v41 = vrot.slane %v22891_v28, %v22882_v21  ;;  %v12336_v7 = vmul.f32 %v20921_v12, %v15510_v23 }
 0x826   : > { %v15573_v11 = vpop.f32.mrb[79].mxu1  ;;  %v21091_v48 = vpop.f32.mrb[49].mxu0  ;;  %v12647_v51 = vrot.slane %v12349_v5, %v22882_v21  ;;  %v12713_v9 = vrot.slane %v12350_v45, %v22882_v21  ;;  %v12764_v46 = vrot.slane %v12335_v34, %v22882_v21 }
 0x827   : > { %v15574_v17 = vadd.f32 %v15573_v11, %v15572_v61  ;;  %v21094_v44 = vpop.f32.mrb[50].mxu0  ;;  %v22892_v61 = vmov 0.0   ;;  %v12351_v10 = vmul.f32 %v20955_v30, %v15571_v57 }
 0x828   : > { %v21110_v15 = vpop.f32.mrb[51].mxu0  ;;  %v12640_v19 = vcombine.high %v12349_v5, %v22892_v61  ;;  %v12706_v1 = vcombine.high %v12350_v45, %v22892_v61  ;;  %v12757_v11 = vcombine.high %v12335_v34, %v22892_v61  ;;  %v12655_v20 = vcombine.low %v21035_v31, %v12647_v51 }
 0x829   : > { %v12656_v60 = vcombine.high %v21035_v31, %v12647_v51  ;;  %v12823_v22 = vcombine.high %v12336_v7, %v22892_v61  ;;  %v12721_v30 = vcombine.low %v21044_v42, %v12713_v9  ;;  %v12722_v57 = vcombine.high %v21044_v42, %v12713_v9 }
 0x82a   : > { %v12654_v63 = vrot.slane %v12640_v19, %v22882_v21  ;;  %v12720_v12 = vrot.slane %v12706_v1, %v22882_v21  ;;  %v12771_v23 = vrot.slane %v12757_v11, %v22882_v21  ;;  %v21133_v34 = vrot.slane %v12655_v20, %v22885_v26 }
 0x82b   : > { %v21124_v13 = vpop.f32.mrb[80].mxu1  ;;  %v21136_v54 = vrot.slane %v12656_v60, %v22885_v26  ;;  %v21145_v42 = vrot.slane %v12721_v30, %v22885_v26  ;;  %v21148_v51 = vrot.slane %v12722_v57, %v22885_v26  ;;  %v12837_v0 = vrot.slane %v12823_v22, %v22882_v21 }
 0x82c   : > { %v21130_v5 = vpop.f32.mrb[81].mxu1  ;;  %v12671_v31 = vcombine.low %v21041_v16, %v12654_v63  ;;  %v12672_v45 = vcombine.high %v21041_v16, %v12654_v63  ;;  %v12737_v1 = vcombine.low %v12705_v29, %v12720_v12  ;;  %v12738_v9 = vcombine.high %v12705_v29, %v12720_v12 }
 0x82d   : > { %v21140_v28 = vpop.f32.mrb[82].mxu1  ;;  %v21142_v19 = vpop.f32.mrb[52].mxu0  ;;  %22893 = vst [vmem:[#allocation102_spill] sm:$0xff] %v21148_v51  ;;  %v12779_v37 = vrot.slane %v12351_v10, %v22882_v21  ;;  %v12352_v4 = vmul.f32 %v20967_v35, %v15574_v17  ;;  %v13449_v63 = vcombine.low %v21023_v27, %v21026_v36  ;;  %v22896_v22 = vcombine.low %v20982_v59, %v20985_v55 }
 0x82e   : > { %v21150_v11 = vpop.f32.mrb[83].mxu1  ;;  %v21152_v20 = vpop.f32.mrb[53].mxu0  ;;  %v21155_v60 = vrot.slane %v12671_v31, %v22885_v26  ;;  %v21158_v16 = vrot.slane %v12672_v45, %v22885_v26  ;;  %v21167_v29 = vrot.slane %v12737_v1, %v22885_v26  ;;  %v21170_v12 = vrot.slane %v12738_v9, %v22885_v26 }
 0x82f   : > { %v21164_v57 = vpop.f32.mrb[54].mxu0  ;;  %v12830_v1 = vrot.slane %v12336_v7, %v22882_v21  ;;  %v12772_v45 = vcombine.high %v12351_v10, %v22892_v61  ;;  %v13457_v7 = vcombine.low %v21102_v53, %v21108_v41  ;;  %v13474_v9 = vrot.slane %v22896_v22, %v22882_v21 }
 0x830   : > { %22894 = vst [vmem:[#allocation103_spill] sm:$0xff] %v21167_v29  ;;  %22895 = vst [vmem:[#allocation104_spill] sm:$0xff] %v21170_v12  ;;  %v21176_v6 = vpop.f32.mrb[55].mxu0  ;;  %v12787_v33 = vcombine.low %v12764_v46, %v12779_v37  ;;  %v12788_v12 = vcombine.high %v12764_v46, %v12779_v37  ;;  %v22897_v35 = vcombine.high %v20982_v59, %v20985_v55 }
 0x831   : > { %v12786_v31 = vrot.slane %v12772_v45, %v22882_v21  ;;  %v12838_v36 = vcombine.high %v12352_v4, %v22892_v61  ;;  %v12845_v53 = vrot.slane %v12352_v4, %v22882_v21  ;;  %v21211_v41 = vrot.slane %v13449_v63, %v22885_v26 }
 0x832   : > { %v13482_v17 = vrot.slane %v22897_v35, %v22882_v21  ;;  %v21214_v10 = vrot.slane %v13457_v7, %v22885_v26  ;;  %v21221_v46 = vrot.slane %v12787_v33, %v22885_v26  ;;  %v21224_v59 = vrot.slane %v12788_v12, %v22885_v26 }
 0x833   : > { %v21199_v30 = vpop.f32.mrb[84].mxu1  ;;  %v12803_v55 = vcombine.low %v12771_v23, %v12786_v31  ;;  %v12804_v22 = vcombine.high %v12771_v23, %v12786_v31  ;;  %v12852_v63 = vrot.slane %v12838_v36, %v22882_v21  ;;  %v12853_v7 = vcombine.low %v12830_v1, %v12845_v53 }
 0x834   : > { %v21206_v27 = vpop.f32.mrb[85].mxu1  ;;  %22899 = vst [vmem:[#allocation106_spill] sm:$0xff] %v21224_v59  ;;  %v12854_v29 = vcombine.high %v12830_v1, %v12845_v53  ;;  %v13465_v51 = vcombine.low %v21211_v41, %v21214_v10  ;;  %v13466_v23 = vcombine.high %v21211_v41, %v21214_v10  ;;  %v22903_v31 = vcombine.low %v20998_v39, %v21001_v18 }
 0x835   : > { %v21216_v45 = vpop.f32.mrb[86].mxu1  ;;  %v21218_v37 = vpop.f32.mrb[56].mxu0  ;;  %v21236_v33 = vrot.slane %v12803_v55, %v22885_v26  ;;  %v21239_v12 = vrot.slane %v12804_v22, %v22885_v26  ;;  %v21248_v1 = vrot.slane %v12853_v7, %v22885_v26  ;;  %v12870_v55 = vcombine.high %v12837_v0, %v12852_v63 }
 0x836   : > { %22898 = vst [vmem:[#allocation105_spill] sm:$0xff] %v21218_v37  ;;  %v21226_v35 = vpop.f32.mrb[87].mxu1  ;;  %v21228_v4 = vpop.f32.mrb[57].mxu0  ;;  %v21251_v53 = vrot.slane %v12854_v29, %v22885_v26  ;;  %v13490_v7 = vrot.slane %v22903_v31, %v22882_v21  ;;  %v22904_v41 = vcombine.high %v20998_v39, %v21001_v18  ;;  %v13499_v31 = vcombine.low %v13474_v9, %v13482_v17 }
 0x837   : > { %22900 = vst [vmem:[#allocation92_spill] sm:$0xff] %v21228_v4  ;;  %v21233_v37 = vpop.f32.mrb[58].mxu0  ;;  %v21267_v29 = vrot.slane %v12870_v55, %v22885_v26  ;;  %v15516_v55 = vadd.f32 %v21110_v15, %v21094_v44  ;;  %v15580_v39 = vadd.f32 %v21150_v11, %v21140_v28  ;;  %v22906_v28 = vcombine.low %v21047_v3, %v21050_v8 }
 0x838   : > { %22901 = vst [vmem:[#allocation93_spill] sm:$0xff] %v21233_v37  ;;  %v21245_v36 = vpop.f32.mrb[59].mxu0  ;;  %22902 = vst [vmem:[#allocation107_spill] sm:$0xff] %v21251_v53  ;;  %v12869_v37 = vcombine.low %v12837_v0, %v12852_v63  ;;  %v13498_v10 = vrot.slane %v22904_v41, %v22882_v21  ;;  %v15577_v53 = vadd.f32 %v21130_v5, %v21124_v13 }
 0x839   : > { %v12338_v9 = vmul.f32 %v20925_v58, %v15516_v55  ;;  %v12354_v5 = vmul.f32 %v20979_v52, %v15580_v39  ;;  %v13524_v11 = vrot.slane %v22906_v28, %v22882_v21 }
 0x83a   : > { %v21264_v59 = vrot.slane %v12869_v37, %v22885_v26  ;;  %v15513_v37 = vadd.f32 %v21091_v48, %v21085_v43  ;;  %v13506_v48 = vrot.slane %v13499_v31, %v22885_v26  ;;  %v13507_v44 = vcombine.low %v13490_v7, %v13498_v10 }
 0x83b   : > { %v21273_v4 = vpop.f32.mrb[88].mxu1  ;;  %v12353_v13 = vmul.f32 %v20963_v32, %v15577_v53  ;;  %v22907_v7 = vcombine.high %v21047_v3, %v21050_v8  ;;  %v12955_v52 = vcombine.high %v12338_v9, %v22892_v61  ;;  %v12970_v8 = vcombine.high %v12354_v5, %v22892_v61 }
 0x83c   : > { %v21283_v22 = vpop.f32.mrb[89].mxu1  ;;  %v12337_v15 = vmul.f32 %v20923_v24, %v15513_v37  ;;  %v13514_v58 = vrot.slane %v13507_v44, %v22885_v26  ;;  %v12962_v37 = vrot.slane %v12338_v9, %v22882_v21 }
 0x83d   : > { %v21293_v18 = vpop.f32.mrb[90].mxu1  ;;  %v21295_v43 = vpop.f32.mrb[60].mxu0  ;;  %v13532_v24 = vrot.slane %v22907_v7, %v22882_v21  ;;  %v12904_v55 = vcombine.high %v12353_v13, %v22892_v61  ;;  %v12911_v39 = vrot.slane %v12353_v13, %v22882_v21  ;;  %v12969_v7 = vrot.slane %v12955_v52, %v22882_v21 }
 0x83e   : > { %v21300_v17 = vpop.f32.mrb[91].mxu1  ;;  %v21302_v41 = vpop.f32.mrb[61].mxu0  ;;  %v12889_v31 = vcombine.high %v12337_v15, %v22892_v61  ;;  %v12896_v32 = vrot.slane %v12337_v15, %v22882_v21  ;;  %v13515_v3 = vcombine.low %v13506_v48, %v13514_v58  ;;  %v13516_v28 = vcombine.high %v13506_v48, %v13514_v58 }
 0x83f   : > { %22905 = vst [vmem:[#allocation108_spill] sm:$0xff] %v21302_v41  ;;  %v21314_v10 = vpop.f32.mrb[62].mxu0  ;;  %v12918_v15 = vrot.slane %v12904_v55, %v22882_v21  ;;  %v12984_v13 = vrot.slane %v12970_v8, %v22882_v21  ;;  %v22910_v48 = vcombine.low %v21061_v50, %v21064_v62 }
 0x840   : > { %22908 = vst [vmem:[#allocation109_spill] sm:$0xff] %v21314_v10  ;;  %v21320_v53 = vpop.f32.mrb[63].mxu0  ;;  %v12903_v44 = vrot.slane %v12889_v31, %v22882_v21  ;;  %v12919_v63 = vcombine.low %v12896_v32, %v12911_v39  ;;  %v12920_v0 = vcombine.high %v12896_v32, %v12911_v39  ;;  %v14218_v9 = vpack.c.bf16 %v13516_v28, %v13466_v23 }
 0x841   : > { %22909 = vst [vmem:[#allocation110_spill] sm:$0xff] %v21320_v53  ;;  %v12977_v53 = vrot.slane %v12354_v5, %v22882_v21  ;;  %v14217_v41 = vpack.c.bf16 %v13515_v3, %v13465_v51  ;;  %v13540_v58 = vrot.slane %v22910_v48, %v22882_v21  ;;  %v13001_v8 = vcombine.low %v12969_v7, %v12984_v13 }
 0x842   : > { %v21340_v52 = vrot.slane %v12919_v63, %v22885_v26  ;;  %v21343_v32 = vrot.slane %v12920_v0, %v22885_v26  ;;  %v12935_v5 = vcombine.low %v12903_v44, %v12918_v15  ;;  %v12936_v55 = vcombine.high %v12903_v44, %v12918_v15  ;;  %14469 = vmatprep.mubr.bf16.mxu0 %v14218_v9 }
 0x843   : > { %v21330_v10 = vpop.f32.mrb[92].mxu1  ;;  %v12985_v51 = vcombine.low %v12962_v37, %v12977_v53  ;;  %v12986_v23 = vcombine.high %v12962_v37, %v12977_v53  ;;  %v13002_v3 = vcombine.high %v12969_v7, %v12984_v13  ;;  %14470 = vmatmul.mubr.bf16.vlgmr.msra.gmra.mrb[64].mxu0 %v14217_v41  ;;  %v21366_v41 = vrot.slane %v13001_v8, %v22885_v26 }
 0x844   : > { %v21337_v31 = vpop.f32.mrb[93].mxu1  ;;  %v21350_v48 = vrot.slane %v12935_v5, %v22885_v26  ;;  %v21353_v63 = vrot.slane %v12936_v55, %v22885_v26  ;;  %v13817_v0 = vcombine.low %v21340_v52, %v21343_v32  ;;  %v15413_v44 = vcombine.high %v21340_v52, %v21343_v32 }
 0x845   : > { %v21345_v39 = vpop.f32.mrb[94].mxu1  ;;  %v21360_v15 = vrot.slane %v12985_v51, %v22885_v26  ;;  %v21363_v53 = vrot.slane %v12986_v23, %v22885_v26  ;;  %v21369_v37 = vrot.slane %v13002_v3, %v22885_v26  ;;  %v22911_v13 = vcombine.high %v21061_v50, %v21064_v62 }
 0x846   : > { %v21347_v28 = vpop.f32.mrb[95].mxu1  ;;  %v13549_v55 = vcombine.low %v13524_v11, %v13532_v24  ;;  %v22912_v50 = vcombine.low %v21053_v47, %v21056_v14  ;;  %v22913_v11 = vcombine.high %v21053_v47, %v21056_v14  ;;  %v15583_v14 = vadd.f32 %v21206_v27, %v21199_v30 }
 0x847   : > { %v13548_v5 = vrot.slane %v22911_v13, %v22882_v21  ;;  %v13867_v51 = vcombine.low %v21360_v15, %v21363_v53  ;;  %v22914_v13 = vcombine.low %v21071_v56, %v21074_v49  ;;  %v22952_v52 = vcombine.high %v21350_v48, %v21353_v63 }
 0x848   : > { %v13556_v9 = vrot.slane %v13549_v55, %v22885_v26  ;;  %v13574_v62 = vrot.slane %v22912_v50, %v22882_v21  ;;  %v13582_v24 = vrot.slane %v22913_v11, %v22882_v21  ;;  %v22915_v55 = vcombine.high %v21071_v56, %v21074_v49 }
 0x849   : > { %v13557_v7 = vcombine.low %v13540_v58, %v13548_v5  ;;  %v13590_v8 = vrot.slane %v22914_v13, %v22882_v21  ;;  %v15519_v5 = vadd.f32 %v21152_v20, %v21142_v19  ;;  %v15522_v50 = vadd.f32 %v21176_v6, %v21164_v57 }
 0x84a   : > { %v13598_v58 = vrot.slane %v22915_v55, %v22882_v21  ;;  %v13599_v47 = vcombine.low %v13574_v62, %v13582_v24  ;;  %v15586_v11 = vadd.f32 %v21226_v35, %v21216_v45  ;;  %v22916_v49 = vcombine.low %v21133_v34, %v21136_v54 }
 0x84b   : > { %v13564_v3 = vrot.slane %v13557_v7, %v22885_v26  ;;  %v12339_v23 = vmul.f32 %v20935_v2, %v15519_v5  ;;  %v12340_v56 = vmul.f32 %v20943_v25, %v15522_v50  ;;  %v12355_v7 = vmul.f32 %v20987_v38, %v15583_v14 }
 0x84c   : > { %v13607_v13 = vcombine.low %v13590_v8, %v13598_v58  ;;  %v13624_v19 = vrot.slane %v22916_v49, %v22882_v21  ;;  %v13606_v20 = vrot.slane %v13599_v47, %v22885_v26  ;;  %v12356_v62 = vmul.f32 %v21018_v40, %v15586_v11 }
 0x84d   : > { %v13566_v6 = vcombine.high %v13556_v9, %v13564_v3  ;;  %v13565_v57 = vcombine.low %v13556_v9, %v13564_v3  ;;  %v13021_v27 = vcombine.high %v12339_v23, %v22892_v61  ;;  %v13028_v45 = vrot.slane %v12339_v23, %v22882_v21 }
 0x84e   : > { %v13614_v30 = vrot.slane %v13607_v13, %v22885_v26  ;;  %v13087_v2 = vcombine.high %v12340_v56, %v22892_v61  ;;  %v13094_v25 = vrot.slane %v12340_v56, %v22882_v21  ;;  %v13036_v35 = vcombine.high %v12355_v7, %v22892_v61 }
 0x84f   : > { %v13043_v8 = vrot.slane %v12355_v7, %v22882_v21  ;;  %v13035_v9 = vrot.slane %v13021_v27, %v22882_v21  ;;  %v13102_v5 = vcombine.high %v12356_v62, %v22892_v61  ;;  %v13109_v14 = vrot.slane %v12356_v62, %v22882_v21 }
 0x850   : > { %v13616_v24 = vcombine.high %v13606_v20, %v13614_v30  ;;  %v13615_v38 = vcombine.low %v13606_v20, %v13614_v30  ;;  %v13101_v3 = vrot.slane %v13087_v2, %v22882_v21  ;;  %v13050_v55 = vrot.slane %v13036_v35, %v22882_v21 }
 0x851   : > { %v13051_v58 = vcombine.low %v13028_v45, %v13043_v8  ;;  %v13052_v23 = vcombine.high %v13028_v45, %v13043_v8  ;;  %v22917_v40 = vcombine.high %v21133_v34, %v21136_v54  ;;  %v13116_v7 = vrot.slane %v13102_v5, %v22882_v21 }
 0x852   : > { %v14220_v50 = vpack.c.bf16 %v13616_v24, %v13566_v6  ;;  %v14219_v47 = vpack.c.bf16 %v13615_v38, %v13565_v57  ;;  %v13067_v49 = vcombine.low %v13035_v9, %v13050_v55  ;;  %v13068_v20 = vcombine.high %v13035_v9, %v13050_v55 }
 0x853   : > { %v13632_v11 = vrot.slane %v22917_v40, %v22882_v21  ;;  %v21439_v13 = vrot.slane %v13051_v58, %v22885_v26  ;;  %v21442_v56 = vrot.slane %v13052_v23, %v22885_v26  ;;  %v13117_v6 = vcombine.low %v13094_v25, %v13109_v14 }
 0x854   : > { %14479 = vmatprep.mubr.bf16.mxu0 %v14220_v50  ;;  %v13118_v57 = vcombine.high %v13094_v25, %v13109_v14  ;;  %v22918_v30 = vcombine.low %v21155_v60, %v21158_v16  ;;  %v21450_v34 = vrot.slane %v13067_v49, %v22885_v26  ;;  %v21453_v54 = vrot.slane %v13068_v20, %v22885_v26 }
 0x855   : > { %14480 = vmatmul.mubr.bf16.gmra.mrb[68].mxu0 %v14219_v47  ;;  %v13917_v45 = vcombine.low %v21439_v13, %v21442_v56  ;;  %v15417_v2 = vcombine.high %v21439_v13, %v21442_v56  ;;  %v21460_v25 = vrot.slane %v13117_v6, %v22885_v26  ;;  %v13133_v8 = vcombine.low %v13101_v3, %v13116_v7  ;;  %v22924_v6 = vld [vmem:[#allocation104_spill] sm:$0xff] }
 0x856   : > { %v13640_v27 = vrot.slane %v22918_v30, %v22882_v21  ;;  %v21463_v35 = vrot.slane %v13118_v57, %v22885_v26  ;;  %v13134_v62 = vcombine.high %v13101_v3, %v13116_v7  ;;  %v13933_v24 = vcombine.low %v21450_v34, %v21453_v54  ;;  %v22923_v7 = vld [vmem:[#allocation103_spill] sm:$0xff] }
 0x857   : > { %v15418_v9 = vcombine.high %v21450_v34, %v21453_v54  ;;  %v22919_v38 = vcombine.high %v21155_v60, %v21158_v16  ;;  %v13649_v58 = vcombine.low %v13624_v19, %v13632_v11  ;;  %v21474_v23 = vrot.slane %v13133_v8, %v22885_v26  ;;  %v22920_v60 = vld [vmem:[#allocation102_spill] sm:$0xff] }
 0x858   : > { %v21477_v5 = vrot.slane %v13134_v62, %v22885_v26  ;;  %v13967_v3 = vcombine.low %v21460_v25, %v21463_v35  ;;  %v22921_v16 = vcombine.low %v21145_v42, %v22920_v60  ;;  %v22922_v40 = vcombine.high %v21145_v42, %v22920_v60  ;;  %v22929_v60 = vld [vmem:[#allocation93_spill] sm:$0xff] }
 0x859   : > { %v13648_v55 = vrot.slane %v22919_v38, %v22882_v21  ;;  %v13656_v47 = vrot.slane %v13649_v58, %v22885_v26  ;;  %v22925_v57 = vcombine.low %v22923_v7, %v22924_v6  ;;  %v22927_v38 = vld [vmem:[#allocation105_spill] sm:$0xff]  ;;  %v15589_v20 = vadd.f32 %v21283_v22, %v21273_v4  ;;  %v22935_v22 = vld [vmem:[#allocation95_spill] sm:$0xff] }
 0x85a   : > { %v13674_v19 = vrot.slane %v22921_v16, %v22882_v21  ;;  %v13682_v11 = vrot.slane %v22922_v40, %v22882_v21  ;;  %v15528_v16 = vadd.f32 %v21245_v36, %v22929_v60  ;;  %v22934_v60 = vld [vmem:[#allocation100_spill] sm:$0xff]  ;;  %v13848_v32 = vrot.slane %v22952_v52, %v22882_v21 }
 0x85b   : > { %v13657_v14 = vcombine.low %v13640_v27, %v13648_v55  ;;  %v13690_v30 = vrot.slane %v22925_v57, %v22882_v21  ;;  %v22926_v27 = vcombine.high %v22923_v7, %v22924_v6  ;;  %v22928_v55 = vld [vmem:[#allocation92_spill] sm:$0xff]  ;;  %v15592_v57 = vadd.f32 %v21300_v17, %v21293_v18  ;;  %v22930_v7 = vld [vmem:[#allocation106_spill] sm:$0xff] }
 0x85c   : > { %v13699_v42 = vcombine.low %v13674_v19, %v13682_v11  ;;  %v15525_v58 = vadd.f32 %v22928_v55, %v22927_v38  ;;  %v22931_v6 = vcombine.low %v21221_v46, %v22930_v7  ;;  %v22932_v11 = vld [vmem:[#allocation97_spill] sm:$0xff]  ;;  %v12357_v4 = vmul.f32 %v22934_v60, %v15589_v20 }
 0x85d   : > { %v13698_v8 = vrot.slane %v22926_v27, %v22882_v21  ;;  %v13664_v62 = vrot.slane %v13657_v14, %v22885_v26  ;;  %v12358_v49 = vmul.f32 %v22935_v22, %v15592_v57  ;;  %v13974_v13 = vrot.slane %v13967_v3, %v22882_v21 }
 0x85e   : > { %v13724_v27 = vrot.slane %v22931_v6, %v22882_v21  ;;  %v13706_v19 = vrot.slane %v13699_v42, %v22885_v26  ;;  %v12341_v38 = vmul.f32 %v22932_v11, %v15525_v58  ;;  %v22936_v6 = vcombine.high %v21221_v46, %v22930_v7 }
 0x85f   : > { %v13707_v40 = vcombine.low %v13690_v30, %v13698_v8  ;;  %v13666_v14 = vcombine.high %v13656_v47, %v13664_v62  ;;  %v13665_v55 = vcombine.low %v13656_v47, %v13664_v62  ;;  %v22933_v30 = vld [vmem:[#allocation98_spill] sm:$0xff]  ;;  %v22937_v47 = vcombine.low %v21236_v33, %v21239_v12 }
 0x860   : > { %v12342_v8 = vmul.f32 %v22933_v30, %v15528_v16  ;;  %v13153_v18 = vcombine.high %v12341_v38, %v22892_v61  ;;  %v13160_v17 = vrot.slane %v12341_v38, %v22882_v21  ;;  %v13732_v42 = vrot.slane %v22936_v6, %v22882_v21 }
 0x861   : > { %v13714_v36 = vrot.slane %v13707_v40, %v22885_v26  ;;  %v13740_v62 = vrot.slane %v22937_v47, %v22882_v21  ;;  %v13168_v11 = vcombine.high %v12357_v4, %v22892_v61  ;;  %v13175_v38 = vrot.slane %v12357_v4, %v22882_v21 }
 0x862   : > { %v13219_v20 = vcombine.high %v12342_v8, %v22892_v61  ;;  %v13226_v40 = vrot.slane %v12342_v8, %v22882_v21  ;;  %v13167_v57 = vrot.slane %v13153_v18, %v22882_v21  ;;  %v13234_v46 = vcombine.high %v12358_v49, %v22892_v61 }
 0x863   : > { %v13716_v58 = vcombine.high %v13706_v19, %v13714_v36  ;;  %v13715_v16 = vcombine.low %v13706_v19, %v13714_v36  ;;  %v13241_v22 = vrot.slane %v12358_v49, %v22882_v21  ;;  %v13182_v19 = vrot.slane %v13168_v11, %v22882_v21 }
 0x864   : > { %v13233_v60 = vrot.slane %v13219_v20, %v22882_v21  ;;  %v13183_v36 = vcombine.low %v13160_v17, %v13175_v38  ;;  %v13184_v6 = vcombine.high %v13160_v17, %v13175_v38  ;;  %v13248_v8 = vrot.slane %v13234_v46, %v22882_v21  ;;  %v22947_v46 = vld [vmem:[#allocation94_spill] sm:$0xff] }
 0x865   : > { %v14222_v7 = vpack.c.bf16 %v13716_v58, %v13666_v14  ;;  %v14221_v30 = vpack.c.bf16 %v13715_v16, %v13665_v55  ;;  %v13249_v18 = vcombine.low %v13226_v40, %v13241_v22  ;;  %v13250_v47 = vcombine.high %v13226_v40, %v13241_v22 }
 0x866   : > { %v22938_v4 = vcombine.high %v21236_v33, %v21239_v12  ;;  %v13749_v14 = vcombine.low %v13724_v27, %v13732_v42  ;;  %v21548_v55 = vrot.slane %v13183_v36, %v22885_v26  ;;  %v21551_v49 = vrot.slane %v13184_v6, %v22885_v26  ;;  %v22945_v36 = vld [vmem:[#allocation109_spill] sm:$0xff] }
 0x867   : > { %14489 = vmatprep.mubr.bf16.mxu0 %v14222_v7  ;;  %v13199_v58 = vcombine.low %v13167_v57, %v13182_v19  ;;  %v13200_v17 = vcombine.high %v13167_v57, %v13182_v19  ;;  %v21554_v16 = vrot.slane %v13249_v18, %v22885_v26  ;;  %v21557_v20 = vrot.slane %v13250_v47, %v22885_v26  ;;  %v22946_v7 = vld [vmem:[#allocation110_spill] sm:$0xff] }
 0x868   : > { %v13748_v50 = vrot.slane %v22938_v4, %v22882_v21  ;;  %14490 = vmatmul.mubr.bf16.gmra.mrb[72].mxu0 %v14221_v30  ;;  %v13265_v40 = vcombine.low %v13233_v60, %v13248_v8  ;;  %v13266_v11 = vcombine.high %v13233_v60, %v13248_v8  ;;  %v14017_v27 = vcombine.low %v21548_v55, %v21551_v49  ;;  %v22939_v8 = vld [vmem:[#allocation107_spill] sm:$0xff] }
 0x869   : > { %v21560_v33 = vrot.slane %v13199_v58, %v22885_v26  ;;  %v21563_v12 = vrot.slane %v13200_v17, %v22885_v26  ;;  %v15421_v42 = vcombine.high %v21548_v55, %v21551_v49  ;;  %v13756_v22 = vrot.slane %v13749_v14, %v22885_v26 }
 0x86a   : > { %v21570_v57 = vrot.slane %v13265_v40, %v22885_v26  ;;  %v21573_v38 = vrot.slane %v13266_v11, %v22885_v26  ;;  %v13757_v19 = vcombine.low %v13740_v62, %v13748_v50  ;;  %v22940_v18 = vcombine.low %v21248_v1, %v22939_v8  ;;  %v22944_v11 = vld [vmem:[#allocation108_spill] sm:$0xff] }
 0x86b   : > { %v22941_v4 = vcombine.high %v21248_v1, %v22939_v8  ;;  %v22942_v50 = vcombine.low %v21264_v59, %v21267_v29  ;;  %v22943_v14 = vcombine.high %v21264_v59, %v21267_v29  ;;  %v15534_v1 = vadd.f32 %v22946_v7, %v22945_v36  ;;  %v22948_v29 = vld [vmem:[#allocation99_spill] sm:$0xff] }
 0x86c   : > { %v13774_v47 = vrot.slane %v22940_v18, %v22882_v21  ;;  %v13764_v17 = vrot.slane %v13757_v19, %v22885_v26  ;;  %v15531_v18 = vadd.f32 %v22944_v11, %v21295_v43  ;;  %v15595_v19 = vadd.f32 %v21337_v31, %v21330_v10  ;;  %v22949_v43 = vld [vmem:[#allocation96_spill] sm:$0xff] }
 0x86d   : > { %v13782_v58 = vrot.slane %v22941_v4, %v22882_v21  ;;  %v13790_v62 = vrot.slane %v22942_v50, %v22882_v21  ;;  %v13798_v40 = vrot.slane %v22943_v14, %v22882_v21  ;;  %v15598_v8 = vadd.f32 %v21347_v28, %v21345_v39 }
 0x86e   : > { %v13766_v4 = vcombine.high %v13756_v22, %v13764_v17  ;;  %v12343_v60 = vmul.f32 %v22947_v46, %v15531_v18  ;;  %v13765_v30 = vcombine.low %v13756_v22, %v13764_v17  ;;  %v12344_v14 = vmul.f32 %v22948_v29, %v15534_v1 }
 0x86f   : > { %v13799_v6 = vcombine.low %v13774_v47, %v13782_v58  ;;  %v13807_v50 = vcombine.low %v13790_v62, %v13798_v40  ;;  %v12359_v47 = vmul.f32 %v22949_v43, %v15595_v19  ;;  %v22950_v58 = vld [vmem:[#allocation101_spill] sm:$0xff]  ;;  %v13824_v39 = vrot.slane %v13817_v0, %v22882_v21 }
 0x870   : > { %v12360_v11 = vmul.f32 %v22950_v58, %v15598_v8  ;;  %v13285_v10 = vcombine.high %v12343_v60, %v22892_v61  ;;  %v13292_v31 = vrot.slane %v12343_v60, %v22882_v21  ;;  %v13351_v28 = vcombine.high %v12344_v14, %v22892_v61 }
 0x871   : > { %v13806_v59 = vrot.slane %v13799_v6, %v22885_v26  ;;  %v13814_v7 = vrot.slane %v13807_v50, %v22885_v26  ;;  %v13358_v46 = vrot.slane %v12344_v14, %v22882_v21  ;;  %v13300_v22 = vcombine.high %v12359_v47, %v22892_v61 }
 0x872   : > { %v13307_v36 = vrot.slane %v12359_v47, %v22882_v21  ;;  %v13299_v17 = vrot.slane %v13285_v10, %v22882_v21  ;;  %v13366_v40 = vcombine.high %v12360_v11, %v22892_v61  ;;  %v13365_v60 = vrot.slane %v13351_v28, %v22882_v21 }
 0x873   : > { %v13816_v6 = vcombine.high %v13806_v59, %v13814_v7  ;;  %v13815_v62 = vcombine.low %v13806_v59, %v13814_v7  ;;  %v13314_v18 = vrot.slane %v13300_v22, %v22882_v21  ;;  %v13373_v50 = vrot.slane %v12360_v11, %v22882_v21 }
 0x874   : > { %v13315_v1 = vcombine.low %v13292_v31, %v13307_v36  ;;  %v13316_v0 = vcombine.high %v13292_v31, %v13307_v36  ;;  %v13380_v29 = vrot.slane %v13366_v40, %v22882_v21  ;;  %v22951_v40 = vcombine.low %v21350_v48, %v21353_v63 }
 0x875   : > { %v14224_v19 = vpack.c.bf16 %v13816_v6, %v13766_v4  ;;  %v14223_v8 = vpack.c.bf16 %v13815_v62, %v13765_v30  ;;  %v13331_v59 = vcombine.low %v13299_v17, %v13314_v18  ;;  %v13332_v61 = vcombine.high %v13299_v17, %v13314_v18 }
 0x876   : > { %v21636_v14 = vrot.slane %v13315_v1, %v22885_v26  ;;  %v21639_v43 = vrot.slane %v13316_v0, %v22885_v26  ;;  %v13381_v47 = vcombine.low %v13358_v46, %v13373_v50  ;;  %v13382_v58 = vcombine.high %v13358_v46, %v13373_v50 }
 0x877   : > { %14499 = vmatprep.mubr.bf16.mxu0 %v14224_v19  ;;  %v13397_v7 = vcombine.low %v13365_v60, %v13380_v29  ;;  %v13398_v10 = vcombine.high %v13365_v60, %v13380_v29  ;;  %v21642_v30 = vrot.slane %v13331_v59, %v22885_v26  ;;  %v21645_v4 = vrot.slane %v13332_v61, %v22885_v26 }
 0x878   : > { %14500 = vmatmul.mubr.bf16.gmra.mrb[76].mxu0 %v14223_v8  ;;  %v14117_v11 = vcombine.low %v21636_v14, %v21639_v43  ;;  %v15425_v31 = vcombine.high %v21636_v14, %v21639_v43  ;;  %v21652_v28 = vrot.slane %v13381_v47, %v22885_v26  ;;  %v21655_v46 = vrot.slane %v13382_v58, %v22885_v26 }
 0x879   : > { %v21658_v22 = vrot.slane %v13397_v7, %v22885_v26  ;;  %v21661_v36 = vrot.slane %v13398_v10, %v22885_v26  ;;  %v14133_v6 = vcombine.low %v21642_v30, %v21645_v4  ;;  %v15426_v17 = vcombine.high %v21642_v30, %v21645_v4 }
 0x87a   : > { %v13832_v62 = vrot.slane %v15413_v44, %v22882_v21  ;;  %v13840_v60 = vrot.slane %v22951_v40, %v22882_v21  ;;  %v14167_v18 = vcombine.low %v21652_v28, %v21655_v46  ;;  %v15427_v1 = vcombine.high %v21652_v28, %v21655_v46 }
 0x87b   : > { %v14183_v0 = vcombine.low %v21658_v22, %v21661_v36  ;;  %v15428_v19 = vcombine.high %v21658_v22, %v21661_v36  ;;  %v13874_v8 = vrot.slane %v13867_v51, %v22882_v21  ;;  %v22953_v50 = vcombine.high %v21360_v15, %v21363_v53 }
 0x87c   : > { %v13849_v44 = vcombine.low %v13824_v39, %v13832_v62  ;;  %v22954_v59 = vcombine.low %v21366_v41, %v21369_v37  ;;  %v22955_v48 = vcombine.high %v21366_v41, %v21369_v37  ;;  %v13924_v51 = vrot.slane %v13917_v45, %v22882_v21 }
 0x87d   : > { %v13882_v29 = vrot.slane %v22953_v50, %v22882_v21  ;;  %v13932_v15 = vrot.slane %v15417_v2, %v22882_v21  ;;  %v13857_v39 = vcombine.low %v13840_v60, %v13848_v32  ;;  %v13940_v41 = vrot.slane %v13933_v24, %v22882_v21 }
 0x87e   : > { %v13890_v61 = vrot.slane %v22954_v59, %v22882_v21  ;;  %v13898_v63 = vrot.slane %v22955_v48, %v22882_v21  ;;  %v13856_v53 = vrot.slane %v13849_v44, %v22885_v26  ;;  %v13948_v45 = vrot.slane %v15418_v9, %v22882_v21 }
 0x87f   : > { %v13899_v47 = vcombine.low %v13874_v8, %v13882_v29  ;;  %v13949_v58 = vcombine.low %v13924_v51, %v13932_v15  ;;  %v13864_v56 = vrot.slane %v13857_v39, %v22885_v26  ;;  %v22956_v24 = vcombine.high %v21460_v25, %v21463_v35 }
 0x880   : > { %v13907_v37 = vcombine.low %v13890_v61, %v13898_v63  ;;  %v22957_v34 = vcombine.low %v21474_v23, %v21477_v5  ;;  %v13957_v62 = vcombine.low %v13940_v41, %v13948_v45  ;;  %v22958_v3 = vcombine.high %v21474_v23, %v21477_v5 }
 0x881   : > { %v13906_v2 = vrot.slane %v13899_v47, %v22885_v26  ;;  %v13982_v7 = vrot.slane %v22956_v24, %v22882_v21  ;;  %v13956_v10 = vrot.slane %v13949_v58, %v22885_v26  ;;  %v13866_v60 = vcombine.high %v13856_v53, %v13864_v56 }
 0x882   : > { %v13990_v54 = vrot.slane %v22957_v34, %v22882_v21  ;;  %v13914_v9 = vrot.slane %v13907_v37, %v22885_v26  ;;  %v13998_v40 = vrot.slane %v22958_v3, %v22882_v21  ;;  %v13865_v52 = vcombine.low %v13856_v53, %v13864_v56 }
 0x883   : > { %v13999_v32 = vcombine.low %v13974_v13, %v13982_v7  ;;  %v14024_v25 = vrot.slane %v14017_v27, %v22882_v21  ;;  %v13964_v8 = vrot.slane %v13957_v62, %v22885_v26  ;;  %v14032_v23 = vrot.slane %v15421_v42, %v22882_v21 }
 0x884   : > { %v13916_v35 = vcombine.high %v13906_v2, %v13914_v9  ;;  %v13915_v44 = vcombine.low %v13906_v2, %v13914_v9  ;;  %v14007_v50 = vcombine.low %v13990_v54, %v13998_v40  ;;  %v22959_v5 = vcombine.low %v21560_v33, %v21563_v12 }
 0x885   : > { %v14006_v29 = vrot.slane %v13999_v32, %v22885_v26  ;;  %v22960_v27 = vcombine.high %v21560_v33, %v21563_v12  ;;  %v13966_v51 = vcombine.high %v13956_v10, %v13964_v8  ;;  %v13965_v53 = vcombine.low %v13956_v10, %v13964_v8 }
 0x886   : > { %v14040_v59 = vrot.slane %v22959_v5, %v22882_v21  ;;  %v14226_v48 = vpack.c.bf16 %v13916_v35, %v13866_v60  ;;  %v14225_v63 = vpack.c.bf16 %v13915_v44, %v13865_v52  ;;  %v14014_v15 = vrot.slane %v14007_v50, %v22885_v26  ;;  %v14265_v35 = vld [vmem:[%s22965_s12] sm:$0x3]  ;;  %v22967_v50 = vld [vmem:[#allocation91_spill] sm:$0xff] }
 0x887   : > { %v14048_v61 = vrot.slane %v22960_v27, %v22882_v21  ;;  %v14049_v39 = vcombine.low %v14024_v25, %v14032_v23  ;;  %v22961_v55 = vcombine.low %v21554_v16, %v21557_v20  ;;  %v22962_v33 = vcombine.high %v21554_v16, %v21557_v20  ;;  %v22966_v44 = vld [vmem:[#allocation90_spill] sm:$0xff] }
 0x888   : > { %14509 = vmatprep.mubr.bf16.mxu0 %v14226_v48  ;;  %v14016_v42 = vcombine.high %v14006_v29, %v14014_v15  ;;  %v14015_v41 = vcombine.low %v14006_v29, %v14014_v15  ;;  %v22963_v37 = vcombine.low %v21570_v57, %v21573_v38  ;;  %v22964_v56 = vcombine.high %v21570_v57, %v21573_v38 }
 0x889   : > { %v14057_v47 = vcombine.low %v14040_v59, %v14048_v61  ;;  %v14074_v49 = vrot.slane %v22961_v55, %v22882_v21  ;;  %v14082_v12 = vrot.slane %v22962_v33, %v22882_v21  ;;  %14510 = vmatmul.mubr.bf16.gmra.mrb[80].mxu0 %v14225_v63  ;;  %v14056_v58 = vrot.slane %v14049_v39, %v22885_v26 }
 0x88a   : > { %v14090_v45 = vrot.slane %v22963_v37, %v22882_v21  ;;  %v14098_v2 = vrot.slane %v22964_v56, %v22882_v21  ;;  %v14124_v16 = vrot.slane %v14117_v11, %v22882_v21  ;;  %v14228_v20 = vpack.c.bf16 %v14016_v42, %v13966_v51 }
 0x88b   : > { %v14064_v13 = vrot.slane %v14057_v47, %v22885_v26  ;;  %v14227_v24 = vpack.c.bf16 %v14015_v41, %v13965_v53  ;;  %v14099_v7 = vcombine.low %v14074_v49, %v14082_v12  ;;  %v14132_v34 = vrot.slane %v15425_v31, %v22882_v21 }
 0x88c   : > { %v14107_v10 = vcombine.low %v14090_v45, %v14098_v2  ;;  %v14140_v57 = vrot.slane %v14133_v6, %v22882_v21  ;;  %14519 = vmatprep.mubr.bf16.mxu0 %v14228_v20  ;;  %v14148_v11 = vrot.slane %v15426_v17, %v22882_v21  ;;  %v14174_v14 = vrot.slane %v14167_v18, %v22882_v21 }
 0x88d   : > { %v14065_v54 = vcombine.low %v14056_v58, %v14064_v13  ;;  %v14066_v9 = vcombine.high %v14056_v58, %v14064_v13  ;;  %v14106_v38 = vrot.slane %v14099_v7, %v22885_v26  ;;  %v14149_v62 = vcombine.low %v14124_v16, %v14132_v34 }
 0x88e   : > { %v14114_v43 = vrot.slane %v14107_v10, %v22885_v26  ;;  %v14182_v31 = vrot.slane %v15427_v1, %v22882_v21  ;;  %v14190_v6 = vrot.slane %v14183_v0, %v22882_v21  ;;  %v14198_v30 = vrot.slane %v15428_v19, %v22882_v21 }
 0x88f   : > { %v14157_v4 = vcombine.low %v14140_v57, %v14148_v11  ;;  %v14156_v60 = vrot.slane %v14149_v62, %v22885_v26  ;;  %v21819_v8 = vrot.slane %v14265_v35, %v22966_v44  ;;  %v21822_v29 = vrot.slane %v14265_v35, %v22967_v50 }
 0x890   : > { %v14115_v17 = vcombine.low %v14106_v38, %v14114_v43  ;;  %v14116_v18 = vcombine.high %v14106_v38, %v14114_v43  ;;  %v14199_v3 = vcombine.low %v14174_v14, %v14182_v31  ;;  %v14207_v40 = vcombine.low %v14190_v6, %v14198_v30 }
 0x891   : > { %v14164_v28 = vrot.slane %v14157_v4, %v22885_v26  ;;  %14520 = vmatmul.mubr.bf16.gmra.mrb[84].mxu0 %v14227_v24 }
 0x892   : > { %v14230_v46 = vpack.c.bf16 %v14116_v18, %v14066_v9  ;;  %v14229_v1 = vpack.c.bf16 %v14115_v17, %v14065_v54  ;;  %v14206_v52 = vrot.slane %v14199_v3, %v22885_v26  ;;  %v14214_v0 = vrot.slane %v14207_v40, %v22885_v26 }
 0x893   : > { %v14166_v32 = vcombine.high %v14156_v60, %v14164_v28  ;;  %v14165_v25 = vcombine.low %v14156_v60, %v14164_v28 }
 0x894   : > { %14529 = vmatprep.mubr.bf16.mxu1 %v14230_v46  ;;  %v14216_v21 = vcombine.high %v14206_v52, %v14214_v0  ;;  %v14215_v22 = vcombine.low %v14206_v52, %v14214_v0 }
 0x895   : > { %14530 = vmatmul.mubr.bf16.vlgmr.msra.gmra.mrb[96].mxu1 %v14229_v1 }
 0x896   : > { %v14232_v36 = vpack.c.bf16 %v14216_v21, %v14166_v32  ;;  %v14231_v19 = vpack.c.bf16 %v14215_v22, %v14165_v25 }
 0x898   : > { %14539 = vmatprep.mubr.bf16.mxu1 %v14232_v36 }
 0x89d   : > { %14540 = vmatmul.mubr.bf16.gmra.mrb[100].mxu1 %v14231_v19 }
 0x916   : > { %v14471_v26 = vpop.f32.mrb[64].mxu0 }
 0x917   : > { %v21825_v23 = vadd.f32 %v14471_v26, %v21819_v8  ;;  %v14473_v5 = vpop.f32.mrb[65].mxu0 }
 0x918   : > { %v21828_v59 = vadd.f32 %v14473_v5, %v21822_v29  ;;  %v14475_v27 = vpop.f32.mrb[66].mxu0 }
 0x919   : > { %v21831_v61 = vadd.f32 %v14475_v27, %v21819_v8  ;;  %v14477_v48 = vpop.f32.mrb[67].mxu0 }
 0x91a   : > { %v21834_v63 = vadd.f32 %v14477_v48, %v21822_v29  ;;  %v14550_v51 = vadd.f32 %v21828_v59, %v21825_v23 }
 0x91c   : > { %14551 = vadd.xlane.f32.xlu0 %v14550_v51  ;;  %v14553_v15 = vadd.f32 %v21834_v63, %v21831_v61 }
 0x91e   : > { %14554 = vadd.xlane.f32.xlu1 %v14553_v15 }
 0x928   : > { %v14481_v53 = vpop.f32.mrb[68].mxu0 }
 0x929   : > { %v21841_v39 = vadd.f32 %v14481_v53, %v21819_v8  ;;  %v14483_v47 = vpop.f32.mrb[69].mxu0 }
 0x92a   : > { %v21844_v55 = vadd.f32 %v14483_v47, %v21822_v29  ;;  %v14485_v49 = vpop.f32.mrb[70].mxu0 }
 0x92b   : > { %v21847_v42 = vadd.f32 %v14485_v49, %v21819_v8  ;;  %v14487_v41 = vpop.f32.mrb[71].mxu0 }
 0x92c   : > { %v21850_v33 = vadd.f32 %v14487_v41, %v21822_v29  ;;  %v14556_v12 = vadd.f32 %v21844_v55, %v21841_v39 }
 0x92e   : > { %14557 = vadd.xlane.f32.xlu0 %v14556_v12  ;;  %v14559_v37 = vadd.f32 %v21850_v33, %v21847_v42 }
 0x930   : > { %14560 = vadd.xlane.f32.xlu1 %v14559_v37 }
 0x93b   : > { %v14491_v45 = vpop.f32.mrb[72].mxu0 }
 0x93c   : > { %v21857_v58 = vadd.f32 %v14491_v45, %v21819_v8  ;;  %v14493_v13 = vpop.f32.mrb[73].mxu0 }
 0x93d   : > { %v21860_v56 = vadd.f32 %v14493_v13, %v21822_v29  ;;  %v14495_v2 = vpop.f32.mrb[74].mxu0 }
 0x93e   : > { %v21863_v16 = vadd.f32 %v14495_v2, %v21819_v8  ;;  %v14497_v20 = vpop.f32.mrb[75].mxu0 }
 0x93f   : > { %v21866_v24 = vadd.f32 %v14497_v20, %v21822_v29  ;;  %v14562_v7 = vadd.f32 %v21860_v56, %v21857_v58 }
 0x941   : > { %14563 = vadd.xlane.f32.xlu0 %v14562_v7  ;;  %v14565_v34 = vadd.f32 %v21866_v24, %v21863_v16 }
 0x943   : > { %14566 = vadd.xlane.f32.xlu1 %v14565_v34 }
 0x94b   : > { %v14501_v54 = vpop.f32.mrb[76].mxu0 }
 0x94c   : > { %v21873_v9 = vadd.f32 %v14501_v54, %v21819_v8  ;;  %v14503_v10 = vpop.f32.mrb[77].mxu0 }
 0x94d   : > { %v21876_v57 = vadd.f32 %v14503_v10, %v21822_v29  ;;  %v14505_v38 = vpop.f32.mrb[78].mxu0 }
 0x94e   : > { %v21879_v11 = vadd.f32 %v14505_v38, %v21819_v8  ;;  %v14507_v62 = vpop.f32.mrb[79].mxu0 }
 0x94f   : > { %v21882_v14 = vadd.f32 %v14507_v62, %v21822_v29  ;;  %v14568_v43 = vadd.f32 %v21876_v57, %v21873_v9 }
 0x951   : > { %14569 = vadd.xlane.f32.xlu0 %v14568_v43  ;;  %v14571_v31 = vadd.f32 %v21882_v14, %v21879_v11 }
 0x953   : > { %14572 = vadd.xlane.f32.xlu1 %v14571_v31 }
 0x95c   : > { %v14511_v6 = vpop.f32.mrb[80].mxu0 }
 0x95d   : > { %v21889_v30 = vadd.f32 %v14511_v6, %v21819_v8  ;;  %v14513_v4 = vpop.f32.mrb[81].mxu0 }
 0x95e   : > { %v21892_v17 = vadd.f32 %v14513_v4, %v21822_v29  ;;  %v14515_v18 = vpop.f32.mrb[82].mxu0 }
 0x95f   : > { %v21895_v3 = vadd.f32 %v14515_v18, %v21819_v8  ;;  %v14517_v40 = vpop.f32.mrb[83].mxu0 }
 0x960   : > { %v21898_v60 = vadd.f32 %v14517_v40, %v21822_v29  ;;  %v14574_v28 = vadd.f32 %v21892_v17, %v21889_v30 }
 0x962   : > { %14575 = vadd.xlane.f32.xlu0 %v14574_v28  ;;  %v14577_v46 = vadd.f32 %v21898_v60, %v21895_v3 }
 0x964   : > { %14578 = vadd.xlane.f32.xlu1 %v14577_v46  ;;  %v14521_v1 = vpop.f32.mrb[84].mxu0 }
 0x965   : > { %v21905_v52 = vadd.f32 %v14521_v1, %v21819_v8  ;;  %v14523_v0 = vpop.f32.mrb[85].mxu0 }
 0x966   : > { %v21908_v32 = vadd.f32 %v14523_v0, %v21822_v29  ;;  %v14525_v25 = vpop.f32.mrb[86].mxu0 }
 0x967   : > { %v21911_v21 = vadd.f32 %v14525_v25, %v21819_v8  ;;  %v14527_v22 = vpop.f32.mrb[87].mxu0 }
 0x968   : > { %v14531_v36 = vpop.f32.mrb[96].mxu1  ;;  %v21914_v19 = vadd.f32 %v14527_v22, %v21822_v29  ;;  %v14580_v35 = vadd.f32 %v21908_v32, %v21905_v52 }
 0x969   : > { %v21919_v26 = vadd.f32 %v14531_v36, %v21819_v8  ;;  %v14533_v5 = vpop.f32.mrb[97].mxu1 }
 0x96a   : > { %v21922_v27 = vadd.f32 %v14533_v5, %v21822_v29  ;;  %v14535_v48 = vpop.f32.mrb[98].mxu1  ;;  %14581 = vadd.xlane.f32.xlu0 %v14580_v35  ;;  %v14583_v51 = vadd.f32 %v21914_v19, %v21911_v21 }
 0x96b   : > { %v21927_v15 = vadd.f32 %v14535_v48, %v21819_v8  ;;  %v14537_v53 = vpop.f32.mrb[99].mxu1 }
 0x96c   : > { %v21930_v47 = vadd.f32 %v14537_v53, %v21822_v29  ;;  %v14586_v49 = vadd.f32 %v21922_v27, %v21919_v26  ;;  %14584 = vadd.xlane.f32.xlu1 %v14583_v51 }
 0x96e   : > { %v14589_v41 = vadd.f32 %v21930_v47, %v21927_v15  ;;  %14587 = vadd.xlane.f32.xlu0 %v14586_v49 }
 0x970   : > { %v14541_v12 = vpop.f32.mrb[100].mxu1  ;;  %14590 = vadd.xlane.f32.xlu1 %v14589_v41 }
 0x971   : > { %v21937_v37 = vadd.f32 %v14541_v12, %v21819_v8  ;;  %v14543_v45 = vpop.f32.mrb[101].mxu1 }
 0x972   : > { %v21940_v13 = vadd.f32 %v14543_v45, %v21822_v29  ;;  %v14545_v2 = vpop.f32.mrb[102].mxu1 }
 0x973   : > { %v21943_v20 = vadd.f32 %v14545_v2, %v21819_v8  ;;  %v14547_v7 = vpop.f32.mrb[103].mxu1 }
 0x974   : > { %v21946_v34 = vadd.f32 %v14547_v7, %v21822_v29  ;;  %v14592_v54 = vadd.f32 %v21940_v13, %v21937_v37 }
 0x976   : > { %14593 = vadd.xlane.f32.xlu0 %v14592_v54  ;;  %v14595_v10 = vadd.f32 %v21946_v34, %v21943_v20 }
 0x978   : > { %14596 = vadd.xlane.f32.xlu1 %v14595_v10 }
 0x9a9   : > { %v14552_v38 = vpop.xlane.xlu0 %14551 }
 0x9aa   : > { %v14599_v62 = vmul.f32 0.00390625, %v14552_v38 }
 0x9ab   : > { %v14555_v43 = vpop.xlane.xlu1 %14554 }
 0x9ac   : > { %v21953_v31 = vsub.f32 %v21825_v23, %v14599_v62  ;;  %v21956_v8 = vsub.f32 %v21828_v59, %v14599_v62  ;;  %v14600_v6 = vmul.f32 0.00390625, %v14555_v43 }
 0x9ae   : > { %v21959_v29 = vsub.f32 %v21831_v61, %v14600_v6  ;;  %v21962_v4 = vsub.f32 %v21834_v63, %v14600_v6  ;;  %v14647_v18 = vmul.f32 %v21953_v31, %v21953_v31  ;;  %v14648_v40 = vmul.f32 %v21956_v8, %v21956_v8 }
 0x9b0   : > { %v14679_v28 = vadd.f32 %v14648_v40, %v14647_v18  ;;  %v14649_v23 = vmul.f32 %v21959_v29, %v21959_v29  ;;  %v14650_v59 = vmul.f32 %v21962_v4, %v21962_v4 }
 0x9b2   : > { %14680 = vadd.xlane.f32.xlu0 %v14679_v28  ;;  %v14682_v46 = vadd.f32 %v14650_v59, %v14649_v23 }
 0x9b4   : > { %14683 = vadd.xlane.f32.xlu1 %v14682_v46 }
 0x9bb   : > { %v14558_v61 = vpop.xlane.xlu0 %14557 }
 0x9bc   : > { %v14601_v1 = vmul.f32 0.00390625, %v14558_v61 }
 0x9bd   : > { %v14561_v63 = vpop.xlane.xlu1 %14560 }
 0x9be   : > { %v21973_v0 = vsub.f32 %v21841_v39, %v14601_v1  ;;  %v21976_v25 = vsub.f32 %v21844_v55, %v14601_v1  ;;  %v14602_v22 = vmul.f32 0.00390625, %v14561_v63 }
 0x9c0   : > { %v21979_v36 = vsub.f32 %v21847_v42, %v14602_v22  ;;  %v21982_v35 = vsub.f32 %v21850_v33, %v14602_v22  ;;  %v14651_v5 = vmul.f32 %v21973_v0, %v21973_v0  ;;  %v14652_v48 = vmul.f32 %v21976_v25, %v21976_v25 }
 0x9c2   : > { %v14685_v51 = vadd.f32 %v14652_v48, %v14651_v5  ;;  %v14653_v39 = vmul.f32 %v21979_v36, %v21979_v36  ;;  %v14654_v55 = vmul.f32 %v21982_v35, %v21982_v35 }
 0x9c4   : > { %14686 = vadd.xlane.f32.xlu0 %v14685_v51  ;;  %v14688_v53 = vadd.f32 %v14654_v55, %v14653_v39 }
 0x9c6   : > { %14689 = vadd.xlane.f32.xlu1 %v14688_v53 }
 0x9ce   : > { %v14564_v42 = vpop.xlane.xlu0 %14563 }
 0x9cf   : > { %v14603_v49 = vmul.f32 0.00390625, %v14564_v42 }
 0x9d0   : > { %v14567_v33 = vpop.xlane.xlu1 %14566 }
 0x9d1   : > { %v21993_v41 = vsub.f32 %v21857_v58, %v14603_v49  ;;  %v21996_v12 = vsub.f32 %v21860_v56, %v14603_v49  ;;  %v14604_v45 = vmul.f32 0.00390625, %v14567_v33 }
 0x9d3   : > { %v21999_v2 = vsub.f32 %v21863_v16, %v14604_v45  ;;  %v22002_v7 = vsub.f32 %v21866_v24, %v14604_v45  ;;  %v14655_v54 = vmul.f32 %v21993_v41, %v21993_v41  ;;  %v14656_v10 = vmul.f32 %v21996_v12, %v21996_v12 }
 0x9d5   : > { %v14691_v38 = vadd.f32 %v14656_v10, %v14655_v54  ;;  %v14657_v58 = vmul.f32 %v21999_v2, %v21999_v2  ;;  %v14658_v56 = vmul.f32 %v22002_v7, %v22002_v7 }
 0x9d7   : > { %14692 = vadd.xlane.f32.xlu0 %v14691_v38  ;;  %v14694_v62 = vadd.f32 %v14658_v56, %v14657_v58 }
 0x9d9   : > { %14695 = vadd.xlane.f32.xlu1 %v14694_v62 }
 0x9de   : > { %v14570_v16 = vpop.xlane.xlu0 %14569 }
 0x9df   : > { %v14605_v43 = vmul.f32 0.00390625, %v14570_v16 }
 0x9e0   : > { %v14573_v24 = vpop.xlane.xlu1 %14572 }
 0x9e1   : > { %v22013_v6 = vsub.f32 %v21873_v9, %v14605_v43  ;;  %v22016_v18 = vsub.f32 %v21876_v57, %v14605_v43  ;;  %v14606_v40 = vmul.f32 0.00390625, %v14573_v24 }
 0x9e3   : > { %v22019_v28 = vsub.f32 %v21879_v11, %v14606_v40  ;;  %v22022_v23 = vsub.f32 %v21882_v14, %v14606_v40  ;;  %v14659_v59 = vmul.f32 %v22013_v6, %v22013_v6  ;;  %v14660_v46 = vmul.f32 %v22016_v18, %v22016_v18 }
 0x9e5   : > { %v14697_v61 = vadd.f32 %v14660_v46, %v14659_v59  ;;  %v14661_v9 = vmul.f32 %v22019_v28, %v22019_v28  ;;  %v14662_v57 = vmul.f32 %v22022_v23, %v22022_v23 }
 0x9e7   : > { %14698 = vadd.xlane.f32.xlu0 %v14697_v61  ;;  %v14700_v1 = vadd.f32 %v14662_v57, %v14661_v9 }
 0x9e9   : > { %14701 = vadd.xlane.f32.xlu1 %v14700_v1 }
 0x9ef   : > { %v14576_v11 = vpop.xlane.xlu0 %14575 }
 0x9f0   : > { %v14607_v63 = vmul.f32 0.00390625, %v14576_v11 }
 0x9f1   : > { %v14579_v14 = vpop.xlane.xlu1 %14578 }
 0x9f2   : > { %v22033_v22 = vsub.f32 %v21889_v30, %v14607_v63  ;;  %v22036_v5 = vsub.f32 %v21892_v17, %v14607_v63  ;;  %v14608_v48 = vmul.f32 0.00390625, %v14579_v14 }
 0x9f4   : > { %v22039_v51 = vsub.f32 %v21895_v3, %v14608_v48  ;;  %v22042_v39 = vsub.f32 %v21898_v60, %v14608_v48  ;;  %v14663_v55 = vmul.f32 %v22033_v22, %v22033_v22  ;;  %v14664_v53 = vmul.f32 %v22036_v5, %v22036_v5 }
 0x9f6   : > { %v14703_v42 = vadd.f32 %v14664_v53, %v14663_v55  ;;  %v14665_v30 = vmul.f32 %v22039_v51, %v22039_v51  ;;  %v14666_v17 = vmul.f32 %v22042_v39, %v22042_v39 }
 0x9f7   : > { %v14582_v49 = vpop.xlane.xlu0 %14581 }
 0x9f8   : > { %v14609_v33 = vmul.f32 0.00390625, %v14582_v49  ;;  %14704 = vadd.xlane.f32.xlu0 %v14703_v42  ;;  %v14706_v3 = vadd.f32 %v14666_v17, %v14665_v30 }
 0x9f9   : > { %v14585_v45 = vpop.xlane.xlu1 %14584 }
 0x9fa   : > { %v22053_v60 = vsub.f32 %v21905_v52, %v14609_v33  ;;  %v22056_v54 = vsub.f32 %v21908_v32, %v14609_v33  ;;  %v14610_v10 = vmul.f32 0.00390625, %v14585_v45  ;;  %14707 = vadd.xlane.f32.xlu1 %v14706_v3 }
 0x9fb   : > { %v14588_v38 = vpop.xlane.xlu0 %14587 }
 0x9fc   : > { %v22059_v58 = vsub.f32 %v21911_v21, %v14610_v10  ;;  %v22062_v56 = vsub.f32 %v21914_v19, %v14610_v10  ;;  %v14611_v62 = vmul.f32 0.00390625, %v14588_v38  ;;  %v14667_v16 = vmul.f32 %v22053_v60, %v22053_v60 }
 0x9fd   : > { %v14668_v52 = vmul.f32 %v22056_v54, %v22056_v54  ;;  %v14591_v43 = vpop.xlane.xlu1 %14590 }
 0x9fe   : > { %v22069_v32 = vsub.f32 %v21919_v26, %v14611_v62  ;;  %v22072_v24 = vsub.f32 %v21922_v27, %v14611_v62  ;;  %v14612_v40 = vmul.f32 0.00390625, %v14591_v43  ;;  %v14669_v21 = vmul.f32 %v22059_v58, %v22059_v58 }
 0x9ff   : > { %v14709_v19 = vadd.f32 %v14668_v52, %v14667_v16  ;;  %v14670_v59 = vmul.f32 %v22062_v56, %v22062_v56  ;;  %v14807_v16 = vld [vmem:[%s22968_s1] sm:$0x3]  ;;  %s22270_s1 = scalar_lea.sflag [#allocation7], %s474_s3 }
 0xa00   : > { %v22079_v46 = vsub.f32 %v21927_v15, %v14612_v40  ;;  %v22082_v61 = vsub.f32 %v21930_v47, %v14612_v40  ;;  %v14671_v26 = vmul.f32 %v22069_v32, %v22069_v32  ;;  %v14672_v27 = vmul.f32 %v22072_v24, %v22072_v24  ;;  %v14851_v52 = vld [vmem:[%s22969_s8] sm:$0x3]  ;;  %s16643_s8 = sshll.u32 %s16785_s11, 4  ;;  %s16644_s8 = int_to_ptr.vmem [resolvable:$false] %s16643_s8 }
 0xa01   : > { %14710 = vadd.xlane.f32.xlu0 %v14709_v19  ;;  %v14712_v9 = vadd.f32 %v14670_v59, %v14669_v21  ;;  %v22119_v43 = vrot.slane %v14807_v16, %v22966_v44  ;;  %v22122_v40 = vrot.slane %v14807_v16, %v22967_v50  ;;  %v22125_v19 = vrot.slane %v14851_v52, %v22966_v44  ;;  %s16645_s4 = scalar_lea.vmem %s16644_s8, 8192  ;;  %p16646_p11 = scmp.lt.s32.totalorder %s22255_s9, %s16644_s8 }
 0xa02   : > { %v14715_v1 = vadd.f32 %v14672_v27, %v14671_v26  ;;  %v14673_v11 = vmul.f32 %v22079_v46, %v22079_v46  ;;  %v14674_v15 = vmul.f32 %v22082_v61, %v22082_v61  ;;  %v22128_v59 = vrot.slane %v14851_v52, %v22967_v50  ;;  %p16647_p0 = scmp.lt.s32.totalorder %s16645_s4, %s16639_s6 }
 0xa03   : > { %v14594_v57 = vpop.xlane.xlu0 %14593  ;;  %14713 = vadd.xlane.f32.xlu1 %v14712_v9 }
 0xa04   : > { %v14613_v63 = vmul.f32 0.00390625, %v14594_v57  ;;  %v14718_v14 = vadd.f32 %v14674_v15, %v14673_v11  ;;  %p16648_p5 = por %p16647_p0, %p16646_p11 }
 0xa05   : > { %v14597_v47 = vpop.xlane.xlu1 %14596  ;;  %14716 = vadd.xlane.f32.xlu0 %v14715_v1 }
 0xa06   : > { %v22093_v48 = vsub.f32 %v21937_v37, %v14613_v63  ;;  %v22096_v55 = vsub.f32 %v21940_v13, %v14613_v63  ;;  %v14614_v53 = vmul.f32 0.00390625, %v14597_v47  ;;  %p16649_p8 = pnand %p16648_p5, %p16642_p13 }
 0xa07   : > { %14719 = vadd.xlane.f32.xlu1 %v14718_v14 }
 0xa08   : > { %v22099_v42 = vsub.f32 %v21943_v20, %v14614_v53  ;;  %v22102_v30 = vsub.f32 %v21946_v34, %v14614_v53  ;;  %v14675_v17 = vmul.f32 %v22093_v48, %v22093_v48  ;;  %v14676_v49 = vmul.f32 %v22096_v55, %v22096_v55 }
 0xa0a   : > { %v14721_v37 = vadd.f32 %v14676_v49, %v14675_v17  ;;  %v14677_v13 = vmul.f32 %v22099_v42, %v22099_v42  ;;  %v14678_v33 = vmul.f32 %v22102_v30, %v22102_v30 }
 0xa0c   : > { %14722 = vadd.xlane.f32.xlu0 %v14721_v37  ;;  %v14724_v20 = vadd.f32 %v14678_v33, %v14677_v13 }
 0xa0e   : > { %14725 = vadd.xlane.f32.xlu1 %v14724_v20 }
 0xa3f   : > { %v14681_v3 = vpop.xlane.xlu0 %14680 }
 0xa40   : > { %v14727_v34 = vmul.f32 0.00390625, %v14681_v3 }
 0xa41   : > { %v14684_v45 = vpop.xlane.xlu1 %14683 }
 0xa42   : > { %v14743_v10 = vadd.f32 1e-05, %v14727_v34  ;;  %v14728_v38 = vmul.f32 0.00390625, %v14684_v45 }
 0xa44   : > { %16465 = vrsqrt.f32 %v14743_v10  ;;  %v14744_v62 = vadd.f32 1e-05, %v14728_v38 }
 0xa46   : > { %16467 = vrsqrt.f32 %v14744_v62 }
 0xa4e   : > { %v16466_v21 = vpop.eup %16465 }
 0xa4f   : > { %v14775_v26 = vmul.f32 %v16466_v21, %v21953_v31  ;;  %v14776_v27 = vmul.f32 %v16466_v21, %v21956_v8 }
 0xa50   : > { %v16468_v57 = vpop.eup %16467 }
 0xa51   : > { %v14687_v9 = vpop.xlane.xlu0 %14686  ;;  %v14819_v11 = vmul.f32 %v22119_v43, %v14775_v26  ;;  %v14820_v15 = vmul.f32 %v22122_v40, %v14776_v27  ;;  %v14777_v63 = vmul.f32 %v16468_v57, %v21959_v29  ;;  %v14778_v44 = vmul.f32 %v16468_v57, %v21962_v4 }
 0xa52   : > { %v14729_v1 = vmul.f32 0.00390625, %v14687_v9 }
 0xa53   : > { %v14690_v50 = vpop.xlane.xlu1 %14689  ;;  %v14863_v8 = vadd.f32 %v22125_v19, %v14819_v11  ;;  %v14864_v14 = vadd.f32 %v22128_v59, %v14820_v15  ;;  %v14821_v53 = vmul.f32 %v22119_v43, %v14777_v63  ;;  %v14822_v17 = vmul.f32 %v22122_v40, %v14778_v44 }
 0xa54   : > { %v14745_v47 = vadd.f32 1e-05, %v14729_v1  ;;  %v14730_v31 = vmul.f32 0.00390625, %v14690_v50 }
 0xa55   : > { %14895 = vst [vmem:[%s17132_s10] sm:$0xff] %v14863_v8  ;;  %14896 = vst [vmem:[%s17132_s10 + $0x8] sm:$0xff] %v14864_v14  ;;  %v14865_v29 = vadd.f32 %v22125_v19, %v14821_v53  ;;  %v14866_v4 = vadd.f32 %v22128_v59, %v14822_v17 }
 0xa56   : > { %16469 = vrsqrt.f32 %v14745_v47  ;;  %v14746_v49 = vadd.f32 1e-05, %v14730_v31 }
 0xa57   : > { %14897 = vst [vmem:[%s17132_s10 + $0x10] sm:$0xff] %v14865_v29  ;;  %14898 = vst [vmem:[%s17132_s10 + $0x18] sm:$0xff] %v14866_v4 }
 0xa58   : > { %16471 = vrsqrt.f32 %v14746_v49 }
 0xa60   : > { %v16470_v37 = vpop.eup %16469 }
 0xa61   : > { %v14779_v13 = vmul.f32 %v16470_v37, %v21973_v0  ;;  %v14780_v33 = vmul.f32 %v16470_v37, %v21976_v25 }
 0xa62   : > { %v16472_v3 = vpop.eup %16471 }
 0xa63   : > { %v14823_v45 = vmul.f32 %v22119_v43, %v14779_v13  ;;  %v14824_v10 = vmul.f32 %v22122_v40, %v14780_v33  ;;  %v14781_v38 = vmul.f32 %v16472_v3, %v21979_v36  ;;  %v14782_v62 = vmul.f32 %v16472_v3, %v21982_v35 }
 0xa64   : > { %v14693_v20 = vpop.xlane.xlu0 %14692 }
 0xa65   : > { %v14731_v34 = vmul.f32 0.00390625, %v14693_v20  ;;  %v14867_v25 = vadd.f32 %v22125_v19, %v14823_v45  ;;  %v14868_v21 = vadd.f32 %v22128_v59, %v14824_v10  ;;  %v14825_v26 = vmul.f32 %v22119_v43, %v14781_v38 }
 0xa66   : > { %v14696_v16 = vpop.xlane.xlu1 %14695  ;;  %v14826_v27 = vmul.f32 %v22122_v40, %v14782_v62 }
 0xa67   : > { %v14747_v52 = vadd.f32 1e-05, %v14731_v34  ;;  %v14732_v0 = vmul.f32 0.00390625, %v14696_v16  ;;  %14899 = vst [vmem:[%s17132_s10 + $0x20] sm:$0xff] %v14867_v25  ;;  %14900 = vst [vmem:[%s17132_s10 + $0x28] sm:$0xff] %v14868_v21  ;;  %v14869_v36 = vadd.f32 %v22125_v19, %v14825_v26 }
 0xa68   : > { %v14870_v35 = vadd.f32 %v22128_v59, %v14826_v27 }
 0xa69   : > { %16473 = vrsqrt.f32 %v14747_v52  ;;  %v14748_v9 = vadd.f32 1e-05, %v14732_v0  ;;  %14901 = vst [vmem:[%s17132_s10 + $0x30] sm:$0xff] %v14869_v36 }
 0xa6a   : > { %14902 = vst [vmem:[%s17132_s10 + $0x38] sm:$0xff] %v14870_v35 }
 0xa6b   : > { %16475 = vrsqrt.f32 %v14748_v9 }
 0xa73   : > { %v16474_v57 = vpop.eup %16473 }
 0xa74   : > { %v14783_v1 = vmul.f32 %v16474_v57, %v21993_v41  ;;  %v14784_v11 = vmul.f32 %v16474_v57, %v21996_v12  ;;  %v14699_v63 = vpop.xlane.xlu0 %14698 }
 0xa75   : > { %v16476_v15 = vpop.eup %16475  ;;  %v14733_v8 = vmul.f32 0.00390625, %v14699_v63 }
 0xa76   : > { %v14827_v44 = vmul.f32 %v22119_v43, %v14783_v1  ;;  %v14828_v50 = vmul.f32 %v22122_v40, %v14784_v11  ;;  %v14785_v47 = vmul.f32 %v16476_v15, %v21999_v2  ;;  %v14786_v31 = vmul.f32 %v16476_v15, %v22002_v7  ;;  %v14702_v14 = vpop.xlane.xlu1 %14701 }
 0xa77   : > { %v14749_v49 = vadd.f32 1e-05, %v14733_v8  ;;  %v14734_v29 = vmul.f32 0.00390625, %v14702_v14 }
 0xa78   : > { %v14871_v41 = vadd.f32 %v22125_v19, %v14827_v44  ;;  %v14872_v53 = vadd.f32 %v22128_v59, %v14828_v50  ;;  %v14829_v12 = vmul.f32 %v22119_v43, %v14785_v47  ;;  %v14830_v17 = vmul.f32 %v22122_v40, %v14786_v31 }
 0xa79   : > { %16477 = vrsqrt.f32 %v14749_v49  ;;  %v14750_v7 = vadd.f32 1e-05, %v14734_v29 }
 0xa7a   : > { %14903 = vst [vmem:[%s17132_s10 + $0x40] sm:$0xff] %v14871_v41  ;;  %14904 = vst [vmem:[%s17132_s10 + $0x48] sm:$0xff] %v14872_v53  ;;  %v14873_v2 = vadd.f32 %v22125_v19, %v14829_v12  ;;  %v14874_v4 = vadd.f32 %v22128_v59, %v14830_v17 }
 0xa7b   : > { %16479 = vrsqrt.f32 %v14750_v7 }
 0xa7c   : > { %14905 = vst [vmem:[%s17132_s10 + $0x50] sm:$0xff] %v14873_v2  ;;  %14906 = vst [vmem:[%s17132_s10 + $0x58] sm:$0xff] %v14874_v4 }
 0xa83   : > { %v16478_v37 = vpop.eup %16477 }
 0xa84   : > { %v14787_v33 = vmul.f32 %v16478_v37, %v22013_v6  ;;  %v14788_v20 = vmul.f32 %v16478_v37, %v22016_v18 }
 0xa85   : > { %v14705_v13 = vpop.xlane.xlu0 %14704  ;;  %v16480_v34 = vpop.eup %16479 }
 0xa86   : > { %v14735_v3 = vmul.f32 0.00390625, %v14705_v13  ;;  %v14831_v10 = vmul.f32 %v22119_v43, %v14787_v33  ;;  %v14832_v38 = vmul.f32 %v22122_v40, %v14788_v20  ;;  %v14789_v62 = vmul.f32 %v16480_v34, %v22019_v28 }
 0xa87   : > { %v14708_v45 = vpop.xlane.xlu1 %14707  ;;  %v14790_v16 = vmul.f32 %v16480_v34, %v22022_v23 }
 0xa88   : > { %v14751_v52 = vadd.f32 1e-05, %v14735_v3  ;;  %v14736_v0 = vmul.f32 0.00390625, %v14708_v45  ;;  %v14875_v6 = vadd.f32 %v22125_v19, %v14831_v10  ;;  %v14876_v18 = vadd.f32 %v22128_v59, %v14832_v38 }
 0xa89   : > { %v14833_v25 = vmul.f32 %v22119_v43, %v14789_v62  ;;  %v14834_v21 = vmul.f32 %v22122_v40, %v14790_v16 }
 0xa8a   : > { %16481 = vrsqrt.f32 %v14751_v52  ;;  %v14752_v26 = vadd.f32 1e-05, %v14736_v0  ;;  %14907 = vst [vmem:[%s17132_s10 + $0x60] sm:$0xff] %v14875_v6  ;;  %14908 = vst [vmem:[%s17132_s10 + $0x68] sm:$0xff] %v14876_v18 }
 0xa8b   : > { %v14877_v27 = vadd.f32 %v22125_v19, %v14833_v25  ;;  %v14878_v28 = vadd.f32 %v22128_v59, %v14834_v21 }
 0xa8c   : > { %16483 = vrsqrt.f32 %v14752_v26 }
 0xa8d   : > { %14909 = vst [vmem:[%s17132_s10 + $0x70] sm:$0xff] %v14877_v27  ;;  %14910 = vst [vmem:[%s17132_s10 + $0x78] sm:$0xff] %v14878_v28 }
 0xa8e   : > { %v14711_v23 = vpop.xlane.xlu0 %14710 }
 0xa8f   : > { %v14737_v9 = vmul.f32 0.00390625, %v14711_v23 }
 0xa90   : > { %v14714_v36 = vpop.xlane.xlu1 %14713 }
 0xa91   : > { %v14753_v35 = vadd.f32 1e-05, %v14737_v9  ;;  %v14738_v57 = vmul.f32 0.00390625, %v14714_v36 }
 0xa92   : > { %v14717_v1 = vpop.xlane.xlu0 %14716 }
 0xa93   : > { %16485 = vrsqrt.f32 %v14753_v35  ;;  %v14754_v11 = vadd.f32 1e-05, %v14738_v57  ;;  %v14739_v15 = vmul.f32 0.00390625, %v14717_v1 }
 0xa94   : > { %v14720_v63 = vpop.xlane.xlu1 %14719  ;;  %v16482_v44 = vpop.eup %16481 }
 0xa95   : > { %16487 = vrsqrt.f32 %v14754_v11  ;;  %v14755_v50 = vadd.f32 1e-05, %v14739_v15  ;;  %v14740_v47 = vmul.f32 0.00390625, %v14720_v63  ;;  %v14791_v31 = vmul.f32 %v16482_v44, %v22033_v22 }
 0xa96   : > { %v14792_v8 = vmul.f32 %v16482_v44, %v22036_v5  ;;  %v16484_v14 = vpop.eup %16483 }
 0xa97   : > { %16489 = vrsqrt.f32 %v14755_v50  ;;  %v14756_v41 = vadd.f32 1e-05, %v14740_v47  ;;  %v14835_v53 = vmul.f32 %v22119_v43, %v14791_v31  ;;  %v14793_v17 = vmul.f32 %v16484_v14, %v22039_v51 }
 0xa98   : > { %v14836_v12 = vmul.f32 %v22122_v40, %v14792_v8  ;;  %v14794_v49 = vmul.f32 %v16484_v14, %v22042_v39 }
 0xa99   : > { %v14723_v29 = vpop.xlane.xlu0 %14722  ;;  %16491 = vrsqrt.f32 %v14756_v41  ;;  %v14879_v22 = vadd.f32 %v22125_v19, %v14835_v53  ;;  %v14837_v4 = vmul.f32 %v22119_v43, %v14793_v17 }
 0xa9a   : > { %v14741_v2 = vmul.f32 0.00390625, %v14723_v29  ;;  %v14880_v5 = vadd.f32 %v22128_v59, %v14836_v12  ;;  %v14838_v7 = vmul.f32 %v22122_v40, %v14794_v49 }
 0xa9b   : > { %v14726_v37 = vpop.xlane.xlu1 %14725  ;;  %14911 = vst [vmem:[%s17132_s10 + $0x80] sm:$0xff] %v14879_v22  ;;  %v14881_v51 = vadd.f32 %v22125_v19, %v14837_v4 }
 0xa9c   : > { %v14757_v13 = vadd.f32 1e-05, %v14741_v2  ;;  %v14742_v33 = vmul.f32 0.00390625, %v14726_v37  ;;  %14912 = vst [vmem:[%s17132_s10 + $0x88] sm:$0xff] %v14880_v5  ;;  %v14882_v39 = vadd.f32 %v22128_v59, %v14838_v7 }
 0xa9d   : > { %v16486_v20 = vpop.eup %16485  ;;  %14913 = vst [vmem:[%s17132_s10 + $0x90] sm:$0xff] %v14881_v51 }
 0xa9e   : > { %16493 = vrsqrt.f32 %v14757_v13  ;;  %v14758_v3 = vadd.f32 1e-05, %v14742_v33  ;;  %14914 = vst [vmem:[%s17132_s10 + $0x98] sm:$0xff] %v14882_v39  ;;  %v14795_v34 = vmul.f32 %v16486_v20, %v22053_v60  ;;  %v14796_v45 = vmul.f32 %v16486_v20, %v22056_v54 }
 0xa9f   : > { %v16488_v10 = vpop.eup %16487 }
 0xaa0   : > { %16495 = vrsqrt.f32 %v14758_v3  ;;  %v14839_v38 = vmul.f32 %v22119_v43, %v14795_v34  ;;  %v14840_v62 = vmul.f32 %v22122_v40, %v14796_v45  ;;  %v14797_v16 = vmul.f32 %v16488_v10, %v22059_v58 }
 0xaa1   : > { %v14798_v52 = vmul.f32 %v16488_v10, %v22062_v56  ;;  %v16490_v0 = vpop.eup %16489 }
 0xaa2   : > { %v14883_v6 = vadd.f32 %v22125_v19, %v14839_v38  ;;  %v14884_v60 = vadd.f32 %v22128_v59, %v14840_v62  ;;  %v14841_v54 = vmul.f32 %v22119_v43, %v14797_v16  ;;  %v14799_v21 = vmul.f32 %v16490_v0, %v22069_v32 }
 0xaa3   : > { %v14842_v18 = vmul.f32 %v22122_v40, %v14798_v52  ;;  %v16492_v25 = vpop.eup %16491  ;;  %v14800_v58 = vmul.f32 %v16490_v0, %v22072_v24 }
 0xaa4   : > { %14915 = vst [vmem:[%s17132_s10 + $0xa0] sm:$0xff] %v14883_v6  ;;  %14916 = vst [vmem:[%s17132_s10 + $0xa8] sm:$0xff] %v14884_v60  ;;  %v14885_v56 = vadd.f32 %v22125_v19, %v14841_v54  ;;  %v14801_v27 = vmul.f32 %v16492_v25, %v22079_v46  ;;  %v14802_v28 = vmul.f32 %v16492_v25, %v22082_v61 }
 0xaa5   : > { %v14886_v26 = vadd.f32 %v22128_v59, %v14842_v18  ;;  %v14843_v23 = vmul.f32 %v22119_v43, %v14799_v21  ;;  %v14844_v9 = vmul.f32 %v22122_v40, %v14800_v58 }
 0xaa6   : > { %14917 = vst [vmem:[%s17132_s10 + $0xb0] sm:$0xff] %v14885_v56  ;;  %v14845_v32 = vmul.f32 %v22119_v43, %v14801_v27  ;;  %v14846_v24 = vmul.f32 %v22122_v40, %v14802_v28 }
 0xaa7   : > { %14918 = vst [vmem:[%s17132_s10 + $0xb8] sm:$0xff] %v14886_v26  ;;  %v14887_v46 = vadd.f32 %v22125_v19, %v14843_v23  ;;  %v14888_v61 = vadd.f32 %v22128_v59, %v14844_v9 }
 0xaa8   : > { %v16494_v36 = vpop.eup %16493  ;;  %v14889_v35 = vadd.f32 %v22125_v19, %v14845_v32  ;;  %v14890_v57 = vadd.f32 %v22128_v59, %v14846_v24 }
 0xaa9   : > { %v14803_v1 = vmul.f32 %v16494_v36, %v22093_v48  ;;  %v14804_v11 = vmul.f32 %v16494_v36, %v22096_v55  ;;  %14919 = vst [vmem:[%s17132_s10 + $0xc0] sm:$0xff] %v14887_v46  ;;  %14920 = vst [vmem:[%s17132_s10 + $0xc8] sm:$0xff] %v14888_v61 }
 0xaaa   : > { %v16496_v15 = vpop.eup %16495  ;;  %14921 = vst [vmem:[%s17132_s10 + $0xd0] sm:$0xff] %v14889_v35  ;;  %14922 = vst [vmem:[%s17132_s10 + $0xd8] sm:$0xff] %v14890_v57 }
 0xaab   : > { %v14847_v63 = vmul.f32 %v22119_v43, %v14803_v1  ;;  %v14848_v44 = vmul.f32 %v22122_v40, %v14804_v11  ;;  %v14805_v50 = vmul.f32 %v16496_v15, %v22099_v42  ;;  %v14806_v48 = vmul.f32 %v16496_v15, %v22102_v30 }
 0xaad   : > { %v14891_v55 = vadd.f32 %v22125_v19, %v14847_v63  ;;  %v14892_v47 = vadd.f32 %v22128_v59, %v14848_v44  ;;  %v14849_v31 = vmul.f32 %v22119_v43, %v14805_v50  ;;  %v14850_v8 = vmul.f32 %v22122_v40, %v14806_v48 }
 0xaaf   : > { %14923 = vst [vmem:[%s17132_s10 + $0xe0] sm:$0xff] %v14891_v55  ;;  %14924 = vst [vmem:[%s17132_s10 + $0xe8] sm:$0xff] %v14892_v47  ;;  %v14893_v42 = vadd.f32 %v22125_v19, %v14849_v31  ;;  %v14894_v30 = vadd.f32 %v22128_v59, %v14850_v8 }
 0xab1   : > { %14925 = vst [vmem:[%s17132_s10 + $0xf0] sm:$0xff] %v14893_v42  ;;  %14926 = vst [vmem:[%s17132_s10 + $0xf8] sm:$0xff] %v14894_v30 }
 0xab2   : > { %16652 = shalt.err (!%p16649_p8)
}
 0xab3   : > { %s16653_s3 = scalar_lea.hbm %s22264_s23, 4096  ;;  %s16657_s13 = scalar_lea.hbm %s22972_s30, 16384 }
 0xab4   : > { %p16654_p12 = scmp.ne.s32.totalorder %s22264_s23, %s16653_s3  ;;  %p16658_p9 = scmp.lt.u32.totalorder %s22264_s23, %s22972_s30 }
 0xab5   : > { %p16659_p1 = scmp.lt.u32.totalorder %s16657_s13, %s16653_s3  ;;  %p16661_p4 = scmp.lt.u32.totalorder %s16653_s3, %s22264_s23 }
 0xab6   : > { %p16655_p2 = pnand %p16654_p12, %p22973_p6 }
 0xab7   : > { %p16660_p3 = por %p16659_p1, %p16658_p9 }
 0xab8   : > { %p16656_p7 = pneg %p16655_p2 }
 0xab9   : > { %p16662_p10 = por %p16661_p4, %p16660_p3 }
 0xabb   : > { %p16663_p13 = pnand %p16662_p10, %p16656_p7 }
 0xabd   : > { %16666 = shalt.err (!%p16663_p13)
}
 0xabe   : > { %s16786_s15 = smov 256   ;;  %s16787_s12 = smov 16  }
 0xabf   : > { %15649 = dma.vmem_to_hbm [thread:$0]  (%p22973_p6), %s22255_s9, 4096, %s22264_s23, %s22270_s1, %s16786_s15, %s16786_s15, %s16787_s12  }
 0xac0 PF: > { %s22974_s6 = sld [smem:[#allocation19_spill]]  ;;  %s22975_s11 = sld [smem:[#allocation23_spill]] }
 0xac1   : > { %p15681_p11 = scmp.ge.s32.totalorder %s16769_s27, 2 }
 0xac6   : > { %s14959_s8 = sand.u32 1, %s22974_s6   ;;  %p22976_p0 = scmp.ne.s32.totalorder %s22975_s11, 0 }
 0xac7   : > { %s14960_s4 = scalar_lea.sflag [#allocation7], %s14959_s8 }
 0xac8   : > { %p15669_p5 = pnand %p15681_p11, %p22976_p0 }
 0xaca   : > { %16724 = dma.done.wait (!%p15669_p5), %s14960_s4, 4096  }
 0xacb   : > { %16726 = vsyncadd (!%p15669_p5), %s14960_s4, 4294963200  ;;  %s29_s27 = sadd.s32 1, %s16769_s27   ;;  %s22977_s9 = smov %s17061_s20 }
 0xacc   : > { %p26_p8 = scmp.ge.s32.totalorder %s29_s27, 6   ;;  %s22978_s17 = smov %s16733_s18 }
 0xacd   : > { %s22979_s18 = smov %s16737_s19  ;;  %s22980_s19 = smov %s17064_s2 }
 0xace   : > { %s22981_s20 = smov %s16745_s21  ;;  %s22982_s21 = smov %s16749_s22 }
 0xacf   : > { %s22983_s22 = smov %s22977_s9  ;;  %s22984_s23 = smov %s16761_s25 }
 0xad0   : > { %s22985_s24 = smov %s16765_s26  ;;  %s22986_s25 = smov %s22989_s28 }
 0xad1   : > { %s22987_s26 = smov %s22993_s16  ;;  %28 = sbr.rel (!%p26_p8) target bundleno = 21 (0x15), region = 131 }
 0xad8   :  { %14965 = vsyncpa [#allocation6], 1 }
 0xad9   :  { %14967 = vsyncpa [#allocation6 + $0x1], 1 }
 0xada   :  { %14968 = vsyncpa [#allocation9], 1 }
 0xadb   :  { %14969 = vsyncpa [#allocation12], 1 }
 0xadc   :  { %14970 = vsyncpa [#allocation7], 1 }
 0xadd   :  { %14972 = vsyncpa [#allocation7 + $0x1], 1 }

</bundles_post_ra>
